<compile_context>
chip_gen: v5e
topology: v5e:2x2
jax: 0.10.0
libtpu: 0.0.40
codegen_flags: <defaults>
</compile_context>

<pallas_src>
import functools

import numpy as np
import jax
import jax.numpy as jnp
from jax.experimental import pallas as pl
from jax.experimental.pallas import tpu as pltpu


LANE = 128            # lane width / hidden padding multiple
TILE_N = 128          # rows per i-tile and per j-tile
_NEG_BIG = -1e30      # finite "-inf" for masked logsumexp entries


def _round_up(a, b):
    return (a + b - 1) // b * b


def _softplus(x):
    # Matches torch.nn.Softplus(beta=1, threshold=20)
    return jnp.where(x > 20.0, x, jnp.log1p(jnp.exp(jnp.minimum(x, 20.0))))


# --------------------------------------------------------------------------- #
# Kernel 1: per-row features xh = x@W1x, yhb = y@W1y + b1, and paired scores T0
# --------------------------------------------------------------------------- #
def _feature_kernel(x_ref, y_ref, w1x_ref, w1y_ref, b1_ref, w2_ref, b2_ref,
                    xh_ref, yhb_ref, t0_ref):
    xh = jnp.dot(x_ref[...], w1x_ref[...], preferred_element_type=jnp.float32)
    yhb = jnp.dot(y_ref[...], w1y_ref[...], preferred_element_type=jnp.float32) + b1_ref[...]
    xh_ref[...] = xh
    yhb_ref[...] = yhb

    h0 = jnp.maximum(xh + yhb, 0.0)                                   # [T, Hp]
    s0 = jnp.sum(h0 * w2_ref[...], axis=-1, keepdims=True) + b2_ref[0, 0]
    t0_ref[...] = _softplus(s0)                                       # [T, 1]


# --------------------------------------------------------------------------- #
# Kernel 2: pairwise scores + online logsumexp over the j (x) axis
# --------------------------------------------------------------------------- #
def _pairwise_lse_kernel(xh_ref, yhb_ref, w2_ref, b2_ref, lse_ref,
                         t1_buf, m_buf, l_buf, *, n_valid, sub_i):
    bj = pl.program_id(1)
    nj = pl.num_programs(1)
    tile_i = yhb_ref.shape[0]
    tile_j = xh_ref.shape[0]

    @pl.when(bj == 0)
    def _init():
        m_buf[...] = jnp.full_like(m_buf, _NEG_BIG)
        l_buf[...] = jnp.zeros_like(l_buf)

    xh_blk = xh_ref[...]                 # [tile_j, Hp]   (resident across the loop)
    w2_3d = w2_ref[...][None, :, :]      # [1, 1, Hp]
    b2 = b2_ref[0, 0]

    # Compute the [tile_i, tile_j] score block SUB_I rows at a time so the live
    # [sub_i, tile_j, Hp] slab stays small (no O(N^2*H) materialization).
    @pl.loop(0, tile_i // sub_i)
    def _rows(a):
        r0 = pl.multiple_of(a * sub_i, sub_i)
        y_sub = yhb_ref[pl.ds(r0, sub_i), :]                               # [sub_i, Hp]
        h = jnp.maximum(xh_blk[None, :, :] + y_sub[:, None, :], 0.0)       # [sub_i, tile_j, Hp]
        s = jnp.sum(h * w2_3d, axis=-1) + b2                               # [sub_i, tile_j]
        t1_buf[pl.ds(r0, sub_i), :] = _softplus(s)

    # Vectorized online-logsumexp update over the whole block, masking padded j.
    col = jax.lax.broadcasted_iota(jnp.int32, (tile_i, tile_j), 1) + bj * tile_j
    t1 = jnp.where(col < n_valid, t1_buf[...], _NEG_BIG)                   # [tile_i, tile_j]
    m_prev = m_buf[...]                                                    # [tile_i, 1]
    m_new = jnp.maximum(m_prev, jnp.max(t1, axis=1, keepdims=True))
    l_buf[...] = (jnp.exp(m_prev - m_new) * l_buf[...]
                  + jnp.sum(jnp.exp(t1 - m_new), axis=1, keepdims=True))
    m_buf[...] = m_new

    @pl.when(bj == nj - 1)
    def _finalize():
        lse_ref[...] = m_buf[...] + jnp.log(l_buf[...])


# --------------------------------------------------------------------------- #
# Wrapper
# --------------------------------------------------------------------------- #
@jax.jit
def infonce_forward(x, y, w1x, w1y, b1, w2, b2):
    f32 = jnp.float32
    n, dx = x.shape
    dy = y.shape[1]
    hidden = w1x.shape[1]
    hp = _round_up(hidden, LANE)
    n_pad = _round_up(n, TILE_N)
    num_tiles = n_pad // TILE_N

    # Zero-pad hidden dim to a lane-dense multiple of 128 and N to the tile size.
    # Padded hidden units contribute exactly 0 (w2, b1 padded with zeros).
    xp = jnp.zeros((n_pad, dx), f32).at[:n, :].set(x.astype(f32))
    yp = jnp.zeros((n_pad, dy), f32).at[:n, :].set(y.astype(f32))
    w1xp = jnp.zeros((dx, hp), f32).at[:, :hidden].set(w1x.astype(f32))
    w1yp = jnp.zeros((dy, hp), f32).at[:, :hidden].set(w1y.astype(f32))
    b1p = jnp.zeros((1, hp), f32).at[:, :hidden].set(b1.astype(f32))
    w2p = jnp.zeros((1, hp), f32).at[:, :hidden].set(w2.astype(f32))
    b2p = b2.astype(f32).reshape(1, 1)

    # ---- Kernel 1: features + T0 ----
    xh, yhb, t0 = pl.pallas_call(
        _feature_kernel,
        out_shape=(
            jax.ShapeDtypeStruct((n_pad, hp), f32),
            jax.ShapeDtypeStruct((n_pad, hp), f32),
            jax.ShapeDtypeStruct((n_pad, 1), f32),
        ),
        grid=(num_tiles,),
        in_specs=[
            pl.BlockSpec((TILE_N, dx), lambda i: (i, 0)),
            pl.BlockSpec((TILE_N, dy), lambda i: (i, 0)),
            pl.BlockSpec((dx, hp), lambda i: (0, 0)),
            pl.BlockSpec((dy, hp), lambda i: (0, 0)),
            pl.BlockSpec((1, hp), lambda i: (0, 0)),
            pl.BlockSpec((1, hp), lambda i: (0, 0)),
            pl.BlockSpec((1, 1), lambda i: (0, 0)),
        ],
        out_specs=(
            pl.BlockSpec((TILE_N, hp), lambda i: (i, 0)),
            pl.BlockSpec((TILE_N, hp), lambda i: (i, 0)),
            pl.BlockSpec((TILE_N, 1), lambda i: (i, 0)),
        ),
        compiler_params=pltpu.CompilerParams(
            dimension_semantics=("parallel",),
            vmem_limit_bytes=32 * 1024 * 1024,
        ),
    )(xp, yp, w1xp, w1yp, b1p, w2p, b2p)

    # Inner row-chunk: keep the [sub_i, TILE_N, hp] slab around 8*128*128 elements.
    sub_i = 8
    while sub_i > 1 and sub_i * TILE_N * hp > 8 * 128 * 128:
        sub_i //= 2

    cost = pl.CostEstimate(
        flops=4 * n_pad * n_pad * hp + 4 * n_pad * (dx + dy) * hp,
        transcendentals=3 * n_pad * n_pad,
        bytes_accessed=4 * (2 * n_pad * hp * num_tiles + 2 * n_pad),
    )

    # ---- Kernel 2: pairwise T1 + logsumexp over j ----
    lse = pl.pallas_call(
        functools.partial(_pairwise_lse_kernel, n_valid=n, sub_i=sub_i),
        out_shape=jax.ShapeDtypeStruct((n_pad, 1), f32),
        grid=(num_tiles, num_tiles),
        in_specs=[
            pl.BlockSpec((TILE_N, hp), lambda i, j: (j, 0)),   # xh: tiled over j
            pl.BlockSpec((TILE_N, hp), lambda i, j: (i, 0)),   # yhb: tiled over i
            pl.BlockSpec((1, hp), lambda i, j: (0, 0)),        # w2
            pl.BlockSpec((1, 1), lambda i, j: (0, 0)),         # b2
        ],
        out_specs=pl.BlockSpec((TILE_N, 1), lambda i, j: (i, 0)),
        scratch_shapes=[
            pltpu.VMEM((TILE_N, TILE_N), jnp.float32),   # t1 block
            pltpu.VMEM((TILE_N, 1), jnp.float32),        # running max m
            pltpu.VMEM((TILE_N, 1), jnp.float32),        # running sum l
        ],
        compiler_params=pltpu.CompilerParams(
            dimension_semantics=("parallel", "arbitrary"),
            vmem_limit_bytes=32 * 1024 * 1024,
        ),
        cost_estimate=cost,
    )(xh, yhb, w2p, b2p)

    # Final tiny scalar reduction (O(N)) done in plain JAX.
    t0_mean = jnp.mean(t0[:n, 0])
    lse_mean = jnp.mean(lse[:n, 0])
    return t0_mean - (lse_mean - jnp.log(jnp.float32(n)))


def infonce_ref(x, y, w1x, w1y, b1, w2, b2):
    # Pure-JAX reference mirroring the PyTorch forward (for validation only).
    n = x.shape[0]

    def F(xx, yy):
        h = jnp.maximum(xx @ w1x + yy @ w1y + b1[0], 0.0)
        s = jnp.sum(h * w2[0], axis=-1) + b2[0, 0]
        return jnp.where(s > 20.0, s, jnp.log1p(jnp.exp(jnp.minimum(s, 20.0))))

    t0 = F(x, y)
    x_tile = jnp.broadcast_to(x[None, :, :], (n, n, x.shape[1])).reshape(n * n, -1)
    y_tile = jnp.broadcast_to(y[:, None, :], (n, n, y.shape[1])).reshape(n * n, -1)
    t1 = F(x_tile, y_tile).reshape(n, n)
    lse = jax.scipy.special.logsumexp(t1, axis=1)
    return jnp.mean(t0) - (jnp.mean(lse) - jnp.log(float(n)))


if __name__ == "__main__":
    N, X_DIM, Y_DIM, HIDDEN = 8, 16, 16, 32

    key = jax.random.PRNGKey(0)
    kx, ky, kw1, kb1, kw2, kb2 = jax.random.split(key, 6)

    x = jax.random.normal(kx, (N, X_DIM), jnp.float32)
    y = jax.random.normal(ky, (N, Y_DIM), jnp.float32)

    # Param init mimicking torch.nn.Linear defaults (U[-1/sqrt(fan_in), 1/sqrt(fan_in)]).
    fan1 = X_DIM + Y_DIM
    lim1 = 1.0 / np.sqrt(fan1)
    lim2 = 1.0 / np.sqrt(HIDDEN)
    w1 = jax.random.uniform(kw1, (fan1, HIDDEN), jnp.float32, -lim1, lim1)   # [x_dim+y_dim, H]
    b1 = jax.random.uniform(kb1, (1, HIDDEN), jnp.float32, -lim1, lim1)      # [1, H]
    w2 = jax.random.uniform(kw2, (1, HIDDEN), jnp.float32, -lim2, lim2)      # [1, H] (Linear H -> 1)
    b2 = jax.random.uniform(kb2, (1, 1), jnp.float32, -lim2, lim2)           # [1, 1]

    w1x, w1y = w1[:X_DIM, :], w1[X_DIM:, :]

    out = infonce_forward(x, y, w1x, w1y, b1, w2, b2)
    jax.block_until_ready(out)

    ref = infonce_ref(x, y, w1x, w1y, b1, w2, b2)
    np.testing.assert_allclose(np.asarray(out), np.asarray(ref), rtol=1e-5, atol=1e-5)

    print("KERNEL_OK")
</pallas_src>

<mosaic_0001>
module attributes {stable_mosaic.version = 11 : i64} {
  func.func @_feature_kernel(%arg0: i32, %arg1: memref<128x16xf32, #tpu.memory_space<vmem>>, %arg2: memref<128x16xf32, #tpu.memory_space<vmem>>, %arg3: memref<16x128xf32, #tpu.memory_space<vmem>>, %arg4: memref<16x128xf32, #tpu.memory_space<vmem>>, %arg5: memref<1x128xf32, #tpu.memory_space<vmem>>, %arg6: memref<1x128xf32, #tpu.memory_space<vmem>>, %arg7: memref<1x1xf32, #tpu.memory_space<vmem>>, %arg8: memref<128x128xf32, #tpu.memory_space<vmem>>, %arg9: memref<128x128xf32, #tpu.memory_space<vmem>>, %arg10: memref<128x1xf32, #tpu.memory_space<vmem>>) attributes {dimension_semantics = [#tpu.dimension_semantics<parallel>], iteration_bounds = array<i64: 1>, scalar_prefetch = 0 : i64, scratch_operands = 0 : i64, tpu.core_type = #tpu.core_type<tc>, window_params = [{transform_indices = @transform_0, window_bounds = array<i64: 128, 16>}, {transform_indices = @transform_1, window_bounds = array<i64: 128, 16>}, {pipeline_mode = #tpu.pipeline_mode<synchronous>, transform_indices = @transform_2, window_bounds = array<i64: 16, 128>}, {pipeline_mode = #tpu.pipeline_mode<synchronous>, transform_indices = @transform_3, window_bounds = array<i64: 16, 128>}, {pipeline_mode = #tpu.pipeline_mode<synchronous>, transform_indices = @transform_4, window_bounds = array<i64: 1, 128>}, {pipeline_mode = #tpu.pipeline_mode<synchronous>, transform_indices = @transform_5, window_bounds = array<i64: 1, 128>}, {pipeline_mode = #tpu.pipeline_mode<synchronous>, transform_indices = @transform_6, window_bounds = array<i64: 1, 1>}, {transform_indices = @transform_7, window_bounds = array<i64: 128, 128>}, {transform_indices = @transform_8, window_bounds = array<i64: 128, 128>}, {transform_indices = @transform_9, window_bounds = array<i64: 128, 1>}]} {
    %c0 = arith.constant 0 : index
    %c0_0 = arith.constant 0 : index
    %0 = vector.load %arg1[%c0, %c0_0] : memref<128x16xf32, #tpu.memory_space<vmem>>, vector<128x16xf32>
    %c0_1 = arith.constant 0 : index
    %c0_2 = arith.constant 0 : index
    %1 = vector.load %arg3[%c0_1, %c0_2] : memref<16x128xf32, #tpu.memory_space<vmem>>, vector<16x128xf32>
    %cst = arith.constant dense<0.000000e+00> : vector<128x128xf32>
    %2 = tpu.matmul %0, %1, %cst {dimension_numbers = #tpu.dot_dimension_numbers<[1], [0], [0], [1], [0, 0, 1, 1], [], []>} : vector<128x16xf32>, vector<16x128xf32>, vector<128x128xf32> -> vector<128x128xf32>
    %c0_3 = arith.constant 0 : index
    %c0_4 = arith.constant 0 : index
    %3 = vector.load %arg2[%c0_3, %c0_4] : memref<128x16xf32, #tpu.memory_space<vmem>>, vector<128x16xf32>
    %c0_5 = arith.constant 0 : index
    %c0_6 = arith.constant 0 : index
    %4 = vector.load %arg4[%c0_5, %c0_6] : memref<16x128xf32, #tpu.memory_space<vmem>>, vector<16x128xf32>
    %cst_7 = arith.constant dense<0.000000e+00> : vector<128x128xf32>
    %5 = tpu.matmul %3, %4, %cst_7 {dimension_numbers = #tpu.dot_dimension_numbers<[1], [0], [0], [1], [0, 0, 1, 1], [], []>} : vector<128x16xf32>, vector<16x128xf32>, vector<128x128xf32> -> vector<128x128xf32>
    %c0_8 = arith.constant 0 : index
    %c0_9 = arith.constant 0 : index
    %6 = vector.load %arg5[%c0_8, %c0_9] : memref<1x128xf32, #tpu.memory_space<vmem>>, vector<1x128xf32>
    %7 = vector.broadcast %6 : vector<1x128xf32> to vector<128x128xf32>
    %8 = arith.addf %5, %7 : vector<128x128xf32>
    %c0_10 = arith.constant 0 : index
    %c0_11 = arith.constant 0 : index
    %9 = vector.load %arg8[%c0_10, %c0_11] : memref<128x128xf32, #tpu.memory_space<vmem>>, vector<128x128xf32>
    tpu.vector_store %arg8[%c0_10, %c0_11], %2 {strides = array<i32>} : memref<128x128xf32, #tpu.memory_space<vmem>>, vector<128x128xf32>,
    %c0_12 = arith.constant 0 : index
    %c0_13 = arith.constant 0 : index
    %10 = vector.load %arg9[%c0_12, %c0_13] : memref<128x128xf32, #tpu.memory_space<vmem>>, vector<128x128xf32>
    tpu.vector_store %arg9[%c0_12, %c0_13], %8 {strides = array<i32>} : memref<128x128xf32, #tpu.memory_space<vmem>>, vector<128x128xf32>,
    %11 = arith.addf %2, %8 : vector<128x128xf32>
    %cst_14 = arith.constant 0.000000e+00 : f32
    %12 = vector.broadcast %cst_14 : f32 to vector<128x128xf32>
    %13 = arith.maximumf %11, %12 : vector<128x128xf32>
    %c0_15 = arith.constant 0 : index
    %c0_16 = arith.constant 0 : index
    %14 = vector.load %arg6[%c0_15, %c0_16] : memref<1x128xf32, #tpu.memory_space<vmem>>, vector<1x128xf32>
    %15 = vector.broadcast %14 : vector<1x128xf32> to vector<128x128xf32>
    %16 = arith.mulf %13, %15 : vector<128x128xf32>
    %cst_17 = arith.constant dense<0.000000e+00> : vector<128xf32>
    %17 = vector.multi_reduction <add>, %16, %cst_17 [1] : vector<128x128xf32> to vector<128xf32>
    %18 = vector.shape_cast %17 : vector<128xf32> to vector<128x1xf32>
    %c0_18 = arith.constant 0 : index
    %c0_19 = arith.constant 0 : index
    %19 = vector.load %arg7[%c0_18, %c0_19] : memref<1x1xf32, #tpu.memory_space<vmem>>, vector<1x1xf32>
    %20 = vector.extract %19[0, 0] : f32 from vector<1x1xf32>
    %21 = vector.broadcast %20 : f32 to vector<128x1xf32>
    %22 = arith.addf %18, %21 : vector<128x1xf32>
    %cst_20 = arith.constant 2.000000e+01 : f32
    %23 = vector.broadcast %cst_20 : f32 to vector<128x1xf32>
    %24 = arith.cmpf ogt, %22, %23 : vector<128x1xf32>
    %cst_21 = arith.constant 2.000000e+01 : f32
    %25 = vector.broadcast %cst_21 : f32 to vector<128x1xf32>
    %26 = arith.minimumf %22, %25 : vector<128x1xf32>
    %27 = math.exp %26 : vector<128x1xf32>
    %28 = math.log1p %27 : vector<128x1xf32>
    %29 = arith.select %24, %22, %28 : vector<128x1xi1>, vector<128x1xf32>
    %c0_22 = arith.constant 0 : index
    %c0_23 = arith.constant 0 : index
    %30 = vector.load %arg10[%c0_22, %c0_23] : memref<128x1xf32, #tpu.memory_space<vmem>>, vector<128x1xf32>
    tpu.vector_store %arg10[%c0_22, %c0_23], %29 {strides = array<i32>} : memref<128x1xf32, #tpu.memory_space<vmem>>, vector<128x1xf32>,
    return
  }
  func.func @transform_0(%arg0: i32) -> (i32, i32) {
    %c0_i32 = arith.constant 0 : i32
    %c0_i32_0 = arith.constant 0 : i32
    return %arg0, %c0_i32 : i32, i32
  }
  func.func @transform_1(%arg0: i32) -> (i32, i32) {
    %c0_i32 = arith.constant 0 : i32
    %c0_i32_0 = arith.constant 0 : i32
    return %arg0, %c0_i32 : i32, i32
  }
  func.func @transform_2(%arg0: i32) -> (i32, i32) {
    %c0_i32 = arith.constant 0 : i32
    %c0_i32_0 = arith.constant 0 : i32
    %c0_i32_1 = arith.constant 0 : i32
    return %c0_i32, %c0_i32_0 : i32, i32
  }
  func.func @transform_3(%arg0: i32) -> (i32, i32) {
    %c0_i32 = arith.constant 0 : i32
    %c0_i32_0 = arith.constant 0 : i32
    %c0_i32_1 = arith.constant 0 : i32
    return %c0_i32, %c0_i32_0 : i32, i32
  }
  func.func @transform_4(%arg0: i32) -> (i32, i32) {
    %c0_i32 = arith.constant 0 : i32
    %c0_i32_0 = arith.constant 0 : i32
    %c0_i32_1 = arith.constant 0 : i32
    return %c0_i32, %c0_i32_0 : i32, i32
  }
  func.func @transform_5(%arg0: i32) -> (i32, i32) {
    %c0_i32 = arith.constant 0 : i32
    %c0_i32_0 = arith.constant 0 : i32
    %c0_i32_1 = arith.constant 0 : i32
    return %c0_i32, %c0_i32_0 : i32, i32
  }
  func.func @transform_6(%arg0: i32) -> (i32, i32) {
    %c0_i32 = arith.constant 0 : i32
    %c0_i32_0 = arith.constant 0 : i32
    %c0_i32_1 = arith.constant 0 : i32
    return %c0_i32, %c0_i32_0 : i32, i32
  }
  func.func @transform_7(%arg0: i32) -> (i32, i32) {
    %c0_i32 = arith.constant 0 : i32
    %c0_i32_0 = arith.constant 0 : i32
    return %arg0, %c0_i32 : i32, i32
  }
  func.func @transform_8(%arg0: i32) -> (i32, i32) {
    %c0_i32 = arith.constant 0 : i32
    %c0_i32_0 = arith.constant 0 : i32
    return %arg0, %c0_i32 : i32, i32
  }
  func.func @transform_9(%arg0: i32) -> (i32, i32) {
    %c0_i32 = arith.constant 0 : i32
    %c0_i32_0 = arith.constant 0 : i32
    return %arg0, %c0_i32 : i32, i32
  }
}

module attributes {stable_mosaic.version = 11 : i64} {
  func.func @_pairwise_lse_kernel(%arg0: i32, %arg1: i32, %arg2: memref<128x128xf32, #tpu.memory_space<vmem>>, %arg3: memref<128x128xf32, #tpu.memory_space<vmem>>, %arg4: memref<1x128xf32, #tpu.memory_space<vmem>>, %arg5: memref<1x1xf32, #tpu.memory_space<vmem>>, %arg6: memref<128x1xf32, #tpu.memory_space<vmem>>, %arg7: memref<128x128xf32, #tpu.memory_space<vmem>>, %arg8: memref<128x1xf32, #tpu.memory_space<vmem>>, %arg9: memref<128x1xf32, #tpu.memory_space<vmem>>) attributes {dimension_semantics = [#tpu.dimension_semantics<parallel>, #tpu.dimension_semantics<arbitrary>], iteration_bounds = array<i64: 1, 1>, scalar_prefetch = 0 : i64, scratch_operands = 3 : i64, tpu.core_type = #tpu.core_type<tc>, window_params = [{transform_indices = @transform_0, window_bounds = array<i64: 128, 128>}, {transform_indices = @transform_1, window_bounds = array<i64: 128, 128>}, {pipeline_mode = #tpu.pipeline_mode<synchronous>, transform_indices = @transform_2, window_bounds = array<i64: 1, 128>}, {pipeline_mode = #tpu.pipeline_mode<synchronous>, transform_indices = @transform_3, window_bounds = array<i64: 1, 1>}, {transform_indices = @transform_4, window_bounds = array<i64: 128, 1>}]} {
    %c0_i32 = arith.constant 0 : i32
    %0 = arith.cmpi eq, %arg1, %c0_i32 : i32
    %1 = arith.extui %0 : i1 to i32
    %c0_i32_0 = arith.constant 0 : i32
    %2 = arith.cmpi ne, %1, %c0_i32_0 : i32
    scf.if %2 {
      %cst_22 = arith.constant -1.000000e+30 : f32
      %37 = vector.broadcast %cst_22 : f32 to vector<128x1xf32>
      %c0_23 = arith.constant 0 : index
      %c0_24 = arith.constant 0 : index
      %38 = vector.load %arg8[%c0_23, %c0_24] : memref<128x1xf32, #tpu.memory_space<vmem>>, vector<128x1xf32>
      tpu.vector_store %arg8[%c0_23, %c0_24], %37 {strides = array<i32>} : memref<128x1xf32, #tpu.memory_space<vmem>>, vector<128x1xf32>,
      %cst_25 = arith.constant 0.000000e+00 : f32
      %39 = vector.broadcast %cst_25 : f32 to vector<128x1xf32>
      %c0_26 = arith.constant 0 : index
      %c0_27 = arith.constant 0 : index
      %40 = vector.load %arg9[%c0_26, %c0_27] : memref<128x1xf32, #tpu.memory_space<vmem>>, vector<128x1xf32>
      tpu.vector_store %arg9[%c0_26, %c0_27], %39 {strides = array<i32>} : memref<128x1xf32, #tpu.memory_space<vmem>>, vector<128x1xf32>,
    } else {
    }
    %c0 = arith.constant 0 : index
    %c0_1 = arith.constant 0 : index
    %3 = vector.load %arg2[%c0, %c0_1] : memref<128x128xf32, #tpu.memory_space<vmem>>, vector<128x128xf32>
    %c0_2 = arith.constant 0 : index
    %c0_3 = arith.constant 0 : index
    %4 = vector.load %arg4[%c0_2, %c0_3] : memref<1x128xf32, #tpu.memory_space<vmem>>, vector<1x128xf32>
    %5 = vector.shape_cast %4 : vector<1x128xf32> to vector<1x1x128xf32>
    %c0_4 = arith.constant 0 : index
    %c0_5 = arith.constant 0 : index
    %6 = vector.load %arg5[%c0_4, %c0_5] : memref<1x1xf32, #tpu.memory_space<vmem>>, vector<1x1xf32>
    %7 = vector.extract %6[0, 0] : f32 from vector<1x1xf32>
    %c0_i32_6 = arith.constant 0 : i32
    %c16_i32 = arith.constant 16 : i32
    %8 = arith.addi %c0_i32_6, %c16_i32 : i32
    %c1_i32 = arith.constant 1 : i32
    scf.for %arg10 = %c0_i32_6 to %8 step %c1_i32  : i32 {
      %c1_i32_22 = arith.constant 1 : i32
      %37 = arith.muli %arg10, %c1_i32_22 : i32
      %c0_i32_23 = arith.constant 0 : i32
      %38 = arith.addi %c0_i32_23, %37 : i32
      %c8_i32_24 = arith.constant 8 : i32
      %39 = arith.muli %38, %c8_i32_24 : i32
      %40 = tpu.assume_multiple %39, 8 : i32
      %41 = arith.index_cast %40 : i32 to index
      %c0_25 = arith.constant 0 : index
      %42 = vector.load %arg3[%41, %c0_25] : memref<128x128xf32, #tpu.memory_space<vmem>>, vector<8x128xf32>
      %43 = vector.shape_cast %3 : vector<128x128xf32> to vector<1x128x128xf32>
      %44 = vector.shape_cast %42 : vector<8x128xf32> to vector<8x1x128xf32>
      %45 = vector.broadcast %43 : vector<1x128x128xf32> to vector<8x128x128xf32>
      %46 = vector.broadcast %44 : vector<8x1x128xf32> to vector<8x128x128xf32>
      %47 = arith.addf %45, %46 : vector<8x128x128xf32>
      %cst_26 = arith.constant 0.000000e+00 : f32
      %48 = vector.broadcast %cst_26 : f32 to vector<8x128x128xf32>
      %49 = arith.maximumf %47, %48 : vector<8x128x128xf32>
      %50 = vector.broadcast %5 : vector<1x1x128xf32> to vector<8x128x128xf32>
      %51 = arith.mulf %49, %50 : vector<8x128x128xf32>
      %cst_27 = arith.constant dense<0.000000e+00> : vector<8x128xf32>
      %52 = vector.multi_reduction <add>, %51, %cst_27 [2] : vector<8x128x128xf32> to vector<8x128xf32>
      %53 = vector.broadcast %7 : f32 to vector<8x128xf32>
      %54 = arith.addf %52, %53 : vector<8x128xf32>
      %cst_28 = arith.constant 2.000000e+01 : f32
      %55 = vector.broadcast %cst_28 : f32 to vector<8x128xf32>
      %56 = arith.cmpf ogt, %54, %55 : vector<8x128xf32>
      %cst_29 = arith.constant 2.000000e+01 : f32
      %57 = vector.broadcast %cst_29 : f32 to vector<8x128xf32>
      %58 = arith.minimumf %54, %57 : vector<8x128xf32>
      %59 = math.exp %58 : vector<8x128xf32>
      %60 = math.log1p %59 : vector<8x128xf32>
      %61 = arith.select %56, %54, %60 : vector<8x128xi1>, vector<8x128xf32>
      %62 = arith.index_cast %40 : i32 to index
      %c0_30 = arith.constant 0 : index
      %63 = vector.load %arg7[%62, %c0_30] : memref<128x128xf32, #tpu.memory_space<vmem>>, vector<8x128xf32>
      tpu.vector_store %arg7[%62, %c0_30], %61 {strides = array<i32>} : memref<128x128xf32, #tpu.memory_space<vmem>>, vector<8x128xf32>,
    }
    %c16_i32_7 = arith.constant 16 : i32
    %9 = tpu.iota {dimensions = array<i32: 1>} : vector<128x128xi32>
    %c128_i32 = arith.constant 128 : i32
    %10 = arith.muli %arg1, %c128_i32 : i32
    %11 = vector.broadcast %10 : i32 to vector<128x128xi32>
    %12 = arith.addi %9, %11 : vector<128x128xi32>
    %c8_i32 = arith.constant 8 : i32
    %13 = vector.broadcast %c8_i32 : i32 to vector<128x128xi32>
    %14 = arith.cmpi slt, %12, %13 : vector<128x128xi32>
    %c0_8 = arith.constant 0 : index
    %c0_9 = arith.constant 0 : index
    %15 = vector.load %arg7[%c0_8, %c0_9] : memref<128x128xf32, #tpu.memory_space<vmem>>, vector<128x128xf32>
    %cst = arith.constant -1.000000e+30 : f32
    %16 = vector.broadcast %cst : f32 to vector<128x128xf32>
    %17 = arith.select %14, %15, %16 : vector<128x128xi1>, vector<128x128xf32>
    %c0_10 = arith.constant 0 : index
    %c0_11 = arith.constant 0 : index
    %18 = vector.load %arg8[%c0_10, %c0_11] : memref<128x1xf32, #tpu.memory_space<vmem>>, vector<128x1xf32>
    %cst_12 = arith.constant dense<0xFF800000> : vector<128xf32>
    %19 = vector.multi_reduction <maximumf>, %17, %cst_12 [1] : vector<128x128xf32> to vector<128xf32>
    %20 = vector.shape_cast %19 : vector<128xf32> to vector<128x1xf32>
    %21 = arith.maximumf %18, %20 : vector<128x1xf32>
    %22 = arith.subf %18, %21 : vector<128x1xf32>
    %23 = math.exp %22 : vector<128x1xf32>
    %c0_13 = arith.constant 0 : index
    %c0_14 = arith.constant 0 : index
    %24 = vector.load %arg9[%c0_13, %c0_14] : memref<128x1xf32, #tpu.memory_space<vmem>>, vector<128x1xf32>
    %25 = arith.mulf %23, %24 : vector<128x1xf32>
    %26 = vector.broadcast %21 : vector<128x1xf32> to vector<128x128xf32>
    %27 = arith.subf %17, %26 : vector<128x128xf32>
    %28 = math.exp %27 : vector<128x128xf32>
    %cst_15 = arith.constant dense<0.000000e+00> : vector<128xf32>
    %29 = vector.multi_reduction <add>, %28, %cst_15 [1] : vector<128x128xf32> to vector<128xf32>
    %30 = vector.shape_cast %29 : vector<128xf32> to vector<128x1xf32>
    %31 = arith.addf %25, %30 : vector<128x1xf32>
    %c0_16 = arith.constant 0 : index
    %c0_17 = arith.constant 0 : index
    %32 = vector.load %arg9[%c0_16, %c0_17] : memref<128x1xf32, #tpu.memory_space<vmem>>, vector<128x1xf32>
    tpu.vector_store %arg9[%c0_16, %c0_17], %31 {strides = array<i32>} : memref<128x1xf32, #tpu.memory_space<vmem>>, vector<128x1xf32>,
    %c0_18 = arith.constant 0 : index
    %c0_19 = arith.constant 0 : index
    %33 = vector.load %arg8[%c0_18, %c0_19] : memref<128x1xf32, #tpu.memory_space<vmem>>, vector<128x1xf32>
    tpu.vector_store %arg8[%c0_18, %c0_19], %21 {strides = array<i32>} : memref<128x1xf32, #tpu.memory_space<vmem>>, vector<128x1xf32>,
    %c0_i32_20 = arith.constant 0 : i32
    %34 = arith.cmpi eq, %arg1, %c0_i32_20 : i32
    %35 = arith.extui %34 : i1 to i32
    %c0_i32_21 = arith.constant 0 : i32
    %36 = arith.cmpi ne, %35, %c0_i32_21 : i32
    scf.if %36 {
      %c0_22 = arith.constant 0 : index
      %c0_23 = arith.constant 0 : index
      %37 = vector.load %arg8[%c0_22, %c0_23] : memref<128x1xf32, #tpu.memory_space<vmem>>, vector<128x1xf32>
      %c0_24 = arith.constant 0 : index
      %c0_25 = arith.constant 0 : index
      %38 = vector.load %arg9[%c0_24, %c0_25] : memref<128x1xf32, #tpu.memory_space<vmem>>, vector<128x1xf32>
      %39 = math.log %38 : vector<128x1xf32>
      %40 = arith.addf %37, %39 : vector<128x1xf32>
      %c0_26 = arith.constant 0 : index
      %c0_27 = arith.constant 0 : index
      %41 = vector.load %arg6[%c0_26, %c0_27] : memref<128x1xf32, #tpu.memory_space<vmem>>, vector<128x1xf32>
      tpu.vector_store %arg6[%c0_26, %c0_27], %40 {strides = array<i32>} : memref<128x1xf32, #tpu.memory_space<vmem>>, vector<128x1xf32>,
    } else {
    }
    return
  }
  func.func @transform_0(%arg0: i32, %arg1: i32) -> (i32, i32) {
    %c0_i32 = arith.constant 0 : i32
    %c0_i32_0 = arith.constant 0 : i32
    return %arg1, %c0_i32 : i32, i32
  }
  func.func @transform_1(%arg0: i32, %arg1: i32) -> (i32, i32) {
    %c0_i32 = arith.constant 0 : i32
    %c0_i32_0 = arith.constant 0 : i32
    return %arg0, %c0_i32 : i32, i32
  }
  func.func @transform_2(%arg0: i32, %arg1: i32) -> (i32, i32) {
    %c0_i32 = arith.constant 0 : i32
    %c0_i32_0 = arith.constant 0 : i32
    %c0_i32_1 = arith.constant 0 : i32
    return %c0_i32, %c0_i32_0 : i32, i32
  }
  func.func @transform_3(%arg0: i32, %arg1: i32) -> (i32, i32) {
    %c0_i32 = arith.constant 0 : i32
    %c0_i32_0 = arith.constant 0 : i32
    %c0_i32_1 = arith.constant 0 : i32
    return %c0_i32, %c0_i32_0 : i32, i32
  }
  func.func @transform_4(%arg0: i32, %arg1: i32) -> (i32, i32) {
    %c0_i32 = arith.constant 0 : i32
    %c0_i32_0 = arith.constant 0 : i32
    return %arg0, %c0_i32 : i32, i32
  }
}

</mosaic_0001>

<bundles_post_ra>
// kernel: infonce_forward.2
= control target key start
LH: loop header
LB: loop body
LE: loop exit
PB: predicated region body
PF: predicated region fallthrough
CT: control target
= control target key end

     0   :  { %vm49_vm0 = vcmask 130048   ;;  %vm657_vm1 = vcmask 7168   ;;  %s1288_s3 = inlined_call_operand.vmem [shape: f32[16,128], index: 3, kind: input, shape index: {}]   ;;  %s1289_s2 = inlined_call_operand.vmem [shape: f32[16,128], index: 2, kind: input, shape index: {}]   ;;  %s1290_s1 = inlined_call_operand.vmem [shape: f32[128,16], index: 1, kind: input, shape index: {}]   ;;  %s1291_s0 = inlined_call_operand.vmem [shape: f32[128,16], index: 0, kind: input, shape index: {}]   ;;  %s1292_s4 = inlined_call_operand.vmem [shape: f32[1,128], index: 4, kind: input, shape index: {}]   ;;  %s1293_s5 = inlined_call_operand.vmem [shape: f32[1,128], index: 5, kind: input, shape index: {}]   ;;  %s1294_s8 = inlined_call_operand.vmem [shape: f32[128,128], index: 8, kind: output, shape index: {1}]   ;;  %s1295_s7 = inlined_call_operand.vmem [shape: f32[128,128], index: 7, kind: output, shape index: {0}]   ;;  %s1296_s6 = inlined_call_operand.<no memory space> [shape: f32[1,1], index: 6, kind: input, shape index: {}]   ;;  %s1297_s9 = inlined_call_operand.vmem [shape: f32[128,1], index: 9, kind: output, shape index: {2}]  }
   0x1   :  { %v180_v0 = vld [vmem:[%s1288_s3 + $0x8] sm:$0xff]  ;;  %v179_v2 = vld [vmem:[%s1288_s3] sm:$0xff]  ;;  %v165_v12 = vld [vmem:[%s1290_s1 + $0x10] sm:$0xff] }
   0x2   :  { %v48_v1 = vld [vmem:[%s1289_s2 + $0x8] sm:$0xff]  ;;  %247 = vmatpush.msra.mxu1 %v180_v0  ;;  %720 = vmatpush.msra.mxu3 %v180_v0  ;;  %v163_v3 = vld [vmem:[%s1290_s1] sm:$0xff]  ;;  %v173_v13 = vld [vmem:[%s1290_s1 + $0x50] sm:$0xff] }
   0x3   :  { %v171_v4 = vld [vmem:[%s1290_s1 + $0x40] sm:$0xff]  ;;  %112 = vmatpush.msra.mxu0 %v48_v1  ;;  %718 = vmatpush.msra.mxu2 %v48_v1  ;;  %v164_v8 = vld [vmem:[%s1290_s1 + $0x8] sm:$0xff]  ;;  %v33_v14 = vld [vmem:[%s1291_s0 + $0x10] sm:$0xff] }
   0x4   :  { %v47_v5 = vld [vmem:[%s1289_s2] sm:$0xff]  ;;  %248 = vmatpush.msra.mxu1 %v179_v2  ;;  %721 = vmatpush.msra.mxu3 %v179_v2  ;;  %v172_v9 = vld [vmem:[%s1290_s1 + $0x48] sm:$0xff]  ;;  %v41_v15 = vld [vmem:[%s1291_s0 + $0x50] sm:$0xff] }
   0x5   :  { %v31_v6 = vld [vmem:[%s1291_s0] sm:$0xff]  ;;  %702 = vmatmul.msk.f32.vlgmr.msra.gmra.mxu1 %vm49_vm0, %v163_v3  ;;  %710 = vmatmul.msk.f32.vlgmr.msra.gmra.mxu3 %vm49_vm0, %v171_v4  ;;  %v32_v10 = vld [vmem:[%s1291_s0 + $0x8] sm:$0xff]  ;;  %v166_v16 = vld [vmem:[%s1290_s1 + $0x18] sm:$0xff] }
   0x6   :  { %v39_v7 = vld [vmem:[%s1291_s0 + $0x40] sm:$0xff]  ;;  %113 = vmatpush.msra.mxu0 %v47_v5  ;;  %719 = vmatpush.msra.mxu2 %v47_v5  ;;  %v40_v11 = vld [vmem:[%s1291_s0 + $0x48] sm:$0xff]  ;;  %v174_v17 = vld [vmem:[%s1290_s1 + $0x58] sm:$0xff] }
   0x7   :  { %686 = vmatmul.msk.f32.vlgmr.msra.gmra.mxu0 %vm49_vm0, %v31_v6  ;;  %694 = vmatmul.msk.f32.vlgmr.msra.gmra.mxu2 %vm49_vm0, %v39_v7  ;;  %v34_v18 = vld [vmem:[%s1291_s0 + $0x18] sm:$0xff]  ;;  %v167_v20 = vld [vmem:[%s1290_s1 + $0x20] sm:$0xff]  ;;  %v168_v24 = vld [vmem:[%s1290_s1 + $0x28] sm:$0xff] }
   0x8   :  { %v42_v19 = vld [vmem:[%s1291_s0 + $0x58] sm:$0xff]  ;;  %v175_v21 = vld [vmem:[%s1290_s1 + $0x60] sm:$0xff]  ;;  %v176_v25 = vld [vmem:[%s1290_s1 + $0x68] sm:$0xff] }
   0x9   :  { %v35_v22 = vld [vmem:[%s1291_s0 + $0x20] sm:$0xff]  ;;  %v36_v26 = vld [vmem:[%s1291_s0 + $0x28] sm:$0xff]  ;;  %v169_v28 = vld [vmem:[%s1290_s1 + $0x30] sm:$0xff] }
   0xa   :  { %v43_v23 = vld [vmem:[%s1291_s0 + $0x60] sm:$0xff]  ;;  %v44_v27 = vld [vmem:[%s1291_s0 + $0x68] sm:$0xff]  ;;  %v177_v29 = vld [vmem:[%s1290_s1 + $0x70] sm:$0xff] }
   0xb   :  { %v37_v30 = vld [vmem:[%s1291_s0 + $0x30] sm:$0xff]  ;;  %v170_v32 = vld [vmem:[%s1290_s1 + $0x38] sm:$0xff]  ;;  %v983_v36 = vld [vmem:[%s1292_s4] ss:$0 sm:$0xff] }
   0xc   :  { %v45_v31 = vld [vmem:[%s1291_s0 + $0x70] sm:$0xff]  ;;  %v178_v33 = vld [vmem:[%s1290_s1 + $0x78] sm:$0xff]  ;;  %v992_v41 = vld [vmem:[%s1293_s5] ss:$0 sm:$0xff] }
   0xd   :  { %703 = vmatmul.msk.f32.gmra.mxu1 %vm49_vm0, %v164_v8  ;;  %711 = vmatmul.msk.f32.gmra.mxu3 %vm49_vm0, %v172_v9  ;;  %v38_v34 = vld [vmem:[%s1291_s0 + $0x38] sm:$0xff] }
   0xe   :  { %v46_v35 = vld [vmem:[%s1291_s0 + $0x78] sm:$0xff] }
   0xf   :  { %687 = vmatmul.msk.f32.gmra.mxu0 %vm49_vm0, %v32_v10  ;;  %695 = vmatmul.msk.f32.gmra.mxu2 %vm49_vm0, %v40_v11 }
  0x15   :  { %704 = vmatmul.msk.f32.gmra.mxu1 %vm49_vm0, %v165_v12  ;;  %712 = vmatmul.msk.f32.gmra.mxu3 %vm49_vm0, %v173_v13 }
  0x17   :  { %688 = vmatmul.msk.f32.gmra.mxu0 %vm49_vm0, %v33_v14  ;;  %696 = vmatmul.msk.f32.gmra.mxu2 %vm49_vm0, %v41_v15 }
  0x1d   :  { %705 = vmatmul.msk.f32.gmra.mxu1 %vm49_vm0, %v166_v16  ;;  %713 = vmatmul.msk.f32.gmra.mxu3 %vm49_vm0, %v174_v17 }
  0x1f   :  { %689 = vmatmul.msk.f32.gmra.mxu0 %vm49_vm0, %v34_v18  ;;  %697 = vmatmul.msk.f32.gmra.mxu2 %vm49_vm0, %v42_v19 }
  0x25   :  { %706 = vmatmul.msk.f32.gmra.mxu1 %vm49_vm0, %v167_v20  ;;  %714 = vmatmul.msk.f32.gmra.mxu3 %vm49_vm0, %v175_v21  ;;  %v15_v21 = vstv %s1296_s6 }
  0x26   :  { %16 = vst [vmem:[#allocation2] sm:$0x1] %v15_v21 }
  0x27   :  { %690 = vmatmul.msk.f32.gmra.mxu0 %vm49_vm0, %v35_v22  ;;  %698 = vmatmul.msk.f32.gmra.mxu2 %vm49_vm0, %v43_v23 }
  0x2d   :  { %707 = vmatmul.msk.f32.gmra.mxu1 %vm49_vm0, %v168_v24  ;;  %715 = vmatmul.msk.f32.gmra.mxu3 %vm49_vm0, %v176_v25 }
  0x2f   :  { %691 = vmatmul.msk.f32.gmra.mxu0 %vm49_vm0, %v36_v26  ;;  %699 = vmatmul.msk.f32.gmra.mxu2 %vm49_vm0, %v44_v27 }
  0x35   :  { %708 = vmatmul.msk.f32.gmra.mxu1 %vm49_vm0, %v169_v28  ;;  %716 = vmatmul.msk.f32.gmra.mxu3 %vm49_vm0, %v177_v29 }
  0x37   :  { %692 = vmatmul.msk.f32.gmra.mxu0 %vm49_vm0, %v37_v30  ;;  %700 = vmatmul.msk.f32.gmra.mxu2 %vm49_vm0, %v45_v31 }
  0x3d   :  { %709 = vmatmul.msk.f32.gmra.mxu1 %vm49_vm0, %v170_v32  ;;  %717 = vmatmul.msk.f32.gmra.mxu3 %vm49_vm0, %v178_v33 }
  0x3f   :  { %693 = vmatmul.msk.f32.gmra.mxu0 %vm49_vm0, %v38_v34  ;;  %701 = vmatmul.msk.f32.gmra.mxu2 %vm49_vm0, %v46_v35 }
  0x82   :  { %v250_v37 = vpop.f32.mrf.mxu1 }
  0x83   :  { %v251_v38 = vadd.f32 %v983_v36, %v250_v37  ;;  %v414_v37 = vld [vmem:[#allocation2] sm:$0x1] }
  0x84   :  { %v115_v39 = vpop.f32.mrf.mxu0  ;;  %722 = vpush %v414_v37 }
  0x85   :  { %314 = vst [vmem:[%s1294_s8] sm:$0xff] %v251_v38  ;;  %v330_v40 = vadd.f32 %v251_v38, %v115_v39 }
  0x86   :  { %298 = vst [vmem:[%s1295_s7] sm:$0xff] %v115_v39 }
  0x87   :  { %v346_v42 = vmax.f32 %v330_v40, 0.0 }
  0x88   :  { %v274_v43 = vpop.f32.mrf.mxu3 }
  0x89   :  { %v275_v44 = vadd.f32 %v983_v36, %v274_v43  ;;  %v366_v45 = vmul.f32 %v992_v41, %v346_v42 }
  0x8a   :  { %v139_v46 = vpop.f32.mrf.mxu2  ;;  %v253_v47 = vpop.f32.mrf.mxu1 }
  0x8b   :  { %322 = vst [vmem:[%s1294_s8 + $0x40] sm:$0xff] %v275_v44  ;;  %v338_v48 = vadd.f32 %v275_v44, %v139_v46  ;;  %v254_v49 = vadd.f32 %v983_v36, %v253_v47  ;;  %382 = vadd.xlane.f32.xlu0 %v366_v45 }
  0x8c   :  { %306 = vst [vmem:[%s1295_s7 + $0x40] sm:$0xff] %v139_v46  ;;  %v118_v50 = vpop.f32.mrf.mxu0 }
  0x8d   :  { %315 = vst [vmem:[%s1294_s8 + $0x8] sm:$0xff] %v254_v49  ;;  %v331_v51 = vadd.f32 %v254_v49, %v118_v50  ;;  %v354_v52 = vmax.f32 %v338_v48, 0.0 }
  0x8e   :  { %299 = vst [vmem:[%s1295_s7 + $0x8] sm:$0xff] %v118_v50 }
  0x8f   :  { %v347_v53 = vmax.f32 %v331_v51, 0.0  ;;  %v374_v54 = vmul.f32 %v992_v41, %v354_v52 }
  0x90   :  { %v277_v55 = vpop.f32.mrf.mxu3 }
  0x91   :  { %v278_v56 = vadd.f32 %v983_v36, %v277_v55  ;;  %398 = vadd.xlane.f32.xlu2 %v374_v54  ;;  %v367_v57 = vmul.f32 %v992_v41, %v347_v53 }
  0x92   :  { %v142_v58 = vpop.f32.mrf.mxu2  ;;  %v256_v59 = vpop.f32.mrf.mxu1 }
  0x93   :  { %323 = vst [vmem:[%s1294_s8 + $0x48] sm:$0xff] %v278_v56  ;;  %v339_v60 = vadd.f32 %v278_v56, %v142_v58  ;;  %v257_v61 = vadd.f32 %v983_v36, %v256_v59  ;;  %384 = vadd.xlane.f32.xlu0 %v367_v57 }
  0x94   :  { %307 = vst [vmem:[%s1295_s7 + $0x48] sm:$0xff] %v142_v58  ;;  %v121_v62 = vpop.f32.mrf.mxu0 }
  0x95   :  { %v355_v63 = vmax.f32 %v339_v60, 0.0  ;;  %316 = vst [vmem:[%s1294_s8 + $0x10] sm:$0xff] %v257_v61  ;;  %v332_v0 = vadd.f32 %v257_v61, %v121_v62 }
  0x96   :  { %300 = vst [vmem:[%s1295_s7 + $0x10] sm:$0xff] %v121_v62 }
  0x97   :  { %v375_v1 = vmul.f32 %v992_v41, %v355_v63  ;;  %v348_v2 = vmax.f32 %v332_v0, 0.0 }
  0x98   :  { %v280_v3 = vpop.f32.mrf.mxu3 }
  0x99   :  { %v281_v4 = vadd.f32 %v983_v36, %v280_v3  ;;  %v368_v5 = vmul.f32 %v992_v41, %v348_v2 }
  0x9a   :  { %v145_v6 = vpop.f32.mrf.mxu2  ;;  %v259_v7 = vpop.f32.mrf.mxu1 }
  0x9b   :  { %324 = vst [vmem:[%s1294_s8 + $0x50] sm:$0xff] %v281_v4  ;;  %v340_v8 = vadd.f32 %v281_v4, %v145_v6  ;;  %v260_v9 = vadd.f32 %v983_v36, %v259_v7  ;;  %400 = vadd.xlane.f32.xlu0 %v375_v1  ;;  %386 = vadd.xlane.f32.xlu1 %v368_v5 }
  0x9c   :  { %308 = vst [vmem:[%s1295_s7 + $0x50] sm:$0xff] %v145_v6  ;;  %v124_v10 = vpop.f32.mrf.mxu0 }
  0x9d   :  { %v356_v11 = vmax.f32 %v340_v8, 0.0  ;;  %317 = vst [vmem:[%s1294_s8 + $0x18] sm:$0xff] %v260_v9  ;;  %v333_v14 = vadd.f32 %v260_v9, %v124_v10 }
  0x9e   :  { %301 = vst [vmem:[%s1295_s7 + $0x18] sm:$0xff] %v124_v10 }
  0x9f   :  { %v376_v12 = vmul.f32 %v992_v41, %v356_v11  ;;  %v349_v22 = vmax.f32 %v333_v14, 0.0 }
  0xa0   :  { %v283_v13 = vpop.f32.mrf.mxu3 }
  0xa1   :  { %v284_v15 = vadd.f32 %v983_v36, %v283_v13  ;;  %v369_v28 = vmul.f32 %v992_v41, %v349_v22 }
  0xa2   :  { %v148_v16 = vpop.f32.mrf.mxu2  ;;  %v262_v17 = vpop.f32.mrf.mxu1 }
  0xa3   :  { %325 = vst [vmem:[%s1294_s8 + $0x58] sm:$0xff] %v284_v15  ;;  %v341_v18 = vadd.f32 %v284_v15, %v148_v16  ;;  %v263_v19 = vadd.f32 %v983_v36, %v262_v17  ;;  %402 = vadd.xlane.f32.xlu1 %v376_v12 }
  0xa4   :  { %309 = vst [vmem:[%s1295_s7 + $0x58] sm:$0xff] %v148_v16  ;;  %v127_v20 = vpop.f32.mrf.mxu0 }
  0xa5   :  { %v357_v23 = vmax.f32 %v341_v18, 0.0  ;;  %318 = vst [vmem:[%s1294_s8 + $0x20] sm:$0xff] %v263_v19  ;;  %v334_v24 = vadd.f32 %v263_v19, %v127_v20 }
  0xa6   :  { %302 = vst [vmem:[%s1295_s7 + $0x20] sm:$0xff] %v127_v20 }
  0xa7   :  { %v377_v25 = vmul.f32 %v992_v41, %v357_v23  ;;  %v350_v31 = vmax.f32 %v334_v24, 0.0 }
  0xa8   :  { %v286_v26 = vpop.f32.mrf.mxu3 }
  0xa9   :  { %v287_v27 = vadd.f32 %v983_v36, %v286_v26  ;;  %404 = vadd.xlane.f32.xlu2 %v377_v25  ;;  %v370_v40 = vmul.f32 %v992_v41, %v350_v31 }
  0xaa   :  { %v151_v29 = vpop.f32.mrf.mxu2  ;;  %v265_v30 = vpop.f32.mrf.mxu1 }
  0xab   :  { %326 = vst [vmem:[%s1294_s8 + $0x60] sm:$0xff] %v287_v27  ;;  %v342_v32 = vadd.f32 %v287_v27, %v151_v29  ;;  %v266_v33 = vadd.f32 %v983_v36, %v265_v30  ;;  %388 = vadd.xlane.f32.xlu1 %v369_v28 }
  0xac   :  { %310 = vst [vmem:[%s1295_s7 + $0x60] sm:$0xff] %v151_v29  ;;  %v130_v34 = vpop.f32.mrf.mxu0 }
  0xad   :  { %v358_v35 = vmax.f32 %v342_v32, 0.0  ;;  %319 = vst [vmem:[%s1294_s8 + $0x28] sm:$0xff] %v266_v33  ;;  %v335_v38 = vadd.f32 %v266_v33, %v130_v34 }
  0xae   :  { %303 = vst [vmem:[%s1295_s7 + $0x28] sm:$0xff] %v130_v34 }
  0xaf   :  { %v378_v39 = vmul.f32 %v992_v41, %v358_v35  ;;  %v351_v46 = vmax.f32 %v335_v38, 0.0 }
  0xb0   :  { %v289_v42 = vpop.f32.mrf.mxu3 }
  0xb1   :  { %v290_v43 = vadd.f32 %v983_v36, %v289_v42  ;;  %406 = vadd.xlane.f32.xlu0 %v378_v39  ;;  %390 = vadd.xlane.f32.xlu2 %v370_v40  ;;  %v371_v53 = vmul.f32 %v992_v41, %v351_v46 }
  0xb2   :  { %v154_v44 = vpop.f32.mrf.mxu2  ;;  %v268_v45 = vpop.f32.mrf.mxu1 }
  0xb3   :  { %327 = vst [vmem:[%s1294_s8 + $0x68] sm:$0xff] %v290_v43  ;;  %v343_v47 = vadd.f32 %v290_v43, %v154_v44  ;;  %v269_v48 = vadd.f32 %v983_v36, %v268_v45 }
  0xb4   :  { %311 = vst [vmem:[%s1295_s7 + $0x68] sm:$0xff] %v154_v44  ;;  %v133_v49 = vpop.f32.mrf.mxu0 }
  0xb5   :  { %v359_v50 = vmax.f32 %v343_v47, 0.0  ;;  %320 = vst [vmem:[%s1294_s8 + $0x30] sm:$0xff] %v269_v48  ;;  %v336_v51 = vadd.f32 %v269_v48, %v133_v49  ;;  %s723_s6 = spop %722 }
  0xb6   :  { %304 = vst [vmem:[%s1295_s7 + $0x30] sm:$0xff] %v133_v49 }
  0xb7   :  { %v352_v52 = vmax.f32 %v336_v51, 0.0  ;;  %v379_v54 = vmul.f32 %v992_v41, %v359_v50 }
  0xb8   :  { %v292_v55 = vpop.f32.mrf.mxu3 }
  0xb9   :  { %v293_v56 = vadd.f32 %v983_v36, %v292_v55  ;;  %392 = vadd.xlane.f32.xlu2 %v371_v53  ;;  %v372_v57 = vmul.f32 %v992_v41, %v352_v52 }
  0xba   :  { %v157_v58 = vpop.f32.mrf.mxu2  ;;  %v271_v59 = vpop.f32.mrf.mxu1 }
  0xbb   :  { %328 = vst [vmem:[%s1294_s8 + $0x70] sm:$0xff] %v293_v56  ;;  %v344_v60 = vadd.f32 %v293_v56, %v157_v58  ;;  %v272_v61 = vadd.f32 %v983_v36, %v271_v59  ;;  %394 = vadd.xlane.f32.xlu0 %v372_v57 }
  0xbc   :  { %312 = vst [vmem:[%s1295_s7 + $0x70] sm:$0xff] %v157_v58  ;;  %v136_v62 = vpop.f32.mrf.mxu0 }
  0xbd   :  { %v360_v63 = vmax.f32 %v344_v60, 0.0  ;;  %321 = vst [vmem:[%s1294_s8 + $0x38] sm:$0xff] %v272_v61  ;;  %v337_v0 = vadd.f32 %v272_v61, %v136_v62 }
  0xbe   :  { %305 = vst [vmem:[%s1295_s7 + $0x38] sm:$0xff] %v136_v62 }
  0xbf   :  { %v353_v1 = vmax.f32 %v337_v0, 0.0  ;;  %v380_v2 = vmul.f32 %v992_v41, %v360_v63 }
  0xc0   :  { %v295_v3 = vpop.f32.mrf.mxu3 }
  0xc1   :  { %v296_v4 = vadd.f32 %v983_v36, %v295_v3  ;;  %410 = vadd.xlane.f32.xlu2 %v380_v2  ;;  %v373_v5 = vmul.f32 %v992_v41, %v353_v1  ;;  %v1121_v36 = vstv %s723_s6 }
  0xc2   :  { %v160_v6 = vpop.f32.mrf.mxu2 }
  0xc3   :  { %329 = vst [vmem:[%s1294_s8 + $0x78] sm:$0xff] %v296_v4  ;;  %v345_v7 = vadd.f32 %v296_v4, %v160_v6  ;;  %396 = vadd.xlane.f32.xlu1 %v373_v5 }
  0xc4   :  { %313 = vst [vmem:[%s1295_s7 + $0x78] sm:$0xff] %v160_v6 }
  0xc5   :  { %v361_v8 = vmax.f32 %v345_v7, 0.0 }
  0xc7   :  { %v381_v9 = vmul.f32 %v992_v41, %v361_v8 }
  0xc9   :  { %412 = vadd.xlane.f32.xlu0 %v381_v9 }
  0xcb   :  { %408 = vadd.xlane.f32.xlu1 %v379_v54 }
  0xfe   :  { %v383_v10 = vpop.xlane.xlu0 %382 }
  0xff   :  { %v417_v11 = vadd.f32 %v1121_v36, %v383_v10 }
 0x101   :  { %v449_v12 = vmin.f32 %v417_v11, 20.0  ;;  %vm433_vm3 = vcmp.gt.f32.partialorder %v417_v11, 20.0 }
 0x103   :  { %v465_v13 = vmul.f32 1.442695, %v449_v12 }
 0x104   :  { %v399_v14 = vpop.xlane.xlu2 %398 }
 0x105   :  { %726 = vpow2.f32 %v465_v13  ;;  %v1125_v15 = vadd.f32 %v1121_v36, %v399_v14 }
 0x106   :  { %v385_v16 = vpop.xlane.xlu0 %384 }
 0x107   :  { %v457_v17 = vmin.f32 %v1125_v15, 20.0  ;;  %v1129_v41 = vadd.f32 %v1121_v36, %v385_v16  ;;  %vm441_vm4 = vcmp.gt.f32.partialorder %v1125_v15, 20.0 }
 0x109   :  { %v481_v18 = vmul.f32 1.442695, %v457_v17  ;;  %v450_v19 = vmin.f32 %v1129_v41, 20.0  ;;  %vm434_vm7 = vcmp.gt.f32.partialorder %v1129_v41, 20.0 }
 0x10b   :  { %v727_v20 = vpop.eup %726  ;;  %728 = vpow2.f32 %v481_v18  ;;  %v467_v21 = vmul.f32 1.442695, %v450_v19 }
 0x10c   :  { %v497_v22 = vadd.f32 1.0, %v727_v20  ;;  %v500_v23 = vmul.f32 -0.5, %v727_v20  ;;  %v503_v32 = vand.u32 2147483647, %v727_v20 }
 0x10d   :  { %730 = vpow2.f32 %v467_v21 }
 0x10e   :  { %732 = vlog2.f32 %v497_v22  ;;  %v401_v24 = vpop.xlane.xlu0 %400  ;;  %v387_v25 = vpop.xlane.xlu1 %386  ;;  %v501_v29 = vadd.f32 1.0, %v500_v23  ;;  %vm504_vm2 = vcmp.lt.f32.partialorder %v503_v32, 0.0004427343 }
 0x10f   :  { %v1133_v26 = vadd.f32 %v1121_v36, %v401_v24  ;;  %v1136_v27 = vadd.f32 %v1121_v36, %v387_v25 }
 0x110   :  { %v502_v43 = vmul.f32 %v727_v20, %v501_v29 }
 0x111   :  { %v729_v28 = vpop.eup %728  ;;  %v458_v30 = vmin.f32 %v1133_v26, 20.0  ;;  %v451_v31 = vmin.f32 %v1136_v27, 20.0  ;;  %vm442_vm9 = vcmp.gt.f32.partialorder %v1133_v26, 20.0  ;;  %vm435_vm11 = vcmp.gt.f32.partialorder %v1136_v27, 20.0 }
 0x112   :  { %v569_v33 = vadd.f32 1.0, %v729_v28  ;;  %v572_v35 = vmul.f32 -0.5, %v729_v28  ;;  %v575_v49 = vand.u32 2147483647, %v729_v28 }
 0x113   :  { %v731_v34 = vpop.eup %730  ;;  %v483_v37 = vmul.f32 1.442695, %v458_v30  ;;  %v469_v38 = vmul.f32 1.442695, %v451_v31 }
 0x114   :  { %v733_v39 = vpop.eup %732  ;;  %734 = vlog2.f32 %v569_v33  ;;  %v506_v40 = vadd.f32 1.0, %v731_v34  ;;  %v509_v44 = vmul.f32 -0.5, %v731_v34  ;;  %v573_v47 = vadd.f32 1.0, %v572_v35 }
 0x115   :  { %v499_v42 = vmul.f32 0.6931472, %v733_v39  ;;  %736 = vpow2.f32 %v483_v37  ;;  %v512_v53 = vand.u32 2147483647, %v731_v34  ;;  %vm576_vm5 = vcmp.lt.f32.partialorder %v575_v49, 0.0004427343 }
 0x116   :  { %738 = vlog2.f32 %v506_v40  ;;  %v403_v45 = vpop.xlane.xlu1 %402  ;;  %v510_v50 = vadd.f32 1.0, %v509_v44  ;;  %v574_v57 = vmul.f32 %v729_v28, %v573_v47 }
 0x117   :  { %v505_v46 = vsel %vm504_vm2, %v502_v43, %v499_v42  ;;  %740 = vpow2.f32 %v469_v38  ;;  %v1141_v51 = vadd.f32 %v1121_v36, %v403_v45  ;;  %vm513_vm6 = vcmp.lt.f32.partialorder %v512_v53, 0.0004427343 }
 0x118   :  { %v641_v48 = vsel %vm433_vm3, %v417_v11, %v505_v46  ;;  %v511_v59 = vmul.f32 %v731_v34, %v510_v50 }
 0x119   :  { %658 = vst.msk [vmem:[%s1297_s9] sm:$0xff] %vm657_vm1, %v641_v48  ;;  %v459_v54 = vmin.f32 %v1141_v51, 20.0  ;;  %vm443_vm13 = vcmp.gt.f32.partialorder %v1141_v51, 20.0 }
 0x11a   :  { %v735_v52 = vpop.eup %734 }
 0x11b   :  { %v737_v55 = vpop.eup %736  ;;  %v571_v56 = vmul.f32 0.6931472, %v735_v52  ;;  %v485_v61 = vmul.f32 1.442695, %v459_v54 }
 0x11c   :  { %v739_v58 = vpop.eup %738  ;;  %v578_v60 = vadd.f32 1.0, %v737_v55  ;;  %v405_v62 = vpop.xlane.xlu2 %404  ;;  %v581_v2 = vmul.f32 -0.5, %v737_v55  ;;  %v584_v12 = vand.u32 2147483647, %v737_v55 }
 0x11d   :  { %v741_v63 = vpop.eup %740  ;;  %v577_v0 = vsel %vm576_vm5, %v574_v57, %v571_v56  ;;  %v508_v1 = vmul.f32 0.6931472, %v739_v58  ;;  %v1150_v3 = vadd.f32 %v1121_v36, %v405_v62 }
 0x11e   :  { %v649_v4 = vsel %vm441_vm4, %v1125_v15, %v577_v0  ;;  %742 = vlog2.f32 %v578_v60  ;;  %v515_v6 = vadd.f32 1.0, %v741_v63  ;;  %v389_v7 = vpop.xlane.xlu1 %388  ;;  %v518_v9 = vmul.f32 -0.5, %v741_v63 }
 0x11f   :  { %666 = vst.msk [vmem:[%s1297_s9 + $0x40] sm:$0xff] %vm657_vm1, %v649_v4  ;;  %v514_v5 = vsel %vm513_vm6, %v511_v59, %v508_v1  ;;  %744 = vpow2.f32 %v485_v61  ;;  %v582_v10 = vadd.f32 1.0, %v581_v2  ;;  %v460_v11 = vmin.f32 %v1150_v3, 20.0 }
 0x120   :  { %v642_v8 = vsel %vm434_vm7, %v1129_v41, %v514_v5  ;;  %746 = vlog2.f32 %v515_v6  ;;  %v1165_v13 = vadd.f32 %v1121_v36, %v389_v7  ;;  %v519_v16 = vadd.f32 1.0, %v518_v9 }
 0x121   :  { %659 = vst.msk [vmem:[%s1297_s9 + $0x8] sm:$0xff] %vm657_vm1, %v642_v8  ;;  %v487_v14 = vmul.f32 1.442695, %v460_v11  ;;  %v521_v17 = vand.u32 2147483647, %v741_v63  ;;  %v583_v21 = vmul.f32 %v737_v55, %v582_v10  ;;  %vm444_vm15 = vcmp.gt.f32.partialorder %v1150_v3, 20.0 }
 0x122   :  { %v452_v41 = vmin.f32 %v1165_v13, 20.0  ;;  %vm585_vm8 = vcmp.lt.f32.partialorder %v584_v12, 0.0004427343  ;;  %v520_v34 = vmul.f32 %v741_v63, %v519_v16  ;;  %vm436_vm0 = vcmp.gt.f32.partialorder %v1165_v13, 20.0 }
 0x123   :  { %748 = vpow2.f32 %v487_v14  ;;  %vm522_vm10 = vcmp.lt.f32.partialorder %v521_v17, 0.0004427343 }
 0x124   :  { %v743_v15 = vpop.eup %742  ;;  %v407_v18 = vpop.xlane.xlu0 %406  ;;  %v471_v24 = vmul.f32 1.442695, %v452_v41 }
 0x125   :  { %v391_v19 = vpop.xlane.xlu2 %390  ;;  %v580_v20 = vmul.f32 0.6931472, %v743_v15  ;;  %v1169_v22 = vadd.f32 %v1121_v36, %v407_v18  ;;  %v745_v23 = vpop.eup %744 }
 0x126   :  { %v1172_v25 = vadd.f32 %v1121_v36, %v391_v19  ;;  %v747_v28 = vpop.eup %746  ;;  %v587_v30 = vadd.f32 1.0, %v745_v23  ;;  %v590_v31 = vmul.f32 -0.5, %v745_v23  ;;  %750 = vpow2.f32 %v471_v24 }
 0x127   :  { %v586_v29 = vsel %vm585_vm8, %v583_v21, %v580_v20  ;;  %v517_v33 = vmul.f32 0.6931472, %v747_v28  ;;  %v461_v35 = vmin.f32 %v1169_v22, 20.0  ;;  %v593_v46 = vand.u32 2147483647, %v745_v23 }
 0x128   :  { %v650_v32 = vsel %vm442_vm9, %v1133_v26, %v586_v29  ;;  %752 = vlog2.f32 %v587_v30  ;;  %v453_v38 = vmin.f32 %v1172_v25, 20.0  ;;  %v591_v40 = vadd.f32 1.0, %v590_v31 }
 0x129   :  { %667 = vst.msk [vmem:[%s1297_s9 + $0x48] sm:$0xff] %vm657_vm1, %v650_v32  ;;  %v523_v37 = vsel %vm522_vm10, %v520_v34, %v517_v33  ;;  %v749_v39 = vpop.eup %748  ;;  %v489_v42 = vmul.f32 1.442695, %v461_v35  ;;  %vm594_vm12 = vcmp.lt.f32.partialorder %v593_v46, 0.0004427343  ;;  %vm445_vm3 = vcmp.gt.f32.partialorder %v1169_v22, 20.0 }
 0x12a   :  { %v643_v26 = vsel %vm435_vm11, %v1136_v27, %v523_v37  ;;  %v596_v43 = vadd.f32 1.0, %v749_v39  ;;  %v599_v44 = vmul.f32 -0.5, %v749_v39  ;;  %v473_v47 = vmul.f32 1.442695, %v453_v38 }
 0x12b   :  { %660 = vst.msk [vmem:[%s1297_s9 + $0x10] sm:$0xff] %vm657_vm1, %v643_v26  ;;  %754 = vpow2.f32 %v489_v42  ;;  %v592_v52 = vmul.f32 %v745_v23, %v591_v40  ;;  %v602_v60 = vand.u32 2147483647, %v749_v39  ;;  %vm437_vm4 = vcmp.gt.f32.partialorder %v1172_v25, 20.0 }
 0x12c   :  { %v751_v49 = vpop.eup %750  ;;  %756 = vlog2.f32 %v596_v43  ;;  %v600_v55 = vadd.f32 1.0, %v599_v44 }
 0x12d   :  { %v393_v45 = vpop.xlane.xlu2 %392  ;;  %v524_v53 = vadd.f32 1.0, %v751_v49  ;;  %758 = vpow2.f32 %v473_v47  ;;  %v527_v56 = vmul.f32 -0.5, %v751_v49  ;;  %v530_v0 = vand.u32 2147483647, %v751_v49 }
 0x12e   :  { %v1189_v48 = vadd.f32 %v1121_v36, %v393_v45  ;;  %v395_v50 = vpop.xlane.xlu0 %394  ;;  %v753_v27 = vpop.eup %752  ;;  %v601_v4 = vmul.f32 %v749_v39, %v600_v55  ;;  %vm603_vm14 = vcmp.lt.f32.partialorder %v602_v60, 0.0004427343 }
 0x12f   :  { %v589_v54 = vmul.f32 0.6931472, %v753_v27  ;;  %760 = vlog2.f32 %v524_v53  ;;  %v1193_v58 = vadd.f32 %v1121_v36, %v395_v50  ;;  %v528_v5 = vadd.f32 1.0, %v527_v56 }
 0x130   :  { %v454_v57 = vmin.f32 %v1189_v48, 20.0  ;;  %vm531_vm2 = vcmp.lt.f32.partialorder %v530_v0, 0.0004427343  ;;  %vm438_vm7 = vcmp.gt.f32.partialorder %v1189_v48, 20.0 }
 0x131   :  { %v595_v59 = vsel %vm594_vm12, %v592_v52, %v589_v54  ;;  %v755_v62 = vpop.eup %754  ;;  %v455_v1 = vmin.f32 %v1193_v58, 20.0  ;;  %v529_v19 = vmul.f32 %v751_v49, %v528_v5  ;;  %vm439_vm10 = vcmp.gt.f32.partialorder %v1193_v58, 20.0 }
 0x132   :  { %v475_v61 = vmul.f32 1.442695, %v454_v57  ;;  %v651_v63 = vsel %vm443_vm13, %v1141_v51, %v595_v59  ;;  %v757_v2 = vpop.eup %756  ;;  %v605_v6 = vadd.f32 1.0, %v755_v62  ;;  %v608_v10 = vmul.f32 -0.5, %v755_v62 }
 0x133   :  { %668 = vst.msk [vmem:[%s1297_s9 + $0x50] sm:$0xff] %vm657_vm1, %v651_v63  ;;  %v759_v8 = vpop.eup %758  ;;  %v598_v9 = vmul.f32 0.6931472, %v757_v2  ;;  %v477_v11 = vmul.f32 1.442695, %v455_v1 }
 0x134   :  { %762 = vpow2.f32 %v475_v61  ;;  %v533_v12 = vadd.f32 1.0, %v759_v8  ;;  %v536_v17 = vmul.f32 -0.5, %v759_v8  ;;  %v609_v20 = vadd.f32 1.0, %v608_v10 }
 0x135   :  { %v411_v7 = vpop.xlane.xlu2 %410  ;;  %764 = vlog2.f32 %v605_v6  ;;  %v761_v15 = vpop.eup %760  ;;  %v604_v16 = vsel %vm603_vm14, %v601_v4, %v598_v9  ;;  %v611_v28 = vand.u32 2147483647, %v755_v62  ;;  %v539_v29 = vand.u32 2147483647, %v759_v8 }
 0x136   :  { %v1203_v51 = vadd.f32 %v1121_v36, %v411_v7  ;;  %v397_v14 = vpop.xlane.xlu1 %396  ;;  %766 = vpow2.f32 %v477_v11  ;;  %v652_v41 = vsel %vm444_vm15, %v1150_v3, %v604_v16  ;;  %v526_v18 = vmul.f32 0.6931472, %v761_v15 }
 0x137   :  { %768 = vlog2.f32 %v533_v12  ;;  %669 = vst.msk [vmem:[%s1297_s9 + $0x58] sm:$0xff] %vm657_vm1, %v652_v41  ;;  %v1214_v3 = vadd.f32 %v1121_v36, %v397_v14  ;;  %v537_v31 = vadd.f32 1.0, %v536_v17  ;;  %v610_v39 = vmul.f32 %v755_v62, %v609_v20 }
 0x138   :  { %v463_v21 = vmin.f32 %v1203_v51, 20.0  ;;  %v532_v24 = vsel %vm531_vm2, %v529_v19, %v526_v18  ;;  %vm612_vm5 = vcmp.lt.f32.partialorder %v611_v28, 0.0004427343  ;;  %vm1224_vm6 = vcmp.lt.f32.partialorder %v539_v29, 0.0004427343 }
 0x139   :  { %v644_v30 = vsel %vm436_vm0, %v1165_v13, %v532_v24  ;;  %v456_v13 = vmin.f32 %v1214_v3, 20.0  ;;  %v538_v49 = vmul.f32 %v759_v8, %v537_v31  ;;  %vm447_vm12 = vcmp.gt.f32.partialorder %v1203_v51, 20.0 }
 0x13a   :  { %v763_v23 = vpop.eup %762  ;;  %661 = vst.msk [vmem:[%s1297_s9 + $0x18] sm:$0xff] %vm657_vm1, %v644_v30  ;;  %v493_v35 = vmul.f32 1.442695, %v463_v21  ;;  %vm440_vm14 = vcmp.gt.f32.partialorder %v1214_v3, 20.0 }
 0x13b   :  { %v542_v32 = vadd.f32 1.0, %v763_v23  ;;  %v765_v33 = vpop.eup %764  ;;  %v545_v34 = vmul.f32 -0.5, %v763_v23  ;;  %v548_v52 = vand.u32 2147483647, %v763_v23  ;;  %v479_v54 = vmul.f32 1.442695, %v456_v13 }
 0x13c   :  { %v767_v37 = vpop.eup %766  ;;  %v607_v38 = vmul.f32 0.6931472, %v765_v33  ;;  %v413_v44 = vpop.xlane.xlu0 %412 }
 0x13d   :  { %770 = vlog2.f32 %v542_v32  ;;  %v769_v26 = vpop.eup %768  ;;  %v551_v42 = vadd.f32 1.0, %v767_v37  ;;  %v554_v43 = vmul.f32 -0.5, %v767_v37  ;;  %v546_v27 = vadd.f32 1.0, %v545_v34 }
 0x13e   :  { %v409_v45 = vpop.xlane.xlu1 %408  ;;  %v613_v46 = vsel %vm612_vm5, %v610_v39, %v607_v38  ;;  %v535_v47 = vmul.f32 0.6931472, %v769_v26  ;;  %772 = vpow2.f32 %v493_v35  ;;  %v1238_v55 = vadd.f32 %v1121_v36, %v413_v44 }
 0x13f   :  { %v653_v50 = vsel %vm445_vm3, %v1169_v22, %v613_v46  ;;  %774 = vlog2.f32 %v551_v42  ;;  %v1241_v56 = vadd.f32 %v1121_v36, %v409_v45  ;;  %v555_v57 = vadd.f32 1.0, %v554_v43 }
 0x140   :  { %670 = vst.msk [vmem:[%s1297_s9 + $0x60] sm:$0xff] %vm657_vm1, %v653_v50  ;;  %v541_v53 = vsel %vm1224_vm6, %v538_v49, %v535_v47  ;;  %776 = vpow2.f32 %v479_v54  ;;  %v464_v60 = vmin.f32 %v1238_v55, 20.0  ;;  %v547_v62 = vmul.f32 %v763_v23, %v546_v27 }
 0x141   :  { %v645_v22 = vsel %vm437_vm4, %v1172_v25, %v541_v53  ;;  %v557_v63 = vand.u32 2147483647, %v767_v37  ;;  %v462_v36 = vmin.f32 %v1241_v56, 20.0  ;;  %vm549_vm8 = vcmp.lt.f32.partialorder %v548_v52, 0.0004427343 }
 0x142   :  { %662 = vst.msk [vmem:[%s1297_s9 + $0x20] sm:$0xff] %vm657_vm1, %v645_v22  ;;  %v495_v25 = vmul.f32 1.442695, %v464_v60  ;;  %v556_v4 = vmul.f32 %v767_v37, %v555_v57  ;;  %vm448_vm0 = vcmp.gt.f32.partialorder %v1238_v55, 20.0  ;;  %vm446_vm3 = vcmp.gt.f32.partialorder %v1241_v56, 20.0 }
 0x143   :  { %v771_v59 = vpop.eup %770  ;;  %v491_v9 = vmul.f32 1.442695, %v462_v36  ;;  %vm558_vm9 = vcmp.lt.f32.partialorder %v557_v63, 0.0004427343 }
 0x144   :  { %v544_v61 = vmul.f32 0.6931472, %v771_v59  ;;  %v773_v0 = vpop.eup %772  ;;  %778 = vpow2.f32 %v495_v25 }
 0x145   :  { %v775_v1 = vpop.eup %774  ;;  %v623_v5 = vadd.f32 1.0, %v773_v0  ;;  %v626_v6 = vmul.f32 -0.5, %v773_v0  ;;  %v629_v16 = vand.u32 2147483647, %v773_v0 }
 0x146   :  { %v550_v2 = vsel %vm549_vm8, %v547_v62, %v544_v61  ;;  %v553_v8 = vmul.f32 0.6931472, %v775_v1  ;;  %v777_v10 = vpop.eup %776 }
 0x147   :  { %v646_v7 = vsel %vm438_vm7, %v1189_v48, %v550_v2  ;;  %780 = vlog2.f32 %v623_v5  ;;  %v560_v14 = vadd.f32 1.0, %v777_v10  ;;  %v627_v48 = vadd.f32 1.0, %v626_v6 }
 0x148   :  { %663 = vst.msk [vmem:[%s1297_s9 + $0x28] sm:$0xff] %vm657_vm1, %v646_v7  ;;  %v559_v11 = vsel %vm558_vm9, %v556_v4, %v553_v8  ;;  %782 = vpow2.f32 %v491_v9  ;;  %v563_v15 = vmul.f32 -0.5, %v777_v10  ;;  %vm630_vm11 = vcmp.lt.f32.partialorder %v629_v16, 0.0004427343 }
 0x149   :  { %v647_v12 = vsel %vm439_vm10, %v1193_v58, %v559_v11  ;;  %784 = vlog2.f32 %v560_v14  ;;  %v628_v21 = vmul.f32 %v773_v0, %v627_v48  ;;  %v566_v58 = vand.u32 2147483647, %v777_v10 }
 0x14a   :  { %664 = vst.msk [vmem:[%s1297_s9 + $0x30] sm:$0xff] %vm657_vm1, %v647_v12  ;;  %v779_v17 = vpop.eup %778  ;;  %v564_v23 = vadd.f32 1.0, %v563_v15 }
 0x14b   :  { %v632_v18 = vadd.f32 1.0, %v779_v17  ;;  %v635_v24 = vmul.f32 -0.5, %v779_v17  ;;  %vm567_vm13 = vcmp.lt.f32.partialorder %v566_v58, 0.0004427343  ;;  %v638_v37 = vand.u32 2147483647, %v779_v17 }
 0x14c   :  { %v565_v34 = vmul.f32 %v777_v10, %v564_v23 }
 0x14d   :  { %v781_v41 = vpop.eup %780  ;;  %786 = vlog2.f32 %v632_v18  ;;  %v636_v35 = vadd.f32 1.0, %v635_v24  ;;  %vm639_vm15 = vcmp.lt.f32.partialorder %v638_v37, 0.0004427343 }
 0x14e   :  { %v783_v19 = vpop.eup %782  ;;  %v625_v20 = vmul.f32 0.6931472, %v781_v41 }
 0x14f   :  { %v614_v28 = vadd.f32 1.0, %v783_v19  ;;  %v617_v30 = vmul.f32 -0.5, %v783_v19  ;;  %v785_v31 = vpop.eup %784  ;;  %v620_v40 = vand.u32 2147483647, %v783_v19  ;;  %v637_v42 = vmul.f32 %v779_v17, %v636_v35 }
 0x150   :  { %v631_v29 = vsel %vm630_vm11, %v628_v21, %v625_v20  ;;  %v562_v33 = vmul.f32 0.6931472, %v785_v31 }
 0x151   :  { %v655_v32 = vsel %vm447_vm12, %v1203_v51, %v631_v29  ;;  %788 = vlog2.f32 %v614_v28  ;;  %v618_v39 = vadd.f32 1.0, %v617_v30  ;;  %vm621_vm2 = vcmp.lt.f32.partialorder %v620_v40, 0.0004427343 }
 0x152   :  { %672 = vst.msk [vmem:[%s1297_s9 + $0x70] sm:$0xff] %vm657_vm1, %v655_v32  ;;  %v568_v38 = vsel %vm567_vm13, %v565_v34, %v562_v33 }
 0x153   :  { %v787_v13 = vpop.eup %786  ;;  %v648_v26 = vsel %vm440_vm14, %v1214_v3, %v568_v38  ;;  %v619_v46 = vmul.f32 %v783_v19, %v618_v39 }
 0x154   :  { %665 = vst.msk [vmem:[%s1297_s9 + $0x38] sm:$0xff] %vm657_vm1, %v648_v26  ;;  %v634_v51 = vmul.f32 0.6931472, %v787_v13 }
 0x156   :  { %v640_v44 = vsel %vm639_vm15, %v637_v42, %v634_v51 }
 0x157   :  { %v789_v43 = vpop.eup %788  ;;  %v656_v47 = vsel %vm448_vm0, %v1238_v55, %v640_v44 }
 0x158   :  { %v616_v45 = vmul.f32 0.6931472, %v789_v43  ;;  %673 = vst.msk [vmem:[%s1297_s9 + $0x78] sm:$0xff] %vm657_vm1, %v656_v47 }
 0x15a   :  { %v622_v3 = vsel %vm621_vm2, %v619_v46, %v616_v45 }
 0x15b   :  { %v654_v49 = vsel %vm446_vm3, %v1241_v56, %v622_v3 }
 0x15c   :  { %671 = vst.msk [vmem:[%s1297_s9 + $0x68] sm:$0xff] %vm657_vm1, %v654_v49 }

// kernel: infonce_forward.3
= control target key start
LH: loop header
LB: loop body
LE: loop exit
PB: predicated region body
PF: predicated region fallthrough
CT: control target
= control target key end

     0   :  { %vm7381_vm0 = vcmask 7168   ;;  %v4235_v1 = vmov -1e+30   ;;  %v4236_v19 = vmov 0.0   ;;  %s7374_s0 = inlined_call_operand.vmem [shape: f32[128,128], index: 0, kind: input, shape index: {}]   ;;  %s7375_s1 = inlined_call_operand.vmem [shape: f32[128,128], index: 1, kind: input, shape index: {}]   ;;  %s7376_s3 = inlined_call_operand.<no memory space> [shape: f32[1,1], index: 3, kind: input, shape index: {}]   ;;  %s7377_s4 = inlined_call_operand.vmem [shape: f32[128,1], index: 4, kind: output, shape index: {}]   ;;  %s7378_s2 = inlined_call_operand.vmem [shape: f32[1,128], index: 2, kind: input, shape index: {}]  }
   0x1   :  { %v9_v0 = vstv %s7376_s3  ;;  %24 = vst.msk [vmem:[#allocation3] sm:$0xff] %vm7381_vm0, %v4235_v1  ;;  %v4270_v2 = vld [vmem:[%s7374_s0] sm:$0xff]  ;;  %v4275_v3 = vld [vmem:[%s7374_s0 + $0x8] sm:$0xff]  ;;  %v4280_v4 = vld [vmem:[%s7374_s0 + $0x10] sm:$0xff] }
   0x2   :  { %7423 = vst [vmem:[#allocation6_spill] sm:$0xff] %v4270_v2  ;;  %v4285_v5 = vld [vmem:[%s7374_s0 + $0x18] sm:$0xff]  ;;  %v4290_v6 = vld [vmem:[%s7374_s0 + $0x20] sm:$0xff]  ;;  %v4295_v7 = vld [vmem:[%s7374_s0 + $0x28] sm:$0xff] }
   0x3   :  { %7424 = vst [vmem:[#allocation7_spill] sm:$0xff] %v4275_v3  ;;  %v4301_v8 = vld [vmem:[%s7374_s0 + $0x30] sm:$0xff]  ;;  %v4306_v9 = vld [vmem:[%s7374_s0 + $0x38] sm:$0xff]  ;;  %v4311_v10 = vld [vmem:[%s7374_s0 + $0x40] sm:$0xff] }
   0x4   :  { %7425 = vst [vmem:[#allocation8_spill] sm:$0xff] %v4280_v4  ;;  %v4317_v11 = vld [vmem:[%s7374_s0 + $0x48] sm:$0xff]  ;;  %v4322_v12 = vld [vmem:[%s7374_s0 + $0x50] sm:$0xff]  ;;  %v4327_v13 = vld [vmem:[%s7374_s0 + $0x58] sm:$0xff] }
   0x5   :  { %10 = vst [vmem:[#allocation5] sm:$0x1] %v9_v0  ;;  %v4333_v14 = vld [vmem:[%s7374_s0 + $0x60] sm:$0xff]  ;;  %v4338_v15 = vld [vmem:[%s7374_s0 + $0x68] sm:$0xff]  ;;  %v4343_v16 = vld [vmem:[%s7374_s0 + $0x70] sm:$0xff] }
   0x6   :  { %7426 = vst [vmem:[#allocation9_spill] sm:$0xff] %v4285_v5  ;;  %v4349_v17 = vld [vmem:[%s7374_s0 + $0x78] sm:$0xff]  ;;  %v4354_v18 = vld [vmem:[%s7378_s2] sm:$0x1]  ;;  %s4385_s2 = smov 0  }
   0x7   :  { %7427 = vst [vmem:[#allocation10_spill] sm:$0xff] %v4290_v6 }
   0x8   :  { %7428 = vst [vmem:[#allocation11_spill] sm:$0xff] %v4295_v7 }
   0x9   :  { %25 = vst.msk [vmem:[#allocation3 + $0x8] sm:$0xff] %vm7381_vm0, %v4235_v1 }
   0xa   :  { %7429 = vst [vmem:[#allocation12_spill] sm:$0xff] %v4301_v8 }
   0xb   :  { %7430 = vst [vmem:[#allocation13_spill] sm:$0xff] %v4306_v9 }
   0xc   :  { %26 = vst.msk [vmem:[#allocation3 + $0x10] sm:$0xff] %vm7381_vm0, %v4235_v1  ;;  %v73_v20 = vld [vmem:[#allocation5] sm:$0x1] }
   0xd   :  { %7431 = vst [vmem:[#allocation14_spill] sm:$0xff] %v4322_v12 }
   0xe   :  { %7432 = vst [vmem:[#allocation15_spill] sm:$0xff] %v4327_v13 }
   0xf   :  { %27 = vst.msk [vmem:[#allocation3 + $0x18] sm:$0xff] %vm7381_vm0, %v4235_v1 }
  0x10   :  { %7433 = vst [vmem:[#allocation16_spill] sm:$0xff] %v4333_v14 }
  0x11   :  { %7434 = vst [vmem:[#allocation17_spill] sm:$0xff] %v4338_v15 }
  0x12   :  { %7435 = vst [vmem:[#allocation18_spill] sm:$0xff] %v4343_v16 }
  0x13   :  { %28 = vst.msk [vmem:[#allocation3 + $0x20] sm:$0xff] %vm7381_vm0, %v4235_v1 }
  0x14   :  { %7436 = vst [vmem:[#allocation19_spill] sm:$0xff] %v4349_v17 }
  0x15   :  { %7437 = vst [vmem:[#allocation20_spill] sm:$0xff] %v4354_v18 }
  0x16   :  { %29 = vst.msk [vmem:[#allocation3 + $0x28] sm:$0xff] %vm7381_vm0, %v4235_v1 }
  0x17   :  { %30 = vst.msk [vmem:[#allocation3 + $0x30] sm:$0xff] %vm7381_vm0, %v4235_v1 }
  0x18   :  { %31 = vst.msk [vmem:[#allocation3 + $0x38] sm:$0xff] %vm7381_vm0, %v4235_v1 }
  0x19   :  { %32 = vst.msk [vmem:[#allocation3 + $0x40] sm:$0xff] %vm7381_vm0, %v4235_v1 }
  0x1a   :  { %33 = vst.msk [vmem:[#allocation3 + $0x48] sm:$0xff] %vm7381_vm0, %v4235_v1 }
  0x1b   :  { %34 = vst.msk [vmem:[#allocation3 + $0x50] sm:$0xff] %vm7381_vm0, %v4235_v1 }
  0x1c   :  { %35 = vst.msk [vmem:[#allocation3 + $0x58] sm:$0xff] %vm7381_vm0, %v4235_v1 }
  0x1d   :  { %36 = vst.msk [vmem:[#allocation3 + $0x60] sm:$0xff] %vm7381_vm0, %v4235_v1 }
  0x1e   :  { %37 = vst.msk [vmem:[#allocation3 + $0x68] sm:$0xff] %vm7381_vm0, %v4235_v1 }
  0x1f   :  { %38 = vst.msk [vmem:[#allocation3 + $0x70] sm:$0xff] %vm7381_vm0, %v4235_v1 }
  0x20   :  { %39 = vst.msk [vmem:[#allocation3 + $0x78] sm:$0xff] %vm7381_vm0, %v4235_v1 }
  0x21   :  { %40 = vst.msk [vmem:[#allocation4] sm:$0xff] %vm7381_vm0, %v4236_v19 }
  0x22   :  { %41 = vst.msk [vmem:[#allocation4 + $0x8] sm:$0xff] %vm7381_vm0, %v4236_v19 }
  0x23   :  { %42 = vst.msk [vmem:[#allocation4 + $0x10] sm:$0xff] %vm7381_vm0, %v4236_v19 }
  0x24   :  { %43 = vst.msk [vmem:[#allocation4 + $0x18] sm:$0xff] %vm7381_vm0, %v4236_v19 }
  0x25   :  { %44 = vst.msk [vmem:[#allocation4 + $0x20] sm:$0xff] %vm7381_vm0, %v4236_v19 }
  0x26   :  { %45 = vst.msk [vmem:[#allocation4 + $0x28] sm:$0xff] %vm7381_vm0, %v4236_v19 }
  0x27   :  { %46 = vst.msk [vmem:[#allocation4 + $0x30] sm:$0xff] %vm7381_vm0, %v4236_v19 }
  0x28   :  { %47 = vst.msk [vmem:[#allocation4 + $0x38] sm:$0xff] %vm7381_vm0, %v4236_v19 }
  0x29   :  { %48 = vst.msk [vmem:[#allocation4 + $0x40] sm:$0xff] %vm7381_vm0, %v4236_v19 }
  0x2a   :  { %49 = vst.msk [vmem:[#allocation4 + $0x48] sm:$0xff] %vm7381_vm0, %v4236_v19 }
  0x2b   :  { %50 = vst.msk [vmem:[#allocation4 + $0x50] sm:$0xff] %vm7381_vm0, %v4236_v19 }
  0x2c   :  { %51 = vst.msk [vmem:[#allocation4 + $0x58] sm:$0xff] %vm7381_vm0, %v4236_v19 }
  0x2d   :  { %52 = vst.msk [vmem:[#allocation4 + $0x60] sm:$0xff] %vm7381_vm0, %v4236_v19 }
  0x2e   :  { %53 = vst.msk [vmem:[#allocation4 + $0x68] sm:$0xff] %vm7381_vm0, %v4236_v19 }
  0x2f   :  { %54 = vst.msk [vmem:[#allocation4 + $0x70] sm:$0xff] %vm7381_vm0, %v4236_v19 }
  0x30   :  { %55 = vst.msk [vmem:[#allocation4 + $0x78] sm:$0xff] %vm7381_vm0, %v4236_v19 }
  0x31   :  { %3601 = vpush %v73_v20 }
  0x62   :  { %s4383_s0 = spop %3601 }
  0x63 LB: > { %v7438_v9 = vld [vmem:[#allocation13_spill] sm:$0xff]  ;;  %v7439_v8 = vld [vmem:[#allocation12_spill] sm:$0xff]  ;;  %v7440_v7 = vld [vmem:[#allocation11_spill] sm:$0xff]  ;;  %s3600_s23 = sshll.u32 %s4233_s2, 3  ;;  %vm2805_vm9 = vcmask 130112   ;;  %vm2809_vm12 = vcmask 195712   ;;  %s4233_s2 = sphi %s4385_s2, %s80_s2  }
  0x64   : > { %v7441_v4 = vld [vmem:[#allocation8_spill] sm:$0xff]  ;;  %v7442_v2 = vld [vmem:[#allocation6_spill] sm:$0xff]  ;;  %v7443_v13 = vld [vmem:[#allocation15_spill] sm:$0xff]  ;;  %s4396_s26 = scalar_lea.vmem %s7375_s1, %s3600_s23  ;;  %vm2813_vm13 = vcmask 261312   ;;  %vm2817_vm14 = vcmask 326912   ;;  %vm7385_vm0 = vcmask 851712  }
  0x65   : > { %v7444_v14 = vld [vmem:[#allocation16_spill] sm:$0xff]  ;;  %v7445_v15 = vld [vmem:[#allocation17_spill] sm:$0xff]  ;;  %v7446_v16 = vld [vmem:[#allocation18_spill] sm:$0xff]  ;;  %s3095_s27 = scalar_lea.vmem [#allocation2], %s3600_s23  ;;  %s80_s2 = sadd.s32 1, %s4233_s2  }
  0x66   : > { %v7447_v3 = vld [vmem:[#allocation7_spill] sm:$0xff]  ;;  %v7448_v5 = vld [vmem:[#allocation9_spill] sm:$0xff]  ;;  %v7449_v12 = vld [vmem:[#allocation14_spill] sm:$0xff]  ;;  %p77_p0 = scmp.ge.s32.totalorder %s80_s2, 16  }
  0x67   : > { %v7450_v6 = vld [vmem:[#allocation10_spill] sm:$0xff]  ;;  %v7451_v17 = vld [vmem:[#allocation19_spill] sm:$0xff]  ;;  %v7452_v18 = vld [vmem:[#allocation20_spill] sm:$0xff] }
  0x68   : > { %v4399_v21 = vld [vmem:[%s4396_s26] sm:$0xff]  ;;  %v4407_v24 = vperm.slane %v7452_v18, 0 }
  0x69   : > { %v4402_v22 = vperm.slane %v4399_v21, 0  ;;  %v85_v57 = vrot.slane %v4399_v21, 1 }
  0x6b   : > { %v112_v23 = vadd.f32 %v4402_v22, %v7450_v6  ;;  %v110_v25 = vadd.f32 %v4402_v22, %v7441_v4  ;;  %v108_v26 = vadd.f32 %v4402_v22, %v7442_v2  ;;  %v113_v27 = vadd.f32 %v4402_v22, %v7440_v7 }
  0x6c   : > { %v111_v31 = vadd.f32 %v4402_v22, %v7448_v5  ;;  %v109_v32 = vadd.f32 %v4402_v22, %v7447_v3  ;;  %v116_v41 = vadd.f32 %v4402_v22, %v4311_v10  ;;  %v115_v42 = vadd.f32 %v4402_v22, %v7438_v9 }
  0x6d   : > { %v240_v28 = vmax.f32 %v112_v23, 0.0  ;;  %v238_v29 = vmax.f32 %v110_v25, 0.0  ;;  %v236_v30 = vmax.f32 %v108_v26, 0.0  ;;  %v241_v36 = vmax.f32 %v113_v27, 0.0 }
  0x6e   : > { %v239_v37 = vmax.f32 %v111_v31, 0.0  ;;  %v237_v38 = vmax.f32 %v109_v32, 0.0  ;;  %v114_v44 = vadd.f32 %v4402_v22, %v7439_v8  ;;  %v244_v45 = vmax.f32 %v116_v41, 0.0 }
  0x6f   : > { %v371_v33 = vmul.f32 %v4407_v24, %v240_v28  ;;  %v369_v34 = vmul.f32 %v4407_v24, %v238_v29  ;;  %v367_v35 = vmul.f32 %v4407_v24, %v236_v30  ;;  %v372_v39 = vmul.f32 %v4407_v24, %v241_v36 }
  0x70   : > { %v370_v40 = vmul.f32 %v4407_v24, %v239_v37  ;;  %v368_v43 = vmul.f32 %v4407_v24, %v237_v38  ;;  %v243_v46 = vmax.f32 %v115_v42, 0.0  ;;  %v242_v47 = vmax.f32 %v114_v44, 0.0 }
  0x71   : > { %503 = vadd.xlane.f32.xlu2 %v371_v33  ;;  %499 = vadd.xlane.f32.xlu1 %v369_v34  ;;  %v375_v48 = vmul.f32 %v4407_v24, %v244_v45  ;;  %v119_v50 = vadd.f32 %v4402_v22, %v7443_v13  ;;  %v118_v51 = vadd.f32 %v4402_v22, %v7449_v12  ;;  %v4450_v19 = vperm.slane %v85_v57, 0 }
  0x72   : > { %495 = vadd.xlane.f32.xlu0 %v367_v35  ;;  %v374_v49 = vmul.f32 %v4407_v24, %v243_v46  ;;  %v373_v52 = vmul.f32 %v4407_v24, %v242_v47  ;;  %v117_v53 = vadd.f32 %v4402_v22, %v4317_v11  ;;  %v122_v60 = vadd.f32 %v4402_v22, %v7446_v16 }
  0x73   : > { %v247_v54 = vmax.f32 %v119_v50, 0.0  ;;  %v246_v55 = vmax.f32 %v118_v51, 0.0  ;;  %v121_v61 = vadd.f32 %v4402_v22, %v7445_v15  ;;  %v120_v63 = vadd.f32 %v4402_v22, %v7444_v14 }
  0x74   : > { %v245_v56 = vmax.f32 %v117_v53, 0.0  ;;  %v250_v0 = vmax.f32 %v122_v60, 0.0  ;;  %v125_v26 = vadd.f32 %v4450_v19, %v7447_v3  ;;  %v124_v27 = vadd.f32 %v4450_v19, %v7442_v2 }
  0x75   : > { %v378_v58 = vmul.f32 %v4407_v24, %v247_v54  ;;  %v377_v59 = vmul.f32 %v4407_v24, %v246_v55  ;;  %v249_v1 = vmax.f32 %v121_v61, 0.0  ;;  %v248_v20 = vmax.f32 %v120_v63, 0.0 }
  0x76   : > { %v376_v62 = vmul.f32 %v4407_v24, %v245_v56  ;;  %v381_v23 = vmul.f32 %v4407_v24, %v250_v0  ;;  %v123_v29 = vadd.f32 %v4402_v22, %v7451_v17  ;;  %v253_v30 = vmax.f32 %v125_v26, 0.0 }
  0x77   : > { %v380_v25 = vmul.f32 %v4407_v24, %v249_v1  ;;  %v379_v28 = vmul.f32 %v4407_v24, %v248_v20  ;;  %v252_v31 = vmax.f32 %v124_v27, 0.0  ;;  %v128_v35 = vadd.f32 %v4450_v19, %v7450_v6 }
  0x78   : > { %v251_v32 = vmax.f32 %v123_v29, 0.0  ;;  %v384_v33 = vmul.f32 %v4407_v24, %v253_v30  ;;  %v127_v36 = vadd.f32 %v4450_v19, %v7448_v5  ;;  %v126_v22 = vadd.f32 %v4450_v19, %v7441_v4 }
  0x79   : > { %505 = vadd.xlane.f32.xlu2 %v372_v39  ;;  %501 = vadd.xlane.f32.xlu1 %v370_v40  ;;  %v383_v34 = vmul.f32 %v4407_v24, %v252_v31  ;;  %v256_v38 = vmax.f32 %v128_v35, 0.0  ;;  %v130_v44 = vadd.f32 %v4450_v19, %v7439_v8  ;;  %v129_v46 = vadd.f32 %v4450_v19, %v7440_v7 }
  0x7a   : > { %497 = vadd.xlane.f32.xlu0 %v368_v43  ;;  %v382_v37 = vmul.f32 %v4407_v24, %v251_v32  ;;  %v255_v39 = vmax.f32 %v127_v36, 0.0  ;;  %v254_v40 = vmax.f32 %v126_v22, 0.0  ;;  %v131_v43 = vadd.f32 %v4450_v19, %v7438_v9 }
  0x7b   : > { %v387_v41 = vmul.f32 %v4407_v24, %v256_v38  ;;  %v134_v50 = vadd.f32 %v4450_v19, %v7449_v12  ;;  %v133_v53 = vadd.f32 %v4450_v19, %v4317_v11  ;;  %v132_v55 = vadd.f32 %v4450_v19, %v4311_v10 }
  0x7c   : > { %v386_v42 = vmul.f32 %v4407_v24, %v255_v39  ;;  %v385_v45 = vmul.f32 %v4407_v24, %v254_v40  ;;  %v259_v47 = vmax.f32 %v131_v43, 0.0  ;;  %v137_v61 = vadd.f32 %v4450_v19, %v7445_v15 }
  0x7d   : > { %v262_v56 = vmax.f32 %v134_v50, 0.0  ;;  %v261_v57 = vmax.f32 %v133_v53, 0.0  ;;  %v86_v63 = vrot.slane %v4399_v21, 2  ;;  %v135_v1 = vadd.f32 %v4450_v19, %v7443_v13 }
  0x7e   : > { %v390_v51 = vmul.f32 %v4407_v24, %v259_v47  ;;  %v265_v20 = vmax.f32 %v137_v61, 0.0  ;;  %v139_v30 = vadd.f32 %v4450_v19, %v7451_v17  ;;  %v138_v32 = vadd.f32 %v4450_v19, %v7446_v16 }
  0x7f   : > { %v392_v60 = vmul.f32 %v4407_v24, %v261_v57  ;;  %v263_v26 = vmax.f32 %v135_v1, 0.0 }
  0x80   : > { %v396_v27 = vmul.f32 %v4407_v24, %v265_v20  ;;  %v266_v35 = vmax.f32 %v138_v32, 0.0 }
  0x81   : > { %511 = vadd.xlane.f32.xlu2 %v375_v48  ;;  %509 = vadd.xlane.f32.xlu1 %v374_v49  ;;  %v258_v48 = vmax.f32 %v130_v44, 0.0  ;;  %v257_v49 = vmax.f32 %v129_v46, 0.0  ;;  %v394_v31 = vmul.f32 %v4407_v24, %v263_v26 }
  0x82   : > { %507 = vadd.xlane.f32.xlu0 %v373_v52  ;;  %v397_v39 = vmul.f32 %v4407_v24, %v266_v35 }
  0x83   : > { %v389_v52 = vmul.f32 %v4407_v24, %v258_v48  ;;  %v388_v54 = vmul.f32 %v4407_v24, %v257_v49 }
  0x89   : > { %517 = vadd.xlane.f32.xlu2 %v378_v58  ;;  %515 = vadd.xlane.f32.xlu1 %v377_v59  ;;  %v260_v58 = vmax.f32 %v132_v55, 0.0  ;;  %v393_v59 = vmul.f32 %v4407_v24, %v262_v56 }
  0x8a   : > { %513 = vadd.xlane.f32.xlu0 %v376_v62  ;;  %v136_v62 = vadd.f32 %v4450_v19, %v7444_v14 }
  0x8b   : > { %v391_v0 = vmul.f32 %v4407_v24, %v260_v58 }
  0x91   : > { %523 = vadd.xlane.f32.xlu2 %v381_v23  ;;  %521 = vadd.xlane.f32.xlu1 %v380_v25  ;;  %v264_v23 = vmax.f32 %v136_v62, 0.0  ;;  %v4498_v25 = vperm.slane %v86_v63, 0 }
  0x92   : > { %519 = vadd.xlane.f32.xlu0 %v379_v28 }
  0x93   : > { %v395_v28 = vmul.f32 %v4407_v24, %v264_v23  ;;  %v140_v29 = vadd.f32 %v4498_v25, %v7442_v2  ;;  %v143_v22 = vadd.f32 %v4498_v25, %v7448_v5  ;;  %v142_v38 = vadd.f32 %v4498_v25, %v7441_v4 }
  0x94   : > { %v141_v19 = vadd.f32 %v4498_v25, %v7447_v3  ;;  %v145_v46 = vadd.f32 %v4498_v25, %v7440_v7  ;;  %v144_v48 = vadd.f32 %v4498_v25, %v7450_v6  ;;  %v148_v55 = vadd.f32 %v4498_v25, %v4311_v10 }
  0x95   : > { %v271_v40 = vmax.f32 %v143_v22, 0.0  ;;  %v147_v57 = vadd.f32 %v4498_v25, %v7438_v9  ;;  %v152_v63 = vadd.f32 %v4498_v25, %v7444_v14  ;;  %v150_v20 = vadd.f32 %v4498_v25, %v7449_v12 }
  0x96   : > { %v273_v50 = vmax.f32 %v145_v46, 0.0  ;;  %v154_v32 = vadd.f32 %v4498_v25, %v7446_v16 }
  0x97   : > { %v402_v43 = vmul.f32 %v4407_v24, %v271_v40  ;;  %v280_v23 = vmax.f32 %v152_v63, 0.0 }
  0x98   : > { %v404_v53 = vmul.f32 %v4407_v24, %v273_v50 }
  0x99   : > { %529 = vadd.xlane.f32.xlu2 %v384_v33  ;;  %527 = vadd.xlane.f32.xlu1 %v383_v34  ;;  %v268_v33 = vmax.f32 %v140_v29, 0.0  ;;  %v267_v34 = vmax.f32 %v139_v30, 0.0  ;;  %v411_v29 = vmul.f32 %v4407_v24, %v280_v23 }
  0x9a   : > { %525 = vadd.xlane.f32.xlu0 %v382_v37 }
  0x9b   : > { %v399_v36 = vmul.f32 %v4407_v24, %v268_v33  ;;  %v398_v37 = vmul.f32 %v4407_v24, %v267_v34  ;;  %v153_v34 = vadd.f32 %v4498_v25, %v7445_v15 }
  0x9d   : > { %v281_v22 = vmax.f32 %v153_v34, 0.0 }
  0x9f   : > { %v412_v46 = vmul.f32 %v4407_v24, %v281_v22 }
  0xa1   : > { %535 = vadd.xlane.f32.xlu2 %v387_v41  ;;  %533 = vadd.xlane.f32.xlu1 %v386_v42  ;;  %v270_v41 = vmax.f32 %v142_v38, 0.0  ;;  %v269_v42 = vmax.f32 %v141_v19, 0.0 }
  0xa2   : > { %531 = vadd.xlane.f32.xlu0 %v385_v45  ;;  %v146_v45 = vadd.f32 %v4498_v25, %v7439_v8 }
  0xa3   : > { %v401_v44 = vmul.f32 %v4407_v24, %v270_v41  ;;  %v400_v47 = vmul.f32 %v4407_v24, %v269_v42 }
  0xa4   : > { %v274_v49 = vmax.f32 %v146_v45, 0.0 }
  0xa9   : > { %541 = vadd.xlane.f32.xlu2 %v390_v51  ;;  %539 = vadd.xlane.f32.xlu1 %v389_v52  ;;  %v272_v51 = vmax.f32 %v144_v48, 0.0  ;;  %v405_v52 = vmul.f32 %v4407_v24, %v274_v49 }
  0xaa   : > { %537 = vadd.xlane.f32.xlu0 %v388_v54  ;;  %v149_v54 = vadd.f32 %v4498_v25, %v4317_v11 }
  0xab   : > { %v403_v56 = vmul.f32 %v4407_v24, %v272_v51 }
  0xac   : > { %v277_v58 = vmax.f32 %v149_v54, 0.0 }
  0xae   : > { %v408_v61 = vmul.f32 %v4407_v24, %v277_v58 }
  0xb1   : > { %547 = vadd.xlane.f32.xlu2 %v393_v59  ;;  %545 = vadd.xlane.f32.xlu1 %v392_v60  ;;  %v276_v59 = vmax.f32 %v148_v55, 0.0  ;;  %v275_v60 = vmax.f32 %v147_v57, 0.0 }
  0xb2   : > { %543 = vadd.xlane.f32.xlu0 %v391_v0  ;;  %v151_v0 = vadd.f32 %v4498_v25, %v7443_v13 }
  0xb3   : > { %v407_v62 = vmul.f32 %v4407_v24, %v276_v59  ;;  %v406_v1 = vmul.f32 %v4407_v24, %v275_v60 }
  0xb4   : > { %v279_v26 = vmax.f32 %v151_v0, 0.0 }
  0xb6   : > { %v410_v30 = vmul.f32 %v4407_v24, %v279_v26 }
  0xb9   : > { %553 = vadd.xlane.f32.xlu2 %v396_v27  ;;  %551 = vadd.xlane.f32.xlu1 %v395_v28  ;;  %v278_v27 = vmax.f32 %v150_v20, 0.0  ;;  %v87_v28 = vrot.slane %v4399_v21, 3 }
  0xba   : > { %549 = vadd.xlane.f32.xlu0 %v394_v31  ;;  %v155_v31 = vadd.f32 %v4498_v25, %v7451_v17 }
  0xbb   : > { %v409_v33 = vmul.f32 %v4407_v24, %v278_v27  ;;  %v4555_v35 = vperm.slane %v87_v28, 0 }
  0xbc   : > { %v283_v21 = vmax.f32 %v155_v31, 0.0 }
  0xbd   : > { %v158_v19 = vadd.f32 %v4555_v35, %v7441_v4  ;;  %v157_v40 = vadd.f32 %v4555_v35, %v7447_v3  ;;  %v159_v26 = vadd.f32 %v4555_v35, %v7448_v5 }
  0xbf   : > { %v286_v51 = vmax.f32 %v158_v19, 0.0  ;;  %v287_v22 = vmax.f32 %v159_v26, 0.0 }
  0xc1   : > { %559 = vadd.xlane.f32.xlu2 %v399_v36  ;;  %557 = vadd.xlane.f32.xlu1 %v398_v37  ;;  %v282_v36 = vmax.f32 %v154_v32, 0.0  ;;  %v4558_v37 = vstv %s4383_s0  ;;  %v417_v59 = vmul.f32 %v4407_v24, %v286_v51 }
  0xc2   : > { %555 = vadd.xlane.f32.xlu0 %v397_v39 }
  0xc9   : > { %565 = vadd.xlane.f32.xlu2 %v402_v43  ;;  %563 = vadd.xlane.f32.xlu1 %v401_v44  ;;  %v414_v43 = vmul.f32 %v4407_v24, %v283_v21  ;;  %v413_v44 = vmul.f32 %v4407_v24, %v282_v36  ;;  %v2800_v21 = vlaneseq }
  0xca   : > { %561 = vadd.xlane.f32.xlu0 %v400_v47  ;;  %v156_v47 = vadd.f32 %v4555_v35, %v7442_v2 }
  0xd1   : > { %571 = vadd.xlane.f32.xlu2 %v405_v52  ;;  %569 = vadd.xlane.f32.xlu1 %v404_v53  ;;  %v285_v52 = vmax.f32 %v157_v40, 0.0 }
  0xd2   : > { %567 = vadd.xlane.f32.xlu0 %v403_v56  ;;  %v284_v56 = vmax.f32 %v156_v47, 0.0 }
  0xd3   : > { %v416_v60 = vmul.f32 %v4407_v24, %v285_v52 }
  0xd4   : > { %v415_v23 = vmul.f32 %v4407_v24, %v284_v56 }
  0xd9   : > { %577 = vadd.xlane.f32.xlu2 %v408_v61  ;;  %575 = vadd.xlane.f32.xlu1 %v407_v62  ;;  %v161_v61 = vadd.f32 %v4555_v35, %v7440_v7 }
  0xda   : > { %573 = vadd.xlane.f32.xlu0 %v406_v1  ;;  %v160_v1 = vadd.f32 %v4555_v35, %v7450_v6 }
  0xdb   : > { %v289_v32 = vmax.f32 %v161_v61, 0.0 }
  0xdd   : > { %v420_v47 = vmul.f32 %v4407_v24, %v289_v32 }
  0xe1   : > { %583 = vadd.xlane.f32.xlu2 %v411_v29  ;;  %581 = vadd.xlane.f32.xlu1 %v410_v30 }
  0xe2   : > { %579 = vadd.xlane.f32.xlu0 %v409_v33  ;;  %v288_v33 = vmax.f32 %v160_v1, 0.0 }
  0xe4   : > { %v504_v38 = vpop.xlane.xlu2 %503  ;;  %v500_v39 = vpop.xlane.xlu1 %499 }
  0xe5   : > { %v4565_v25 = vadd.f32 %v4558_v37, %v504_v38  ;;  %v4568_v41 = vadd.f32 %v4558_v37, %v500_v39  ;;  %v496_v42 = vpop.xlane.xlu0 %495 }
  0xe6   : > { %v4573_v45 = vadd.f32 %v4558_v37, %v496_v42 }
  0xe7   : > { %v1012_v48 = vmin.f32 %v4565_v25, 20.0  ;;  %v1010_v49 = vmin.f32 %v4568_v41, 20.0  ;;  %vm884_vm1 = vcmp.gt.f32.partialorder %v4565_v25, 20.0  ;;  %vm882_vm5 = vcmp.gt.f32.partialorder %v4568_v41, 20.0 }
  0xe8   : > { %v1008_v50 = vmin.f32 %v4573_v45, 20.0  ;;  %vm880_vm3 = vcmp.gt.f32.partialorder %v4573_v45, 20.0 }
  0xe9   : > { %v1144_v53 = vmul.f32 1.442695, %v1012_v48  ;;  %v1140_v54 = vmul.f32 1.442695, %v1010_v49  ;;  %589 = vadd.xlane.f32.xlu2 %v414_v43  ;;  %587 = vadd.xlane.f32.xlu1 %v413_v44  ;;  %v419_v48 = vmul.f32 %v4407_v24, %v288_v33  ;;  %v4610_v49 = vand.u32 127, %v2800_v21 }
  0xea   : > { %v1136_v55 = vmul.f32 1.442695, %v1008_v50  ;;  %585 = vadd.xlane.f32.xlu0 %v412_v46  ;;  %v418_v50 = vmul.f32 %v4407_v24, %v287_v22 }
  0xeb   : > { %3614 = vpow2.f32 %v1144_v53  ;;  %7453 = vst [vmem:[#allocation21_spill] sm:$0xff] %v4610_v49 }
  0xec   : > { %3616 = vpow2.f32 %v1140_v54  ;;  %v506_v57 = vpop.xlane.xlu2 %505  ;;  %v502_v58 = vpop.xlane.xlu1 %501 }
  0xed   : > { %3618 = vpow2.f32 %v1136_v55  ;;  %v4586_v62 = vadd.f32 %v4558_v37, %v506_v57  ;;  %v4589_v63 = vadd.f32 %v4558_v37, %v502_v58  ;;  %v498_v0 = vpop.xlane.xlu0 %497  ;;  %v4623_v58 = vadd.s32 4294967264, %v4610_v49 }
  0xee   : > { %v4594_v20 = vadd.f32 %v4558_v37, %v498_v0 }
  0xef   : > { %v1013_v27 = vmin.f32 %v4586_v62, 20.0  ;;  %v1011_v28 = vmin.f32 %v4589_v63, 20.0  ;;  %vm883_vm7 = vcmp.gt.f32.partialorder %v4589_v63, 20.0  ;;  %vm885_vm10 = vcmp.gt.f32.partialorder %v4586_v62, 20.0 }
  0xf0   : > { %v1009_v29 = vmin.f32 %v4594_v20, 20.0  ;;  %vm881_vm8 = vcmp.gt.f32.partialorder %v4594_v20, 20.0 }
  0xf1   : > { %v3615_v30 = vpop.eup %3614  ;;  %v1146_v31 = vmul.f32 1.442695, %v1013_v27  ;;  %595 = vadd.xlane.f32.xlu2 %v417_v59  ;;  %593 = vadd.xlane.f32.xlu1 %v416_v60  ;;  %v1142_v39 = vmul.f32 1.442695, %v1011_v28  ;;  %v4626_v59 = vadd.s32 4294967280, %v4610_v49  ;;  %v4629_v60 = vadd.s32 4294967256, %v4610_v49 }
  0xf2   : > { %v4602_v34 = vpop.eup %3616  ;;  %v1428_v36 = vadd.f32 1.0, %v3615_v30  ;;  %591 = vadd.xlane.f32.xlu0 %v415_v23  ;;  %v1431_v19 = vmul.f32 -0.5, %v3615_v30  ;;  %v1138_v42 = vmul.f32 1.442695, %v1009_v29  ;;  %v1434_v55 = vand.u32 2147483647, %v3615_v30 }
  0xf3   : > { %v4604_v38 = vpop.eup %3618  ;;  %3620 = vpow2.f32 %v1146_v31  ;;  %v1410_v44 = vadd.f32 1.0, %v4602_v34  ;;  %7454 = vst [vmem:[#allocation22_spill] sm:$0xff] %v4626_v59  ;;  %v1413_v0 = vmul.f32 -0.5, %v4602_v34  ;;  %v4637_v31 = vadd.s32 4294967272, %v4610_v49 }
  0xf4   : > { %3622 = vlog2.f32 %v1428_v36  ;;  %v1392_v40 = vadd.f32 1.0, %v4604_v38  ;;  %v512_v43 = vpop.xlane.xlu2 %511  ;;  %v510_v46 = vpop.xlane.xlu1 %509  ;;  %v1432_v52 = vadd.f32 1.0, %v1431_v19  ;;  %v1395_v1 = vmul.f32 -0.5, %v4604_v38 }
  0xf5   : > { %v4614_v51 = vadd.f32 %v4558_v37, %v512_v43  ;;  %v4617_v53 = vadd.f32 %v4558_v37, %v510_v46  ;;  %vm4641_vm2 = vcmp.lt.f32.partialorder %v1434_v55, 0.0004427343  ;;  %v1416_v21 = vand.u32 2147483647, %v4602_v34 }
  0xf6   : > { %3624 = vlog2.f32 %v1392_v40  ;;  %v1433_v29 = vmul.f32 %v3615_v30, %v1432_v52  ;;  %v4647_v36 = vadd.s32 4294967288, %v4610_v49  ;;  %v1396_v43 = vadd.f32 1.0, %v1395_v1 }
  0xf7   : > { %3626 = vpow2.f32 %v1142_v39  ;;  %v1016_v56 = vmin.f32 %v4614_v51, 20.0  ;;  %v1015_v26 = vmin.f32 %v4617_v53, 20.0  ;;  %v4660_v46 = vadd.f32 %v4555_v35, %v4311_v10 }
  0xf8   : > { %3628 = vpow2.f32 %v1138_v42  ;;  %7457 = vst [vmem:[#allocation23_spill] sm:$0xff] %v4647_v36  ;;  %v1414_v42 = vadd.f32 1.0, %v1413_v0  ;;  %vm4666_vm4 = vcmp.lt.f32.partialorder %v1416_v21, 0.0004427343 }
  0xf9   : > { %v4619_v54 = vpop.eup %3620  ;;  %3630 = vlog2.f32 %v1410_v44  ;;  %601 = vadd.xlane.f32.xlu2 %v420_v47  ;;  %599 = vadd.xlane.f32.xlu1 %v419_v48  ;;  %v1152_v23 = vmul.f32 1.442695, %v1016_v56  ;;  %v1150_v19 = vmul.f32 1.442695, %v1015_v26  ;;  %v4656_v44 = vadd.f32 %v4555_v35, %v7439_v8 }
  0xfa   : > { %v3623_v57 = vpop.eup %3622  ;;  %v1437_v61 = vadd.f32 1.0, %v4619_v54  ;;  %597 = vadd.xlane.f32.xlu0 %v418_v50  ;;  %v1440_v30 = vmul.f32 -0.5, %v4619_v54  ;;  %v1398_v48 = vand.u32 2147483647, %v4604_v38  ;;  %v1443_v1 = vand.u32 2147483647, %v4619_v54 }
  0xfb   : > { %v1430_v28 = vmul.f32 0.6931472, %v3623_v57  ;;  %3632 = vpow2.f32 %v1152_v23  ;;  %v1415_v33 = vmul.f32 %v4602_v34, %v1414_v42  ;;  %v4697_v34 = vadd.s32 4294967240, %v4610_v49 }
  0xfc   : > { %v3625_v27 = vpop.eup %3624  ;;  %3634 = vlog2.f32 %v1437_v61  ;;  %v1441_v0 = vadd.f32 1.0, %v1440_v30  ;;  %vm4686_vm6 = vcmp.lt.f32.partialorder %v1398_v48, 0.0004427343  ;;  %v518_v42 = vpop.xlane.xlu2 %517  ;;  %vm4705_vm11 = vcmp.lt.f32.partialorder %v1443_v1, 0.0004427343 }
  0xfd   : > { %v4639_v32 = vpop.eup %3626  ;;  %v1436_v47 = vsel %vm4641_vm2, %v1433_v29, %v1430_v28  ;;  %v1394_v55 = vmul.f32 0.6931472, %v3625_v27  ;;  %v1397_v27 = vmul.f32 %v4604_v38, %v1396_v43  ;;  %v4683_v28 = vadd.s32 4294967232, %v4610_v49  ;;  %7463 = vst [vmem:[#allocation25_spill] sm:$0xff] %v4697_v34 }
  0xfe   : > { %v4649_v22 = vpop.eup %3628  ;;  %v1419_v39 = vadd.f32 1.0, %v4639_v32  ;;  %v1422_v50 = vmul.f32 -0.5, %v4639_v32  ;;  %v4679_v26 = vsel %vm884_vm1, %v4565_v25, %v1436_v47  ;;  %v516_v47 = vpop.xlane.xlu1 %515  ;;  %vm2821_vm1 = vcmask 392512  }
  0xff   : > { %v3631_v40 = vpop.eup %3630  ;;  %v1401_v56 = vadd.f32 1.0, %v4649_v22  ;;  %v1404_v57 = vmul.f32 -0.5, %v4649_v22  ;;  %7460 = vst [vmem:[#allocation24_spill] sm:$0xff] %v4683_v28  ;;  %v1400_v38 = vsel %vm4686_vm6, %v1397_v27, %v1394_v55  ;;  %v1407_v27 = vand.u32 2147483647, %v4649_v22 }
 0x100   : > { %3636 = vlog2.f32 %v1419_v39  ;;  %v1412_v61 = vmul.f32 0.6931472, %v3631_v40  ;;  %v1423_v30 = vadd.f32 1.0, %v1422_v50  ;;  %v508_v39 = vpop.xlane.xlu0 %507  ;;  %v1442_v50 = vmul.f32 %v4619_v54, %v1441_v0 }
 0x101   : > { %3638 = vpow2.f32 %v1150_v19  ;;  %v4674_v23 = vpop.eup %3632  ;;  %v1425_v19 = vand.u32 2147483647, %v4639_v32  ;;  %v1405_v40 = vadd.f32 1.0, %v1404_v57  ;;  %v4711_v21 = vadd.f32 %v4558_v37, %v508_v39 }
 0x102   : > { %3640 = vlog2.f32 %v1401_v56  ;;  %v3635_v29 = vpop.eup %3634  ;;  %v1464_v25 = vadd.f32 1.0, %v4674_v23  ;;  %v1418_v48 = vsel %vm4666_vm4, %v1415_v33, %v1412_v61  ;;  %v2544_v54 = vsel %vm880_vm3, %v4573_v45, %v1400_v38 }
 0x103   : > { %v1439_v56 = vmul.f32 0.6931472, %v3635_v29  ;;  %v1424_v61 = vmul.f32 %v4639_v32, %v1423_v30  ;;  %v4720_v0 = vadd.f32 %v4558_v37, %v518_v42  ;;  %vm4722_vm15 = vcmp.lt.f32.partialorder %v1425_v19, 0.0004427343 }
 0x104   : > { %3642 = vlog2.f32 %v1464_v25  ;;  %v1406_v33 = vmul.f32 %v4649_v22, %v1405_v40  ;;  %v1467_v39 = vmul.f32 -0.5, %v4674_v23  ;;  %v1014_v30 = vmin.f32 %v4711_v21, 20.0 }
 0x105   : > { %v4733_v25 = vadd.f32 %v4558_v37, %v516_v47  ;;  %v2546_v38 = vsel %vm882_vm5, %v4568_v41, %v1418_v48  ;;  %v1445_v22 = vsel %vm4705_vm11, %v1442_v50, %v1439_v56  ;;  %vm1408_vm2 = vcmp.lt.f32.partialorder %v1407_v27, 0.0004427343 }
 0x106   : > { %v3637_v43 = vpop.eup %3636  ;;  %v1470_v19 = vand.u32 2147483647, %v4674_v23  ;;  %v1148_v42 = vmul.f32 1.442695, %v1014_v30  ;;  %v1468_v48 = vadd.f32 1.0, %v1467_v39  ;;  %v2808_v29 = vperm.slane %v2546_v38, %v4626_v59 }
 0x107   : > { %v1421_v57 = vmul.f32 0.6931472, %v3637_v43  ;;  %v4713_v52 = vpop.eup %3638  ;;  %v1018_v27 = vmin.f32 %v4733_v25, 20.0  ;;  %vm888_vm4 = vcmp.gt.f32.partialorder %v4614_v51, 20.0  ;;  %vm887_vm5 = vcmp.gt.f32.partialorder %v4617_v53, 20.0 }
 0x108   : > { %v3641_v1 = vpop.eup %3640  ;;  %v1455_v43 = vadd.f32 1.0, %v4713_v52  ;;  %vm4755_vm3 = vcmp.lt.f32.partialorder %v1470_v19, 0.0004427343  ;;  %v1469_v30 = vmul.f32 %v4674_v23, %v1468_v48  ;;  %vm7416_vm11 = vcmask 589312  }
 0x109   : > { %v1427_v45 = vsel %vm4722_vm15, %v1424_v61, %v1421_v57  ;;  %v1403_v32 = vmul.f32 0.6931472, %v3641_v1  ;;  %v1019_v57 = vmin.f32 %v4720_v0, 20.0  ;;  %v2802_v61 = vperm.slane %v2544_v54, %v4610_v49  ;;  %v514_v1 = vpop.xlane.xlu0 %513 }
 0x10a   : > { %3644 = vlog2.f32 %v1455_v43  ;;  %v2547_v47 = vsel %vm883_vm7, %v4589_v63, %v1427_v45  ;;  %v3643_v50 = vpop.eup %3642  ;;  %v2549_v54 = vsel %vm885_vm10, %v4586_v62, %v1445_v22  ;;  %v1156_v43 = vmul.f32 1.442695, %v1018_v27 }
 0x10b   : > { %v1409_v40 = vsel %vm1408_vm2, %v1406_v33, %v1403_v32  ;;  %3646 = vpow2.f32 %v1148_v42  ;;  %v1158_v56 = vmul.f32 1.442695, %v1019_v57  ;;  %v2812_v33 = vperm.slane %v2547_v47, %v4637_v31 }
 0x10c   : > { %v2545_v41 = vsel %vm881_vm8, %v4594_v20, %v1409_v40  ;;  %v1458_v20 = vmul.f32 -0.5, %v4713_v52  ;;  %v1466_v32 = vmul.f32 0.6931472, %v3643_v50  ;;  %v4766_v62 = vadd.f32 %v4558_v37, %v514_v1 }
 0x10d   : > { %v2804_v55 = vperm.slane %v2545_v41, %v4647_v36  ;;  %3648 = vpow2.f32 %v1158_v56  ;;  %v2820_v22 = vperm.slane %v2549_v54, %v4629_v60  ;;  %v290_v40 = vmax.f32 %v4656_v44, 0.0 }
 0x10e   : > { %3650 = vpow2.f32 %v1156_v43  ;;  %v1461_v42 = vand.u32 2147483647, %v4713_v52  ;;  %v7470_v57 = vperm.slane %v4679_v26, %v4623_v58  ;;  %v1017_v23 = vmin.f32 %v4766_v62, 20.0 }
 0x10f   : > { %v2806_v39 = vsel %vm2805_vm9, %v2804_v55, %v2802_v61  ;;  %v292_v47 = vmax.f32 %v4660_v46, 0.0  ;;  %v1459_v48 = vadd.f32 1.0, %v1458_v20  ;;  %v421_v44 = vmul.f32 %v4407_v24, %v290_v40 }
 0x110   : > { %v2810_v45 = vsel %vm2809_vm12, %v2808_v29, %v2806_v39  ;;  %v3645_v38 = vpop.eup %3644  ;;  %v163_v55 = vadd.f32 %v4555_v35, %v7438_v9  ;;  %v1472_v26 = vsel %vm4755_vm3, %v1469_v30, %v1466_v32  ;;  %v4788_v27 = vadd.s32 4294967248, %v4610_v49 }
 0x111   : > { %v2814_v19 = vsel %vm2813_vm13, %v2812_v33, %v2810_v45  ;;  %v3647_v41 = vpop.eup %3646  ;;  %v1457_v56 = vmul.f32 0.6931472, %v3645_v38  ;;  %v1154_v54 = vmul.f32 1.442695, %v1017_v23  ;;  %603 = vadd.xlane.f32.xlu0 %v421_v44  ;;  %v423_v20 = vmul.f32 %v4407_v24, %v292_v47 }
 0x112   : > { %v2818_v61 = vsel %vm2817_vm14, %v7470_v57, %v2814_v19  ;;  %v1446_v46 = vadd.f32 1.0, %v3647_v41  ;;  %v1449_v29 = vmul.f32 -0.5, %v3647_v41  ;;  %v291_v33 = vmax.f32 %v163_v55, 0.0  ;;  %v522_v57 = vpop.xlane.xlu1 %521 }
 0x113   : > { %v4780_v50 = vsel %vm2821_vm1, %v2820_v22, %v2818_v61  ;;  %v4790_v1 = vpop.eup %3648  ;;  %vm4793_vm6 = vcmp.lt.f32.partialorder %v1461_v42, 0.0004427343  ;;  %v4798_v63 = vadd.s32 4294967208, %v4610_v49  ;;  %v1460_v32 = vmul.f32 %v4713_v52, %v1459_v48  ;;  %607 = vadd.xlane.f32.xlu2 %v423_v20  ;;  %v524_v22 = vpop.xlane.xlu2 %523 }
 0x114   : > { %3652 = vlog2.f32 %v1446_v46  ;;  %v1491_v43 = vadd.f32 1.0, %v4790_v1  ;;  %v3651_v45 = vpop.eup %3650  ;;  %v1494_v30 = vmul.f32 -0.5, %v4790_v1  ;;  %v422_v38 = vmul.f32 %v4407_v24, %v291_v33 }
 0x115   : > { %3654 = vpow2.f32 %v1154_v54  ;;  %v4807_v19 = vsel %vm888_vm4, %v4614_v51, %v1472_v26  ;;  %vm2825_vm7 = vcmask 458112   ;;  %v1452_v40 = vand.u32 2147483647, %v3647_v41 }
 0x116   : > { %3656 = vlog2.f32 %v1491_v43  ;;  %v1482_v42 = vadd.f32 1.0, %v3651_v45  ;;  %v1463_v52 = vsel %vm4793_vm6, %v1460_v32, %v1457_v56  ;;  %vm2829_vm8 = vcmask 523712   ;;  %605 = vadd.xlane.f32.xlu1 %v422_v38 }
 0x117   : > { %vm886_vm10 = vcmp.gt.f32.partialorder %v4711_v21, 20.0  ;;  %v1450_v61 = vadd.f32 1.0, %v1449_v29  ;;  %v4813_v23 = vadd.s32 4294967216, %v4610_v49  ;;  %v1495_v47 = vadd.f32 1.0, %v1494_v30 }
 0x118   : > { %3658 = vlog2.f32 %v1482_v42  ;;  %v1485_v51 = vmul.f32 -0.5, %v3651_v45  ;;  %v4816_v48 = vadd.f32 %v4558_v37, %v524_v22  ;;  %v2832_v44 = vperm.slane %v4807_v19, %v4683_v28 }
 0x119   : > { %v4821_v55 = vadd.s32 4294967224, %v4610_v49  ;;  %v4824_v26 = vadd.f32 %v4558_v37, %v522_v57  ;;  %v2551_v46 = vsel %vm887_vm5, %v4617_v53, %v1463_v52  ;;  %vm4829_vm15 = vcmp.lt.f32.partialorder %v1452_v40, 0.0004427343 }
 0x11a   : > { %v3653_v56 = vpop.eup %3652  ;;  %v1497_v54 = vand.u32 2147483647, %v4790_v1  ;;  %v1022_v20 = vmin.f32 %v4816_v48, 20.0  ;;  %v1451_v43 = vmul.f32 %v3647_v41, %v1450_v61  ;;  %vm891_vm2 = vcmp.gt.f32.partialorder %v4720_v0, 20.0  ;;  %v520_v41 = vpop.xlane.xlu0 %519 }
 0x11b   : > { %v3655_v33 = vpop.eup %3654  ;;  %v1448_v39 = vmul.f32 0.6931472, %v3653_v56  ;;  %v1488_v32 = vand.u32 2147483647, %v3651_v45  ;;  %v1021_v30 = vmin.f32 %v4824_v26, 20.0  ;;  %v1496_v22 = vmul.f32 %v4790_v1, %v1495_v47 }
 0x11c   : > { %v3657_v38 = vpop.eup %3656  ;;  %vm890_vm3 = vcmp.gt.f32.partialorder %v4733_v25, 20.0  ;;  %v1486_v53 = vadd.f32 1.0, %v1485_v51  ;;  %v1473_v19 = vadd.f32 1.0, %v3655_v33  ;;  %v1164_v40 = vmul.f32 1.442695, %v1022_v20 }
 0x11d   : > { %v1454_v42 = vsel %vm4829_vm15, %v1451_v43, %v1448_v39  ;;  %v1493_v57 = vmul.f32 0.6931472, %v3657_v38  ;;  %v1476_v52 = vmul.f32 -0.5, %v3655_v33  ;;  %v1162_v56 = vmul.f32 1.442695, %v1021_v30 }
 0x11e   : > { %v3659_v61 = vpop.eup %3658  ;;  %v2828_v18 = vperm.slane %v2551_v46, %v4697_v34  ;;  %v2550_v28 = vsel %vm886_vm10, %v4711_v21, %v1454_v42  ;;  %vm4845_vm4 = vcmp.lt.f32.partialorder %v1497_v54, 0.0004427343  ;;  %3660 = vlog2.f32 %v1473_v19 }
 0x11f   : > { %v2824_v47 = vperm.slane %v2550_v28, %v4788_v27  ;;  %v1484_v51 = vmul.f32 0.6931472, %v3659_v61  ;;  %vm4850_vm5 = vcmp.lt.f32.partialorder %v1488_v32, 0.0004427343  ;;  %3662 = vpow2.f32 %v1164_v40 }
 0x120   : > { %v1487_v20 = vmul.f32 %v3651_v45, %v1486_v53  ;;  %vm7384_vm6 = vcmask 654912   ;;  %v1479_v46 = vand.u32 2147483647, %v3655_v33  ;;  %3664 = vpow2.f32 %v1162_v56 }
 0x121   : > { %v4855_v39 = vadd.f32 %v4558_v37, %v520_v41  ;;  %v2826_v21 = vsel %vm2825_vm7, %v2824_v47, %v4780_v50  ;;  %v1499_v54 = vsel %vm4845_vm4, %v1496_v22, %v1493_v57  ;;  %vm7383_vm10 = vcmask 720512  }
 0x122   : > { %v1477_v28 = vadd.f32 1.0, %v1476_v52  ;;  %v165_v43 = vadd.f32 %v4555_v35, %v4317_v11  ;;  %v2830_v32 = vsel %vm2829_vm8, %v2828_v18, %v2826_v21  ;;  %v1490_v45 = vsel %vm4850_vm5, %v1487_v20, %v1484_v51 }
 0x123   : > { %vm889_vm15 = vcmp.gt.f32.partialorder %v4766_v62, 20.0  ;;  %v1020_v30 = vmin.f32 %v4855_v39, 20.0  ;;  %v2834_v38 = vsel %vm7416_vm11, %v2832_v44, %v2830_v32  ;;  %v4870_v50 = vadd.s32 4294967184, %v4610_v49 }
 0x124   : > { %v293_v22 = vmax.f32 %v165_v43, 0.0  ;;  %v167_v53 = vadd.f32 %v4555_v35, %v7443_v13  ;;  %v3661_v19 = vpop.eup %3660  ;;  %v2555_v18 = vsel %vm891_vm2, %v4720_v0, %v1499_v54  ;;  %vm4877_vm4 = vcmp.lt.f32.partialorder %v1479_v46, 0.0004427343  ;;  %v526_v54 = vpop.xlane.xlu0 %525 }
 0x125   : > { %v4882_v42 = vadd.s32 4294967192, %v4610_v49  ;;  %v1160_v44 = vmul.f32 1.442695, %v1020_v30  ;;  %v3663_v57 = vpop.eup %3662  ;;  %v2554_v52 = vsel %vm890_vm3, %v4733_v25, %v1490_v45  ;;  %v1475_v56 = vmul.f32 0.6931472, %v3661_v19  ;;  %v528_v30 = vpop.xlane.xlu1 %527 }
 0x126   : > { %v1478_v41 = vmul.f32 %v3655_v33, %v1477_v28  ;;  %v424_v61 = vmul.f32 %v4407_v24, %v293_v22  ;;  %v3665_v1 = vpop.eup %3664  ;;  %v1518_v47 = vadd.f32 1.0, %v3663_v57  ;;  %v295_v0 = vmax.f32 %v167_v53, 0.0  ;;  %v530_v28 = vpop.xlane.xlu2 %529 }
 0x127   : > { %3666 = vpow2.f32 %v1160_v44  ;;  %v166_v51 = vadd.f32 %v4555_v35, %v7449_v12  ;;  %v1521_v20 = vmul.f32 -0.5, %v3663_v57  ;;  %v1509_v46 = vadd.f32 1.0, %v3665_v1 }
 0x128   : > { %v1481_v29 = vsel %vm4877_vm4, %v1478_v41, %v1475_v56  ;;  %v1512_v21 = vmul.f32 -0.5, %v3665_v1  ;;  %609 = vadd.xlane.f32.xlu0 %v424_v61  ;;  %v2840_v25 = vperm.slane %v2554_v52, %v4813_v23  ;;  %3668 = vlog2.f32 %v1518_v47 }
 0x129   : > { %v2553_v33 = vsel %vm889_vm15, %v4766_v62, %v1481_v29  ;;  %vm7382_vm2 = vcmask 786112   ;;  %v2844_v43 = vperm.slane %v2555_v18, %v4798_v63  ;;  %3670 = vlog2.f32 %v1509_v46 }
 0x12a   : > { %v2836_v32 = vperm.slane %v2553_v33, %v4821_v55  ;;  %v4899_v45 = vadd.s32 4294967200, %v4610_v49  ;;  %v1524_v22 = vand.u32 2147483647, %v3663_v57  ;;  %v426_v53 = vmul.f32 %v4407_v24, %v295_v0 }
 0x12b   : > { %v294_v19 = vmax.f32 %v166_v51, 0.0  ;;  %v4903_v40 = vadd.f32 %v4558_v37, %v526_v54  ;;  %v1522_v44 = vadd.f32 1.0, %v1521_v20  ;;  %v1513_v52 = vadd.f32 1.0, %v1512_v21 }
 0x12c   : > { %v2838_v62 = vsel %vm7384_vm6, %v2836_v32, %v2834_v38  ;;  %v4907_v18 = vadd.f32 %v4558_v37, %v530_v28  ;;  %613 = vadd.xlane.f32.xlu2 %v426_v53  ;;  %v4913_v0 = vadd.f32 %v4558_v37, %v528_v30  ;;  %v1515_v51 = vand.u32 2147483647, %v3665_v1 }
 0x12d   : > { %v3667_v56 = vpop.eup %3666  ;;  %v2842_v41 = vsel %vm7383_vm10, %v2840_v25, %v2838_v62  ;;  %v425_v61 = vmul.f32 %v4407_v24, %v294_v19  ;;  %v1023_v47 = vmin.f32 %v4903_v40, 20.0  ;;  %vm894_vm3 = vcmp.gt.f32.partialorder %v4816_v48, 20.0 }
 0x12e   : > { %v4916_v29 = vsel %vm7382_vm2, %v2844_v43, %v2842_v41  ;;  %v1500_v38 = vadd.f32 1.0, %v3667_v56  ;;  %v1503_v20 = vmul.f32 -0.5, %v3667_v56  ;;  %v3669_v46 = vpop.eup %3668  ;;  %vm4919_vm5 = vcmp.lt.f32.partialorder %v1524_v22, 0.0004427343 }
 0x12f   : > { %vm893_vm15 = vcmp.gt.f32.partialorder %v4824_v26, 20.0  ;;  %611 = vadd.xlane.f32.xlu1 %v425_v61  ;;  %v1166_v54 = vmul.f32 1.442695, %v1023_v47  ;;  %v1025_v25 = vmin.f32 %v4907_v18, 20.0  ;;  %v3671_v33 = vpop.eup %3670  ;;  %v1520_v28 = vmul.f32 0.6931472, %v3669_v46 }
 0x130   : > { %v1523_v32 = vmul.f32 %v3663_v57, %v1522_v44  ;;  %v1514_v43 = vmul.f32 %v3665_v1, %v1513_v52  ;;  %3672 = vlog2.f32 %v1500_v38  ;;  %v1511_v30 = vmul.f32 0.6931472, %v3671_v33  ;;  %v532_v57 = vpop.xlane.xlu0 %531 }
 0x131   : > { %3674 = vpow2.f32 %v1166_v54  ;;  %v1170_v53 = vmul.f32 1.442695, %v1025_v25  ;;  %v1024_v19 = vmin.f32 %v4913_v0, 20.0  ;;  %vm4926_vm4 = vcmp.lt.f32.partialorder %v1515_v51, 0.0004427343 }
 0x132   : > { %v1504_v62 = vadd.f32 1.0, %v1503_v20  ;;  %v168_v41 = vadd.f32 %v4555_v35, %v7444_v14  ;;  %v170_v61 = vadd.f32 %v4555_v35, %v7446_v16  ;;  %v1517_v1 = vsel %vm4926_vm4, %v1514_v43, %v1511_v30  ;;  %v536_v20 = vpop.xlane.xlu2 %535 }
 0x133   : > { %vm7417_vm2 = vcmask 917312   ;;  %vm892_vm10 = vcmp.gt.f32.partialorder %v4855_v39, 20.0  ;;  %3676 = vpow2.f32 %v1170_v53  ;;  %v1168_v44 = vmul.f32 1.442695, %v1024_v19 }
 0x134   : > { %v1506_v52 = vand.u32 2147483647, %v3667_v56  ;;  %vm7386_vm6 = vcmask 982912   ;;  %v4938_v47 = vadd.s32 4294967176, %v4610_v49  ;;  %v296_v51 = vmax.f32 %v168_v41, 0.0 }
 0x135   : > { %v298_v38 = vmax.f32 %v170_v61, 0.0  ;;  %v1526_v46 = vsel %vm4919_vm5, %v1523_v32, %v1520_v28  ;;  %3678 = vpow2.f32 %v1168_v44  ;;  %v169_v54 = vadd.f32 %v4555_v35, %v7445_v15  ;;  %v534_v61 = vpop.xlane.xlu1 %533 }
 0x136   : > { %v4945_v25 = vadd.f32 %v4558_v37, %v532_v57  ;;  %v3673_v33 = vpop.eup %3672  ;;  %v2557_v43 = vsel %vm893_vm15, %v4824_v26, %v1517_v1  ;;  %v1505_v30 = vmul.f32 %v3667_v56, %v1504_v62  ;;  %v427_v53 = vmul.f32 %v4407_v24, %v296_v51 }
 0x137   : > { %v429_v19 = vmul.f32 %v4407_v24, %v298_v38  ;;  %v3675_v22 = vpop.eup %3674  ;;  %v1502_v21 = vmul.f32 0.6931472, %v3673_v33  ;;  %v297_v28 = vmax.f32 %v169_v54, 0.0  ;;  %v4954_v41 = vadd.f32 %v4558_v37, %v536_v20 }
 0x138   : > { %v1026_v32 = vmin.f32 %v4945_v25, 20.0  ;;  %v2558_v57 = vsel %vm894_vm3, %v4816_v48, %v1526_v46  ;;  %vm1507_vm5 = vcmp.lt.f32.partialorder %v1506_v52, 0.0004427343  ;;  %v1527_v26 = vadd.f32 1.0, %v3675_v22  ;;  %615 = vadd.xlane.f32.xlu0 %v427_v53 }
 0x139   : > { %v1530_v56 = vmul.f32 -0.5, %v3675_v22  ;;  %619 = vadd.xlane.f32.xlu2 %v429_v19  ;;  %v3677_v62 = vpop.eup %3676  ;;  %v2852_v1 = vperm.slane %v2557_v43, %v4882_v42  ;;  %v1508_v44 = vsel %vm1507_vm5, %v1505_v30, %v1502_v21  ;;  %v1533_v51 = vand.u32 2147483647, %v3675_v22 }
 0x13a   : > { %v428_v38 = vmul.f32 %v4407_v24, %v297_v28  ;;  %v2556_v20 = vsel %vm892_vm10, %v4855_v39, %v1508_v44  ;;  %3680 = vlog2.f32 %v1527_v26  ;;  %v1172_v54 = vmul.f32 1.442695, %v1026_v32 }
 0x13b   : > { %v4965_v48 = vadd.f32 %v4558_v37, %v534_v61  ;;  %v3679_v52 = vpop.eup %3678  ;;  %v2848_v46 = vperm.slane %v2556_v20, %v4899_v45  ;;  %vm895_vm3 = vcmp.gt.f32.partialorder %v4903_v40, 20.0  ;;  %v1545_v33 = vadd.f32 1.0, %v3677_v62 }
 0x13c   : > { %v1548_v43 = vmul.f32 -0.5, %v3677_v62  ;;  %617 = vadd.xlane.f32.xlu1 %v428_v38  ;;  %v1028_v30 = vmin.f32 %v4954_v41, 20.0  ;;  %vm2861_vm15 = vcmask 1048512   ;;  %v1531_v53 = vadd.f32 1.0, %v1530_v56  ;;  %v538_v38 = vpop.xlane.xlu0 %537 }
 0x13d   : > { %v1551_v19 = vand.u32 2147483647, %v3677_v62  ;;  %v1536_v21 = vadd.f32 1.0, %v3679_v52  ;;  %v1539_v39 = vmul.f32 -0.5, %v3679_v52  ;;  %v2856_v28 = vperm.slane %v2558_v57, %v4870_v50 }
 0x13e   : > { %v2850_v32 = vsel %vm7385_vm0, %v2848_v46, %v4916_v29  ;;  %vm4973_vm10 = vcmp.lt.f32.partialorder %v1533_v51, 0.0004427343  ;;  %3682 = vlog2.f32 %v1545_v33  ;;  %vm897_vm4 = vcmp.gt.f32.partialorder %v4907_v18, 20.0  ;;  %v540_v33 = vpop.xlane.xlu1 %539 }
 0x13f   : > { %v2854_v26 = vsel %vm7417_vm2, %v2852_v1, %v2850_v32  ;;  %v1549_v44 = vadd.f32 1.0, %v1548_v43  ;;  %3684 = vlog2.f32 %v1536_v21  ;;  %v1542_v56 = vand.u32 2147483647, %v3679_v52  ;;  %v542_v21 = vpop.xlane.xlu2 %541 }
 0x140   : > { %v2858_v20 = vsel %vm7386_vm6, %v2856_v28, %v2854_v26  ;;  %vm896_vm5 = vcmp.gt.f32.partialorder %v4913_v0, 20.0  ;;  %v1540_v57 = vadd.f32 1.0, %v1539_v39  ;;  %3686 = vpow2.f32 %v1172_v54  ;;  %v3681_v51 = vpop.eup %3680  ;;  %v4989_v28 = vld [vmem:[%s4396_s26] sm:$0xff] }
 0x141   : > { %v1176_v29 = vmul.f32 1.442695, %v1028_v30  ;;  %v1532_v46 = vmul.f32 %v3675_v22, %v1531_v53  ;;  %vm4981_vm0 = vcmp.lt.f32.partialorder %v1551_v19, 0.0004427343  ;;  %v1027_v1 = vmin.f32 %v4965_v48, 20.0  ;;  %7489 = vst [vmem:[#allocation26_spill] sm:$0xff] %v4989_v28 }
 0x142   : > { %v171_v43 = vadd.f32 %v4555_v35, %v7451_v17  ;;  %v1529_v32 = vmul.f32 0.6931472, %v3681_v51  ;;  %v88_v39 = vrot.slane %v4989_v28, 4  ;;  %v4993_v54 = vadd.f32 %v4558_v37, %v538_v38 }
 0x143   : > { %3688 = vpow2.f32 %v1176_v29  ;;  %v1550_v22 = vmul.f32 %v3677_v62, %v1549_v44  ;;  %vm4995_vm6 = vcmp.lt.f32.partialorder %v1542_v56, 0.0004427343  ;;  %v1174_v53 = vmul.f32 1.442695, %v1027_v1 }
 0x144   : > { %v299_v19 = vmax.f32 %v171_v43, 0.0  ;;  %v3683_v26 = vpop.eup %3682  ;;  %v1535_v35 = vsel %vm4973_vm10, %v1532_v46, %v1529_v32  ;;  %v1541_v51 = vmul.f32 %v3679_v52, %v1540_v57  ;;  %v5001_v29 = vperm.slane %v88_v39, 0 }
 0x145   : > { %v5004_v17 = vadd.f32 %v4558_v37, %v542_v21  ;;  %v3685_v28 = vpop.eup %3684  ;;  %v2559_v62 = vsel %vm895_vm3, %v4903_v40, %v1535_v35  ;;  %v1547_v44 = vmul.f32 0.6931472, %v3683_v26  ;;  %3690 = vpow2.f32 %v1174_v53 }
 0x146   : > { %v430_v56 = vmul.f32 %v4407_v24, %v299_v19  ;;  %v3687_v38 = vpop.eup %3686  ;;  %v2860_v1 = vperm.slane %v2559_v62, %v4938_v47  ;;  %v1538_v61 = vmul.f32 0.6931472, %v3685_v28  ;;  %v173_v52 = vadd.f32 %v5001_v29, %v7447_v3 }
 0x147   : > { %v1029_v57 = vmin.f32 %v4993_v54, 20.0  ;;  %v1553_v46 = vsel %vm4981_vm0, %v1550_v22, %v1547_v44  ;;  %v1554_v43 = vadd.f32 1.0, %v3687_v38  ;;  %v1557_v21 = vmul.f32 -0.5, %v3687_v38 }
 0x148   : > { %621 = vadd.xlane.f32.xlu0 %v430_v56  ;;  %v172_v40 = vadd.f32 %v5001_v29, %v7442_v2  ;;  %v5019_v39 = vsel %vm2861_vm15, %v2860_v1, %v2858_v20  ;;  %v2561_v28 = vsel %vm897_vm4, %v4907_v18, %v1553_v46  ;;  %v1544_v53 = vsel %vm4995_vm6, %v1541_v51, %v1538_v61 }
 0x149   : > { %v3689_v32 = vpop.eup %3688  ;;  %v301_v19 = vmax.f32 %v173_v52, 0.0  ;;  %v2864_v22 = vperm.slane %v2561_v28, %v4647_v36  ;;  %v2560_v26 = vsel %vm896_vm5, %v4913_v0, %v1544_v53  ;;  %3692 = vlog2.f32 %v1554_v43 }
 0x14a   : > { %v1560_v35 = vand.u32 2147483647, %v3687_v38  ;;  %v2863_v20 = vperm.slane %v2560_v26, %v4610_v49  ;;  %vm898_vm0 = vcmp.gt.f32.partialorder %v4945_v25, 20.0  ;;  %v1558_v62 = vadd.f32 1.0, %v1557_v21 }
 0x14b   : > { %v1572_v44 = vadd.f32 1.0, %v3689_v32  ;;  %v1575_v18 = vmul.f32 -0.5, %v3689_v32  ;;  %v3691_v56 = vpop.eup %3690  ;;  %v1578_v30 = vand.u32 2147483647, %v3689_v32  ;;  %v432_v51 = vmul.f32 %v4407_v24, %v301_v19 }
 0x14c   : > { %v300_v1 = vmax.f32 %v172_v40, 0.0  ;;  %v5034_v61 = vadd.f32 %v4558_v37, %v540_v33  ;;  %v2865_v52 = vsel %vm2805_vm9, %v2864_v22, %v2863_v20  ;;  %v1563_v46 = vadd.f32 1.0, %v3691_v56 }
 0x14d   : > { %3694 = vlog2.f32 %v1572_v44  ;;  %v1576_v0 = vadd.f32 1.0, %v1575_v18  ;;  %vm900_vm6 = vcmp.gt.f32.partialorder %v4954_v41, 20.0  ;;  %v1566_v43 = vmul.f32 -0.5, %v3691_v56  ;;  %625 = vadd.xlane.f32.xlu2 %v432_v51  ;;  %v544_v18 = vpop.xlane.xlu0 %543 }
 0x14e   : > { %v1569_v28 = vand.u32 2147483647, %v3691_v56  ;;  %v431_v21 = vmul.f32 %v4407_v24, %v300_v1  ;;  %v1559_v53 = vmul.f32 %v3687_v38, %v1558_v62  ;;  %vm5039_vm3 = vcmp.lt.f32.partialorder %v1560_v35, 0.0004427343 }
 0x14f   : > { %3696 = vlog2.f32 %v1563_v46  ;;  %v1178_v40 = vmul.f32 1.442695, %v1029_v57  ;;  %v3693_v19 = vpop.eup %3692  ;;  %v1577_v33 = vmul.f32 %v3689_v32, %v1576_v0  ;;  %vm5043_vm10 = vcmp.lt.f32.partialorder %v1578_v30, 0.0004427343 }
 0x150   : > { %v1567_v20 = vadd.f32 1.0, %v1566_v43  ;;  %623 = vadd.xlane.f32.xlu1 %v431_v21  ;;  %v1031_v44 = vmin.f32 %v5004_v17, 20.0  ;;  %v1556_v51 = vmul.f32 0.6931472, %v3693_v19  ;;  %v1030_v38 = vmin.f32 %v5034_v61, 20.0 }
 0x151   : > { %3698 = vpow2.f32 %v1178_v40  ;;  %v174_v35 = vadd.f32 %v5001_v29, %v7441_v4  ;;  %vm5051_vm4 = vcmp.lt.f32.partialorder %v1569_v28, 0.0004427343  ;;  %v176_v62 = vadd.f32 %v5001_v29, %v7450_v6 }
 0x152   : > { %v1182_v32 = vmul.f32 1.442695, %v1031_v44  ;;  %v175_v30 = vadd.f32 %v5001_v29, %v7448_v5  ;;  %v1562_v0 = vsel %vm5039_vm3, %v1559_v53, %v1556_v51  ;;  %v1180_v46 = vmul.f32 1.442695, %v1030_v38 }
 0x153   : > { %v3695_v1 = vpop.eup %3694  ;;  %v302_v43 = vmax.f32 %v174_v35, 0.0  ;;  %v5062_v21 = vadd.f32 %v4558_v37, %v544_v18  ;;  %v2562_v28 = vsel %vm898_vm0, %v4945_v25, %v1562_v0  ;;  %v304_v19 = vmax.f32 %v176_v62, 0.0 }
 0x154   : > { %v1574_v40 = vmul.f32 0.6931472, %v3695_v1  ;;  %3700 = vpow2.f32 %v1182_v32  ;;  %v2866_v6 = vperm.slane %v2562_v28, %v4626_v59  ;;  %v303_v26 = vmax.f32 %v175_v30, 0.0  ;;  %v548_v30 = vpop.xlane.xlu2 %547 }
 0x155   : > { %v3697_v44 = vpop.eup %3696  ;;  %3702 = vpow2.f32 %v1180_v46  ;;  %v433_v36 = vmul.f32 %v4407_v24, %v302_v43  ;;  %v1568_v18 = vmul.f32 %v3691_v56, %v1567_v20  ;;  %v435_v38 = vmul.f32 %v4407_v24, %v304_v19 }
 0x156   : > { %v1580_v53 = vsel %vm5043_vm10, %v1577_v33, %v1574_v40  ;;  %v1565_v51 = vmul.f32 0.6931472, %v3697_v44  ;;  %v2867_v25 = vsel %vm2809_vm12, %v2866_v6, %v2865_v52  ;;  %v434_v62 = vmul.f32 %v4407_v24, %v303_v26 }
 0x157   : > { %v3699_v35 = vpop.eup %3698  ;;  %v2564_v32 = vsel %vm900_vm6, %v4954_v41, %v1580_v53  ;;  %627 = vadd.xlane.f32.xlu0 %v433_v36  ;;  %v1032_v1 = vmin.f32 %v5062_v21, 20.0  ;;  %vm899_vm5 = vcmp.gt.f32.partialorder %v4965_v48, 20.0  ;;  %631 = vadd.xlane.f32.xlu2 %v435_v38  ;;  %v546_v36 = vpop.xlane.xlu1 %545  ;;  %v5085_v43 = vadd.f32 %v4558_v37, %v548_v30 }
 0x158   : > { %v1571_v56 = vsel %vm5051_vm4, %v1568_v18, %v1565_v51  ;;  %v1581_v33 = vadd.f32 1.0, %v3699_v35  ;;  %v1584_v22 = vmul.f32 -0.5, %v3699_v35  ;;  %v2870_v6 = vperm.slane %v2564_v32, %v4623_v58  ;;  %629 = vadd.xlane.f32.xlu1 %v434_v62 }
 0x159   : > { %v2563_v52 = vsel %vm899_vm5, %v4965_v48, %v1571_v56  ;;  %v1587_v20 = vand.u32 2147483647, %v3699_v35  ;;  %v1184_v46 = vmul.f32 1.442695, %v1032_v1  ;;  %v5089_v51 = vadd.f32 %v4558_v37, %v546_v36  ;;  %v550_v56 = vpop.xlane.xlu0 %549 }
 0x15a   : > { %v3701_v41 = vpop.eup %3700  ;;  %v2868_v0 = vperm.slane %v2563_v52, %v4637_v31  ;;  %3704 = vlog2.f32 %v1581_v33  ;;  %v1585_v28 = vadd.f32 1.0, %v1584_v22  ;;  %vm901_vm0 = vcmp.gt.f32.partialorder %v4993_v54, 20.0 }
 0x15b   : > { %v3703_v57 = vpop.eup %3702  ;;  %v1599_v40 = vadd.f32 1.0, %v3701_v41  ;;  %v1602_v19 = vmul.f32 -0.5, %v3701_v41  ;;  %v1605_v44 = vand.u32 2147483647, %v3701_v41  ;;  %vm5093_vm6 = vcmp.lt.f32.partialorder %v1587_v20, 0.0004427343 }
 0x15c   : > { %v2869_v26 = vsel %vm2813_vm13, %v2868_v0, %v2867_v25  ;;  %v1590_v53 = vadd.f32 1.0, %v3703_v57  ;;  %v1593_v48 = vmul.f32 -0.5, %v3703_v57  ;;  %vm903_vm3 = vcmp.gt.f32.partialorder %v5004_v17, 20.0 }
 0x15d   : > { %v2871_v18 = vsel %vm2817_vm14, %v2870_v6, %v2869_v26  ;;  %3706 = vlog2.f32 %v1599_v40  ;;  %v1603_v38 = vadd.f32 1.0, %v1602_v19  ;;  %v1586_v25 = vmul.f32 %v3699_v35, %v1585_v28 }
 0x15e   : > { %3708 = vlog2.f32 %v1590_v53  ;;  %v1594_v62 = vadd.f32 1.0, %v1593_v48  ;;  %vm5098_vm10 = vcmp.lt.f32.partialorder %v1605_v44, 0.0004427343  ;;  %v1034_v30 = vmin.f32 %v5085_v43, 20.0 }
 0x15f   : > { %3710 = vpow2.f32 %v1184_v46  ;;  %v1604_v22 = vmul.f32 %v3701_v41, %v1603_v38  ;;  %v1596_v6 = vand.u32 2147483647, %v3703_v57  ;;  %v1033_v52 = vmin.f32 %v5089_v51, 20.0 }
 0x160   : > { %v3705_v33 = vpop.eup %3704  ;;  %v177_v20 = vadd.f32 %v5001_v29, %v7440_v7  ;;  %v1188_v0 = vmul.f32 1.442695, %v1034_v30  ;;  %v179_v35 = vadd.f32 %v5001_v29, %v7438_v9  ;;  %v178_v28 = vadd.f32 %v5001_v29, %v7439_v8 }
 0x161   : > { %v1583_v36 = vmul.f32 0.6931472, %v3705_v33  ;;  %v1595_v46 = vmul.f32 %v3703_v57, %v1594_v62  ;;  %v1186_v40 = vmul.f32 1.442695, %v1033_v52  ;;  %v5111_v44 = vadd.f32 %v4558_v37, %v550_v56 }
 0x162   : > { %v305_v19 = vmax.f32 %v177_v20, 0.0  ;;  %3712 = vpow2.f32 %v1188_v0  ;;  %v307_v53 = vmax.f32 %v179_v35, 0.0  ;;  %v306_v48 = vmax.f32 %v178_v28, 0.0 }
 0x163   : > { %v3707_v41 = vpop.eup %3706  ;;  %v1589_v26 = vsel %vm5093_vm6, %v1586_v25, %v1583_v36  ;;  %3714 = vpow2.f32 %v1186_v40  ;;  %vm1597_vm4 = vcmp.lt.f32.partialorder %v1596_v6, 0.0004427343  ;;  %vm902_vm5 = vcmp.gt.f32.partialorder %v5034_v61, 20.0 }
 0x164   : > { %v3709_v38 = vpop.eup %3708  ;;  %v2565_v30 = vsel %vm901_vm0, %v4993_v54, %v1589_v26  ;;  %v1601_v33 = vmul.f32 0.6931472, %v3707_v41  ;;  %v436_v57 = vmul.f32 %v4407_v24, %v305_v19  ;;  %v438_v20 = vmul.f32 %v4407_v24, %v307_v53  ;;  %v554_v54 = vpop.xlane.xlu2 %553 }
 0x165   : > { %v3711_v62 = vpop.eup %3710  ;;  %v2872_v56 = vperm.slane %v2565_v30, %v4629_v60  ;;  %v1592_v52 = vmul.f32 0.6931472, %v3709_v38  ;;  %v437_v32 = vmul.f32 %v4407_v24, %v306_v48  ;;  %vm904_vm0 = vcmp.gt.f32.partialorder %v5062_v21, 20.0 }
 0x166   : > { %v1607_v25 = vsel %vm5098_vm10, %v1604_v22, %v1601_v33  ;;  %v1608_v36 = vadd.f32 1.0, %v3711_v62  ;;  %v1611_v0 = vmul.f32 -0.5, %v3711_v62  ;;  %633 = vadd.xlane.f32.xlu0 %v436_v57  ;;  %637 = vadd.xlane.f32.xlu2 %v438_v20  ;;  %v1614_v1 = vand.u32 2147483647, %v3711_v62 }
 0x167   : > { %v2873_v35 = vsel %vm2821_vm1, %v2872_v56, %v2871_v18  ;;  %v2567_v28 = vsel %vm903_vm3, %v5004_v17, %v1607_v25  ;;  %v1598_v40 = vsel %vm1597_vm4, %v1595_v46, %v1592_v52  ;;  %635 = vadd.xlane.f32.xlu1 %v437_v32  ;;  %v1035_v18 = vmin.f32 %v5111_v44, 20.0  ;;  %v552_v56 = vpop.xlane.xlu1 %551  ;;  %v7508_v52 = vld [vmem:[#allocation24_spill] sm:$0xff] }
 0x168   : > { %v2566_v19 = vsel %vm902_vm5, %v5034_v61, %v1598_v40  ;;  %3716 = vlog2.f32 %v1608_v36  ;;  %v3713_v22 = vpop.eup %3712  ;;  %v1612_v41 = vadd.f32 1.0, %v1611_v0  ;;  %v5134_v26 = vadd.f32 %v4558_v37, %v554_v54 }
 0x169   : > { %v2874_v6 = vperm.slane %v2566_v19, %v4788_v27  ;;  %v3715_v17 = vpop.eup %3714  ;;  %v2876_v46 = vperm.slane %v2567_v28, %v4697_v34  ;;  %v1626_v53 = vadd.f32 1.0, %v3713_v22  ;;  %v1629_v48 = vmul.f32 -0.5, %v3713_v22  ;;  %v556_v19 = vpop.xlane.xlu0 %555 }
 0x16a   : > { %v1632_v38 = vand.u32 2147483647, %v3713_v22  ;;  %v1617_v30 = vadd.f32 1.0, %v3715_v17  ;;  %v1620_v33 = vmul.f32 -0.5, %v3715_v17  ;;  %v1623_v57 = vand.u32 2147483647, %v3715_v17 }
 0x16b   : > { %v2875_v61 = vsel %vm2825_vm7, %v2874_v6, %v2873_v35  ;;  %vm5138_vm6 = vcmp.lt.f32.partialorder %v1614_v1, 0.0004427343  ;;  %3718 = vlog2.f32 %v1626_v53  ;;  %v1630_v32 = vadd.f32 1.0, %v1629_v48 }
 0x16c   : > { %v2877_v20 = vsel %vm2829_vm8, %v2876_v46, %v2875_v61  ;;  %v1613_v25 = vmul.f32 %v3711_v62, %v1612_v41  ;;  %vm906_vm3 = vcmp.gt.f32.partialorder %v5085_v43, 20.0  ;;  %vm5144_vm10 = vcmp.lt.f32.partialorder %v1632_v38, 0.0004427343 }
 0x16d   : > { %3720 = vlog2.f32 %v1617_v30  ;;  %v1190_v0 = vmul.f32 1.442695, %v1035_v18  ;;  %vm905_vm4 = vcmp.gt.f32.partialorder %v5089_v51, 20.0  ;;  %v1621_v35 = vadd.f32 1.0, %v1620_v33 }
 0x16e   : > { %v3717_v54 = vpop.eup %3716  ;;  %v1037_v28 = vmin.f32 %v5134_v26, 20.0  ;;  %v5151_v40 = vadd.f32 %v4558_v37, %v552_v56  ;;  %v180_v62 = vadd.f32 %v5001_v29, %v4311_v10  ;;  %vm5155_vm5 = vcmp.lt.f32.partialorder %v1623_v57, 0.0004427343 }
 0x16f   : > { %v1610_v1 = vmul.f32 0.6931472, %v3717_v54  ;;  %3722 = vpow2.f32 %v1190_v0  ;;  %v182_v41 = vadd.f32 %v5001_v29, %v7449_v12  ;;  %v1631_v18 = vmul.f32 %v3713_v22, %v1630_v32  ;;  %v560_v0 = vpop.xlane.xlu2 %559 }
 0x170   : > { %v1194_v46 = vmul.f32 1.442695, %v1037_v28  ;;  %v1036_v53 = vmin.f32 %v5151_v40, 20.0  ;;  %v308_v48 = vmax.f32 %v180_v62, 0.0  ;;  %v181_v30 = vadd.f32 %v5001_v29, %v4317_v11 }
 0x171   : > { %v1616_v38 = vsel %vm5138_vm6, %v1613_v25, %v1610_v1  ;;  %v310_v61 = vmax.f32 %v182_v41, 0.0  ;;  %v5167_v33 = vadd.f32 %v4558_v37, %v556_v19  ;;  %v3719_v57 = vpop.eup %3718  ;;  %v1622_v19 = vmul.f32 %v3715_v17, %v1621_v35 }
 0x172   : > { %v2568_v56 = vsel %vm904_vm0, %v5062_v21, %v1616_v38  ;;  %3724 = vpow2.f32 %v1194_v46  ;;  %v1192_v22 = vmul.f32 1.442695, %v1036_v53  ;;  %v439_v32 = vmul.f32 %v4407_v24, %v308_v48 }
 0x173   : > { %v3721_v54 = vpop.eup %3720  ;;  %v2878_v25 = vperm.slane %v2568_v56, %v7508_v52  ;;  %v1628_v28 = vmul.f32 0.6931472, %v3719_v57  ;;  %v441_v62 = vmul.f32 %v4407_v24, %v310_v61  ;;  %v309_v1 = vmax.f32 %v181_v30, 0.0 }
 0x174   : > { %v1619_v41 = vmul.f32 0.6931472, %v3721_v54  ;;  %3726 = vpow2.f32 %v1192_v22  ;;  %639 = vadd.xlane.f32.xlu0 %v439_v32  ;;  %v1038_v12 = vmin.f32 %v5167_v33, 20.0  ;;  %v5181_v48 = vadd.f32 %v4558_v37, %v560_v0 }
 0x175   : > { %v3723_v34 = vpop.eup %3722  ;;  %v2879_v21 = vsel %vm7416_vm11, %v2878_v25, %v2877_v20  ;;  %v1634_v46 = vsel %vm5144_vm10, %v1631_v18, %v1628_v28  ;;  %643 = vadd.xlane.f32.xlu2 %v441_v62  ;;  %v440_v53 = vmul.f32 %v4407_v24, %v309_v1  ;;  %vm7509_vm0 = vcmask 654912  }
 0x176   : > { %v2570_v17 = vsel %vm906_vm3, %v5085_v43, %v1634_v46  ;;  %v1625_v35 = vsel %vm5155_vm5, %v1622_v19, %v1619_v41  ;;  %v1635_v38 = vadd.f32 1.0, %v3723_v34  ;;  %v1638_v61 = vmul.f32 -0.5, %v3723_v34 }
 0x177   : > { %v2569_v20 = vsel %vm905_vm4, %v5089_v51, %v1625_v35  ;;  %641 = vadd.xlane.f32.xlu1 %v440_v53  ;;  %v1196_v36 = vmul.f32 1.442695, %v1038_v12  ;;  %v2882_v30 = vperm.slane %v2570_v17, %v4813_v23  ;;  %v1641_v22 = vand.u32 2147483647, %v3723_v34  ;;  %v558_v51 = vpop.xlane.xlu1 %557 }
 0x178   : > { %v3725_v18 = vpop.eup %3724  ;;  %v2880_v57 = vperm.slane %v2569_v20, %v4821_v55  ;;  %3728 = vlog2.f32 %v1635_v38  ;;  %v1639_v56 = vadd.f32 1.0, %v1638_v61  ;;  %v1040_v25 = vmin.f32 %v5181_v48, 20.0 }
 0x179   : > { %v1653_v43 = vadd.f32 1.0, %v3725_v18  ;;  %v1656_v32 = vmul.f32 -0.5, %v3725_v18  ;;  %v1659_v54 = vand.u32 2147483647, %v3725_v18  ;;  %3730 = vpow2.f32 %v1196_v36 }
 0x17a   : > { %v3727_v6 = vpop.eup %3726  ;;  %v2881_v0 = vsel %vm7509_vm0, %v2880_v57, %v2879_v21  ;;  %vm7510_vm6 = vcmask 720512   ;;  %vm907_vm3 = vcmp.gt.f32.partialorder %v5111_v44, 20.0  ;;  %v1200_v1 = vmul.f32 1.442695, %v1040_v25 }
 0x17b   : > { %v2883_v12 = vsel %vm7510_vm6, %v2882_v30, %v2881_v0  ;;  %3732 = vlog2.f32 %v1653_v43  ;;  %v1657_v28 = vadd.f32 1.0, %v1656_v32  ;;  %v1644_v62 = vadd.f32 1.0, %v3727_v6 }
 0x17c   : > { %vm5197_vm10 = vcmp.lt.f32.partialorder %v1641_v22, 0.0004427343  ;;  %vm909_vm4 = vcmp.gt.f32.partialorder %v5134_v26, 20.0  ;;  %v1647_v19 = vmul.f32 -0.5, %v3727_v6  ;;  %v5203_v21 = vadd.f32 %v4558_v37, %v558_v51 }
 0x17d   : > { %v183_v46 = vadd.f32 %v5001_v29, %v7443_v13  ;;  %v1640_v17 = vmul.f32 %v3723_v34, %v1639_v56  ;;  %vm5207_vm5 = vcmp.lt.f32.partialorder %v1659_v54, 0.0004427343  ;;  %3734 = vlog2.f32 %v1644_v62 }
 0x17e   : > { %v3729_v53 = vpop.eup %3728  ;;  %v185_v38 = vadd.f32 %v5001_v29, %v7445_v15  ;;  %v1650_v20 = vand.u32 2147483647, %v3727_v6  ;;  %3736 = vpow2.f32 %v1200_v1  ;;  %v1039_v36 = vmin.f32 %v5203_v21, 20.0 }
 0x17f   : > { %v1637_v61 = vmul.f32 0.6931472, %v3729_v53  ;;  %v3731_v30 = vpop.eup %3730  ;;  %v1658_v57 = vmul.f32 %v3725_v18, %v1657_v28  ;;  %v311_v22 = vmax.f32 %v183_v46, 0.0  ;;  %v184_v34 = vadd.f32 %v5001_v29, %v7444_v14 }
 0x180   : > { %v313_v43 = vmax.f32 %v185_v38, 0.0  ;;  %v1648_v0 = vadd.f32 1.0, %v1647_v19  ;;  %v1662_v54 = vadd.f32 1.0, %v3731_v30  ;;  %v1665_v25 = vmul.f32 -0.5, %v3731_v30  ;;  %v566_v38 = vpop.xlane.xlu2 %565 }
 0x181   : > { %v3733_v56 = vpop.eup %3732  ;;  %v1643_v32 = vsel %vm5197_vm10, %v1640_v17, %v1637_v61  ;;  %v1198_v1 = vmul.f32 1.442695, %v1039_v36  ;;  %v442_v18 = vmul.f32 %v4407_v24, %v311_v22  ;;  %vm908_vm0 = vcmp.gt.f32.partialorder %v5151_v40, 20.0 }
 0x182   : > { %v2571_v51 = vsel %vm907_vm3, %v5111_v44, %v1643_v32  ;;  %v1655_v62 = vmul.f32 0.6931472, %v3733_v56  ;;  %3738 = vlog2.f32 %v1662_v54  ;;  %v1666_v46 = vadd.f32 1.0, %v1665_v25  ;;  %v562_v44 = vpop.xlane.xlu0 %561 }
 0x183   : > { %v2884_v28 = vperm.slane %v2571_v51, %v4798_v63  ;;  %v3735_v53 = vpop.eup %3734  ;;  %3740 = vpow2.f32 %v1198_v1  ;;  %645 = vadd.xlane.f32.xlu0 %v442_v18  ;;  %v444_v19 = vmul.f32 %v4407_v24, %v313_v43  ;;  %v312_v17 = vmax.f32 %v184_v34, 0.0 }
 0x184   : > { %v1661_v41 = vsel %vm5207_vm5, %v1658_v57, %v1655_v62  ;;  %v3737_v61 = vpop.eup %3736  ;;  %vm7515_vm6 = vcmask 786112   ;;  %v1646_v22 = vmul.f32 0.6931472, %v3735_v53  ;;  %v1649_v56 = vmul.f32 %v3727_v6, %v1648_v0 }
 0x185   : > { %v2885_v36 = vsel %vm7515_vm6, %v2884_v28, %v2883_v12  ;;  %vm1651_vm3 = vcmp.lt.f32.partialorder %v1650_v20, 0.0004427343  ;;  %v2573_v32 = vsel %vm909_vm4, %v5134_v26, %v1661_v41  ;;  %v1668_v54 = vand.u32 2147483647, %v3731_v30  ;;  %649 = vadd.xlane.f32.xlu2 %v444_v19  ;;  %v564_v12 = vpop.xlane.xlu1 %563 }
 0x186   : > { %v1680_v35 = vadd.f32 1.0, %v3737_v61  ;;  %v1683_v57 = vmul.f32 -0.5, %v3737_v61  ;;  %v1652_v25 = vsel %vm1651_vm3, %v1649_v56, %v1646_v22  ;;  %v443_v43 = vmul.f32 %v4407_v24, %v312_v17 }
 0x187   : > { %v5233_v34 = vadd.f32 %v4558_v37, %v562_v44  ;;  %v5236_v51 = vadd.f32 %v4558_v37, %v566_v38  ;;  %v2572_v6 = vsel %vm908_vm0, %v5151_v40, %v1652_v25  ;;  %vm910_vm10 = vcmp.gt.f32.partialorder %v5167_v33, 20.0 }
 0x188   : > { %v1667_v26 = vmul.f32 %v3731_v30, %v1666_v46  ;;  %3742 = vlog2.f32 %v1680_v35  ;;  %v3739_v20 = vpop.eup %3738  ;;  %v2886_v0 = vperm.slane %v2572_v6, %v4899_v45  ;;  %v1684_v62 = vadd.f32 1.0, %v1683_v57  ;;  %647 = vadd.xlane.f32.xlu1 %v443_v43 }
 0x189   : > { %v1686_v1 = vand.u32 2147483647, %v3737_v61  ;;  %v1041_v18 = vmin.f32 %v5233_v34, 20.0  ;;  %v3741_v28 = vpop.eup %3740  ;;  %v2888_v53 = vperm.slane %v2573_v32, %v4882_v42  ;;  %v1664_v41 = vmul.f32 0.6931472, %v3739_v20 }
 0x18a   : > { %v1043_v19 = vmin.f32 %v5236_v51, 20.0  ;;  %v5247_v40 = vadd.f32 %v4558_v37, %v564_v12  ;;  %vm7516_vm4 = vcmask 851712   ;;  %vm1669_vm5 = vcmp.lt.f32.partialorder %v1668_v54, 0.0004427343  ;;  %v568_v12 = vpop.xlane.xlu0 %567 }
 0x18b   : > { %v2887_v30 = vsel %vm7516_vm4, %v2886_v0, %v2885_v36  ;;  %v1671_v46 = vadd.f32 1.0, %v3741_v28  ;;  %v1674_v17 = vmul.f32 -0.5, %v3741_v28  ;;  %v1670_v44 = vsel %vm1669_vm5, %v1667_v26, %v1664_v41  ;;  %v7520_v0 = vld [vmem:[#allocation26_spill] sm:$0xff] }
 0x18c   : > { %v2889_v38 = vsel %vm7417_vm2, %v2888_v53, %v2887_v30  ;;  %v1202_v22 = vmul.f32 1.442695, %v1041_v18  ;;  %v1206_v56 = vmul.f32 1.442695, %v1043_v19  ;;  %v2574_v32 = vsel %vm910_vm10, %v5167_v33, %v1670_v44 }
 0x18d   : > { %v1685_v35 = vmul.f32 %v3737_v61, %v1684_v62  ;;  %vm5254_vm0 = vcmp.lt.f32.partialorder %v1686_v1, 0.0004427343  ;;  %3744 = vlog2.f32 %v1671_v46  ;;  %v2890_v36 = vperm.slane %v2574_v32, %v4870_v50  ;;  %v7521_v1 = vld [vmem:[#allocation19_spill] sm:$0xff] }
 0x18e   : > { %v3743_v25 = vpop.eup %3742  ;;  %v1677_v54 = vand.u32 2147483647, %v3741_v28  ;;  %3746 = vpow2.f32 %v1202_v22  ;;  %v1042_v43 = vmin.f32 %v5247_v40, 20.0  ;;  %v1675_v26 = vadd.f32 1.0, %v1674_v17 }
 0x18f   : > { %v1682_v6 = vmul.f32 0.6931472, %v3743_v25  ;;  %3748 = vpow2.f32 %v1206_v56  ;;  %v186_v33 = vadd.f32 %v5001_v29, %v7446_v16  ;;  %vm7519_vm6 = vcmask 982912  }
 0x190   : > { %v2891_v61 = vsel %vm7519_vm6, %v2890_v36, %v2889_v38  ;;  %v1204_v20 = vmul.f32 1.442695, %v1042_v43  ;;  %v89_v62 = vrot.slane %v7520_v0, 5  ;;  %v187_v18 = vadd.f32 %v5001_v29, %v7521_v1 }
 0x191   : > { %v314_v53 = vmax.f32 %v186_v33, 0.0  ;;  %v5267_v41 = vadd.f32 %v4558_v37, %v568_v12  ;;  %v1688_v19 = vsel %vm5254_vm0, %v1685_v35, %v1682_v6  ;;  %vm912_vm3 = vcmp.gt.f32.partialorder %v5181_v48, 20.0  ;;  %v572_v6 = vpop.xlane.xlu2 %571 }
 0x192   : > { %3750 = vpow2.f32 %v1204_v20  ;;  %v5271_v30 = vperm.slane %v89_v62, 0  ;;  %v315_v46 = vmax.f32 %v187_v18, 0.0  ;;  %vm911_vm10 = vcmp.gt.f32.partialorder %v5203_v21, 20.0 }
 0x193   : > { %v3745_v17 = vpop.eup %3744  ;;  %v445_v44 = vmul.f32 %v4407_v24, %v314_v53  ;;  %v1044_v29 = vmin.f32 %v5267_v41, 20.0  ;;  %v1676_v56 = vmul.f32 %v3741_v28, %v1675_v26  ;;  %vm5277_vm4 = vcmp.lt.f32.partialorder %v1677_v54, 0.0004427343 }
 0x194   : > { %v3747_v38 = vpop.eup %3746  ;;  %v1673_v22 = vmul.f32 0.6931472, %v3745_v17  ;;  %v446_v35 = vmul.f32 %v4407_v24, %v315_v46  ;;  %v5283_v25 = vsel %vm912_vm3, %v5181_v48, %v1688_v19  ;;  %v188_v12 = vadd.f32 %v5271_v30, %v7442_v2 }
 0x195   : > { %v3749_v57 = vpop.eup %3748  ;;  %v1689_v36 = vadd.f32 1.0, %v3747_v38  ;;  %v1692_v43 = vmul.f32 -0.5, %v3747_v38  ;;  %651 = vadd.xlane.f32.xlu0 %v445_v44  ;;  %v1208_v33 = vmul.f32 1.442695, %v1044_v29  ;;  %vm3080_vm5 = vcmask 1041409   ;;  %v570_v29 = vpop.xlane.xlu1 %569 }
 0x196   : > { %v1679_v28 = vsel %vm5277_vm4, %v1676_v56, %v1673_v22  ;;  %v1707_v54 = vadd.f32 1.0, %v3749_v57  ;;  %v1710_v26 = vmul.f32 -0.5, %v3749_v57  ;;  %653 = vadd.xlane.f32.xlu1 %v446_v35  ;;  %v1695_v20 = vand.u32 2147483647, %v3747_v38 }
 0x197   : > { %v2575_v48 = vsel %vm911_vm10, %v5203_v21, %v1679_v28  ;;  %3752 = vlog2.f32 %v1689_v36  ;;  %v2894_v62 = vperm.slane %v5283_v25, %v4610_v49  ;;  %vm913_vm0 = vcmp.gt.f32.partialorder %v5233_v34, 20.0 }
 0x198   : > { %v3751_v0 = vpop.eup %3750  ;;  %v2892_v18 = vperm.slane %v2575_v48, %v4938_v47  ;;  %3754 = vlog2.f32 %v1707_v54  ;;  %v5297_v53 = vadd.f32 %v4558_v37, %v572_v6  ;;  %v1711_v19 = vadd.f32 1.0, %v1710_v26 }
 0x199   : > { %v1713_v46 = vand.u32 2147483647, %v3749_v57  ;;  %v1698_v17 = vadd.f32 1.0, %v3751_v0  ;;  %v1701_v44 = vmul.f32 -0.5, %v3751_v0  ;;  %v1693_v22 = vadd.f32 1.0, %v1692_v43 }
 0x19a   : > { %v2893_v21 = vsel %vm2861_vm15, %v2892_v18, %v2891_v61  ;;  %v316_v56 = vmax.f32 %v188_v12, 0.0  ;;  %3756 = vpow2.f32 %v1208_v33  ;;  %vm5304_vm6 = vcmp.lt.f32.partialorder %v1695_v20, 0.0004427343 }
 0x19b   : > { %v5302_v32 = vsel %vm3080_vm5, %v2893_v21, %v5019_v39  ;;  %vm915_vm3 = vcmp.gt.f32.partialorder %v5236_v51, 20.0  ;;  %3758 = vlog2.f32 %v1698_v17  ;;  %v1702_v25 = vadd.f32 1.0, %v1701_v44 }
 0x19c   : > { %7524 = vst [vmem:[#allocation24_spill] sm:$0xff] %v5302_v32  ;;  %v447_v36 = vmul.f32 %v4407_v24, %v316_v56  ;;  %v1046_v6 = vmin.f32 %v5297_v53, 20.0  ;;  %v5312_v61 = vadd.f32 %v4558_v37, %v570_v29  ;;  %v189_v43 = vadd.f32 %v5271_v30, %v7447_v3 }
 0x19d   : > { %v3753_v39 = vpop.eup %3752  ;;  %v1712_v12 = vmul.f32 %v3749_v57, %v1711_v19  ;;  %vm5316_vm10 = vcmp.lt.f32.partialorder %v1713_v46, 0.0004427343  ;;  %v191_v54 = vadd.f32 %v5271_v30, %v7448_v5  ;;  %v190_v26 = vadd.f32 %v5271_v30, %v7441_v4  ;;  %v574_v46 = vpop.xlane.xlu0 %573 }
 0x19e   : > { %v3755_v33 = vpop.eup %3754  ;;  %v1691_v48 = vmul.f32 0.6931472, %v3753_v39  ;;  %v1694_v20 = vmul.f32 %v3747_v38, %v1693_v22  ;;  %655 = vadd.xlane.f32.xlu2 %v447_v36  ;;  %v1212_v18 = vmul.f32 1.442695, %v1046_v6  ;;  %v1045_v17 = vmin.f32 %v5312_v61, 20.0 }
 0x19f   : > { %v1709_v44 = vmul.f32 0.6931472, %v3755_v33  ;;  %v1703_v29 = vmul.f32 %v3751_v0, %v1702_v25  ;;  %v1704_v57 = vand.u32 2147483647, %v3751_v0  ;;  %v317_v19 = vmax.f32 %v189_v43, 0.0  ;;  %v7529_v0 = vld [vmem:[#allocation23_spill] sm:$0xff]  ;;  %v578_v33 = vpop.xlane.xlu2 %577 }
 0x1a0   : > { %v3757_v21 = vpop.eup %3756  ;;  %v1697_v56 = vsel %vm5304_vm6, %v1694_v20, %v1691_v48  ;;  %3760 = vpow2.f32 %v1212_v18  ;;  %v1210_v32 = vmul.f32 1.442695, %v1045_v17  ;;  %v319_v5 = vmax.f32 %v191_v54, 0.0 }
 0x1a1   : > { %v3759_v3 = vpop.eup %3758  ;;  %v2577_v38 = vsel %vm913_vm0, %v5233_v34, %v1697_v56  ;;  %v1715_v22 = vsel %vm5316_vm10, %v1712_v12, %v1709_v44  ;;  %v1716_v36 = vadd.f32 1.0, %v3757_v21  ;;  %v318_v25 = vmax.f32 %v190_v26, 0.0 }
 0x1a2   : > { %v2895_v6 = vperm.slane %v2577_v38, %v7529_v0  ;;  %v1700_v43 = vmul.f32 0.6931472, %v3759_v3  ;;  %v1719_v39 = vmul.f32 -0.5, %v3757_v21  ;;  %v5334_v35 = vadd.f32 %v4558_v37, %v574_v46  ;;  %v576_v3 = vpop.xlane.xlu1 %575  ;;  %v7530_v38 = vld [vmem:[#allocation10_spill] sm:$0xff] }
 0x1a3   : > { %vm914_vm4 = vcmp.gt.f32.partialorder %v5247_v40, 20.0  ;;  %vm1705_vm5 = vcmp.lt.f32.partialorder %v1704_v57, 0.0004427343  ;;  %3762 = vlog2.f32 %v1716_v36  ;;  %v448_v54 = vmul.f32 %v4407_v24, %v317_v19 }
 0x1a4   : > { %v2896_v34 = vsel %vm2805_vm9, %v2895_v6, %v2894_v62  ;;  %v2579_v12 = vsel %vm915_vm3, %v5236_v51, %v1715_v22  ;;  %v1706_v28 = vsel %vm1705_vm5, %v1703_v29, %v1700_v43  ;;  %3764 = vpow2.f32 %v1210_v32 }
 0x1a5   : > { %v2578_v26 = vsel %vm914_vm4, %v5247_v40, %v1706_v28  ;;  %v1722_v48 = vand.u32 2147483647, %v3757_v21  ;;  %657 = vadd.xlane.f32.xlu0 %v448_v54  ;;  %v450_v20 = vmul.f32 %v4407_v24, %v319_v5  ;;  %v449_v18 = vmul.f32 %v4407_v24, %v318_v25 }
 0x1a6   : > { %v3761_v17 = vpop.eup %3760  ;;  %v2897_v44 = vperm.slane %v2578_v26, %v4626_v59  ;;  %v1720_v57 = vadd.f32 1.0, %v1719_v39  ;;  %v1047_v62 = vmin.f32 %v5334_v35, 20.0  ;;  %v5348_v19 = vadd.f32 %v4558_v37, %v578_v33 }
 0x1a7   : > { %v2899_v51 = vperm.slane %v2579_v12, %v4637_v31  ;;  %v1734_v32 = vadd.f32 1.0, %v3761_v17  ;;  %v1737_v29 = vmul.f32 -0.5, %v3761_v17  ;;  %661 = vadd.xlane.f32.xlu2 %v450_v20  ;;  %659 = vadd.xlane.f32.xlu1 %v449_v18  ;;  %v5352_v40 = vadd.f32 %v4558_v37, %v576_v3  ;;  %v580_v18 = vpop.xlane.xlu0 %579 }
 0x1a8   : > { %v2898_v5 = vsel %vm2809_vm12, %v2897_v44, %v2896_v34  ;;  %v1214_v46 = vmul.f32 1.442695, %v1047_v62  ;;  %v1049_v56 = vmin.f32 %v5348_v19, 20.0  ;;  %v192_v22 = vadd.f32 %v5271_v30, %v7530_v38 }
 0x1a9   : > { %v3763_v36 = vpop.eup %3762  ;;  %vm916_vm0 = vcmp.gt.f32.partialorder %v5267_v41, 20.0  ;;  %v2900_v25 = vsel %vm2813_vm13, %v2899_v51, %v2898_v5  ;;  %3766 = vlog2.f32 %v1734_v32  ;;  %v1738_v6 = vadd.f32 1.0, %v1737_v29 }
 0x1aa   : > { %v3765_v43 = vpop.eup %3764  ;;  %v1718_v39 = vmul.f32 0.6931472, %v3763_v36  ;;  %v1721_v54 = vmul.f32 %v3757_v21, %v1720_v57  ;;  %3768 = vpow2.f32 %v1214_v46  ;;  %v1218_v33 = vmul.f32 1.442695, %v1049_v56 }
 0x1ab   : > { %vm1723_vm6 = vcmp.lt.f32.partialorder %v1722_v48, 0.0004427343  ;;  %v1740_v34 = vand.u32 2147483647, %v3761_v17  ;;  %v1725_v12 = vadd.f32 1.0, %v3765_v43  ;;  %v1728_v28 = vmul.f32 -0.5, %v3765_v43 }
 0x1ac   : > { %v1724_v3 = vsel %vm1723_vm6, %v1721_v54, %v1718_v39  ;;  %vm918_vm3 = vcmp.gt.f32.partialorder %v5297_v53, 20.0  ;;  %3770 = vpow2.f32 %v1218_v33  ;;  %v1048_v26 = vmin.f32 %v5352_v40, 20.0  ;;  %v584_v39 = vpop.xlane.xlu2 %583 }
 0x1ad   : > { %v320_v20 = vmax.f32 %v192_v22, 0.0  ;;  %v2580_v44 = vsel %vm916_vm0, %v5267_v41, %v1724_v3  ;;  %v1739_v62 = vmul.f32 %v3761_v17, %v1738_v6  ;;  %3772 = vlog2.f32 %v1725_v12 }
 0x1ae   : > { %v1731_v21 = vand.u32 2147483647, %v3765_v43  ;;  %v2901_v48 = vperm.slane %v2580_v44, %v4623_v58  ;;  %v1216_v57 = vmul.f32 1.442695, %v1048_v26  ;;  %v194_v32 = vadd.f32 %v5271_v30, %v7439_v8 }
 0x1af   : > { %v451_v51 = vmul.f32 %v4407_v24, %v320_v20  ;;  %v3767_v29 = vpop.eup %3766  ;;  %vm5369_vm10 = vcmp.lt.f32.partialorder %v1740_v34, 0.0004427343  ;;  %v1729_v46 = vadd.f32 1.0, %v1728_v28  ;;  %v193_v41 = vadd.f32 %v5271_v30, %v7440_v7 }
 0x1b0   : > { %v5376_v17 = vadd.f32 %v4558_v37, %v580_v18  ;;  %v3769_v56 = vpop.eup %3768  ;;  %v2902_v22 = vsel %vm2817_vm14, %v2901_v48, %v2900_v25  ;;  %v1736_v36 = vmul.f32 0.6931472, %v3767_v29  ;;  %3774 = vpow2.f32 %v1216_v57 }
 0x1b1   : > { %663 = vadd.xlane.f32.xlu0 %v451_v51  ;;  %v322_v6 = vmax.f32 %v194_v32, 0.0  ;;  %vm917_vm4 = vcmp.gt.f32.partialorder %v5312_v61, 20.0  ;;  %v1743_v54 = vadd.f32 1.0, %v3769_v56  ;;  %v1746_v33 = vmul.f32 -0.5, %v3769_v56 }
 0x1b2   : > { %v321_v34 = vmax.f32 %v193_v41, 0.0  ;;  %v3771_v12 = vpop.eup %3770  ;;  %v1742_v28 = vsel %vm5369_vm10, %v1739_v62, %v1736_v36  ;;  %vm5382_vm5 = vcmp.lt.f32.partialorder %v1731_v21, 0.0004427343  ;;  %v1050_v26 = vmin.f32 %v5376_v17, 20.0 }
 0x1b3   : > { %v453_v25 = vmul.f32 %v4407_v24, %v322_v6  ;;  %v3773_v20 = vpop.eup %3772  ;;  %v1730_v18 = vmul.f32 %v3765_v43, %v1729_v46  ;;  %3776 = vlog2.f32 %v1743_v54  ;;  %v1749_v44 = vand.u32 2147483647, %v3769_v56  ;;  %v582_v6 = vpop.xlane.xlu1 %581 }
 0x1b4   : > { %v5389_v48 = vadd.f32 %v4558_v37, %v584_v39  ;;  %v1727_v57 = vmul.f32 0.6931472, %v3773_v20  ;;  %v1747_v51 = vadd.f32 1.0, %v1746_v33  ;;  %v1761_v32 = vadd.f32 1.0, %v3771_v12 }
 0x1b5   : > { %v1764_v29 = vmul.f32 -0.5, %v3771_v12  ;;  %667 = vadd.xlane.f32.xlu2 %v453_v25  ;;  %v2582_v62 = vsel %vm918_vm3, %v5297_v53, %v1742_v28  ;;  %v1767_v21 = vand.u32 2147483647, %v3771_v12  ;;  %v452_v5 = vmul.f32 %v4407_v24, %v321_v34 }
 0x1b6   : > { %v1220_v41 = vmul.f32 1.442695, %v1050_v26  ;;  %v3775_v36 = vpop.eup %3774  ;;  %v1733_v43 = vsel %vm5382_vm5, %v1730_v18, %v1727_v57  ;;  %vm919_vm0 = vcmp.gt.f32.partialorder %v5334_v35, 20.0  ;;  %3778 = vlog2.f32 %v1761_v32 }
 0x1b7   : > { %v1765_v46 = vadd.f32 1.0, %v1764_v29  ;;  %v2581_v39 = vsel %vm917_vm4, %v5312_v61, %v1733_v43  ;;  %vm5401_vm6 = vcmp.lt.f32.partialorder %v1749_v44, 0.0004427343  ;;  %v1752_v53 = vadd.f32 1.0, %v3775_v36  ;;  %665 = vadd.xlane.f32.xlu1 %v452_v5 }
 0x1b8   : > { %v1755_v33 = vmul.f32 -0.5, %v3775_v36  ;;  %v2905_v34 = vperm.slane %v2582_v62, %v4788_v27  ;;  %v2903_v28 = vperm.slane %v2581_v39, %v4629_v60  ;;  %v1748_v3 = vmul.f32 %v3769_v56, %v1747_v51 }
 0x1b9   : > { %3780 = vpow2.f32 %v1220_v41  ;;  %v3777_v25 = vpop.eup %3776  ;;  %vm5407_vm3 = vcmp.lt.f32.partialorder %v1767_v21, 0.0004427343  ;;  %v1052_v61 = vmin.f32 %v5389_v48, 20.0  ;;  %v5413_v20 = vadd.f32 %v4558_v37, %v582_v6 }
 0x1ba   : > { %3782 = vlog2.f32 %v1752_v53  ;;  %v2904_v18 = vsel %vm2821_vm1, %v2903_v28, %v2902_v22  ;;  %v1745_v44 = vmul.f32 0.6931472, %v3777_v25  ;;  %v1766_v57 = vmul.f32 %v3771_v12, %v1765_v46  ;;  %v7539_v53 = vld [vmem:[#allocation25_spill] sm:$0xff] }
 0x1bb   : > { %v195_v32 = vadd.f32 %v5271_v30, %v7438_v9  ;;  %v2906_v56 = vsel %vm2825_vm7, %v2905_v34, %v2904_v18  ;;  %v1756_v51 = vadd.f32 1.0, %v1755_v33  ;;  %v1758_v29 = vand.u32 2147483647, %v3775_v36  ;;  %v586_v18 = vpop.xlane.xlu0 %585 }
 0x1bc   : > { %v1224_v62 = vmul.f32 1.442695, %v1052_v61  ;;  %v3779_v21 = vpop.eup %3778  ;;  %v1751_v5 = vsel %vm5401_vm6, %v1748_v3, %v1745_v44  ;;  %v1051_v41 = vmin.f32 %v5413_v20, 20.0  ;;  %v197_v22 = vadd.f32 %v5271_v30, %v4317_v11 }
 0x1bd   : > { %v323_v43 = vmax.f32 %v195_v32, 0.0  ;;  %v2583_v12 = vsel %vm919_vm0, %v5334_v35, %v1751_v5  ;;  %v1763_v46 = vmul.f32 0.6931472, %v3779_v21  ;;  %v196_v6 = vadd.f32 %v5271_v30, %v4311_v10  ;;  %v590_v5 = vpop.xlane.xlu2 %589 }
 0x1be   : > { %3784 = vpow2.f32 %v1224_v62  ;;  %v2907_v33 = vperm.slane %v2583_v12, %v7539_v53  ;;  %v1222_v54 = vmul.f32 1.442695, %v1051_v41  ;;  %v325_v28 = vmax.f32 %v197_v22, 0.0 }
 0x1bf   : > { %v3781_v39 = vpop.eup %3780  ;;  %v454_v34 = vmul.f32 %v4407_v24, %v323_v43  ;;  %vm921_vm10 = vcmp.gt.f32.partialorder %v5348_v19, 20.0  ;;  %v1769_v25 = vsel %vm5407_vm3, %v1766_v57, %v1763_v46  ;;  %v1757_v62 = vmul.f32 %v3775_v36, %v1756_v51 }
 0x1c0   : > { %v3783_v3 = vpop.eup %3782  ;;  %v1770_v61 = vadd.f32 1.0, %v3781_v39  ;;  %v1773_v35 = vmul.f32 -0.5, %v3781_v39  ;;  %v2908_v44 = vsel %vm2829_vm8, %v2907_v33, %v2906_v56  ;;  %3786 = vpow2.f32 %v1222_v54 }
 0x1c1   : > { %v1754_v32 = vmul.f32 0.6931472, %v3783_v3  ;;  %669 = vadd.xlane.f32.xlu0 %v454_v34  ;;  %v2585_v21 = vsel %vm921_vm10, %v5348_v19, %v1769_v25  ;;  %vm920_vm4 = vcmp.gt.f32.partialorder %v5352_v40, 20.0  ;;  %vm1759_vm5 = vcmp.lt.f32.partialorder %v1758_v29, 0.0004427343  ;;  %v588_v19 = vpop.xlane.xlu1 %587 }
 0x1c2   : > { %3788 = vlog2.f32 %v1770_v61  ;;  %v456_v26 = vmul.f32 %v4407_v24, %v325_v28  ;;  %v324_v57 = vmax.f32 %v196_v6, 0.0  ;;  %v5439_v43 = vadd.f32 %v4558_v37, %v586_v18 }
 0x1c3   : > { %v1760_v41 = vsel %vm1759_vm5, %v1757_v62, %v1754_v32  ;;  %vm922_vm0 = vcmp.gt.f32.partialorder %v5376_v17, 20.0  ;;  %v1774_v36 = vadd.f32 1.0, %v1773_v35  ;;  %v1776_v51 = vand.u32 2147483647, %v3781_v39 }
 0x1c4   : > { %v3785_v22 = vpop.eup %3784  ;;  %v2584_v56 = vsel %vm920_vm4, %v5352_v40, %v1760_v41  ;;  %673 = vadd.xlane.f32.xlu2 %v456_v26  ;;  %v5445_v33 = vadd.f32 %v4558_v37, %v590_v5  ;;  %v2911_v6 = vperm.slane %v2585_v21, %v4821_v55  ;;  %v455_v34 = vmul.f32 %v4407_v24, %v324_v57 }
 0x1c5   : > { %v2909_v12 = vperm.slane %v2584_v56, %v7508_v52  ;;  %v1788_v29 = vadd.f32 1.0, %v3785_v22  ;;  %v1791_v46 = vmul.f32 -0.5, %v3785_v22  ;;  %v1794_v54 = vand.u32 2147483647, %v3785_v22 }
 0x1c6   : > { %v1053_v40 = vmin.f32 %v5439_v43, 20.0  ;;  %v3787_v28 = vpop.eup %3786  ;;  %v5452_v61 = vadd.f32 %v4558_v37, %v588_v19  ;;  %vm5454_vm6 = vcmp.lt.f32.partialorder %v1776_v51, 0.0004427343  ;;  %vm7542_vm3 = vcmask 654912   ;;  %671 = vadd.xlane.f32.xlu1 %v455_v34 }
 0x1c7   : > { %v2910_v3 = vsel %vm7416_vm11, %v2909_v12, %v2908_v44  ;;  %3790 = vlog2.f32 %v1788_v29  ;;  %v1792_v25 = vadd.f32 1.0, %v1791_v46  ;;  %v1779_v62 = vadd.f32 1.0, %v3787_v28  ;;  %v592_v46 = vpop.xlane.xlu0 %591 }
 0x1c8   : > { %v3789_v35 = vpop.eup %3788  ;;  %v2912_v32 = vsel %vm7542_vm3, %v2911_v6, %v2910_v3  ;;  %v1782_v21 = vmul.f32 -0.5, %v3787_v28  ;;  %v1775_v41 = vmul.f32 %v3781_v39, %v1774_v36  ;;  %v1226_v26 = vmul.f32 1.442695, %v1053_v40 }
 0x1c9   : > { %v1772_v5 = vmul.f32 0.6931472, %v3789_v35  ;;  %v1055_v44 = vmin.f32 %v5445_v33, 20.0  ;;  %v1793_v57 = vmul.f32 %v3785_v22, %v1792_v25  ;;  %vm5460_vm10 = vcmp.lt.f32.partialorder %v1794_v54, 0.0004427343  ;;  %v7545_v22 = vld [vmem:[#allocation14_spill] sm:$0xff] }
 0x1ca   : > { %3792 = vlog2.f32 %v1779_v62  ;;  %v1785_v51 = vand.u32 2147483647, %v3787_v28  ;;  %v1054_v29 = vmin.f32 %v5452_v61, 20.0  ;;  %v1783_v36 = vadd.f32 1.0, %v1782_v21  ;;  %v596_v21 = vpop.xlane.xlu2 %595 }
 0x1cb   : > { %v1778_v19 = vsel %vm5454_vm6, %v1775_v41, %v1772_v5  ;;  %3794 = vpow2.f32 %v1226_v26  ;;  %v1230_v12 = vmul.f32 1.442695, %v1055_v44  ;;  %v198_v6 = vadd.f32 %v5271_v30, %v7545_v22 }
 0x1cc   : > { %v2586_v39 = vsel %vm922_vm0, %v5376_v17, %v1778_v19  ;;  %v200_v54 = vadd.f32 %v5271_v30, %v7444_v14  ;;  %v1228_v3 = vmul.f32 1.442695, %v1054_v29  ;;  %v199_v25 = vadd.f32 %v5271_v30, %v7443_v13 }
 0x1cd   : > { %v3791_v34 = vpop.eup %3790  ;;  %v2913_v40 = vperm.slane %v2586_v39, %v4813_v23  ;;  %3796 = vpow2.f32 %v1230_v12  ;;  %v326_v18 = vmax.f32 %v198_v6, 0.0  ;;  %v5478_v17 = vadd.f32 %v4558_v37, %v592_v46 }
 0x1ce   : > { %v1790_v35 = vmul.f32 0.6931472, %v3791_v34  ;;  %v328_v62 = vmax.f32 %v200_v54, 0.0  ;;  %vm7546_vm4 = vcmask 720512   ;;  %3798 = vpow2.f32 %v1228_v3 }
 0x1cf   : > { %v2914_v5 = vsel %vm7546_vm4, %v2913_v40, %v2912_v32  ;;  %v327_v41 = vmax.f32 %v199_v25, 0.0  ;;  %v1784_v19 = vmul.f32 %v3787_v28, %v1783_v36  ;;  %v457_v12 = vmul.f32 %v4407_v24, %v326_v18 }
 0x1d0   : > { %v3793_v26 = vpop.eup %3792  ;;  %v1796_v44 = vsel %vm5460_vm10, %v1793_v57, %v1790_v35  ;;  %v459_v29 = vmul.f32 %v4407_v24, %v328_v62  ;;  %v1056_v46 = vmin.f32 %v5478_v17, 20.0  ;;  %v5488_v34 = vadd.f32 %v4558_v37, %v596_v21 }
 0x1d1   : > { %v3795_v39 = vpop.eup %3794  ;;  %v1781_v6 = vmul.f32 0.6931472, %v3793_v26  ;;  %v458_v54 = vmul.f32 %v4407_v24, %v327_v41  ;;  %vm924_vm5 = vcmp.gt.f32.partialorder %v5389_v48, 20.0  ;;  %vm1786_vm0 = vcmp.lt.f32.partialorder %v1785_v51, 0.0004427343  ;;  %675 = vadd.xlane.f32.xlu0 %v457_v12 }
 0x1d2   : > { %v1797_v32 = vadd.f32 1.0, %v3795_v39  ;;  %v1800_v56 = vmul.f32 -0.5, %v3795_v39  ;;  %679 = vadd.xlane.f32.xlu2 %v459_v29  ;;  %v2588_v57 = vsel %vm924_vm5, %v5389_v48, %v1796_v44  ;;  %vm923_vm6 = vcmp.gt.f32.partialorder %v5413_v20, 20.0 }
 0x1d3   : > { %v3797_v28 = vpop.eup %3796  ;;  %v1787_v36 = vsel %vm1786_vm0, %v1784_v19, %v1781_v6  ;;  %v1803_v40 = vand.u32 2147483647, %v3795_v39  ;;  %677 = vadd.xlane.f32.xlu1 %v458_v54  ;;  %v1232_v25 = vmul.f32 1.442695, %v1056_v46  ;;  %vm925_vm3 = vcmp.gt.f32.partialorder %v5439_v43, 20.0  ;;  %v594_v19 = vpop.xlane.xlu1 %593 }
 0x1d4   : > { %v2587_v3 = vsel %vm923_vm6, %v5413_v20, %v1787_v36  ;;  %3800 = vlog2.f32 %v1797_v32  ;;  %v3799_v35 = vpop.eup %3798  ;;  %v1815_v51 = vadd.f32 1.0, %v3797_v28  ;;  %v1818_v62 = vmul.f32 -0.5, %v3797_v28 }
 0x1d5   : > { %v2915_v18 = vperm.slane %v2587_v3, %v4798_v63  ;;  %v1058_v21 = vmin.f32 %v5488_v34, 20.0  ;;  %v2917_v48 = vperm.slane %v2588_v57, %v4899_v45  ;;  %v1801_v41 = vadd.f32 1.0, %v1800_v56 }
 0x1d6   : > { %v1806_v26 = vadd.f32 1.0, %v3799_v35  ;;  %v1809_v44 = vmul.f32 -0.5, %v3799_v35  ;;  %vm7547_vm10 = vcmask 786112   ;;  %vm5499_vm4 = vcmp.lt.f32.partialorder %v1803_v40, 0.0004427343 }
 0x1d7   : > { %v2916_v12 = vsel %vm7547_vm10, %v2915_v18, %v2914_v5  ;;  %3802 = vlog2.f32 %v1815_v51  ;;  %v1821_v29 = vand.u32 2147483647, %v3797_v28  ;;  %vm7550_vm5 = vcmask 851712  }
 0x1d8   : > { %v2918_v6 = vsel %vm7550_vm5, %v2917_v48, %v2916_v12  ;;  %vm927_vm0 = vcmp.gt.f32.partialorder %v5445_v33, 20.0  ;;  %v1819_v54 = vadd.f32 1.0, %v1818_v62  ;;  %3804 = vlog2.f32 %v1806_v26 }
 0x1d9   : > { %v1812_v46 = vand.u32 2147483647, %v3799_v35  ;;  %vm926_vm6 = vcmp.gt.f32.partialorder %v5452_v61, 20.0  ;;  %v1810_v32 = vadd.f32 1.0, %v1809_v44  ;;  %3806 = vpow2.f32 %v1232_v25 }
 0x1da   : > { %v1236_v56 = vmul.f32 1.442695, %v1058_v21  ;;  %v5507_v5 = vadd.f32 %v4558_v37, %v594_v19  ;;  %v3801_v57 = vpop.eup %3800  ;;  %v1802_v36 = vmul.f32 %v3795_v39, %v1801_v41  ;;  %v201_v40 = vadd.f32 %v5271_v30, %v7445_v15 }
 0x1db   : > { %v203_v3 = vadd.f32 %v5271_v30, %v7521_v1  ;;  %v202_v18 = vadd.f32 %v5271_v30, %v7446_v16  ;;  %v1799_v51 = vmul.f32 0.6931472, %v3801_v57  ;;  %vm5515_vm10 = vcmp.lt.f32.partialorder %v1821_v29, 0.0004427343  ;;  %v598_v29 = vpop.xlane.xlu0 %597 }
 0x1dc   : > { %3808 = vpow2.f32 %v1236_v56  ;;  %v1057_v25 = vmin.f32 %v5507_v5, 20.0  ;;  %v1820_v21 = vmul.f32 %v3797_v28, %v1819_v54  ;;  %v329_v48 = vmax.f32 %v201_v40, 0.0 }
 0x1dd   : > { %v331_v39 = vmax.f32 %v203_v3, 0.0  ;;  %v330_v41 = vmax.f32 %v202_v18, 0.0  ;;  %v3803_v26 = vpop.eup %3802  ;;  %v1805_v44 = vsel %vm5499_vm4, %v1802_v36, %v1799_v51  ;;  %v1811_v19 = vmul.f32 %v3799_v35, %v1810_v32  ;;  %v602_v3 = vpop.xlane.xlu2 %601 }
 0x1de   : > { %vm5522_vm5 = vcmp.lt.f32.partialorder %v1812_v46, 0.0004427343  ;;  %v1234_v30 = vmul.f32 1.442695, %v1057_v25  ;;  %v3805_v57 = vpop.eup %3804  ;;  %v2589_v56 = vsel %vm925_vm3, %v5439_v43, %v1805_v44  ;;  %v1817_v28 = vmul.f32 0.6931472, %v3803_v26 }
 0x1df   : > { %v460_v54 = vmul.f32 %v4407_v24, %v329_v48  ;;  %v462_v40 = vmul.f32 %v4407_v24, %v331_v39  ;;  %v3807_v20 = vpop.eup %3806  ;;  %v2919_v35 = vperm.slane %v2589_v56, %v4882_v42  ;;  %v1808_v46 = vmul.f32 0.6931472, %v3805_v57 }
 0x1e0   : > { %3810 = vpow2.f32 %v1234_v30  ;;  %v461_v32 = vmul.f32 %v4407_v24, %v330_v41  ;;  %v1823_v36 = vsel %vm5515_vm10, %v1820_v21, %v1817_v28  ;;  %v1824_v18 = vadd.f32 1.0, %v3807_v20  ;;  %v600_v21 = vpop.xlane.xlu1 %599 }
 0x1e1   : > { %v1827_v51 = vmul.f32 -0.5, %v3807_v20  ;;  %681 = vadd.xlane.f32.xlu0 %v460_v54  ;;  %685 = vadd.xlane.f32.xlu2 %v462_v40  ;;  %v5536_v43 = vadd.f32 %v4558_v37, %v598_v29  ;;  %v2920_v48 = vsel %vm7417_vm2, %v2919_v35, %v2918_v6  ;;  %v2591_v39 = vsel %vm927_vm0, %v5445_v33, %v1823_v36 }
 0x1e2   : > { %v3809_v25 = vpop.eup %3808  ;;  %v1814_v41 = vsel %vm5522_vm5, %v1811_v19, %v1808_v46  ;;  %683 = vadd.xlane.f32.xlu1 %v461_v32  ;;  %v5545_v62 = vadd.f32 %v4558_v37, %v602_v3  ;;  %3812 = vlog2.f32 %v1824_v18  ;;  %vm928_vm3 = vcmp.gt.f32.partialorder %v5478_v17, 20.0 }
 0x1e3   : > { %v2590_v26 = vsel %vm926_vm6, %v5452_v61, %v1814_v41  ;;  %v1842_v6 = vadd.f32 1.0, %v3809_v25  ;;  %v1845_v30 = vmul.f32 -0.5, %v3809_v25  ;;  %v2923_v33 = vperm.slane %v2591_v39, %v4938_v47 }
 0x1e4   : > { %v2921_v44 = vperm.slane %v2590_v26, %v4870_v50  ;;  %v1828_v12 = vadd.f32 1.0, %v1827_v51  ;;  %v1059_v19 = vmin.f32 %v5536_v43, 20.0  ;;  %v5555_v29 = vadd.f32 %v4558_v37, %v600_v21  ;;  %v5565_v26 = vld [vmem:[%s4396_s26] sm:$0xff] }
 0x1e5   : > { %vm7555_vm4 = vcmask 982912   ;;  %v1830_v28 = vand.u32 2147483647, %v3807_v20  ;;  %3814 = vlog2.f32 %v1842_v6  ;;  %v1061_v61 = vmin.f32 %v5545_v62, 20.0 }
 0x1e6   : > { %v3811_v57 = vpop.eup %3810  ;;  %v2922_v56 = vsel %vm7555_vm4, %v2921_v44, %v2920_v48  ;;  %vm930_vm0 = vcmp.gt.f32.partialorder %v5488_v34, 20.0  ;;  %v1846_v40 = vadd.f32 1.0, %v1845_v30  ;;  %v1848_v46 = vand.u32 2147483647, %v3809_v25 }
 0x1e7   : > { %v5560_v54 = vsel %vm2861_vm15, %v2923_v33, %v2922_v56  ;;  %v1833_v3 = vadd.f32 1.0, %v3811_v57  ;;  %v1836_v35 = vmul.f32 -0.5, %v3811_v57  ;;  %v1238_v32 = vmul.f32 1.442695, %v1059_v19  ;;  %v604_v33 = vpop.xlane.xlu0 %603 }
 0x1e8   : > { %v1242_v36 = vmul.f32 1.442695, %v1061_v61  ;;  %v3813_v18 = vpop.eup %3812  ;;  %v1829_v51 = vmul.f32 %v3807_v20, %v1828_v12  ;;  %v1839_v48 = vand.u32 2147483647, %v3811_v57  ;;  %v1060_v39 = vmin.f32 %v5555_v29, 20.0  ;;  %v608_v61 = vpop.xlane.xlu2 %607 }
 0x1e9   : > { %3816 = vlog2.f32 %v1833_v3  ;;  %v1826_v41 = vmul.f32 0.6931472, %v3813_v18  ;;  %v1837_v21 = vadd.f32 1.0, %v1836_v35  ;;  %v90_v44 = vrot.slane %v5565_v26, 6  ;;  %v606_v3 = vpop.xlane.xlu1 %605 }
 0x1ea   : > { %3818 = vpow2.f32 %v1238_v32  ;;  %vm1831_vm6 = vcmp.lt.f32.partialorder %v1830_v28, 0.0004427343  ;;  %v1847_v6 = vmul.f32 %v3809_v25, %v1846_v40  ;;  %v1240_v30 = vmul.f32 1.442695, %v1060_v39 }
 0x1eb   : > { %3820 = vpow2.f32 %v1242_v36  ;;  %v3815_v19 = vpop.eup %3814  ;;  %v1832_v56 = vsel %vm1831_vm6, %v1829_v51, %v1826_v41  ;;  %vm5568_vm10 = vcmp.lt.f32.partialorder %v1848_v46, 0.0004427343  ;;  %vm929_vm5 = vcmp.gt.f32.partialorder %v5507_v5, 20.0 }
 0x1ec   : > { %v5573_v12 = vperm.slane %v90_v44, 0  ;;  %v2592_v28 = vsel %vm928_vm3, %v5478_v17, %v1832_v56  ;;  %v1844_v25 = vmul.f32 0.6931472, %v3815_v19  ;;  %vm5578_vm4 = vcmp.lt.f32.partialorder %v1839_v48, 0.0004427343 }
 0x1ed   : > { %3822 = vpow2.f32 %v1240_v30  ;;  %v1838_v35 = vmul.f32 %v3811_v57, %v1837_v21  ;;  %v5587_v36 = vadd.f32 %v4558_v37, %v604_v33  ;;  %v2925_v51 = vperm.slane %v2592_v28, %v4610_v49  ;;  %v7560_v30 = vld [vmem:[#allocation7_spill] sm:$0xff]  ;;  %v7565_v49 = vld [vmem:[#allocation9_spill] sm:$0xff] }
 0x1ee   : > { %v204_v46 = vadd.f32 %v5573_v12, %v7442_v2  ;;  %v206_v32 = vadd.f32 %v5573_v12, %v7441_v4  ;;  %v1850_v17 = vsel %vm5568_vm10, %v1847_v6, %v1844_v25  ;;  %v5593_v48 = vadd.f32 %v4558_v37, %v608_v61 }
 0x1ef   : > { %v3817_v18 = vpop.eup %3816  ;;  %v5596_v57 = vadd.f32 %v4558_v37, %v606_v3  ;;  %v2594_v41 = vsel %vm930_vm0, %v5488_v34, %v1850_v17  ;;  %v205_v33 = vadd.f32 %v5573_v12, %v7560_v30  ;;  %vm931_vm3 = vcmp.gt.f32.partialorder %v5536_v43, 20.0  ;;  %v610_v14 = vpop.xlane.xlu0 %609 }
 0x1f0   : > { %v3819_v39 = vpop.eup %3818  ;;  %v1835_v21 = vmul.f32 0.6931472, %v3817_v18  ;;  %v332_v44 = vmax.f32 %v204_v46, 0.0  ;;  %v334_v28 = vmax.f32 %v206_v32, 0.0  ;;  %v2928_v15 = vperm.slane %v2594_v41, %v4626_v59 }
 0x1f1   : > { %v3821_v19 = vpop.eup %3820  ;;  %v1851_v56 = vadd.f32 1.0, %v3819_v39  ;;  %v1854_v20 = vmul.f32 -0.5, %v3819_v39  ;;  %v1857_v6 = vand.u32 2147483647, %v3819_v39  ;;  %v1062_v40 = vmin.f32 %v5587_v36, 20.0 }
 0x1f2   : > { %v1841_v61 = vsel %vm5578_vm4, %v1838_v35, %v1835_v21  ;;  %v1869_v3 = vadd.f32 1.0, %v3821_v19  ;;  %v1872_v25 = vmul.f32 -0.5, %v3821_v19  ;;  %v1875_v1 = vand.u32 2147483647, %v3821_v19 }
 0x1f3   : > { %v3823_v16 = vpop.eup %3822  ;;  %v2593_v34 = vsel %vm929_vm5, %v5507_v5, %v1841_v61  ;;  %3824 = vlog2.f32 %v1851_v56  ;;  %v1855_v46 = vadd.f32 1.0, %v1854_v20  ;;  %v1064_v35 = vmin.f32 %v5593_v48, 20.0  ;;  %v612_v56 = vpop.xlane.xlu1 %611 }
 0x1f4   : > { %v2926_v18 = vperm.slane %v2593_v34, %v7529_v0  ;;  %3826 = vlog2.f32 %v1869_v3  ;;  %vm5613_vm0 = vcmp.lt.f32.partialorder %v1857_v6, 0.0004427343  ;;  %vm933_vm6 = vcmp.gt.f32.partialorder %v5545_v62, 20.0 }
 0x1f5   : > { %v1873_v17 = vadd.f32 1.0, %v1872_v25  ;;  %v1860_v41 = vadd.f32 1.0, %v3823_v16  ;;  %v1863_v5 = vmul.f32 -0.5, %v3823_v16  ;;  %vm5619_vm10 = vcmp.lt.f32.partialorder %v1875_v1, 0.0004427343 }
 0x1f6   : > { %v2927_v21 = vsel %vm2805_vm9, %v2926_v18, %v2925_v51  ;;  %v463_v20 = vmul.f32 %v4407_v24, %v332_v44  ;;  %v465_v61 = vmul.f32 %v4407_v24, %v334_v28  ;;  %v1856_v3 = vmul.f32 %v3819_v39, %v1855_v46 }
 0x1f7   : > { %v2929_v6 = vsel %vm2809_vm12, %v2928_v15, %v2927_v21  ;;  %3828 = vlog2.f32 %v1860_v41  ;;  %v1866_v34 = vand.u32 2147483647, %v3823_v16  ;;  %v1864_v13 = vadd.f32 1.0, %v1863_v5 }
 0x1f8   : > { %687 = vadd.xlane.f32.xlu0 %v463_v20  ;;  %691 = vadd.xlane.f32.xlu2 %v465_v61  ;;  %v333_v25 = vmax.f32 %v205_v33, 0.0  ;;  %v1244_v59 = vmul.f32 1.442695, %v1062_v40  ;;  %v1248_v51 = vmul.f32 1.442695, %v1064_v35  ;;  %v1874_v18 = vmul.f32 %v3821_v19, %v1873_v17  ;;  %v614_v61 = vpop.xlane.xlu2 %613 }
 0x1f9   : > { %v3825_v1 = vpop.eup %3824  ;;  %v1063_v22 = vmin.f32 %v5596_v57, 20.0  ;;  %v207_v44 = vadd.f32 %v5573_v12, %v7565_v49  ;;  %v91_v39 = vrot.slane %v5565_v26, 7  ;;  %v5632_v41 = vadd.f32 %v4558_v37, %v610_v14 }
 0x1fa   : > { %v3827_v28 = vpop.eup %3826  ;;  %v1853_v15 = vmul.f32 0.6931472, %v3825_v1  ;;  %v464_v46 = vmul.f32 %v4407_v24, %v333_v25  ;;  %3830 = vpow2.f32 %v1244_v59  ;;  %v1865_v17 = vmul.f32 %v3823_v16, %v1864_v13 }
 0x1fb   : > { %v1871_v33 = vmul.f32 0.6931472, %v3827_v28  ;;  %3832 = vpow2.f32 %v1248_v51  ;;  %v1246_v40 = vmul.f32 1.442695, %v1063_v22  ;;  %v335_v35 = vmax.f32 %v207_v44, 0.0 }
 0x1fc   : > { %v1859_v19 = vsel %vm5613_vm0, %v1856_v3, %v1853_v15  ;;  %689 = vadd.xlane.f32.xlu1 %v464_v46  ;;  %v5636_v5 = vperm.slane %v91_v39, 0  ;;  %v1065_v26 = vmin.f32 %v5632_v41, 20.0  ;;  %vm932_vm5 = vcmp.gt.f32.partialorder %v5555_v29, 20.0 }
 0x1fd   : > { %v3829_v21 = vpop.eup %3828  ;;  %v2595_v59 = vsel %vm931_vm3, %v5536_v43, %v1859_v19  ;;  %v1877_v14 = vsel %vm5619_vm10, %v1874_v18, %v1871_v33  ;;  %3834 = vpow2.f32 %v1246_v40  ;;  %v466_v22 = vmul.f32 %v4407_v24, %v335_v35 }
 0x1fe   : > { %v2930_v32 = vperm.slane %v2595_v59, %v4637_v31  ;;  %v2597_v13 = vsel %vm933_vm6, %v5545_v62, %v1877_v14  ;;  %v1862_v16 = vmul.f32 0.6931472, %v3829_v21  ;;  %v221_v20 = vadd.f32 %v5636_v5, %v7560_v30 }
 0x1ff   : > { %v2934_v3 = vperm.slane %v2597_v13, %v4629_v60  ;;  %vm1867_vm4 = vcmp.lt.f32.partialorder %v1866_v34, 0.0004427343  ;;  %v220_v43 = vadd.f32 %v5636_v5, %v7442_v2  ;;  %v1250_v18 = vmul.f32 1.442695, %v1065_v26 }
 0x200   : > { %v3831_v25 = vpop.eup %3830  ;;  %v2931_v51 = vsel %vm2813_vm13, %v2930_v32, %v2929_v6  ;;  %v1868_v1 = vsel %vm1867_vm4, %v1865_v17, %v1862_v16  ;;  %693 = vadd.xlane.f32.xlu0 %v466_v22  ;;  %v349_v62 = vmax.f32 %v221_v20, 0.0  ;;  %v5658_v15 = vadd.f32 %v4558_v37, %v614_v61 }
 0x201   : > { %v3833_v44 = vpop.eup %3832  ;;  %v2596_v30 = vsel %vm932_vm5, %v5555_v29, %v1868_v1  ;;  %v1878_v39 = vadd.f32 1.0, %v3831_v25  ;;  %v1881_v28 = vmul.f32 -0.5, %v3831_v25  ;;  %v5662_v40 = vadd.f32 %v4558_v37, %v612_v56  ;;  %v616_v1 = vpop.xlane.xlu0 %615 }
 0x202   : > { %v2932_v34 = vperm.slane %v2596_v30, %v4623_v58  ;;  %v1896_v46 = vadd.f32 1.0, %v3833_v44  ;;  %v1899_v33 = vmul.f32 -0.5, %v3833_v44  ;;  %v1884_v35 = vand.u32 2147483647, %v3831_v25 }
 0x203   : > { %v3835_v6 = vpop.eup %3834  ;;  %3836 = vlog2.f32 %v1878_v39  ;;  %v1902_v19 = vand.u32 2147483647, %v3833_v44  ;;  %v480_v17 = vmul.f32 %v4407_v24, %v349_v62  ;;  %v1882_v26 = vadd.f32 1.0, %v1881_v28 }
 0x204   : > { %v2933_v29 = vsel %vm2817_vm14, %v2932_v34, %v2931_v51  ;;  %3838 = vlog2.f32 %v1896_v46  ;;  %v1900_v21 = vadd.f32 1.0, %v1899_v33  ;;  %vm934_vm3 = vcmp.gt.f32.partialorder %v5587_v36, 20.0 }
 0x205   : > { %v2935_v59 = vsel %vm2821_vm1, %v2934_v3, %v2933_v29  ;;  %v1887_v14 = vadd.f32 1.0, %v3835_v6  ;;  %721 = vadd.xlane.f32.xlu2 %v480_v17  ;;  %vm936_vm0 = vcmp.gt.f32.partialorder %v5593_v48, 20.0  ;;  %v1890_v22 = vmul.f32 -0.5, %v3835_v6 }
 0x206   : > { %v348_v32 = vmax.f32 %v220_v43, 0.0  ;;  %3840 = vpow2.f32 %v1250_v18  ;;  %vm5669_vm6 = vcmp.lt.f32.partialorder %v1884_v35, 0.0004427343  ;;  %vm5673_vm10 = vcmp.lt.f32.partialorder %v1902_v19, 0.0004427343 }
 0x207   : > { %3842 = vlog2.f32 %v1887_v14  ;;  %v1067_v20 = vmin.f32 %v5658_v15, 20.0  ;;  %v1883_v61 = vmul.f32 %v3831_v25, %v1882_v26  ;;  %v1901_v3 = vmul.f32 %v3833_v44, %v1900_v21 }
 0x208   : > { %v479_v56 = vmul.f32 %v4407_v24, %v348_v32  ;;  %v1066_v51 = vmin.f32 %v5662_v40, 20.0  ;;  %v1893_v62 = vand.u32 2147483647, %v3835_v6  ;;  %v222_v30 = vadd.f32 %v5636_v5, %v7441_v4 }
 0x209   : > { %v3837_v43 = vpop.eup %3836  ;;  %v1254_v18 = vmul.f32 1.442695, %v1067_v20  ;;  %v223_v39 = vadd.f32 %v5636_v5, %v7565_v49  ;;  %v1891_v46 = vadd.f32 1.0, %v1890_v22  ;;  %v208_v44 = vadd.f32 %v5573_v12, %v7530_v38 }
 0x20a   : > { %v3839_v28 = vpop.eup %3838  ;;  %v1880_v34 = vmul.f32 0.6931472, %v3837_v43  ;;  %719 = vadd.xlane.f32.xlu1 %v479_v56  ;;  %v1252_v25 = vmul.f32 1.442695, %v1066_v51  ;;  %v350_v35 = vmax.f32 %v222_v30, 0.0  ;;  %v5687_v19 = vadd.f32 %v4558_v37, %v616_v1 }
 0x20b   : > { %v1898_v33 = vmul.f32 0.6931472, %v3839_v28  ;;  %3844 = vpow2.f32 %v1254_v18  ;;  %v351_v49 = vmax.f32 %v223_v39, 0.0  ;;  %v336_v26 = vmax.f32 %v208_v44, 0.0 }
 0x20c   : > { %v3841_v17 = vpop.eup %3840  ;;  %v1886_v29 = vsel %vm5669_vm6, %v1883_v61, %v1880_v34  ;;  %3846 = vpow2.f32 %v1252_v25  ;;  %vm935_vm5 = vcmp.gt.f32.partialorder %v5596_v57, 20.0  ;;  %v1892_v13 = vmul.f32 %v3835_v6, %v1891_v46 }
 0x20d   : > { %v3843_v21 = vpop.eup %3842  ;;  %v2598_v14 = vsel %vm934_vm3, %v5587_v36, %v1886_v29  ;;  %v1904_v22 = vsel %vm5673_vm10, %v1901_v3, %v1898_v33  ;;  %v1905_v32 = vadd.f32 1.0, %v3841_v17  ;;  %v1908_v20 = vmul.f32 -0.5, %v3841_v17 }
 0x20e   : > { %v2936_v56 = vperm.slane %v2598_v14, %v4788_v27  ;;  %v1889_v51 = vmul.f32 0.6931472, %v3843_v21  ;;  %v2600_v61 = vsel %vm936_vm0, %v5593_v48, %v1904_v22  ;;  %vm1894_vm4 = vcmp.lt.f32.partialorder %v1893_v62, 0.0004427343  ;;  %v618_v21 = vpop.xlane.xlu1 %617 }
 0x20f   : > { %3848 = vlog2.f32 %v1905_v32  ;;  %v481_v1 = vmul.f32 %v4407_v24, %v350_v35  ;;  %vm937_vm3 = vcmp.gt.f32.partialorder %v5632_v41, 20.0  ;;  %v1911_v3 = vand.u32 2147483647, %v3841_v17 }
 0x210   : > { %v2937_v36 = vsel %vm2825_vm7, %v2936_v56, %v2935_v59  ;;  %v1895_v16 = vsel %vm1894_vm4, %v1892_v13, %v1889_v51  ;;  %v482_v43 = vmul.f32 %v4407_v24, %v351_v49  ;;  %v1909_v6 = vadd.f32 1.0, %v1908_v20 }
 0x211   : > { %v3845_v18 = vpop.eup %3844  ;;  %v2599_v30 = vsel %vm935_vm5, %v5596_v57, %v1895_v16  ;;  %723 = vadd.xlane.f32.xlu0 %v481_v1  ;;  %v467_v39 = vmul.f32 %v4407_v24, %v336_v26  ;;  %v1068_v48 = vmin.f32 %v5687_v19, 20.0  ;;  %v2940_v25 = vperm.slane %v2600_v61, %v7508_v52  ;;  %v620_v57 = vpop.xlane.xlu2 %619 }
 0x212   : > { %v3847_v62 = vpop.eup %3846  ;;  %v2938_v28 = vperm.slane %v2599_v30, %v7539_v53  ;;  %v1923_v34 = vadd.f32 1.0, %v3845_v18  ;;  %v1926_v59 = vmul.f32 -0.5, %v3845_v18  ;;  %v1929_v46 = vand.u32 2147483647, %v3845_v18  ;;  %725 = vadd.xlane.f32.xlu2 %v482_v43 }
 0x213   : > { %v1914_v44 = vadd.f32 1.0, %v3847_v62  ;;  %v1917_v33 = vmul.f32 -0.5, %v3847_v62  ;;  %695 = vadd.xlane.f32.xlu1 %v467_v39  ;;  %v1256_v35 = vmul.f32 1.442695, %v1068_v48  ;;  %vm5711_vm0 = vcmp.lt.f32.partialorder %v1911_v3, 0.0004427343 }
 0x214   : > { %v2939_v29 = vsel %vm2829_vm8, %v2938_v28, %v2937_v36  ;;  %3850 = vlog2.f32 %v1923_v34  ;;  %v1920_v26 = vand.u32 2147483647, %v3847_v62  ;;  %v1910_v22 = vmul.f32 %v3841_v17, %v1909_v6 }
 0x215   : > { %v3849_v14 = vpop.eup %3848  ;;  %v2941_v32 = vsel %vm7416_vm11, %v2940_v25, %v2939_v29  ;;  %vm939_vm6 = vcmp.gt.f32.partialorder %v5658_v15, 20.0  ;;  %v1927_v20 = vadd.f32 1.0, %v1926_v59  ;;  %3852 = vlog2.f32 %v1914_v44 }
 0x216   : > { %v1907_v56 = vmul.f32 0.6931472, %v3849_v14  ;;  %vm5717_vm10 = vcmp.lt.f32.partialorder %v1929_v46, 0.0004427343  ;;  %vm938_vm5 = vcmp.gt.f32.partialorder %v5662_v40, 20.0  ;;  %3854 = vpow2.f32 %v1256_v35 }
 0x217   : > { %v5723_v13 = vadd.f32 %v4558_v37, %v620_v57  ;;  %v1918_v61 = vadd.f32 1.0, %v1917_v33  ;;  %v5726_v17 = vadd.f32 %v4558_v37, %v618_v21  ;;  %v209_v1 = vadd.f32 %v5573_v12, %v7440_v7 }
 0x218   : > { %v210_v36 = vadd.f32 %v5573_v12, %v7439_v8  ;;  %v1913_v16 = vsel %vm5711_vm0, %v1910_v22, %v1907_v56  ;;  %vm5734_vm4 = vcmp.lt.f32.partialorder %v1920_v26, 0.0004427343  ;;  %v224_v30 = vadd.f32 %v5636_v5, %v7530_v38 }
 0x219   : > { %v1070_v43 = vmin.f32 %v5723_v13, 20.0  ;;  %v2601_v6 = vsel %vm937_vm3, %v5632_v41, %v1913_v16  ;;  %v1928_v39 = vmul.f32 %v3845_v18, %v1927_v20  ;;  %v1069_v48 = vmin.f32 %v5726_v17, 20.0  ;;  %v622_v20 = vpop.xlane.xlu0 %621 }
 0x21a   : > { %v337_v28 = vmax.f32 %v209_v1, 0.0  ;;  %v3851_v34 = vpop.eup %3850  ;;  %v2942_v59 = vperm.slane %v2601_v6, %v4821_v55  ;;  %v338_v25 = vmax.f32 %v210_v36, 0.0  ;;  %v352_v44 = vmax.f32 %v224_v30, 0.0 }
 0x21b   : > { %v1260_v46 = vmul.f32 1.442695, %v1070_v43  ;;  %v3853_v33 = vpop.eup %3852  ;;  %v1925_v35 = vmul.f32 0.6931472, %v3851_v34  ;;  %v1919_v57 = vmul.f32 %v3847_v62, %v1918_v61  ;;  %v1258_v29 = vmul.f32 1.442695, %v1069_v48  ;;  %v626_v61 = vpop.xlane.xlu2 %625 }
 0x21c   : > { %v468_v38 = vmul.f32 %v4407_v24, %v337_v28  ;;  %v3855_v49 = vpop.eup %3854  ;;  %vm7576_vm0 = vcmask 654912   ;;  %v1916_v41 = vmul.f32 0.6931472, %v3853_v33  ;;  %v469_v18 = vmul.f32 %v4407_v24, %v338_v25  ;;  %v7577_v43 = vld [vmem:[#allocation24_spill] sm:$0xff] }
 0x21d   : > { %v2943_v26 = vsel %vm7576_vm0, %v2942_v59, %v2941_v32  ;;  %3856 = vpow2.f32 %v1260_v46  ;;  %v1931_v21 = vsel %vm5717_vm10, %v1928_v39, %v1925_v35  ;;  %v1932_v14 = vadd.f32 1.0, %v3855_v49 }
 0x21e   : > { %v1935_v22 = vmul.f32 -0.5, %v3855_v49  ;;  %697 = vadd.xlane.f32.xlu0 %v468_v38  ;;  %vm3082_vm3 = vcmask 1042434   ;;  %v2603_v62 = vsel %vm939_vm6, %v5658_v15, %v1931_v21  ;;  %v1922_v56 = vsel %vm5734_vm4, %v1919_v57, %v1916_v41  ;;  %699 = vadd.xlane.f32.xlu2 %v469_v18  ;;  %v624_v15 = vpop.xlane.xlu1 %623 }
 0x21f   : > { %3858 = vpow2.f32 %v1258_v29  ;;  %v483_v32 = vmul.f32 %v4407_v24, %v352_v44  ;;  %v2602_v51 = vsel %vm938_vm5, %v5662_v40, %v1922_v56  ;;  %v5762_v36 = vadd.f32 %v4558_v37, %v622_v20 }
 0x220   : > { %3860 = vlog2.f32 %v1932_v14  ;;  %v2944_v1 = vperm.slane %v2602_v51, %v4813_v23  ;;  %v2946_v16 = vperm.slane %v2603_v62, %v4798_v63  ;;  %v1938_v3 = vand.u32 2147483647, %v3855_v49 }
 0x221   : > { %727 = vadd.xlane.f32.xlu1 %v483_v32  ;;  %v5768_v30 = vsel %vm3082_vm3, %v5560_v54, %v7577_v43  ;;  %v5771_v6 = vadd.f32 %v4558_v37, %v626_v61  ;;  %vm7578_vm6 = vcmask 720512   ;;  %v1936_v48 = vadd.f32 1.0, %v1935_v22 }
 0x222   : > { %v2945_v39 = vsel %vm7578_vm6, %v2944_v1, %v2943_v26  ;;  %v1071_v28 = vmin.f32 %v5762_v36, 20.0  ;;  %vm7579_vm10 = vcmask 786112   ;;  %v5777_v25 = vadd.f32 %v4558_v37, %v624_v15 }
 0x223   : > { %v3857_v40 = vpop.eup %3856  ;;  %v2947_v34 = vsel %vm7579_vm10, %v2946_v16, %v2945_v39  ;;  %vm940_vm5 = vcmp.gt.f32.partialorder %v5687_v19, 20.0  ;;  %v1073_v33 = vmin.f32 %v5771_v6, 20.0  ;;  %v225_v35 = vadd.f32 %v5636_v5, %v7440_v7 }
 0x224   : > { %v1950_v59 = vadd.f32 1.0, %v3857_v40  ;;  %v1953_v46 = vmul.f32 -0.5, %v3857_v40  ;;  %v1262_v54 = vmul.f32 1.442695, %v1071_v28  ;;  %vm5783_vm4 = vcmp.lt.f32.partialorder %v1938_v3, 0.0004427343 }
 0x225   : > { %v3859_v44 = vpop.eup %3858  ;;  %v1937_v18 = vmul.f32 %v3855_v49, %v1936_v48  ;;  %vm942_vm0 = vcmp.gt.f32.partialorder %v5723_v13, 20.0  ;;  %v1956_v14 = vand.u32 2147483647, %v3857_v40  ;;  %v1266_v22 = vmul.f32 1.442695, %v1073_v33 }
 0x226   : > { %v3861_v57 = vpop.eup %3860  ;;  %3862 = vlog2.f32 %v1950_v59  ;;  %v1954_v38 = vadd.f32 1.0, %v1953_v46  ;;  %v1941_v26 = vadd.f32 1.0, %v3859_v44  ;;  %v1944_v21 = vmul.f32 -0.5, %v3859_v44 }
 0x227   : > { %v1934_v41 = vmul.f32 0.6931472, %v3861_v57  ;;  %3864 = vpow2.f32 %v1262_v54  ;;  %v1072_v20 = vmin.f32 %v5777_v25, 20.0  ;;  %v1947_v32 = vand.u32 2147483647, %v3859_v44 }
 0x228   : > { %3866 = vlog2.f32 %v1941_v26  ;;  %v1955_v56 = vmul.f32 %v3857_v40, %v1954_v38  ;;  %v353_v61 = vmax.f32 %v225_v35, 0.0  ;;  %v226_v1 = vadd.f32 %v5636_v5, %v7439_v8  ;;  %v628_v40 = vpop.xlane.xlu0 %627  ;;  %v632_v35 = vpop.xlane.xlu2 %631 }
 0x229   : > { %v1940_v62 = vsel %vm5783_vm4, %v1937_v18, %v1934_v41  ;;  %3868 = vpow2.f32 %v1266_v22  ;;  %v1264_v49 = vmul.f32 1.442695, %v1072_v20  ;;  %v1945_v16 = vadd.f32 1.0, %v1944_v21  ;;  %v630_v22 = vpop.xlane.xlu1 %629 }
 0x22a   : > { %v2604_v51 = vsel %vm940_vm5, %v5687_v19, %v1940_v62  ;;  %v484_v3 = vmul.f32 %v4407_v24, %v353_v61  ;;  %v211_v43 = vadd.f32 %v5573_v12, %v7438_v9  ;;  %vm5800_vm3 = vcmp.lt.f32.partialorder %v1956_v14, 0.0004427343 }
 0x22b   : > { %v2948_v15 = vperm.slane %v2604_v51, %v4899_v45  ;;  %vm941_vm6 = vcmp.gt.f32.partialorder %v5726_v17, 20.0  ;;  %3870 = vpow2.f32 %v1264_v49  ;;  %v354_v19 = vmax.f32 %v226_v1, 0.0 }
 0x22c   : > { %v3863_v39 = vpop.eup %3862  ;;  %vm7584_vm10 = vcmask 851712   ;;  %vm5806_vm5 = vcmp.lt.f32.partialorder %v1947_v32, 0.0004427343  ;;  %729 = vadd.xlane.f32.xlu0 %v484_v3  ;;  %v339_v33 = vmax.f32 %v211_v43, 0.0  ;;  %v5812_v41 = vadd.f32 %v4558_v37, %v628_v40 }
 0x22d   : > { %v3865_v28 = vpop.eup %3864  ;;  %v2949_v59 = vsel %vm7584_vm10, %v2948_v15, %v2947_v34  ;;  %v1952_v46 = vmul.f32 0.6931472, %v3863_v39  ;;  %v485_v26 = vmul.f32 %v4407_v24, %v354_v19  ;;  %v1946_v21 = vmul.f32 %v3859_v44, %v1945_v16 }
 0x22e   : > { %v3867_v57 = vpop.eup %3866  ;;  %v1959_v29 = vadd.f32 1.0, %v3865_v28  ;;  %v1962_v38 = vmul.f32 -0.5, %v3865_v28  ;;  %v470_v14 = vmul.f32 %v4407_v24, %v339_v33  ;;  %v1965_v32 = vand.u32 2147483647, %v3865_v28 }
 0x22f   : > { %v1958_v18 = vsel %vm5800_vm3, %v1955_v56, %v1952_v46  ;;  %v1943_v34 = vmul.f32 0.6931472, %v3867_v57  ;;  %v3869_v20 = vpop.eup %3868  ;;  %731 = vadd.xlane.f32.xlu2 %v485_v26  ;;  %v5821_v61 = vadd.f32 %v4558_v37, %v632_v35  ;;  %vm943_vm4 = vcmp.gt.f32.partialorder %v5762_v36, 20.0 }
 0x230   : > { %v2606_v62 = vsel %vm942_vm0, %v5723_v13, %v1958_v18  ;;  %3872 = vlog2.f32 %v1959_v29  ;;  %v1963_v44 = vadd.f32 1.0, %v1962_v38  ;;  %v1977_v56 = vadd.f32 1.0, %v3869_v20  ;;  %701 = vadd.xlane.f32.xlu1 %v470_v14 }
 0x231   : > { %v1949_v51 = vsel %vm5806_vm5, %v1946_v21, %v1943_v34  ;;  %v1980_v49 = vmul.f32 -0.5, %v3869_v20  ;;  %v3871_v1 = vpop.eup %3870  ;;  %v1983_v15 = vand.u32 2147483647, %v3869_v20  ;;  %v1074_v16 = vmin.f32 %v5812_v41, 20.0 }
 0x232   : > { %v2605_v13 = vsel %vm941_vm6, %v5726_v17, %v1949_v51  ;;  %v5831_v3 = vadd.f32 %v4558_v37, %v630_v22  ;;  %vm3084_vm0 = vcmask 1043459   ;;  %3874 = vlog2.f32 %v1977_v56 }
 0x233   : > { %v2950_v43 = vperm.slane %v2605_v13, %v4882_v42  ;;  %v1981_v40 = vadd.f32 1.0, %v1980_v49  ;;  %v1968_v39 = vadd.f32 1.0, %v3871_v1  ;;  %v2952_v48 = vperm.slane %v2606_v62, %v4870_v50  ;;  %v634_v49 = vpop.xlane.xlu0 %633 }
 0x234   : > { %vm5835_vm3 = vcmp.lt.f32.partialorder %v1965_v32, 0.0004427343  ;;  %vm945_vm6 = vcmp.gt.f32.partialorder %v5771_v6, 20.0  ;;  %v1971_v17 = vmul.f32 -0.5, %v3871_v1  ;;  %v1974_v46 = vand.u32 2147483647, %v3871_v1 }
 0x235   : > { %v2951_v54 = vsel %vm7417_vm2, %v2950_v43, %v2949_v59  ;;  %v1964_v33 = vmul.f32 %v3865_v28, %v1963_v44  ;;  %3876 = vlog2.f32 %v1968_v39  ;;  %v1268_v35 = vmul.f32 1.442695, %v1074_v16 }
 0x236   : > { %v3873_v57 = vpop.eup %3872  ;;  %vm7589_vm10 = vcmask 982912   ;;  %vm5842_vm5 = vcmp.lt.f32.partialorder %v1983_v15, 0.0004427343  ;;  %vm944_vm11 = vcmp.gt.f32.partialorder %v5777_v25, 20.0  ;;  %v1972_v26 = vadd.f32 1.0, %v1971_v17 }
 0x237   : > { %v2953_v29 = vsel %vm7589_vm10, %v2952_v48, %v2951_v54  ;;  %v1076_v18 = vmin.f32 %v5821_v61, 20.0  ;;  %v1961_v34 = vmul.f32 0.6931472, %v3873_v57  ;;  %v1982_v21 = vmul.f32 %v3869_v20, %v1981_v40 }
 0x238   : > { %3878 = vpow2.f32 %v1268_v35  ;;  %v1075_v59 = vmin.f32 %v5831_v3, 20.0  ;;  %vm5849_vm2 = vcmp.lt.f32.partialorder %v1974_v46, 0.0004427343  ;;  %v212_v22 = vadd.f32 %v5573_v12, %v4311_v10  ;;  %v3875_v32 = vpop.eup %3874 }
 0x239   : > { %v1272_v14 = vmul.f32 1.442695, %v1076_v18  ;;  %v213_v62 = vadd.f32 %v5573_v12, %v4317_v11  ;;  %v1967_v51 = vsel %vm5835_vm3, %v1964_v33, %v1961_v34  ;;  %v1973_v44 = vmul.f32 %v3871_v1, %v1972_v26  ;;  %v638_v26 = vpop.xlane.xlu2 %637 }
 0x23a   : > { %v1270_v20 = vmul.f32 1.442695, %v1075_v59  ;;  %v227_v56 = vadd.f32 %v5636_v5, %v7438_v9  ;;  %v2607_v13 = vsel %vm943_vm4, %v5762_v36, %v1967_v51  ;;  %v1979_v15 = vmul.f32 0.6931472, %v3875_v32 }
 0x23b   : > { %3880 = vpow2.f32 %v1272_v14  ;;  %v340_v16 = vmax.f32 %v212_v22, 0.0  ;;  %v3877_v43 = vpop.eup %3876  ;;  %v2954_v40 = vperm.slane %v2607_v13, %v4938_v47  ;;  %v341_v39 = vmax.f32 %v213_v62, 0.0  ;;  %v7594_v62 = vld [vmem:[#allocation21_spill] sm:$0xff] }
 0x23c   : > { %3882 = vpow2.f32 %v1270_v20  ;;  %v355_v48 = vmax.f32 %v227_v56, 0.0  ;;  %v1985_v1 = vsel %vm5842_vm5, %v1982_v21, %v1979_v15  ;;  %v1970_v19 = vmul.f32 0.6931472, %v3877_v43 }
 0x23d   : > { %v471_v17 = vmul.f32 %v4407_v24, %v340_v16  ;;  %v5869_v46 = vadd.f32 %v4558_v37, %v634_v49  ;;  %v2955_v36 = vsel %vm2861_vm15, %v2954_v40, %v2953_v29  ;;  %v2609_v33 = vsel %vm945_vm6, %v5771_v6, %v1985_v1  ;;  %v636_v29 = vpop.xlane.xlu1 %635 }
 0x23e   : > { %v3879_v54 = vpop.eup %3878  ;;  %v472_v35 = vmul.f32 %v4407_v24, %v341_v39  ;;  %v486_v57 = vmul.f32 %v4407_v24, %v355_v48  ;;  %v5879_v38 = vsel %vm3084_vm0, %v2955_v36, %v5768_v30  ;;  %v2957_v18 = vperm.slane %v2609_v33, %v7529_v0  ;;  %v640_v36 = vpop.xlane.xlu0 %639 }
 0x23f   : > { %v1976_v34 = vsel %vm5849_vm2, %v1973_v44, %v1970_v19  ;;  %v1986_v21 = vadd.f32 1.0, %v3879_v54  ;;  %703 = vadd.xlane.f32.xlu0 %v471_v17  ;;  %v1989_v59 = vmul.f32 -0.5, %v3879_v54  ;;  %v1992_v14 = vand.u32 2147483647, %v3879_v54 }
 0x240   : > { %v2608_v6 = vsel %vm944_vm11, %v5777_v25, %v1976_v34  ;;  %705 = vadd.xlane.f32.xlu2 %v472_v35  ;;  %733 = vadd.xlane.f32.xlu1 %v486_v57  ;;  %v1077_v32 = vmin.f32 %v5869_v46, 20.0  ;;  %v5890_v28 = vadd.f32 %v4558_v37, %v638_v26  ;;  %v5893_v49 = vadd.f32 %v4558_v37, %v636_v29 }
 0x241   : > { %v3881_v22 = vpop.eup %3880  ;;  %v2956_v30 = vperm.slane %v2608_v6, %v7594_v62  ;;  %3884 = vlog2.f32 %v1986_v21  ;;  %v1990_v44 = vadd.f32 1.0, %v1989_v59  ;;  %vm946_vm11 = vcmp.gt.f32.partialorder %v5812_v41, 20.0  ;;  %v7599_v59 = vld [vmem:[#allocation14_spill] sm:$0xff]  ;;  %v644_v1 = vpop.xlane.xlu2 %643 }
 0x242   : > { %v3883_v51 = vpop.eup %3882  ;;  %v2004_v20 = vadd.f32 1.0, %v3881_v22  ;;  %v2007_v56 = vmul.f32 -0.5, %v3881_v22  ;;  %v2010_v13 = vand.u32 2147483647, %v3881_v22  ;;  %vm948_vm2 = vcmp.gt.f32.partialorder %v5821_v61, 20.0 }
 0x243   : > { %v2958_v25 = vsel %vm2805_vm9, %v2957_v18, %v2956_v30  ;;  %v1995_v15 = vadd.f32 1.0, %v3883_v51  ;;  %v1998_v16 = vmul.f32 -0.5, %v3883_v51  ;;  %v1274_v39 = vmul.f32 1.442695, %v1077_v32 }
 0x244   : > { %3886 = vlog2.f32 %v2004_v20  ;;  %v2008_v43 = vadd.f32 1.0, %v2007_v56  ;;  %v1991_v48 = vmul.f32 %v3879_v54, %v1990_v44  ;;  %vm5898_vm4 = vcmp.lt.f32.partialorder %v1992_v14, 0.0004427343 }
 0x245   : > { %3888 = vlog2.f32 %v1995_v15  ;;  %v1999_v40 = vadd.f32 1.0, %v1998_v16  ;;  %vm947_vm0 = vcmp.gt.f32.partialorder %v5831_v3, 20.0  ;;  %v2001_v19 = vand.u32 2147483647, %v3883_v51  ;;  %v7600_v16 = vld [vmem:[#allocation22_spill] sm:$0xff] }
 0x246   : > { %v1079_v17 = vmin.f32 %v5890_v28, 20.0  ;;  %v2009_v35 = vmul.f32 %v3881_v22, %v2008_v43  ;;  %vm5904_vm3 = vcmp.lt.f32.partialorder %v2010_v13, 0.0004427343  ;;  %3890 = vpow2.f32 %v1274_v39 }
 0x247   : > { %v3885_v33 = vpop.eup %3884  ;;  %v1078_v26 = vmin.f32 %v5893_v49, 20.0  ;;  %v228_v34 = vadd.f32 %v5636_v5, %v4311_v10  ;;  %v229_v21 = vadd.f32 %v5636_v5, %v4317_v11  ;;  %v2000_v29 = vmul.f32 %v3883_v51, %v1999_v40 }
 0x248   : > { %v1988_v54 = vmul.f32 0.6931472, %v3885_v33  ;;  %v1278_v18 = vmul.f32 1.442695, %v1079_v17  ;;  %v214_v14 = vadd.f32 %v5573_v12, %v7599_v59  ;;  %v5916_v22 = vadd.f32 %v4558_v37, %v640_v36 }
 0x249   : > { %v1276_v6 = vmul.f32 1.442695, %v1078_v26  ;;  %v356_v44 = vmax.f32 %v228_v34, 0.0  ;;  %v357_v20 = vmax.f32 %v229_v21, 0.0  ;;  %vm2002_vm6 = vcmp.lt.f32.partialorder %v2001_v19, 0.0004427343 }
 0x24a   : > { %v3887_v30 = vpop.eup %3886  ;;  %v1994_v32 = vsel %vm5898_vm4, %v1991_v48, %v1988_v54  ;;  %3892 = vpow2.f32 %v1278_v18  ;;  %v342_v15 = vmax.f32 %v214_v14, 0.0  ;;  %v5938_v19 = vadd.f32 %v4558_v37, %v644_v1 }
 0x24b   : > { %v3889_v56 = vpop.eup %3888  ;;  %v2610_v13 = vsel %vm946_vm11, %v5812_v41, %v1994_v32  ;;  %v2006_v51 = vmul.f32 0.6931472, %v3887_v30  ;;  %3894 = vpow2.f32 %v1276_v6  ;;  %v487_v39 = vmul.f32 %v4407_v24, %v356_v44 }
 0x24c   : > { %v2959_v43 = vperm.slane %v2610_v13, %v7600_v16  ;;  %v1997_v40 = vmul.f32 0.6931472, %v3889_v56  ;;  %v488_v17 = vmul.f32 %v4407_v24, %v357_v20  ;;  %v3891_v48 = vpop.eup %3890  ;;  %v473_v33 = vmul.f32 %v4407_v24, %v342_v15 }
 0x24d   : > { %v2012_v36 = vsel %vm5904_vm3, %v2009_v35, %v2006_v51  ;;  %v1080_v41 = vmin.f32 %v5916_v22, 20.0  ;;  %v2013_v34 = vadd.f32 1.0, %v3891_v48  ;;  %735 = vadd.xlane.f32.xlu0 %v487_v39  ;;  %v2016_v35 = vmul.f32 -0.5, %v3891_v48  ;;  %v642_v51 = vpop.xlane.xlu1 %641 }
 0x24e   : > { %v2960_v26 = vsel %vm2809_vm12, %v2959_v43, %v2958_v25  ;;  %v2612_v54 = vsel %vm948_vm2, %v5821_v61, %v2012_v36  ;;  %v2003_v18 = vsel %vm2002_vm6, %v2000_v29, %v1997_v40  ;;  %737 = vadd.xlane.f32.xlu2 %v488_v17  ;;  %707 = vadd.xlane.f32.xlu1 %v473_v33  ;;  %v2019_v61 = vand.u32 2147483647, %v3891_v48 }
 0x24f   : > { %v2611_v57 = vsel %vm947_vm0, %v5831_v3, %v2003_v18  ;;  %v2963_v25 = vperm.slane %v2612_v54, %v4623_v58  ;;  %3896 = vlog2.f32 %v2013_v34  ;;  %v2017_v14 = vadd.f32 1.0, %v2016_v35  ;;  %v7605_v18 = vld [vmem:[#allocation15_spill] sm:$0xff]  ;;  %v646_v35 = vpop.xlane.xlu0 %645 }
 0x250   : > { %v3893_v21 = vpop.eup %3892  ;;  %v2961_v6 = vperm.slane %v2611_v57, %v4637_v31  ;;  %v1280_v44 = vmul.f32 1.442695, %v1080_v41  ;;  %vm949_vm10 = vcmp.gt.f32.partialorder %v5869_v46, 20.0  ;;  %vm5945_vm5 = vcmp.lt.f32.partialorder %v2019_v61, 0.0004427343  ;;  %v7606_v57 = vld [vmem:[#allocation16_spill] sm:$0xff] }
 0x251   : > { %v3895_v29 = vpop.eup %3894  ;;  %v2031_v30 = vadd.f32 1.0, %v3893_v21  ;;  %v2034_v32 = vmul.f32 -0.5, %v3893_v21  ;;  %v2037_v3 = vand.u32 2147483647, %v3893_v21  ;;  %vm951_vm11 = vcmp.gt.f32.partialorder %v5890_v28, 20.0 }
 0x252   : > { %v2962_v20 = vsel %vm2813_vm13, %v2961_v6, %v2960_v26  ;;  %v2022_v56 = vadd.f32 1.0, %v3895_v29  ;;  %v2025_v13 = vmul.f32 -0.5, %v3895_v29  ;;  %v2028_v17 = vand.u32 2147483647, %v3895_v29 }
 0x253   : > { %v2964_v15 = vsel %vm2817_vm14, %v2963_v25, %v2962_v20  ;;  %3898 = vlog2.f32 %v2031_v30  ;;  %v2035_v43 = vadd.f32 1.0, %v2034_v32  ;;  %v2018_v1 = vmul.f32 %v3891_v48, %v2017_v14 }
 0x254   : > { %3900 = vlog2.f32 %v2022_v56  ;;  %v2026_v39 = vadd.f32 1.0, %v2025_v13  ;;  %vm950_vm2 = vcmp.gt.f32.partialorder %v5893_v49, 20.0  ;;  %v1082_v36 = vmin.f32 %v5938_v19, 20.0  ;;  %v650_v13 = vpop.xlane.xlu2 %649 }
 0x255   : > { %3902 = vpow2.f32 %v1280_v44  ;;  %v5953_v33 = vadd.f32 %v4558_v37, %v642_v51  ;;  %v3897_v41 = vpop.eup %3896  ;;  %v2036_v26 = vmul.f32 %v3893_v21, %v2035_v43  ;;  %vm5955_vm4 = vcmp.lt.f32.partialorder %v2037_v3, 0.0004427343 }
 0x256   : > { %v215_v34 = vadd.f32 %v5573_v12, %v7605_v18  ;;  %v216_v48 = vadd.f32 %v5573_v12, %v7606_v57  ;;  %v2015_v25 = vmul.f32 0.6931472, %v3897_v41  ;;  %v2027_v6 = vmul.f32 %v3895_v29, %v2026_v39 }
 0x257   : > { %v1284_v61 = vmul.f32 1.442695, %v1082_v36  ;;  %v1081_v14 = vmin.f32 %v5953_v33, 20.0  ;;  %vm5964_vm0 = vcmp.lt.f32.partialorder %v2028_v17, 0.0004427343  ;;  %v230_v44 = vadd.f32 %v5636_v5, %v7599_v59 }
 0x258   : > { %v343_v21 = vmax.f32 %v215_v34, 0.0  ;;  %v344_v32 = vmax.f32 %v216_v48, 0.0  ;;  %v2021_v3 = vsel %vm5945_vm5, %v2018_v1, %v2015_v25  ;;  %v5973_v29 = vadd.f32 %v4558_v37, %v646_v35 }
 0x259   : > { %v3899_v20 = vpop.eup %3898  ;;  %3904 = vpow2.f32 %v1284_v61  ;;  %v1282_v56 = vmul.f32 1.442695, %v1081_v14  ;;  %v2613_v43 = vsel %vm949_vm10, %v5869_v46, %v2021_v3  ;;  %v358_v41 = vmax.f32 %v230_v44, 0.0 }
 0x25a   : > { %v3901_v51 = vpop.eup %3900  ;;  %v2033_v39 = vmul.f32 0.6931472, %v3899_v20  ;;  %v474_v17 = vmul.f32 %v4407_v24, %v343_v21  ;;  %v475_v59 = vmul.f32 %v4407_v24, %v344_v32  ;;  %v2965_v40 = vperm.slane %v2613_v43, %v4629_v60  ;;  %v648_v43 = vpop.xlane.xlu1 %647 }
 0x25b   : > { %v3903_v36 = vpop.eup %3902  ;;  %v2024_v1 = vmul.f32 0.6931472, %v3901_v51  ;;  %3906 = vpow2.f32 %v1282_v56  ;;  %v5984_v46 = vadd.f32 %v4558_v37, %v650_v13  ;;  %v489_v21 = vmul.f32 %v4407_v24, %v358_v41 }
 0x25c   : > { %v2039_v34 = vsel %vm5955_vm4, %v2036_v26, %v2033_v39  ;;  %v2040_v48 = vadd.f32 1.0, %v3903_v36  ;;  %v2043_v35 = vmul.f32 -0.5, %v3903_v36  ;;  %709 = vadd.xlane.f32.xlu0 %v474_v17  ;;  %711 = vadd.xlane.f32.xlu2 %v475_v59  ;;  %v2966_v25 = vsel %vm2821_vm1, %v2965_v40, %v2964_v15 }
 0x25d   : > { %v2615_v61 = vsel %vm951_vm11, %v5890_v28, %v2039_v34  ;;  %v2030_v14 = vsel %vm5964_vm0, %v2027_v6, %v2024_v1  ;;  %v2046_v44 = vand.u32 2147483647, %v3903_v36  ;;  %739 = vadd.xlane.f32.xlu1 %v489_v21  ;;  %v1083_v15 = vmin.f32 %v5973_v29, 20.0 }
 0x25e   : > { %v2614_v26 = vsel %vm950_vm2, %v5893_v49, %v2030_v14  ;;  %3908 = vlog2.f32 %v2040_v48  ;;  %v2969_v20 = vperm.slane %v2615_v61, %v7539_v53  ;;  %v2044_v28 = vadd.f32 1.0, %v2043_v35 }
 0x25f   : > { %v3905_v54 = vpop.eup %3904  ;;  %v2967_v32 = vperm.slane %v2614_v26, %v4788_v27  ;;  %v1286_v51 = vmul.f32 1.442695, %v1083_v15  ;;  %v1085_v49 = vmin.f32 %v5984_v46, 20.0  ;;  %vm952_vm3 = vcmp.gt.f32.partialorder %v5916_v22, 20.0 }
 0x260   : > { %v2058_v3 = vadd.f32 1.0, %v3905_v54  ;;  %v2061_v30 = vmul.f32 -0.5, %v3905_v54  ;;  %v2064_v13 = vand.u32 2147483647, %v3905_v54  ;;  %vm6003_vm6 = vcmp.lt.f32.partialorder %v2046_v44, 0.0004427343 }
 0x261   : > { %v3907_v6 = vpop.eup %3906  ;;  %v2968_v56 = vsel %vm2825_vm7, %v2967_v32, %v2966_v25  ;;  %v1290_v34 = vmul.f32 1.442695, %v1085_v49  ;;  %v6008_v48 = vadd.f32 %v4558_v37, %v648_v43  ;;  %v231_v35 = vadd.f32 %v5636_v5, %v7605_v18 }
 0x262   : > { %v2970_v39 = vsel %vm2829_vm8, %v2969_v20, %v2968_v56  ;;  %3910 = vlog2.f32 %v2058_v3  ;;  %v2062_v59 = vadd.f32 1.0, %v2061_v30  ;;  %v2049_v40 = vadd.f32 1.0, %v3907_v6 }
 0x263   : > { %3912 = vpow2.f32 %v1286_v51  ;;  %v2052_v41 = vmul.f32 -0.5, %v3907_v6  ;;  %v2045_v61 = vmul.f32 %v3903_v36, %v2044_v28  ;;  %vm954_vm10 = vcmp.gt.f32.partialorder %v5938_v19, 20.0  ;;  %v7613_v36 = vld [vmem:[#allocation17_spill] sm:$0xff]  ;;  %v652_v28 = vpop.xlane.xlu0 %651 }
 0x264   : > { %v3909_v1 = vpop.eup %3908  ;;  %vm6013_vm5 = vcmp.lt.f32.partialorder %v2064_v13, 0.0004427343  ;;  %3914 = vlog2.f32 %v2049_v40  ;;  %v2055_v21 = vand.u32 2147483647, %v3907_v6  ;;  %v1084_v26 = vmin.f32 %v6008_v48, 20.0 }
 0x265   : > { %v2042_v25 = vmul.f32 0.6931472, %v3909_v1  ;;  %3916 = vpow2.f32 %v1290_v34  ;;  %v359_v32 = vmax.f32 %v231_v35, 0.0  ;;  %v2063_v15 = vmul.f32 %v3905_v54, %v2062_v59 }
 0x266   : > { %v232_v18 = vadd.f32 %v5636_v5, %v7606_v57  ;;  %v217_v20 = vadd.f32 %v5573_v12, %v7613_v36  ;;  %v2053_v56 = vadd.f32 1.0, %v2052_v41  ;;  %v1288_v13 = vmul.f32 1.442695, %v1084_v26 }
 0x267   : > { %v2048_v44 = vsel %vm6003_vm6, %v2045_v61, %v2042_v25  ;;  %v490_v51 = vmul.f32 %v4407_v24, %v359_v32  ;;  %v6030_v1 = vadd.f32 %v4558_v37, %v652_v28  ;;  %vm7614_vm11 = vcmask 589312  }
 0x268   : > { %v3911_v3 = vpop.eup %3910  ;;  %v2616_v30 = vsel %vm952_vm3, %v5916_v22, %v2048_v44  ;;  %v360_v17 = vmax.f32 %v232_v18, 0.0  ;;  %v345_v59 = vmax.f32 %v217_v20, 0.0  ;;  %3918 = vpow2.f32 %v1288_v13 }
 0x269   : > { %v3913_v49 = vpop.eup %3912  ;;  %v2971_v43 = vperm.slane %v2616_v30, %v7508_v52  ;;  %v2060_v54 = vmul.f32 0.6931472, %v3911_v3  ;;  %741 = vadd.xlane.f32.xlu0 %v490_v51  ;;  %v2054_v32 = vmul.f32 %v3907_v6, %v2053_v56  ;;  %vm2056_vm2 = vcmp.lt.f32.partialorder %v2055_v21, 0.0004427343  ;;  %v656_v3 = vpop.xlane.xlu2 %655 }
 0x26a   : > { %v2067_v57 = vadd.f32 1.0, %v3913_v49  ;;  %v2070_v40 = vmul.f32 -0.5, %v3913_v49  ;;  %v3915_v34 = vpop.eup %3914  ;;  %v491_v35 = vmul.f32 %v4407_v24, %v360_v17  ;;  %v476_v25 = vmul.f32 %v4407_v24, %v345_v59  ;;  %v654_v17 = vpop.xlane.xlu1 %653 }
 0x26b   : > { %v2972_v22 = vsel %vm7614_vm11, %v2971_v43, %v2970_v39  ;;  %v2066_v41 = vsel %vm6013_vm5, %v2063_v15, %v2060_v54  ;;  %v3917_v61 = vpop.eup %3916  ;;  %v2051_v26 = vmul.f32 0.6931472, %v3915_v34  ;;  %v2073_v18 = vand.u32 2147483647, %v3913_v49 }
 0x26c   : > { %3920 = vlog2.f32 %v2067_v57  ;;  %v2071_v44 = vadd.f32 1.0, %v2070_v40  ;;  %v2085_v20 = vadd.f32 1.0, %v3917_v61  ;;  %v2088_v28 = vmul.f32 -0.5, %v3917_v61  ;;  %743 = vadd.xlane.f32.xlu2 %v491_v35  ;;  %713 = vadd.xlane.f32.xlu1 %v476_v25 }
 0x26d   : > { %v2618_v39 = vsel %vm954_vm10, %v5938_v19, %v2066_v41  ;;  %vm953_vm4 = vcmp.gt.f32.partialorder %v5953_v33, 20.0  ;;  %v2057_v14 = vsel %vm2056_vm2, %v2054_v32, %v2051_v26  ;;  %v2091_v6 = vand.u32 2147483647, %v3917_v61 }
 0x26e   : > { %v2617_v15 = vsel %vm953_vm4, %v5953_v33, %v2057_v14  ;;  %3922 = vlog2.f32 %v2085_v20  ;;  %v1086_v21 = vmin.f32 %v6030_v1, 20.0  ;;  %v3919_v30 = vpop.eup %3918  ;;  %vm955_vm0 = vcmp.gt.f32.partialorder %v5973_v29, 20.0 }
 0x26f   : > { %v2973_v56 = vperm.slane %v2617_v15, %v4821_v55  ;;  %v2089_v13 = vadd.f32 1.0, %v2088_v28  ;;  %v6046_v51 = vadd.f32 %v4558_v37, %v656_v3  ;;  %v2975_v19 = vperm.slane %v2618_v39, %v4813_v23  ;;  %v7621_v28 = vld [vmem:[#allocation18_spill] sm:$0xff]  ;;  %v7622_v39 = vld [vmem:[#allocation19_spill] sm:$0xff]  ;;  %v658_v15 = vpop.xlane.xlu0 %657 }
 0x270   : > { %v2072_v43 = vmul.f32 %v3913_v49, %v2071_v44  ;;  %vm6049_vm3 = vcmp.lt.f32.partialorder %v2073_v18, 0.0004427343  ;;  %v2076_v33 = vadd.f32 1.0, %v3919_v30  ;;  %vm7617_vm6 = vcmask 654912  }
 0x271   : > { %v2974_v57 = vsel %vm7617_vm6, %v2973_v56, %v2972_v22  ;;  %vm957_vm10 = vcmp.gt.f32.partialorder %v5984_v46, 20.0  ;;  %v2079_v40 = vmul.f32 -0.5, %v3919_v30  ;;  %v1292_v34 = vmul.f32 1.442695, %v1086_v21 }
 0x272   : > { %v3921_v59 = vpop.eup %3920  ;;  %v1088_v41 = vmin.f32 %v6046_v51, 20.0  ;;  %vm7618_vm5 = vcmask 720512   ;;  %vm6057_vm11 = vcmp.lt.f32.partialorder %v2091_v6, 0.0004427343  ;;  %3924 = vlog2.f32 %v2076_v33 }
 0x273   : > { %v2069_v35 = vmul.f32 0.6931472, %v3921_v59  ;;  %v2976_v25 = vsel %vm7618_vm5, %v2975_v19, %v2974_v57  ;;  %v2090_v26 = vmul.f32 %v3917_v61, %v2089_v13  ;;  %3926 = vpow2.f32 %v1292_v34 }
 0x274   : > { %v1296_v32 = vmul.f32 1.442695, %v1088_v41  ;;  %v6062_v44 = vadd.f32 %v4558_v37, %v654_v17  ;;  %v3923_v22 = vpop.eup %3922  ;;  %v2082_v20 = vand.u32 2147483647, %v3919_v30  ;;  %v218_v3 = vadd.f32 %v5573_v12, %v7621_v28 }
 0x275   : > { %v2075_v18 = vsel %vm6049_vm3, %v2072_v43, %v2069_v35  ;;  %v219_v14 = vadd.f32 %v5573_v12, %v7622_v39  ;;  %v2087_v6 = vmul.f32 0.6931472, %v3923_v22  ;;  %v2080_v21 = vadd.f32 1.0, %v2079_v40 }
 0x276   : > { %v2619_v61 = vsel %vm955_vm0, %v5973_v29, %v2075_v18  ;;  %3928 = vpow2.f32 %v1296_v32  ;;  %v1087_v13 = vmin.f32 %v6062_v44, 20.0  ;;  %v346_v19 = vmax.f32 %v218_v3, 0.0  ;;  %v662_v29 = vpop.xlane.xlu2 %661 }
 0x277   : > { %v2977_v56 = vperm.slane %v2619_v61, %v4798_v63  ;;  %v347_v43 = vmax.f32 %v219_v14, 0.0  ;;  %v2093_v54 = vsel %vm6057_vm11, %v2090_v26, %v2087_v6  ;;  %vm956_vm2 = vcmp.gt.f32.partialorder %v6008_v48, 20.0 }
 0x278   : > { %v233_v12 = vadd.f32 %v5636_v5, %v7613_v36  ;;  %v6081_v33 = vadd.f32 %v4558_v37, %v658_v15  ;;  %v3925_v17 = vpop.eup %3924  ;;  %vm7623_vm4 = vcmask 786112   ;;  %vm6084_vm0 = vcmp.lt.f32.partialorder %v2082_v20, 0.0004427343 }
 0x279   : > { %v2978_v59 = vsel %vm7623_vm4, %v2977_v56, %v2976_v25  ;;  %v1294_v40 = vmul.f32 1.442695, %v1087_v13  ;;  %v477_v34 = vmul.f32 %v4407_v24, %v346_v19  ;;  %v3927_v41 = vpop.eup %3926  ;;  %v2078_v35 = vmul.f32 0.6931472, %v3925_v17 }
 0x27a   : > { %v2081_v49 = vmul.f32 %v3919_v30, %v2080_v21  ;;  %v478_v26 = vmul.f32 %v4407_v24, %v347_v43  ;;  %v361_v36 = vmax.f32 %v233_v12, 0.0  ;;  %v2621_v32 = vsel %vm957_vm10, %v5984_v46, %v2093_v54  ;;  %v660_v21 = vpop.xlane.xlu1 %659 }
 0x27b   : > { %v2094_v22 = vadd.f32 1.0, %v3927_v41  ;;  %3930 = vpow2.f32 %v1294_v40  ;;  %715 = vadd.xlane.f32.xlu0 %v477_v34  ;;  %v6094_v25 = vadd.f32 %v4558_v37, %v662_v29  ;;  %v2097_v3 = vmul.f32 -0.5, %v3927_v41 }
 0x27c   : > { %v3929_v18 = vpop.eup %3928  ;;  %v2084_v20 = vsel %vm6084_vm0, %v2081_v49, %v2078_v35  ;;  %717 = vadd.xlane.f32.xlu2 %v478_v26  ;;  %v492_v30 = vmul.f32 %v4407_v24, %v361_v36  ;;  %v1089_v14 = vmin.f32 %v6081_v33, 20.0  ;;  %v2100_v61 = vand.u32 2147483647, %v3927_v41  ;;  %v664_v49 = vpop.xlane.xlu0 %663 }
 0x27d   : > { %v2620_v46 = vsel %vm956_vm2, %v6008_v48, %v2084_v20  ;;  %3932 = vlog2.f32 %v2094_v22  ;;  %v2112_v6 = vadd.f32 1.0, %v3929_v18  ;;  %v2981_v56 = vperm.slane %v2621_v32, %v4882_v42 }
 0x27e   : > { %v2979_v15 = vperm.slane %v2620_v46, %v4899_v45  ;;  %745 = vadd.xlane.f32.xlu1 %v492_v30  ;;  %v1298_v13 = vmul.f32 1.442695, %v1089_v14  ;;  %v1091_v19 = vmin.f32 %v6094_v25, 20.0  ;;  %vm7626_vm3 = vcmask 851712  }
 0x27f   : > { %v2098_v54 = vadd.f32 1.0, %v2097_v3  ;;  %3934 = vlog2.f32 %v2112_v6  ;;  %v2115_v12 = vmul.f32 -0.5, %v3929_v18  ;;  %vm7627_vm6 = vcmask 917312  }
 0x280   : > { %v2980_v43 = vsel %vm7626_vm3, %v2979_v15, %v2978_v59  ;;  %3936 = vpow2.f32 %v1298_v13  ;;  %v1302_v17 = vmul.f32 1.442695, %v1091_v19  ;;  %v6109_v57 = vadd.f32 %v4558_v37, %v660_v21 }
 0x281   : > { %v3931_v29 = vpop.eup %3930  ;;  %v2982_v48 = vsel %vm7627_vm6, %v2981_v56, %v2980_v43  ;;  %vm6111_vm10 = vcmp.lt.f32.partialorder %v2100_v61, 0.0004427343  ;;  %v2118_v34 = vand.u32 2147483647, %v3929_v18  ;;  %v234_v32 = vadd.f32 %v5636_v5, %v7621_v28 }
 0x282   : > { %v2103_v35 = vadd.f32 1.0, %v3931_v29  ;;  %v2106_v59 = vmul.f32 -0.5, %v3931_v29  ;;  %3938 = vpow2.f32 %v1302_v17  ;;  %v1090_v36 = vmin.f32 %v6109_v57, 20.0 }
 0x283   : > { %v3933_v26 = vpop.eup %3932  ;;  %v2099_v20 = vmul.f32 %v3927_v41, %v2098_v54  ;;  %v2116_v3 = vadd.f32 1.0, %v2115_v12  ;;  %v362_v14 = vmax.f32 %v234_v32, 0.0  ;;  %v235_v46 = vadd.f32 %v5636_v5, %v7622_v39  ;;  %v668_v54 = vpop.xlane.xlu2 %667 }
 0x284   : > { %v2096_v22 = vmul.f32 0.6931472, %v3933_v26  ;;  %3940 = vlog2.f32 %v2103_v35  ;;  %v1300_v30 = vmul.f32 1.442695, %v1090_v36  ;;  %v6121_v15 = vadd.f32 %v4558_v37, %v664_v49  ;;  %v666_v49 = vpop.xlane.xlu1 %665 }
 0x285   : > { %v3935_v61 = vpop.eup %3934  ;;  %vm958_vm5 = vcmp.gt.f32.partialorder %v6030_v1, 20.0  ;;  %v2109_v21 = vand.u32 2147483647, %v3931_v29  ;;  %vm960_vm11 = vcmp.gt.f32.partialorder %v6046_v51, 20.0  ;;  %vm3086_vm2 = vcmask 1044484  }
 0x286   : > { %v2102_v6 = vsel %vm6111_vm10, %v2099_v20, %v2096_v22  ;;  %v3937_v28 = vpop.eup %3936  ;;  %v2107_v56 = vadd.f32 1.0, %v2106_v59  ;;  %3942 = vpow2.f32 %v1300_v30  ;;  %v493_v5 = vmul.f32 %v4407_v24, %v362_v14 }
 0x287   : > { %v2622_v41 = vsel %vm958_vm5, %v6030_v1, %v2102_v6  ;;  %v2114_v13 = vmul.f32 0.6931472, %v3935_v61  ;;  %v2117_v19 = vmul.f32 %v3929_v18, %v2116_v3  ;;  %v2121_v43 = vadd.f32 1.0, %v3937_v28 }
 0x288   : > { %v2983_v39 = vperm.slane %v2622_v41, %v4870_v50  ;;  %v3939_v12 = vpop.eup %3938  ;;  %vm6130_vm4 = vcmp.lt.f32.partialorder %v2118_v34, 0.0004427343  ;;  %v2124_v40 = vmul.f32 -0.5, %v3937_v28  ;;  %747 = vadd.xlane.f32.xlu0 %v493_v5  ;;  %v363_v1 = vmax.f32 %v235_v46, 0.0  ;;  %v670_v5 = vpop.xlane.xlu0 %669 }
 0x289   : > { %v1092_v35 = vmin.f32 %v6121_v15, 20.0  ;;  %vm7632_vm0 = vcmask 982912   ;;  %vm959_vm3 = vcmp.gt.f32.partialorder %v6062_v44, 20.0  ;;  %vm6137_vm6 = vcmp.lt.f32.partialorder %v2109_v21, 0.0004427343 }
 0x28a   : > { %v3941_v26 = vpop.eup %3940  ;;  %v2984_v59 = vsel %vm7632_vm0, %v2983_v39, %v2982_v48  ;;  %3944 = vlog2.f32 %v2121_v43  ;;  %v2108_v36 = vmul.f32 %v3931_v29, %v2107_v56  ;;  %vm961_vm10 = vcmp.gt.f32.partialorder %v6081_v33, 20.0 }
 0x28b   : > { %v2105_v34 = vmul.f32 0.6931472, %v3941_v26  ;;  %v2139_v32 = vadd.f32 1.0, %v3939_v12  ;;  %v6143_v22 = vadd.f32 %v4558_v37, %v668_v54  ;;  %v2120_v20 = vsel %vm6130_vm4, %v2117_v19, %v2114_v13 }
 0x28c   : > { %v2127_v3 = vand.u32 2147483647, %v3937_v28  ;;  %v2142_v48 = vmul.f32 -0.5, %v3939_v12  ;;  %v494_v30 = vmul.f32 %v4407_v24, %v363_v1  ;;  %v3943_v14 = vpop.eup %3942  ;;  %v2125_v61 = vadd.f32 1.0, %v2124_v40 }
 0x28d   : > { %v2111_v46 = vsel %vm6137_vm6, %v2108_v36, %v2105_v34  ;;  %3946 = vlog2.f32 %v2139_v32  ;;  %v1304_v29 = vmul.f32 1.442695, %v1092_v35  ;;  %v2130_v41 = vadd.f32 1.0, %v3943_v14  ;;  %v674_v34 = vpop.xlane.xlu2 %673 }
 0x28e   : > { %v2623_v6 = vsel %vm959_vm3, %v6062_v44, %v2111_v46  ;;  %v2143_v21 = vadd.f32 1.0, %v2142_v48  ;;  %749 = vadd.xlane.f32.xlu1 %v494_v30  ;;  %v6154_v56 = vadd.f32 %v4558_v37, %v666_v49  ;;  %vm963_vm5 = vcmp.gt.f32.partialorder %v6094_v25, 20.0 }
 0x28f   : > { %v2985_v24 = vperm.slane %v2623_v6, %v4938_v47  ;;  %v2145_v39 = vand.u32 2147483647, %v3939_v12  ;;  %v2133_v13 = vmul.f32 -0.5, %v3943_v14  ;;  %3948 = vpow2.f32 %v1304_v29 }
 0x290   : > { %v3945_v19 = vpop.eup %3944  ;;  %v2624_v43 = vsel %vm960_vm11, %v6046_v51, %v2120_v20  ;;  %vm6161_vm4 = vcmp.lt.f32.partialorder %v2127_v3, 0.0004427343  ;;  %3950 = vlog2.f32 %v2130_v41  ;;  %v1094_v54 = vmin.f32 %v6143_v22, 20.0  ;;  %v672_v20 = vpop.xlane.xlu1 %671 }
 0x291   : > { %v2986_v17 = vsel %vm2861_vm15, %v2985_v24, %v2984_v59  ;;  %v2123_v40 = vmul.f32 0.6931472, %v3945_v19  ;;  %v2126_v1 = vmul.f32 %v3937_v28, %v2125_v61  ;;  %v2144_v35 = vmul.f32 %v3939_v12, %v2143_v21  ;;  %v676_v44 = vpop.xlane.xlu0 %675 }
 0x292   : > { %v6169_v49 = vsel %vm3086_vm2, %v2986_v17, %v5879_v38  ;;  %v1308_v26 = vmul.f32 1.442695, %v1094_v54  ;;  %v1093_v18 = vmin.f32 %v6154_v56, 20.0  ;;  %v6173_v51 = vadd.f32 %v4558_v37, %v670_v5 }
 0x293   : > { %v3947_v36 = vpop.eup %3946  ;;  %v2129_v32 = vsel %vm6161_vm4, %v2126_v1, %v2123_v40  ;;  %vm6177_vm11 = vcmp.lt.f32.partialorder %v2145_v39, 0.0004427343  ;;  %v2134_v28 = vadd.f32 1.0, %v2133_v13  ;;  %v2136_v12 = vand.u32 2147483647, %v3943_v14 }
 0x294   : > { %v2625_v38 = vsel %vm961_vm10, %v6081_v33, %v2129_v32  ;;  %v2141_v3 = vmul.f32 0.6931472, %v3947_v36  ;;  %3952 = vpow2.f32 %v1308_v26  ;;  %v1306_v48 = vmul.f32 1.442695, %v1093_v18 }
 0x295   : > { %v3949_v30 = vpop.eup %3948  ;;  %v2987_v46 = vperm.slane %v2624_v43, %v7594_v62  ;;  %v2988_v61 = vperm.slane %v2625_v38, %v7529_v0  ;;  %v1095_v29 = vmin.f32 %v6173_v51, 20.0  ;;  %v6188_v6 = vadd.f32 %v4558_v37, %v674_v34 }
 0x296   : > { %v3951_v21 = vpop.eup %3950  ;;  %v2147_v41 = vsel %vm6177_vm11, %v2144_v35, %v2141_v3  ;;  %v2148_v5 = vadd.f32 1.0, %v3949_v30  ;;  %v2151_v24 = vmul.f32 -0.5, %v3949_v30  ;;  %v6193_v33 = vadd.f32 %v4558_v37, %v672_v20  ;;  %v680_v3 = vpop.xlane.xlu2 %679 }
 0x297   : > { %v2989_v39 = vsel %vm2805_vm9, %v2988_v61, %v2987_v46  ;;  %v2132_v13 = vmul.f32 0.6931472, %v3951_v21  ;;  %v2135_v19 = vmul.f32 %v3943_v14, %v2134_v28  ;;  %3954 = vpow2.f32 %v1306_v48 }
 0x298   : > { %v2627_v43 = vsel %vm963_vm5, %v6094_v25, %v2147_v41  ;;  %vm962_vm2 = vcmp.gt.f32.partialorder %v6109_v57, 20.0  ;;  %vm2137_vm0 = vcmp.lt.f32.partialorder %v2136_v12, 0.0004427343  ;;  %3956 = vlog2.f32 %v2148_v5 }
 0x299   : > { %v2138_v54 = vsel %vm2137_vm0, %v2135_v19, %v2132_v13  ;;  %v2152_v17 = vadd.f32 1.0, %v2151_v24  ;;  %v1310_v40 = vmul.f32 1.442695, %v1095_v29  ;;  %v1097_v1 = vmin.f32 %v6188_v6, 20.0 }
 0x29a   : > { %v3953_v35 = vpop.eup %3952  ;;  %v2626_v26 = vsel %vm962_vm2, %v6109_v57, %v2138_v54  ;;  %vm964_vm3 = vcmp.gt.f32.partialorder %v6121_v15, 20.0  ;;  %v1096_v14 = vmin.f32 %v6193_v33, 20.0  ;;  %v6206_v36 = vadd.f32 %v4558_v37, %v676_v44 }
 0x29b   : > { %v2990_v18 = vperm.slane %v2626_v26, %v7600_v16  ;;  %v2166_v25 = vadd.f32 1.0, %v3953_v35  ;;  %v2169_v34 = vmul.f32 -0.5, %v3953_v35  ;;  %v2992_v32 = vperm.slane %v2627_v43, %v4637_v31 }
 0x29c   : > { %v2154_v59 = vand.u32 2147483647, %v3949_v30  ;;  %3958 = vpow2.f32 %v1310_v40  ;;  %v1314_v28 = vmul.f32 1.442695, %v1097_v1  ;;  %v2153_v57 = vmul.f32 %v3949_v30, %v2152_v17  ;;  %v678_v40 = vpop.xlane.xlu1 %677 }
 0x29d   : > { %v3955_v12 = vpop.eup %3954  ;;  %v2991_v20 = vsel %vm2809_vm12, %v2990_v18, %v2989_v39  ;;  %3960 = vlog2.f32 %v2166_v25  ;;  %v1312_v38 = vmul.f32 1.442695, %v1096_v14  ;;  %v2170_v61 = vadd.f32 1.0, %v2169_v34 }
 0x29e   : > { %v3957_v48 = vpop.eup %3956  ;;  %v2993_v46 = vsel %vm2813_vm13, %v2992_v32, %v2991_v20  ;;  %v2172_v29 = vand.u32 2147483647, %v3953_v35  ;;  %v2157_v21 = vadd.f32 1.0, %v3955_v12  ;;  %v2160_v5 = vmul.f32 -0.5, %v3955_v12 }
 0x29f   : > { %v2150_v41 = vmul.f32 0.6931472, %v3957_v48  ;;  %3962 = vpow2.f32 %v1314_v28  ;;  %v1098_v24 = vmin.f32 %v6206_v36, 20.0  ;;  %vm2155_vm6 = vcmp.lt.f32.partialorder %v2154_v59, 0.0004427343 }
 0x2a0   : > { %vm966_vm10 = vcmp.gt.f32.partialorder %v6143_v22, 20.0  ;;  %3964 = vlog2.f32 %v2157_v21  ;;  %v6214_v30 = vadd.f32 %v4558_v37, %v680_v3  ;;  %vm965_vm5 = vcmp.gt.f32.partialorder %v6154_v56, 20.0 }
 0x2a1   : > { %v2156_v39 = vsel %vm2155_vm6, %v2153_v57, %v2150_v41  ;;  %3966 = vpow2.f32 %v1312_v38  ;;  %v1316_v13 = vmul.f32 1.442695, %v1098_v24  ;;  %v2171_v44 = vmul.f32 %v3953_v35, %v2170_v61 }
 0x2a2   : > { %v3959_v19 = vpop.eup %3958  ;;  %v2628_v43 = vsel %vm964_vm3, %v6121_v15, %v2156_v39  ;;  %vm6220_vm4 = vcmp.lt.f32.partialorder %v2172_v29, 0.0004427343  ;;  %v1100_v17 = vmin.f32 %v6214_v30, 20.0  ;;  %v2161_v14 = vadd.f32 1.0, %v2160_v5 }
 0x2a3   : > { %v3961_v1 = vpop.eup %3960  ;;  %v2994_v26 = vperm.slane %v2628_v43, %v4623_v58  ;;  %v2175_v18 = vadd.f32 1.0, %v3959_v19  ;;  %v2178_v25 = vmul.f32 -0.5, %v3959_v19  ;;  %v2163_v32 = vand.u32 2147483647, %v3955_v12 }
 0x2a4   : > { %v2168_v34 = vmul.f32 0.6931472, %v3961_v1  ;;  %3968 = vpow2.f32 %v1316_v13  ;;  %v1320_v59 = vmul.f32 1.442695, %v1100_v17  ;;  %v2181_v35 = vand.u32 2147483647, %v3959_v19 }
 0x2a5   : > { %v3963_v28 = vpop.eup %3962  ;;  %v2995_v15 = vsel %vm2817_vm14, %v2994_v26, %v2993_v46  ;;  %3970 = vlog2.f32 %v2175_v18  ;;  %v6228_v20 = vadd.f32 %v4558_v37, %v678_v40  ;;  %v2179_v3 = vadd.f32 1.0, %v2178_v25  ;;  %v682_v40 = vpop.xlane.xlu0 %681 }
 0x2a6   : > { %v3965_v57 = vpop.eup %3964  ;;  %v2174_v38 = vsel %vm6220_vm4, %v2171_v44, %v2168_v34  ;;  %v2193_v48 = vadd.f32 1.0, %v3963_v28  ;;  %v2196_v61 = vmul.f32 -0.5, %v3963_v28  ;;  %v2162_v41 = vmul.f32 %v3955_v12, %v2161_v14 }
 0x2a7   : > { %v3967_v29 = vpop.eup %3966  ;;  %v2159_v21 = vmul.f32 0.6931472, %v3965_v57  ;;  %v2199_v5 = vand.u32 2147483647, %v3963_v28  ;;  %3972 = vpow2.f32 %v1320_v59  ;;  %v2630_v46 = vsel %vm966_vm10, %v6143_v22, %v2174_v38 }
 0x2a8   : > { %vm2164_vm11 = vcmp.lt.f32.partialorder %v2163_v32, 0.0004427343  ;;  %vm967_vm2 = vcmp.gt.f32.partialorder %v6173_v51, 20.0  ;;  %3974 = vlog2.f32 %v2193_v48  ;;  %v2197_v39 = vadd.f32 1.0, %v2196_v61 }
 0x2a9   : > { %v2165_v24 = vsel %vm2164_vm11, %v2162_v41, %v2159_v21  ;;  %v2184_v13 = vadd.f32 1.0, %v3967_v29  ;;  %v2187_v43 = vmul.f32 -0.5, %v3967_v29  ;;  %v2180_v12 = vmul.f32 %v3959_v19, %v2179_v3  ;;  %v686_v41 = vpop.xlane.xlu2 %685 }
 0x2aa   : > { %v3969_v44 = vpop.eup %3968  ;;  %v2629_v54 = vsel %vm965_vm5, %v6154_v56, %v2165_v24  ;;  %vm6239_vm0 = vcmp.lt.f32.partialorder %v2181_v35, 0.0004427343  ;;  %v1099_v22 = vmin.f32 %v6228_v20, 20.0  ;;  %v2998_v26 = vperm.slane %v2630_v46, %v4788_v27  ;;  %v684_v24 = vpop.xlane.xlu1 %683 }
 0x2ab   : > { %v3971_v1 = vpop.eup %3970  ;;  %v2996_v14 = vperm.slane %v2629_v54, %v4629_v60  ;;  %vm969_vm3 = vcmp.gt.f32.partialorder %v6188_v6, 20.0  ;;  %vm6247_vm6 = vcmp.lt.f32.partialorder %v2199_v5, 0.0004427343  ;;  %3976 = vlog2.f32 %v2184_v13 }
 0x2ac   : > { %v2177_v56 = vmul.f32 0.6931472, %v3971_v1  ;;  %v2190_v19 = vand.u32 2147483647, %v3967_v29  ;;  %v2202_v25 = vadd.f32 1.0, %v3969_v44  ;;  %v2205_v34 = vmul.f32 -0.5, %v3969_v44 }
 0x2ad   : > { %v6251_v32 = vpop.eup %3972  ;;  %v2997_v59 = vsel %vm2821_vm1, %v2996_v14, %v2995_v15  ;;  %v2198_v35 = vmul.f32 %v3963_v28, %v2197_v39  ;;  %v2188_v57 = vadd.f32 1.0, %v2187_v43  ;;  %v6255_v38 = vadd.f32 %v4558_v37, %v682_v40 }
 0x2ae   : > { %v3975_v3 = vpop.eup %3974  ;;  %v2183_v48 = vsel %vm6239_vm0, %v2180_v12, %v2177_v56  ;;  %v2999_v61 = vsel %vm2825_vm7, %v2998_v26, %v2997_v59  ;;  %3978 = vlog2.f32 %v2202_v25  ;;  %v1318_v21 = vmul.f32 1.442695, %v1099_v22 }
 0x2af   : > { %v2631_v5 = vsel %vm967_vm2, %v6173_v51, %v2183_v48  ;;  %v2195_v46 = vmul.f32 0.6931472, %v3975_v3  ;;  %v2206_v15 = vadd.f32 1.0, %v2205_v34  ;;  %v2220_v28 = vadd.f32 1.0, %v6251_v32 }
 0x2b0   : > { %v3000_v39 = vperm.slane %v2631_v5, %v7539_v53  ;;  %vm968_vm10 = vcmp.gt.f32.partialorder %v6193_v33, 20.0  ;;  %vm970_vm5 = vcmp.gt.f32.partialorder %v6206_v36, 20.0  ;;  %v2223_v13 = vmul.f32 -0.5, %v6251_v32 }
 0x2b1   : > { %v3977_v43 = vpop.eup %3976  ;;  %v2201_v54 = vsel %vm6247_vm6, %v2198_v35, %v2195_v46  ;;  %3980 = vlog2.f32 %v2220_v28  ;;  %v1101_v51 = vmin.f32 %v6255_v38, 20.0  ;;  %v6272_v12 = vadd.f32 %v4558_v37, %v686_v41  ;;  %v688_v35 = vpop.xlane.xlu0 %687 }
 0x2b2   : > { %v3001_v17 = vsel %vm2829_vm8, %v3000_v39, %v2999_v61  ;;  %v2186_v22 = vmul.f32 0.6931472, %v3977_v43  ;;  %v2189_v40 = vmul.f32 %v3967_v29, %v2188_v57  ;;  %v2208_v1 = vand.u32 2147483647, %v3969_v44 }
 0x2b3   : > { %vm2191_vm4 = vcmp.lt.f32.partialorder %v2190_v19, 0.0004427343  ;;  %v2207_v26 = vmul.f32 %v3969_v44, %v2206_v15  ;;  %3982 = vpow2.f32 %v1318_v21  ;;  %v1322_v14 = vmul.f32 1.442695, %v1101_v51  ;;  %v690_v51 = vpop.xlane.xlu1 %689 }
 0x2b4   : > { %v3979_v56 = vpop.eup %3978  ;;  %v2633_v18 = vsel %vm969_vm3, %v6188_v6, %v2201_v54  ;;  %v2192_v25 = vsel %vm2191_vm4, %v2189_v40, %v2186_v22  ;;  %v2224_v34 = vadd.f32 1.0, %v2223_v13  ;;  %v1103_v59 = vmin.f32 %v6272_v12, 20.0  ;;  %v692_v54 = vpop.xlane.xlu2 %691 }
 0x2b5   : > { %v2632_v3 = vsel %vm968_vm10, %v6193_v33, %v2192_v25  ;;  %v2204_v29 = vmul.f32 0.6931472, %v3979_v56  ;;  %3984 = vpow2.f32 %v1322_v14  ;;  %v6283_v44 = vadd.f32 %v4558_v37, %v684_v24 }
 0x2b6   : > { %v3002_v19 = vperm.slane %v2632_v3, %v7508_v52  ;;  %vm2209_vm11 = vcmp.lt.f32.partialorder %v2208_v1, 0.0004427343  ;;  %v2226_v57 = vand.u32 2147483647, %v6251_v32  ;;  %v1326_v6 = vmul.f32 1.442695, %v1103_v59 }
 0x2b7   : > { %v3981_v48 = vpop.eup %3980  ;;  %v3004_v61 = vperm.slane %v2633_v18, %v4821_v55  ;;  %v2210_v21 = vsel %vm2209_vm11, %v2207_v26, %v2204_v29  ;;  %v1102_v41 = vmin.f32 %v6283_v44, 20.0  ;;  %v6290_v5 = vadd.f32 %v4558_v37, %v688_v35 }
 0x2b8   : > { %vm7645_vm2 = vcmask 589312   ;;  %v2634_v46 = vsel %vm970_vm5, %v6206_v36, %v2210_v21  ;;  %v2225_v15 = vmul.f32 %v6251_v32, %v2224_v34  ;;  %3986 = vpow2.f32 %v1326_v6 }
 0x2b9   : > { %v3003_v33 = vsel %vm7645_vm2, %v3002_v19, %v3001_v17  ;;  %v3983_v28 = vpop.eup %3982  ;;  %vm7646_vm0 = vcmask 654912   ;;  %v3006_v39 = vperm.slane %v2634_v46, %v4813_v23  ;;  %v2222_v13 = vmul.f32 0.6931472, %v3981_v48 }
 0x2ba   : > { %v3005_v24 = vsel %vm7646_vm0, %v3004_v61, %v3003_v33  ;;  %v1324_v43 = vmul.f32 1.442695, %v1102_v41  ;;  %vm6299_vm3 = vcmp.lt.f32.partialorder %v2226_v57, 0.0004427343  ;;  %v2211_v17 = vadd.f32 1.0, %v3983_v28 }
 0x2bb   : > { %v3985_v40 = vpop.eup %3984  ;;  %vm7649_vm6 = vcmask 720512   ;;  %v2214_v1 = vmul.f32 -0.5, %v3983_v28  ;;  %v1104_v32 = vmin.f32 %v6290_v5, 20.0  ;;  %v6306_v26 = vadd.f32 %v4558_v37, %v692_v54 }
 0x2bc   : > { %v3007_v36 = vsel %vm7649_vm6, %v3006_v39, %v3005_v24  ;;  %3988 = vpow2.f32 %v1324_v43  ;;  %v6309_v14 = vadd.f32 %v4558_v37, %v690_v51  ;;  %v2228_v56 = vsel %vm6299_vm3, %v2225_v15, %v2222_v13 }
 0x2bd   : > { %3990 = vlog2.f32 %v2211_v17  ;;  %v2229_v18 = vadd.f32 1.0, %v3985_v40  ;;  %v2232_v25 = vmul.f32 -0.5, %v3985_v40  ;;  %v1328_v34 = vmul.f32 1.442695, %v1104_v32 }
 0x2be   : > { %v3987_v59 = vpop.eup %3986  ;;  %vm972_vm10 = vcmp.gt.f32.partialorder %v6214_v30, 20.0  ;;  %vm971_vm5 = vcmp.gt.f32.partialorder %v6228_v20, 20.0  ;;  %v2215_v35 = vadd.f32 1.0, %v2214_v1  ;;  %v2217_v3 = vand.u32 2147483647, %v3983_v28 }
 0x2bf   : > { %3992 = vlog2.f32 %v2229_v18  ;;  %v2247_v29 = vadd.f32 1.0, %v3987_v59  ;;  %v2636_v19 = vsel %vm972_vm10, %v6214_v30, %v2228_v56  ;;  %v2235_v57 = vand.u32 2147483647, %v3985_v40  ;;  %v694_v56 = vpop.xlane.xlu0 %693 }
 0x2c0   : > { %v2250_v6 = vmul.f32 -0.5, %v3987_v59  ;;  %3994 = vpow2.f32 %v1328_v34  ;;  %v2233_v61 = vadd.f32 1.0, %v2232_v25  ;;  %v1106_v21 = vmin.f32 %v6306_v26, 20.0 }
 0x2c1   : > { %3996 = vlog2.f32 %v2247_v29  ;;  %v1105_v41 = vmin.f32 %v6309_v14, 20.0  ;;  %vm973_vm4 = vcmp.gt.f32.partialorder %v6255_v38, 20.0  ;;  %v2253_v15 = vand.u32 2147483647, %v3987_v59 }
 0x2c2   : > { %v3989_v48 = vpop.eup %3988  ;;  %v2251_v46 = vadd.f32 1.0, %v2250_v6  ;;  %v2216_v13 = vmul.f32 %v3983_v28, %v2215_v35  ;;  %v3010_v54 = vperm.slane %v2636_v19, %v4899_v45  ;;  %vm2218_vm11 = vcmp.lt.f32.partialorder %v2217_v3, 0.0004427343 }
 0x2c3   : > { %v3991_v33 = vpop.eup %3990  ;;  %v2238_v24 = vadd.f32 1.0, %v3989_v48  ;;  %v2241_v43 = vmul.f32 -0.5, %v3989_v48  ;;  %v1330_v30 = vmul.f32 1.442695, %v1105_v41  ;;  %vm6320_vm2 = vcmp.lt.f32.partialorder %v2235_v57, 0.0004427343 }
 0x2c4   : > { %v2213_v39 = vmul.f32 0.6931472, %v3991_v33  ;;  %v2234_v1 = vmul.f32 %v3985_v40, %v2233_v61  ;;  %v1332_v32 = vmul.f32 1.442695, %v1106_v21  ;;  %v2252_v34 = vmul.f32 %v3987_v59, %v2251_v46  ;;  %v722_v33 = vpop.xlane.xlu2 %721 }
 0x2c5   : > { %3998 = vlog2.f32 %v2238_v24  ;;  %v3993_v22 = vpop.eup %3992  ;;  %vm6327_vm0 = vcmp.lt.f32.partialorder %v2253_v15, 0.0004427343  ;;  %v2242_v19 = vadd.f32 1.0, %v2241_v43  ;;  %v2244_v57 = vand.u32 2147483647, %v3989_v48 }
 0x2c6   : > { %v2219_v17 = vsel %vm2218_vm11, %v2216_v13, %v2213_v39  ;;  %4000 = vpow2.f32 %v1330_v30  ;;  %v3995_v18 = vpop.eup %3994  ;;  %v2231_v25 = vmul.f32 0.6931472, %v3993_v22  ;;  %v6335_v41 = vadd.f32 %v4558_v37, %v694_v56 }
 0x2c7   : > { %v2635_v28 = vsel %vm971_vm5, %v6228_v20, %v2219_v17  ;;  %v3997_v3 = vpop.eup %3996  ;;  %v2256_v40 = vadd.f32 1.0, %v3995_v18  ;;  %v2259_v21 = vmul.f32 -0.5, %v3995_v18  ;;  %vm7654_vm3 = vcmask 786112   ;;  %v724_v35 = vpop.xlane.xlu0 %723 }
 0x2c8   : > { %v3008_v29 = vperm.slane %v2635_v28, %v4798_v63  ;;  %v2237_v6 = vsel %vm6320_vm2, %v2234_v1, %v2231_v25  ;;  %v2249_v61 = vmul.f32 0.6931472, %v3997_v3  ;;  %vm975_vm6 = vcmp.gt.f32.partialorder %v6272_v12, 20.0 }
 0x2c9   : > { %v2637_v59 = vsel %vm973_vm4, %v6255_v38, %v2237_v6  ;;  %4002 = vlog2.f32 %v2256_v40  ;;  %vm7655_vm10 = vcmask 851712   ;;  %vm974_vm5 = vcmp.gt.f32.partialorder %v6283_v44, 20.0 }
 0x2ca   : > { %v3009_v20 = vsel %vm7654_vm3, %v3008_v29, %v3007_v36  ;;  %v3012_v24 = vperm.slane %v2637_v59, %v4882_v42  ;;  %v2255_v39 = vsel %vm6327_vm0, %v2252_v34, %v2249_v61  ;;  %v2243_v43 = vmul.f32 %v3989_v48, %v2242_v19 }
 0x2cb   : > { %v3999_v46 = vpop.eup %3998  ;;  %v3011_v15 = vsel %vm7655_vm10, %v3010_v54, %v3009_v20  ;;  %vm2245_vm11 = vcmp.lt.f32.partialorder %v2244_v57, 0.0004427343  ;;  %4004 = vpow2.f32 %v1332_v32  ;;  %vm7656_vm4 = vcmask 917312   ;;  %v720_v54 = vpop.xlane.xlu1 %719 }
 0x2cc   : > { %v4001_v13 = vpop.eup %4000  ;;  %v2240_v36 = vmul.f32 0.6931472, %v3999_v46  ;;  %v3013_v38 = vsel %vm7656_vm4, %v3012_v24, %v3011_v15  ;;  %v2260_v30 = vadd.f32 1.0, %v2259_v21  ;;  %v1107_v51 = vmin.f32 %v6335_v41, 20.0 }
 0x2cd   : > { %v6350_v22 = vadd.f32 %v4558_v37, %v722_v33  ;;  %v2639_v17 = vsel %vm975_vm6, %v6272_v12, %v2255_v39  ;;  %v2262_v56 = vand.u32 2147483647, %v3995_v18  ;;  %v2265_v28 = vadd.f32 1.0, %v4001_v13 }
 0x2ce   : > { %v2246_v1 = vsel %vm2245_vm11, %v2243_v43, %v2240_v36  ;;  %v2268_v25 = vmul.f32 -0.5, %v4001_v13  ;;  %v3016_v3 = vperm.slane %v2639_v17, %v4938_v47  ;;  %v2261_v19 = vmul.f32 %v3995_v18, %v2260_v30  ;;  %v726_v18 = vpop.xlane.xlu2 %725 }
 0x2cf   : > { %v2638_v48 = vsel %vm974_vm5, %v6283_v44, %v2246_v1  ;;  %v4003_v32 = vpop.eup %4002  ;;  %4006 = vlog2.f32 %v2265_v28  ;;  %v1334_v57 = vmul.f32 1.442695, %v1107_v51  ;;  %vm7657_vm2 = vcmask 982912  }
 0x2d0   : > { %v3014_v34 = vperm.slane %v2638_v48, %v4870_v50  ;;  %v2258_v29 = vmul.f32 0.6931472, %v4003_v32  ;;  %vm2263_vm0 = vcmp.lt.f32.partialorder %v2262_v56, 0.0004427343  ;;  %v1121_v12 = vmin.f32 %v6350_v22, 20.0 }
 0x2d1   : > { %v4005_v40 = vpop.eup %4004  ;;  %v2269_v21 = vadd.f32 1.0, %v2268_v25  ;;  %v6364_v20 = vadd.f32 %v4558_v37, %v720_v54  ;;  %v2271_v59 = vand.u32 2147483647, %v4001_v13  ;;  %v6367_v33 = vadd.f32 %v4558_v37, %v724_v35 }
 0x2d2   : > { %v3015_v6 = vsel %vm7657_vm2, %v3014_v34, %v3013_v38  ;;  %v2264_v44 = vsel %vm2263_vm0, %v2261_v19, %v2258_v29  ;;  %vm976_vm3 = vcmp.gt.f32.partialorder %v6290_v5, 20.0  ;;  %4008 = vpow2.f32 %v1334_v57 }
 0x2d3   : > { %v6361_v61 = vsel %vm2861_vm15, %v3016_v3, %v3015_v6  ;;  %v2640_v15 = vsel %vm976_vm3, %v6290_v5, %v2264_v44  ;;  %v2274_v24 = vadd.f32 1.0, %v4005_v40  ;;  %v1362_v39 = vmul.f32 1.442695, %v1121_v12  ;;  %v696_v51 = vpop.xlane.xlu1 %695 }
 0x2d4   : > { %v2270_v43 = vmul.f32 %v4001_v13, %v2269_v21  ;;  %v1120_v38 = vmin.f32 %v6364_v20, 20.0  ;;  %v6373_v30 = vadd.f32 %v4558_v37, %v726_v18  ;;  %vm2272_vm6 = vcmp.lt.f32.partialorder %v2271_v59, 0.0004427343  ;;  %v698_v13 = vpop.xlane.xlu0 %697 }
 0x2d5   : > { %v4007_v46 = vpop.eup %4006  ;;  %v1122_v54 = vmin.f32 %v6367_v33, 20.0  ;;  %v3018_v17 = vperm.slane %v2640_v15, %v7594_v62  ;;  %vm977_vm10 = vcmp.gt.f32.partialorder %v6309_v14, 20.0  ;;  %4010 = vpow2.f32 %v1362_v39 }
 0x2d6   : > { %v2267_v36 = vmul.f32 0.6931472, %v4007_v46  ;;  %v6380_v56 = vadd.f32 %v4558_v37, %v696_v51  ;;  %4012 = vlog2.f32 %v2274_v24  ;;  %v1360_v25 = vmul.f32 1.442695, %v1120_v38  ;;  %v700_v39 = vpop.xlane.xlu2 %699 }
 0x2d7   : > { %v1123_v32 = vmin.f32 %v6373_v30, 20.0  ;;  %v2277_v34 = vmul.f32 -0.5, %v4005_v40  ;;  %v1364_v35 = vmul.f32 1.442695, %v1122_v54  ;;  %v6388_v29 = vadd.f32 %v4558_v37, %v698_v13 }
 0x2d8   : > { %v2273_v1 = vsel %vm2272_vm6, %v2270_v43, %v2267_v36  ;;  %v4009_v28 = vpop.eup %4008  ;;  %v1108_v19 = vmin.f32 %v6380_v56, 20.0  ;;  %4014 = vpow2.f32 %v1360_v25  ;;  %v2280_v21 = vand.u32 2147483647, %v4005_v40 }
 0x2d9   : > { %v2641_v5 = vsel %vm977_vm10, %v6309_v14, %v2273_v1  ;;  %v2283_v14 = vadd.f32 1.0, %v4009_v28  ;;  %v1366_v57 = vmul.f32 1.442695, %v1123_v32  ;;  %v2278_v12 = vadd.f32 1.0, %v2277_v34 }
 0x2da   : > { %v3019_v48 = vperm.slane %v2641_v5, %v7529_v0  ;;  %4016 = vpow2.f32 %v1364_v35  ;;  %v1109_v59 = vmin.f32 %v6388_v29, 20.0  ;;  %v1336_v18 = vmul.f32 1.442695, %v1108_v19 }
 0x2db   : > { %v4011_v6 = vpop.eup %4010  ;;  %4018 = vlog2.f32 %v2283_v14  ;;  %v2279_v24 = vmul.f32 %v4005_v40, %v2278_v12  ;;  %vm6394_vm5 = vcmp.lt.f32.partialorder %v2280_v21, 0.0004427343  ;;  %v2286_v38 = vmul.f32 -0.5, %v4009_v28  ;;  %v728_v54 = vpop.xlane.xlu1 %727 }
 0x2dc   : > { %v6385_v3 = vsel %vm2805_vm9, %v3019_v48, %v3018_v17  ;;  %v4013_v44 = vpop.eup %4012  ;;  %v2409_v46 = vadd.f32 1.0, %v4011_v6  ;;  %4020 = vpow2.f32 %v1366_v57  ;;  %v1338_v51 = vmul.f32 1.442695, %v1109_v59  ;;  %v730_v57 = vpop.xlane.xlu0 %729 }
 0x2dd   : > { %v2276_v15 = vmul.f32 0.6931472, %v4013_v44  ;;  %v2412_v1 = vmul.f32 -0.5, %v4011_v6  ;;  %4022 = vpow2.f32 %v1336_v18  ;;  %v6404_v48 = vadd.f32 %v4558_v37, %v728_v54 }
 0x2de   : > { %v6392_v36 = vpop.eup %4014  ;;  %4024 = vlog2.f32 %v2409_v46  ;;  %v2287_v32 = vadd.f32 1.0, %v2286_v38  ;;  %v6410_v35 = vadd.f32 %v4558_v37, %v700_v39  ;;  %v2289_v14 = vand.u32 2147483647, %v4009_v28  ;;  %v732_v54 = vpop.xlane.xlu2 %731 }
 0x2df   : > { %v2282_v13 = vsel %vm6394_vm5, %v2279_v24, %v2276_v15  ;;  %v2400_v40 = vadd.f32 1.0, %v6392_v36  ;;  %4026 = vpow2.f32 %v1338_v51  ;;  %v2413_v19 = vadd.f32 1.0, %v2412_v1 }
 0x2e0   : > { %v6398_v17 = vpop.eup %4016  ;;  %vm978_vm11 = vcmp.gt.f32.partialorder %v6306_v26, 20.0  ;;  %vm979_vm4 = vcmp.gt.f32.partialorder %v6335_v41, 20.0  ;;  %v1124_v18 = vmin.f32 %v6404_v48, 20.0  ;;  %v2288_v15 = vmul.f32 %v4009_v28, %v2287_v32 }
 0x2e1   : > { %v4019_v5 = vpop.eup %4018  ;;  %v2418_v34 = vadd.f32 1.0, %v6398_v17  ;;  %v6417_v21 = vsel %vm978_vm11, %v6306_v26, %v2282_v13  ;;  %4028 = vlog2.f32 %v2400_v40  ;;  %v2415_v24 = vand.u32 2147483647, %v4011_v6 }
 0x2e2   : > { %v6406_v25 = vpop.eup %4020  ;;  %v2285_v12 = vmul.f32 0.6931472, %v4019_v5  ;;  %v1110_v39 = vmin.f32 %v6410_v35, 20.0  ;;  %vm6422_vm2 = vcmp.lt.f32.partialorder %v2289_v14, 0.0004427343  ;;  %v2414_v38 = vmul.f32 %v4011_v6, %v2413_v19 }
 0x2e3   : > { %v6414_v44 = vpop.eup %4022  ;;  %v2427_v59 = vadd.f32 1.0, %v6406_v25  ;;  %4030 = vlog2.f32 %v2418_v34  ;;  %v2403_v51 = vmul.f32 -0.5, %v6392_v36  ;;  %v2406_v26 = vand.u32 2147483647, %v6392_v36 }
 0x2e4   : > { %v4025_v46 = vpop.eup %4024  ;;  %v2291_v5 = vsel %vm6422_vm2, %v2288_v15, %v2285_v12  ;;  %v2421_v28 = vmul.f32 -0.5, %v6398_v17  ;;  %v2292_v13 = vadd.f32 1.0, %v6414_v44  ;;  %v6435_v40 = vadd.f32 %v4558_v37, %v730_v57  ;;  %v704_v4 = vpop.xlane.xlu0 %703 }
 0x2e5   : > { %v6428_v1 = vpop.eup %4026  ;;  %v2411_v32 = vmul.f32 0.6931472, %v4025_v46  ;;  %4032 = vlog2.f32 %v2427_v59  ;;  %v2430_v6 = vmul.f32 -0.5, %v6406_v25  ;;  %v1368_v34 = vmul.f32 1.442695, %v1124_v18  ;;  %v702_v46 = vpop.xlane.xlu1 %701 }
 0x2e6   : > { %vm993_vm0 = vcmp.gt.f32.partialorder %v6350_v22, 20.0  ;;  %vm6439_vm3 = vcmp.lt.f32.partialorder %v2415_v24, 0.0004427343  ;;  %v1340_v19 = vmul.f32 1.442695, %v1110_v39  ;;  %v6444_v12 = vadd.f32 %v4558_v37, %v732_v54 }
 0x2e7   : > { %v4029_v15 = vpop.eup %4028  ;;  %v2404_v43 = vadd.f32 1.0, %v2403_v51  ;;  %vm6448_vm6 = vcmp.lt.f32.partialorder %v2406_v26, 0.0004427343  ;;  %v2301_v18 = vadd.f32 1.0, %v6428_v1  ;;  %v6456_v39 = vsel %vm979_vm4, %v6335_v41, %v2291_v5 }
 0x2e8   : > { %vm992_vm10 = vcmp.gt.f32.partialorder %v6364_v20, 20.0  ;;  %v2424_v54 = vand.u32 2147483647, %v6398_v17  ;;  %4034 = vlog2.f32 %v2292_v13  ;;  %v1125_v51 = vmin.f32 %v6435_v40, 20.0 }
 0x2e9   : > { %v4031_v24 = vpop.eup %4030  ;;  %v2417_v26 = vsel %vm6439_vm3, %v2414_v38, %v2411_v32  ;;  %v2422_v57 = vadd.f32 1.0, %v2421_v28  ;;  %v2431_v2 = vadd.f32 1.0, %v2430_v6  ;;  %4036 = vpow2.f32 %v1368_v34 }
 0x2ea   : > { %v2402_v7 = vmul.f32 0.6931472, %v4029_v15  ;;  %vm994_vm5 = vcmp.gt.f32.partialorder %v6367_v33, 20.0  ;;  %4038 = vpow2.f32 %v1340_v19  ;;  %v1126_v41 = vmin.f32 %v6444_v12, 20.0 }
 0x2eb   : > { %v6466_v5 = vadd.f32 %v4558_v37, %v702_v46  ;;  %v4033_v8 = vpop.eup %4032  ;;  %v2420_v13 = vmul.f32 0.6931472, %v4031_v24  ;;  %v2433_v9 = vand.u32 2147483647, %v6406_v25  ;;  %v2295_v14 = vmul.f32 -0.5, %v6414_v44  ;;  %v706_v46 = vpop.xlane.xlu2 %705 }
 0x2ec   : > { %4040 = vlog2.f32 %v2301_v18  ;;  %v2657_v38 = vsel %vm993_vm0, %v6350_v22, %v2417_v26  ;;  %v2405_v28 = vmul.f32 %v6392_v36, %v2404_v43  ;;  %vm995_vm11 = vcmp.gt.f32.partialorder %v6373_v30, 20.0 }
 0x2ed   : > { %v1370_v32 = vmul.f32 1.442695, %v1125_v51  ;;  %v6476_v6 = vadd.f32 %v4558_v37, %v704_v4  ;;  %v2423_v34 = vmul.f32 %v6398_v17, %v2422_v57  ;;  %vm6479_vm4 = vcmp.lt.f32.partialorder %v2424_v54, 0.0004427343 }
 0x2ee   : > { %v2432_v15 = vmul.f32 %v6406_v25, %v2431_v2  ;;  %v2304_v18 = vmul.f32 -0.5, %v6428_v1  ;;  %v4035_v22 = vpop.eup %4034  ;;  %v2408_v36 = vsel %vm6448_vm6, %v2405_v28, %v2402_v7  ;;  %v2429_v43 = vmul.f32 0.6931472, %v4033_v8 }
 0x2ef   : > { %v1372_v24 = vmul.f32 1.442695, %v1126_v41  ;;  %v1111_v4 = vmin.f32 %v6466_v5, 20.0  ;;  %v6488_v51 = vpop.eup %4036  ;;  %v3050_v17 = vperm.slane %v2657_v38, %v7529_v0  ;;  %v2426_v57 = vsel %vm6479_vm4, %v2423_v34, %v2420_v13 }
 0x2f0   : > { %vm6493_vm2 = vcmp.lt.f32.partialorder %v2433_v9, 0.0004427343  ;;  %v2296_v25 = vadd.f32 1.0, %v2295_v14  ;;  %v6497_v54 = vpop.eup %4038  ;;  %vm980_vm0 = vcmp.gt.f32.partialorder %v6380_v56, 20.0  ;;  %4042 = vpow2.f32 %v1370_v32  ;;  %v734_v32 = vpop.xlane.xlu1 %733 }
 0x2f1   : > { %v1342_v7 = vmul.f32 1.442695, %v1111_v4  ;;  %v1112_v8 = vmin.f32 %v6476_v6, 20.0  ;;  %v6502_v59 = vadd.f32 %v4558_v37, %v706_v46  ;;  %v2656_v9 = vsel %vm992_vm10, %v6364_v20, %v2408_v36 }
 0x2f2   : > { %v4041_v0 = vpop.eup %4040  ;;  %v2294_v26 = vmul.f32 0.6931472, %v4035_v22  ;;  %v2298_v41 = vand.u32 2147483647, %v6414_v44  ;;  %v2305_v13 = vadd.f32 1.0, %v2304_v18  ;;  %v2435_v14 = vsel %vm6493_vm2, %v2432_v15, %v2429_v43 }
 0x2f3   : > { %v2436_v38 = vadd.f32 1.0, %v6488_v51  ;;  %4044 = vpow2.f32 %v1372_v24  ;;  %v1344_v28 = vmul.f32 1.442695, %v1112_v8  ;;  %v2658_v34 = vsel %vm994_vm5, %v6367_v33, %v2426_v57 }
 0x2f4   : > { %v2307_v19 = vand.u32 2147483647, %v6428_v1  ;;  %v2310_v20 = vadd.f32 1.0, %v6497_v54  ;;  %4046 = vpow2.f32 %v1342_v7  ;;  %v3049_v46 = vperm.slane %v2656_v9, %v7594_v62  ;;  %v736_v9 = vpop.xlane.xlu0 %735 }
 0x2f5   : > { %v2297_v18 = vmul.f32 %v6414_v44, %v2296_v25  ;;  %v2303_v22 = vmul.f32 0.6931472, %v4041_v0  ;;  %v1113_v15 = vmin.f32 %v6502_v59, 20.0  ;;  %v2659_v36 = vsel %vm995_vm11, %v6373_v30, %v2435_v14 }
 0x2f6   : > { %vm6522_vm3 = vcmp.lt.f32.partialorder %v2298_v41, 0.0004427343  ;;  %4048 = vpow2.f32 %v1344_v28  ;;  %v6527_v33 = vadd.f32 %v4558_v37, %v734_v32  ;;  %v6529_v24 = vpop.eup %4042  ;;  %v3052_v62 = vperm.slane %v2658_v34, %v7600_v16 }
 0x2f7   : > { %v2300_v44 = vsel %vm6522_vm3, %v2297_v18, %v2294_v26  ;;  %v2306_v4 = vmul.f32 %v6428_v1, %v2305_v13  ;;  %4050 = vlog2.f32 %v2436_v38  ;;  %v3023_v30 = vperm.slane %v6456_v39, %v4637_v31 }
 0x2f8   : > { %vm6537_vm6 = vcmp.lt.f32.partialorder %v2307_v19, 0.0004427343  ;;  %4052 = vlog2.f32 %v2310_v20  ;;  %v2313_v2 = vmul.f32 -0.5, %v6497_v54  ;;  %v3051_v7 = vsel %vm2805_vm9, %v3050_v17, %v3049_v46 }
 0x2f9   : > { %v6542_v25 = vpop.eup %4044  ;;  %v3054_v8 = vperm.slane %v2659_v36, %v4637_v31  ;;  %v2309_v1 = vsel %vm6537_vm6, %v2306_v4, %v2303_v22  ;;  %v1346_v0 = vmul.f32 1.442695, %v1113_v15  ;;  %v2644_v39 = vsel %vm980_vm0, %v6380_v56, %v2300_v44  ;;  %v738_v36 = vpop.xlane.xlu2 %737 }
 0x2fa   : > { %v6548_v26 = vpop.eup %4046  ;;  %v2439_v41 = vmul.f32 -0.5, %v6488_v51  ;;  %v2445_v13 = vadd.f32 1.0, %v6529_v24  ;;  %v1127_v14 = vmin.f32 %v6527_v33, 20.0  ;;  %v7674_v31 = vperm.slane %v6417_v21, %v7600_v16 }
 0x2fb   : > { %v3053_v38 = vsel %vm2809_vm12, %v3052_v62, %v3051_v7  ;;  %vm981_vm9 = vcmp.gt.f32.partialorder %v6388_v29, 20.0  ;;  %v2316_v28 = vand.u32 2147483647, %v6497_v54  ;;  %v2314_v34 = vadd.f32 1.0, %v2313_v2 }
 0x2fc   : > { %v3022_v17 = vsel %vm2809_vm12, %v7674_v31, %v6385_v3  ;;  %v6564_v32 = vpop.eup %4048  ;;  %v2645_v56 = vsel %vm981_vm9, %v6388_v29, %v2309_v1  ;;  %v2454_v19 = vadd.f32 1.0, %v6542_v25  ;;  %v6569_v20 = vadd.f32 %v4558_v37, %v736_v9 }
 0x2fd   : > { %v4051_v46 = vpop.eup %4050  ;;  %v3024_v16 = vsel %vm2813_vm13, %v3023_v30, %v3022_v17  ;;  %v3025_v3 = vperm.slane %v2644_v39, %v4623_v58  ;;  %v2319_v21 = vadd.f32 1.0, %v6548_v26  ;;  %4054 = vpow2.f32 %v1346_v0  ;;  %v708_v30 = vpop.xlane.xlu1 %707 }
 0x2fe   : > { %v4053_v18 = vpop.eup %4052  ;;  %v6575_v22 = vsel %vm2813_vm13, %v3054_v8, %v3053_v38  ;;  %vm996_vm12 = vcmp.gt.f32.partialorder %v6404_v48, 20.0  ;;  %v2440_v29 = vadd.f32 1.0, %v2439_v41  ;;  %4056 = vlog2.f32 %v2445_v13 }
 0x2ff   : > { %v1374_v15 = vmul.f32 1.442695, %v1127_v14  ;;  %v3027_v43 = vperm.slane %v2645_v56, %v4629_v60  ;;  %vm6579_vm10 = vcmp.lt.f32.partialorder %v2316_v28, 0.0004427343  ;;  %v2442_v44 = vand.u32 2147483647, %v6488_v51 }
 0x300   : > { %v2328_v4 = vadd.f32 1.0, %v6564_v32  ;;  %v6586_v57 = vmul.f32 %v6497_v54, %v2314_v34  ;;  %v2438_v2 = vmul.f32 0.6931472, %v4051_v46  ;;  %4058 = vlog2.f32 %v2454_v19 }
 0x301   : > { %v1128_v7 = vmin.f32 %v6569_v20, 20.0  ;;  %v6589_v8 = vmul.f32 0.6931472, %v4053_v18  ;;  %v2448_v1 = vmul.f32 -0.5, %v6529_v24  ;;  %4060 = vlog2.f32 %v2319_v21 }
 0x302   : > { %v6593_v0 = vadd.f32 %v4558_v37, %v738_v36  ;;  %v2441_v9 = vmul.f32 %v6488_v51, %v2440_v29  ;;  %v2457_v39 = vmul.f32 -0.5, %v6542_v25  ;;  %4062 = vpow2.f32 %v1374_v15 }
 0x303   : > { %v6598_v54 = vadd.f32 %v4558_v37, %v708_v30  ;;  %v6600_v41 = vpop.eup %4054  ;;  %vm6602_vm13 = vcmp.lt.f32.partialorder %v2442_v44, 0.0004427343  ;;  %v2451_v14 = vand.u32 2147483647, %v6529_v24  ;;  %v2460_v31 = vand.u32 2147483647, %v6542_v25 }
 0x304   : > { %4064 = vlog2.f32 %v2328_v4  ;;  %v4057_v17 = vpop.eup %4056  ;;  %v3026_v51 = vsel %vm2817_vm14, %v3025_v3, %v3024_v16  ;;  %v2444_v38 = vsel %vm6602_vm13, %v2441_v9, %v2438_v2  ;;  %v2322_v28 = vmul.f32 -0.5, %v6548_v26  ;;  %v710_v16 = vpop.xlane.xlu0 %709 }
 0x305   : > { %v1376_v56 = vmul.f32 1.442695, %v1128_v7  ;;  %v6613_v34 = vsel %vm2821_vm1, %v3027_v43, %v3026_v51  ;;  %v2318_v19 = vsel %vm6579_vm10, %v6586_v57, %v6589_v8  ;;  %vm997_vm5 = vcmp.gt.f32.partialorder %v6435_v40, 20.0  ;;  %v712_v51 = vpop.xlane.xlu2 %711 }
 0x306   : > { %v2449_v46 = vadd.f32 1.0, %v2448_v1  ;;  %v1129_v21 = vmin.f32 %v6593_v0, 20.0  ;;  %v4059_v3 = vpop.eup %4058  ;;  %v2458_v18 = vadd.f32 1.0, %v2457_v39  ;;  %v2331_v29 = vmul.f32 -0.5, %v6564_v32 }
 0x307   : > { %v2337_v15 = vadd.f32 1.0, %v6600_v41  ;;  %v1114_v36 = vmin.f32 %v6598_v54, 20.0  ;;  %v4061_v43 = vpop.eup %4060  ;;  %v6627_v62 = vsel %vm996_vm12, %v6404_v48, %v2444_v38  ;;  %v2447_v44 = vmul.f32 0.6931472, %v4057_v17 }
 0x308   : > { %vm6629_vm11 = vcmp.lt.f32.partialorder %v2451_v14, 0.0004427343  ;;  %vm6633_vm4 = vcmp.lt.f32.partialorder %v2460_v31, 0.0004427343  ;;  %v6637_v57 = vpop.eup %4062  ;;  %vm982_vm2 = vcmp.gt.f32.partialorder %v6410_v35, 20.0  ;;  %v2323_v2 = vadd.f32 1.0, %v2322_v28 }
 0x309   : > { %v2325_v7 = vand.u32 2147483647, %v6548_v26  ;;  %4066 = vpow2.f32 %v1376_v56  ;;  %v6642_v48 = vadd.f32 %v4558_v37, %v710_v16  ;;  %v2450_v1 = vmul.f32 %v6529_v24, %v2449_v46 }
 0x30a   : > { %v4065_v8 = vpop.eup %4064  ;;  %vm998_vm0 = vcmp.gt.f32.partialorder %v6444_v12, 20.0  ;;  %vm983_vm3 = vcmp.gt.f32.partialorder %v6466_v5, 20.0  ;;  %v2334_v9 = vand.u32 2147483647, %v6564_v32  ;;  %v2340_v39 = vmul.f32 -0.5, %v6600_v41 }
 0x30b   : > { %v1378_v13 = vmul.f32 1.442695, %v1129_v21  ;;  %v2459_v14 = vmul.f32 %v6542_v25, %v2458_v18  ;;  %vm984_vm6 = vcmp.gt.f32.partialorder %v6476_v6, 20.0  ;;  %v2332_v31 = vadd.f32 1.0, %v2331_v29 }
 0x30c   : > { %4068 = vlog2.f32 %v2337_v15  ;;  %v1348_v17 = vmul.f32 1.442695, %v1114_v36  ;;  %v2453_v24 = vsel %vm6629_vm11, %v2450_v1, %v2447_v44  ;;  %v2456_v38 = vmul.f32 0.6931472, %v4059_v3  ;;  %v740_v1 = vpop.xlane.xlu1 %739 }
 0x30d   : > { %v2321_v28 = vmul.f32 0.6931472, %v4061_v43  ;;  %v2463_v56 = vadd.f32 1.0, %v6637_v57  ;;  %v2324_v46 = vmul.f32 %v6548_v26, %v2323_v2  ;;  %vm6655_vm9 = vcmp.lt.f32.partialorder %v2325_v7, 0.0004427343  ;;  %v744_v18 = vpop.xlane.xlu2 %743 }
 0x30e   : > { %v2330_v25 = vmul.f32 0.6931472, %v4065_v8  ;;  %v1115_v21 = vmin.f32 %v6642_v48, 20.0  ;;  %vm6660_vm12 = vcmp.lt.f32.partialorder %v2334_v9, 0.0004427343  ;;  %v2341_v29 = vadd.f32 1.0, %v2340_v39 }
 0x30f   : > { %4070 = vpow2.f32 %v1378_v13  ;;  %v6665_v3 = vadd.f32 %v4558_v37, %v712_v51  ;;  %v6667_v15 = vpop.eup %4066  ;;  %v2661_v26 = vsel %vm997_vm5, %v6435_v40, %v2453_v24  ;;  %v2333_v36 = vmul.f32 %v6564_v32, %v2332_v31 }
 0x310   : > { %4072 = vpow2.f32 %v1348_v17  ;;  %v1350_v43 = vmul.f32 1.442695, %v1115_v21  ;;  %v2462_v44 = vsel %vm6633_vm4, %v2459_v14, %v2456_v38  ;;  %v2327_v4 = vsel %vm6655_vm9, %v2324_v46, %v2321_v28 }
 0x311   : > { %4074 = vlog2.f32 %v2463_v56  ;;  %v1116_v2 = vmin.f32 %v6665_v3, 20.0  ;;  %v3056_v8 = vperm.slane %v6627_v62, %v4623_v58  ;;  %v2336_v40 = vsel %vm6660_vm12, %v2333_v36, %v2330_v25 }
 0x312   : > { %v4069_v7 = vpop.eup %4068  ;;  %v2343_v32 = vand.u32 2147483647, %v6600_v41  ;;  %4076 = vpow2.f32 %v1350_v43  ;;  %v2646_v30 = vsel %vm982_vm2, %v6410_v35, %v2318_v19  ;;  %v3058_v9 = vperm.slane %v2661_v26, %v4629_v60 }
 0x313   : > { %v2472_v39 = vadd.f32 1.0, %v6667_v15  ;;  %v1352_v13 = vmul.f32 1.442695, %v1116_v2  ;;  %v2662_v58 = vsel %vm998_vm0, %v6444_v12, %v2462_v44  ;;  %v2647_v62 = vsel %vm983_vm3, %v6466_v5, %v2327_v4  ;;  %v742_v12 = vpop.xlane.xlu0 %741 }
 0x314   : > { %v2342_v14 = vmul.f32 %v6600_v41, %v2341_v29  ;;  %v2466_v31 = vmul.f32 -0.5, %v6637_v57  ;;  %v2648_v60 = vsel %vm984_vm6, %v6476_v6, %v2336_v40  ;;  %v2339_v35 = vmul.f32 0.6931472, %v4069_v7 }
 0x315   : > { %v6696_v17 = vpop.eup %4070  ;;  %4078 = vpow2.f32 %v1352_v13  ;;  %v6702_v19 = vadd.f32 %v4558_v37, %v740_v1  ;;  %v3029_v5 = vperm.slane %v2646_v30, %v4788_v27  ;;  %v3057_v41 = vsel %vm2817_vm14, %v3056_v8, %v6575_v22 }
 0x316   : > { %v6704_v51 = vpop.eup %4072  ;;  %vm985_vm10 = vcmp.gt.f32.partialorder %v6502_v59, 20.0  ;;  %vm6710_vm13 = vcmp.lt.f32.partialorder %v2343_v32, 0.0004427343  ;;  %v3059_v38 = vsel %vm2821_vm1, %v3058_v9, %v3057_v41  ;;  %v3060_v28 = vperm.slane %v2662_v58, %v4788_v27  ;;  %v714_v9 = vpop.xlane.xlu1 %713 }
 0x317   : > { %v4075_v6 = vpop.eup %4074  ;;  %v3031_v56 = vperm.slane %v2647_v62, %v7539_v53  ;;  %4080 = vlog2.f32 %v2472_v39  ;;  %v3033_v16 = vperm.slane %v2648_v60, %v7508_v52  ;;  %v2467_v25 = vadd.f32 1.0, %v2466_v31 }
 0x318   : > { %v6717_v46 = vpop.eup %4076  ;;  %v2481_v22 = vadd.f32 1.0, %v6696_v17  ;;  %v6722_v21 = vadd.f32 %v4558_v37, %v742_v12  ;;  %v2345_v29 = vsel %vm6710_vm13, %v2342_v14, %v2339_v35  ;;  %v2469_v26 = vand.u32 2147483647, %v6637_v57 }
 0x319   : > { %v2346_v27 = vadd.f32 1.0, %v6704_v51  ;;  %v1130_v36 = vmin.f32 %v6702_v19, 20.0  ;;  %v3030_v43 = vsel %vm2825_vm7, %v3029_v5, %v6613_v34  ;;  %vm999_vm14 = vcmp.gt.f32.partialorder %v6527_v33, 20.0 }
 0x31a   : > { %v2465_v44 = vmul.f32 0.6931472, %v4075_v6  ;;  %v2355_v4 = vadd.f32 1.0, %v6717_v46  ;;  %v6736_v7 = vsel %vm2825_vm7, %v3060_v28, %v3059_v38  ;;  %v3032_v8 = vsel %vm2829_vm8, %v3031_v56, %v3030_v43 }
 0x31b   : > { %v6733_v2 = vpop.eup %4078  ;;  %v2475_v40 = vmul.f32 -0.5, %v6667_v15  ;;  %v6741_v32 = vadd.f32 %v4558_v37, %v744_v18  ;;  %v2649_v34 = vsel %vm985_vm10, %v6502_v59, %v2345_v29  ;;  %v2468_v1 = vmul.f32 %v6637_v57, %v2467_v25  ;;  %v716_v18 = vpop.xlane.xlu0 %715 }
 0x31c   : > { %4082 = vlog2.f32 %v2481_v22  ;;  %v1131_v30 = vmin.f32 %v6722_v21, 20.0  ;;  %vm7689_vm1 = vcmask 589312   ;;  %vm6749_vm7 = vcmp.lt.f32.partialorder %v2469_v26, 0.0004427343 }
 0x31d   : > { %v4081_v39 = vpop.eup %4080  ;;  %v3034_v13 = vsel %vm7689_vm1, %v3033_v16, %v3032_v8  ;;  %4084 = vlog2.f32 %v2346_v27  ;;  %v1380_v62 = vmul.f32 1.442695, %v1130_v36  ;;  %v2471_v14 = vsel %vm6749_vm7, %v2468_v1, %v2465_v44 }
 0x31e   : > { %v2484_v59 = vmul.f32 -0.5, %v6696_v17  ;;  %4086 = vlog2.f32 %v2355_v4  ;;  %v2364_v57 = vadd.f32 1.0, %v6733_v2  ;;  %vm1000_vm5 = vcmp.gt.f32.partialorder %v6569_v20, 20.0 }
 0x31f   : > { %v2476_v31 = vadd.f32 1.0, %v2475_v40  ;;  %v2478_v60 = vand.u32 2147483647, %v6667_v15  ;;  %v1132_v35 = vmin.f32 %v6741_v32, 20.0  ;;  %v6761_v12 = vadd.f32 %v4558_v37, %v714_v9 }
 0x320   : > { %v2474_v5 = vmul.f32 0.6931472, %v4081_v39  ;;  %v2349_v41 = vmul.f32 -0.5, %v6704_v51  ;;  %v1382_v24 = vmul.f32 1.442695, %v1131_v30  ;;  %vm3088_vm11 = vcmask 1045509  }
 0x321   : > { %v2663_v6 = vsel %vm999_vm14, %v6527_v33, %v2471_v14  ;;  %v2358_v38 = vmul.f32 -0.5, %v6717_v46  ;;  %4088 = vpow2.f32 %v1380_v62  ;;  %v6770_v28 = vsel %vm3088_vm11, %v6361_v61, %v6169_v49  ;;  %vm7703_vm14 = vmmov %vm7689_vm1 }
 0x322   : > { %v4083_v56 = vpop.eup %4082  ;;  %v3035_v16 = vperm.slane %v2649_v34, %v4821_v55  ;;  %v2485_v25 = vadd.f32 1.0, %v2484_v59  ;;  %4090 = vlog2.f32 %v2364_v57  ;;  %v2367_v22 = vmul.f32 -0.5, %v6733_v2 }
 0x323   : > { %v4085_v29 = vpop.eup %4084  ;;  %v2477_v26 = vmul.f32 %v6667_v15, %v2476_v31  ;;  %vm6775_vm4 = vcmp.lt.f32.partialorder %v2478_v60, 0.0004427343  ;;  %v2487_v27 = vand.u32 2147483647, %v6696_v17  ;;  %v1117_v49 = vmin.f32 %v6761_v12, 20.0 }
 0x324   : > { %v4087_v61 = vpop.eup %4086  ;;  %v3062_v36 = vperm.slane %v2663_v6, %v7539_v53  ;;  %vm986_vm2 = vcmp.gt.f32.partialorder %v6598_v54, 20.0  ;;  %v2350_v43 = vadd.f32 1.0, %v2349_v41  ;;  %v2352_v44 = vand.u32 2147483647, %v6704_v51 }
 0x325   : > { %4092 = vpow2.f32 %v1382_v24  ;;  %v2480_v15 = vsel %vm6775_vm4, %v2477_v26, %v2474_v5  ;;  %vm1001_vm0 = vcmp.gt.f32.partialorder %v6593_v0, 20.0  ;;  %vm987_vm3 = vcmp.gt.f32.partialorder %v6642_v48, 20.0 }
 0x326   : > { %v2359_v4 = vadd.f32 1.0, %v2358_v38  ;;  %v2361_v8 = vand.u32 2147483647, %v6717_v46  ;;  %v1384_v40 = vmul.f32 1.442695, %v1132_v35  ;;  %v2486_v53 = vmul.f32 %v6696_v17, %v2485_v25 }
 0x327   : > { %v2483_v34 = vmul.f32 0.6931472, %v4083_v56  ;;  %v2348_v1 = vmul.f32 0.6931472, %v4085_v29  ;;  %v2368_v30 = vadd.f32 1.0, %v2367_v22  ;;  %v6790_v9 = vpop.eup %4088  ;;  %vm7694_vm6 = vcmask 654912  }
 0x328   : > { %v6793_v39 = vsel %vm7694_vm6, %v3035_v16, %v3034_v13  ;;  %vm6795_vm9 = vcmp.lt.f32.partialorder %v2487_v27, 0.0004427343  ;;  %v2357_v62 = vmul.f32 0.6931472, %v4087_v61  ;;  %v1354_v14 = vmul.f32 1.442695, %v1117_v49  ;;  %v4091_v59 = vpop.eup %4090 }
 0x329   : > { %v2664_v57 = vsel %vm1000_vm5, %v6569_v20, %v2480_v15  ;;  %v2351_v17 = vmul.f32 %v6704_v51, %v2350_v43  ;;  %v2370_v31 = vand.u32 2147483647, %v6733_v2  ;;  %v6805_v60 = vadd.f32 %v4558_v37, %v716_v18  ;;  %v718_v20 = vpop.xlane.xlu2 %717  ;;  %v746_v51 = vpop.xlane.xlu1 %745 }
 0x32a   : > { %v3063_v13 = vsel %vm2829_vm8, %v3062_v36, %v6736_v7  ;;  %vm6809_vm12 = vcmp.lt.f32.partialorder %v2352_v44, 0.0004427343  ;;  %v2360_v5 = vmul.f32 %v6717_v46, %v2359_v4  ;;  %vm6814_vm10 = vcmp.lt.f32.partialorder %v2361_v8, 0.0004427343 }
 0x32b   : > { %vm988_vm13 = vcmp.gt.f32.partialorder %v6665_v3, 20.0  ;;  %v6819_v24 = vpop.eup %4092  ;;  %v2489_v6 = vsel %vm6795_vm9, %v2486_v53, %v2483_v34  ;;  %v2354_v7 = vsel %vm6809_vm12, %v2351_v17, %v2348_v1  ;;  %v2369_v38 = vmul.f32 %v6733_v2, %v2368_v30  ;;  %v748_v2 = vpop.xlane.xlu0 %747 }
 0x32c   : > { %4094 = vpow2.f32 %v1384_v40  ;;  %v2363_v46 = vsel %vm6814_vm10, %v2360_v5, %v2357_v62  ;;  %v2366_v56 = vmul.f32 0.6931472, %v4091_v59  ;;  %v2490_v16 = vadd.f32 1.0, %v6790_v9 }
 0x32d   : > { %4096 = vpow2.f32 %v1354_v14  ;;  %v3064_v25 = vperm.slane %v2664_v57, %v7508_v52  ;;  %vm6830_vm8 = vcmp.lt.f32.partialorder %v2370_v31, 0.0004427343  ;;  %v1118_v18 = vmin.f32 %v6805_v60, 20.0 }
 0x32e   : > { %v6836_v29 = vadd.f32 %v4558_v37, %v718_v20  ;;  %v2650_v26 = vsel %vm986_vm2, %v6598_v54, %v2354_v7  ;;  %v2493_v33 = vmul.f32 -0.5, %v6790_v9  ;;  %v2499_v27 = vadd.f32 1.0, %v6819_v24 }
 0x32f   : > { %v6844_v52 = vadd.f32 %v4558_v37, %v746_v51  ;;  %v6849_v49 = vsel %vm1001_vm0, %v6593_v0, %v2489_v6  ;;  %v2651_v61 = vsel %vm987_vm3, %v6642_v48, %v2363_v46  ;;  %v1356_v36 = vmul.f32 1.442695, %v1118_v18 }
 0x330   : > { %v1119_v43 = vmin.f32 %v6836_v29, 20.0  ;;  %v2372_v54 = vsel %vm6830_vm8, %v2369_v38, %v2366_v56  ;;  %4098 = vlog2.f32 %v2490_v16  ;;  %v6859_v15 = vadd.f32 %v4558_v37, %v748_v2 }
 0x331   : > { %v1133_v44 = vmin.f32 %v6844_v52, 20.0  ;;  %v3037_v0 = vperm.slane %v2650_v26, %v4813_v23  ;;  %v2496_v8 = vand.u32 2147483647, %v6790_v9  ;;  %4100 = vpow2.f32 %v1356_v36  ;;  %v750_v14 = vpop.xlane.xlu1 %749 }
 0x332   : > { %v6861_v4 = vpop.eup %4094  ;;  %v1358_v48 = vmul.f32 1.442695, %v1119_v43  ;;  %v3039_v34 = vperm.slane %v2651_v61, %v4798_v63  ;;  %v2494_v53 = vadd.f32 1.0, %v2493_v33  ;;  %4102 = vlog2.f32 %v2499_v27 }
 0x333   : > { %v4097_v40 = vpop.eup %4096  ;;  %v1386_v1 = vmul.f32 1.442695, %v1133_v44  ;;  %v2652_v30 = vsel %vm988_vm13, %v6665_v3, %v2372_v54  ;;  %v2502_v58 = vmul.f32 -0.5, %v6819_v24  ;;  %v2508_v59 = vadd.f32 1.0, %v6861_v4 }
 0x334   : > { %v2373_v62 = vadd.f32 1.0, %v4097_v40  ;;  %4104 = vpow2.f32 %v1358_v48  ;;  %v2376_v57 = vmul.f32 -0.5, %v4097_v40  ;;  %v1134_v17 = vmin.f32 %v6859_v15, 20.0 }
 0x335   : > { %4106 = vpow2.f32 %v1386_v1  ;;  %v6873_v31 = vsel %vm7703_vm14, %v3064_v25, %v3063_v13  ;;  %v3066_v35 = vperm.slane %v6849_v49, %v4821_v55  ;;  %vm7704_vm1 = vcmask 720512  }
 0x336   : > { %v3038_v3 = vsel %vm7704_vm1, %v3037_v0, %v6793_v39  ;;  %4108 = vlog2.f32 %v2373_v62  ;;  %v4099_v5 = vpop.eup %4098  ;;  %v2505_v41 = vand.u32 2147483647, %v6819_v24  ;;  %v2511_v20 = vmul.f32 -0.5, %v6861_v4 }
 0x337   : > { %vm989_vm7 = vcmp.gt.f32.partialorder %v6761_v12, 20.0  ;;  %v1388_v51 = vmul.f32 1.442695, %v1134_v17  ;;  %v6883_v6 = vadd.f32 %v4558_v37, %v750_v14  ;;  %v4101_v13 = vpop.eup %4100  ;;  %vm7705_vm5 = vcmask 786112  }
 0x338   : > { %v3040_v7 = vsel %vm7705_vm5, %v3039_v34, %v3038_v3  ;;  %v3041_v38 = vperm.slane %v2652_v30, %v4899_v45  ;;  %v6888_v46 = vmul.f32 %v6790_v9, %v2494_v53  ;;  %vm6890_vm11 = vcmp.lt.f32.partialorder %v2496_v8, 0.0004427343  ;;  %v4103_v56 = vpop.eup %4102 }
 0x339   : > { %v2503_v16 = vadd.f32 1.0, %v2502_v58  ;;  %4110 = vlog2.f32 %v2508_v59  ;;  %v2377_v25 = vadd.f32 1.0, %v2376_v57  ;;  %v2382_v22 = vadd.f32 1.0, %v4101_v13 }
 0x33a   : > { %v4105_v18 = vpop.eup %4104  ;;  %v2514_v37 = vand.u32 2147483647, %v6861_v4  ;;  %v2379_v2 = vand.u32 2147483647, %v4097_v40  ;;  %v2385_v26 = vmul.f32 -0.5, %v4101_v13  ;;  %4112 = vpow2.f32 %v1388_v51 }
 0x33b   : > { %v6895_v33 = vpop.eup %4106  ;;  %vm6897_vm4 = vcmp.lt.f32.partialorder %v2505_v41, 0.0004427343  ;;  %v2512_v27 = vadd.f32 1.0, %v2511_v20  ;;  %4114 = vlog2.f32 %v2382_v22  ;;  %v2391_v61 = vadd.f32 1.0, %v4105_v18 }
 0x33c   : > { %v1135_v36 = vmin.f32 %v6883_v6, 20.0  ;;  %v4109_v43 = vpop.eup %4108  ;;  %vm7710_vm2 = vcmask 851712   ;;  %v2492_v44 = vmul.f32 0.6931472, %v4099_v5  ;;  %vm990_vm0 = vcmp.gt.f32.partialorder %v6805_v60, 20.0 }
 0x33d   : > { %v3042_v54 = vsel %vm7710_vm2, %v3041_v38, %v3040_v7  ;;  %v2394_v0 = vmul.f32 -0.5, %v4105_v18  ;;  %v2517_v8 = vadd.f32 1.0, %v6895_v33  ;;  %v2504_v48 = vmul.f32 %v6819_v24, %v2503_v16 }
 0x33e   : > { %v2375_v34 = vmul.f32 0.6931472, %v4109_v43  ;;  %v2378_v53 = vmul.f32 %v4097_v40, %v2377_v25  ;;  %4116 = vlog2.f32 %v2391_v61  ;;  %vm1002_vm3 = vcmp.gt.f32.partialorder %v6702_v19, 20.0 }
 0x33f   : > { %vm6907_vm6 = vcmp.lt.f32.partialorder %v2514_v37, 0.0004427343  ;;  %vm2380_vm9 = vcmp.lt.f32.partialorder %v2379_v2, 0.0004427343  ;;  %v2386_v30 = vadd.f32 1.0, %v2385_v26  ;;  %v2395_v58 = vadd.f32 1.0, %v2394_v0  ;;  %v4111_v62 = vpop.eup %4110 }
 0x340   : > { %4118 = vlog2.f32 %v2517_v8  ;;  %vm1003_vm12 = vcmp.gt.f32.partialorder %v6722_v21, 20.0  ;;  %v2381_v14 = vsel %vm2380_vm9, %v2378_v53, %v2375_v34  ;;  %v2388_v59 = vand.u32 2147483647, %v4101_v13  ;;  %v4113_v17 = vpop.eup %4112 }
 0x341   : > { %v2397_v57 = vand.u32 2147483647, %v4105_v18  ;;  %v1390_v24 = vmul.f32 1.442695, %v1135_v36  ;;  %v2501_v40 = vmul.f32 0.6931472, %v4103_v56  ;;  %v2513_v3 = vmul.f32 %v6861_v4, %v2512_v27  ;;  %v4115_v20 = vpop.eup %4114 }
 0x342   : > { %v2653_v5 = vsel %vm989_vm7, %v6761_v12, %v2381_v14  ;;  %v2520_v41 = vmul.f32 -0.5, %v6895_v33  ;;  %v2498_v51 = vsel %vm6890_vm11, %v6888_v46, %v2492_v44  ;;  %vm3090_vm10 = vcmask 1046534  }
 0x343   : > { %v2526_v7 = vadd.f32 1.0, %v4113_v17  ;;  %v2529_v38 = vmul.f32 -0.5, %v4113_v17  ;;  %v2384_v16 = vmul.f32 0.6931472, %v4115_v20  ;;  %v2387_v25 = vmul.f32 %v4101_v13, %v2386_v30 }
 0x344   : > { %v2396_v22 = vmul.f32 %v4105_v18, %v2395_v58  ;;  %4120 = vpow2.f32 %v1390_v24  ;;  %v4117_v56 = vpop.eup %4116  ;;  %vm1004_vm13 = vcmp.gt.f32.partialorder %v6741_v32, 20.0  ;;  %v3043_v4 = vperm.slane %v2653_v5, %v4882_v42 }
 0x345   : > { %vm2389_vm8 = vcmp.lt.f32.partialorder %v2388_v59, 0.0004427343  ;;  %vm6922_vm14 = vcmp.lt.f32.partialorder %v2397_v57, 0.0004427343  ;;  %4122 = vlog2.f32 %v2526_v7  ;;  %v2507_v46 = vsel %vm6897_vm4, %v2504_v48, %v2501_v40 }
 0x346   : > { %v4119_v39 = vpop.eup %4118  ;;  %v2390_v37 = vsel %vm2389_vm8, %v2387_v25, %v2384_v16  ;;  %v2393_v2 = vmul.f32 0.6931472, %v4117_v56  ;;  %v2521_v13 = vadd.f32 1.0, %v2520_v41  ;;  %v2510_v18 = vmul.f32 0.6931472, %v4111_v62 }
 0x347   : > { %v2654_v26 = vsel %vm990_vm0, %v6805_v60, %v2390_v37  ;;  %v2523_v27 = vand.u32 2147483647, %v6895_v33  ;;  %v2530_v61 = vadd.f32 1.0, %v2529_v38  ;;  %vm991_vm1 = vcmp.gt.f32.partialorder %v6836_v29, 20.0 }
 0x348   : > { %v3045_v36 = vperm.slane %v2654_v26, %v4870_v50  ;;  %v2399_v43 = vsel %vm6922_vm14, %v2396_v22, %v2393_v2  ;;  %v2519_v9 = vmul.f32 0.6931472, %v4119_v39  ;;  %v2666_v44 = vsel %vm1002_vm3, %v6702_v19, %v2498_v51  ;;  %v7725_v22 = vld [vmem:[#allocation21_spill] sm:$0xff] (%p77_p0) }
 0x349   : > { %vm7715_vm7 = vcmask 917312   ;;  %v2655_v8 = vsel %vm991_vm1, %v6836_v29, %v2399_v43  ;;  %v2532_v60 = vand.u32 2147483647, %v4113_v17  ;;  %v2667_v34 = vsel %vm1003_vm12, %v6722_v21, %v2507_v46 }
 0x34a   : > { %v3044_v0 = vsel %vm7715_vm7, %v3043_v4, %v3042_v54  ;;  %v4121_v48 = vpop.eup %4120  ;;  %vm7716_vm5 = vcmask 982912   ;;  %v3047_v30 = vperm.slane %v2655_v8, %v4938_v47  ;;  %v2522_v58 = vmul.f32 %v6895_v33, %v2521_v13 }
 0x34b   : > { %v3046_v53 = vsel %vm7716_vm5, %v3045_v36, %v3044_v0  ;;  %v4123_v62 = vpop.eup %4122  ;;  %v2516_v19 = vsel %vm6907_vm6, %v2513_v3, %v2510_v18  ;;  %vm6949_vm11 = vcmp.lt.f32.partialorder %v2523_v27, 0.0004427343  ;;  %v2531_v29 = vmul.f32 %v4113_v17, %v2530_v61  ;;  %vm7724_vm14 = vmmov %vm7716_vm5 }
 0x34c   : > { %v2535_v14 = vadd.f32 1.0, %v4121_v48  ;;  %v3048_v59 = vsel %vm2861_vm15, %v3047_v30, %v3046_v53  ;;  %v2525_v21 = vsel %vm6949_vm11, %v2522_v58, %v2519_v9  ;;  %v2528_v57 = vmul.f32 0.6931472, %v4123_v62 }
 0x34d   : > { %v2538_v24 = vmul.f32 -0.5, %v4121_v48  ;;  %v3068_v40 = vperm.slane %v2666_v44, %v4813_v23  ;;  %v3091_v33 = vsel %vm3090_vm10, %v3048_v59, %v6770_v28  ;;  %vm2533_vm4 = vcmp.lt.f32.partialorder %v2532_v60, 0.0004427343  ;;  %v7070_v59 = vld [vmem:[#allocation3 + $0x10] sm:$0xff] (%p77_p0) }
 0x34e   : > { %4124 = vlog2.f32 %v2535_v14  ;;  %v3070_v1 = vperm.slane %v2667_v34, %v4798_v63  ;;  %v2668_v17 = vsel %vm1004_vm13, %v6741_v32, %v2516_v19  ;;  %vm1005_vm2 = vcmp.gt.f32.partialorder %v6844_v52, 20.0  ;;  %vm7723_vm13 = vmmov %vm7715_vm7 }
 0x34f   : > { %v2534_v3 = vsel %vm2533_vm4, %v2531_v29, %v2528_v57  ;;  %v2669_v5 = vsel %vm1005_vm2, %v6844_v52, %v2525_v21  ;;  %vm1006_vm0 = vcmp.gt.f32.partialorder %v6859_v15, 20.0  ;;  %vm7719_vm3 = vcmask 654912   ;;  %v7072_v21 = vld [vmem:[#allocation3] sm:$0xff] (%p77_p0) }
 0x350   : > { %v3067_v23 = vsel %vm7719_vm3, %v3066_v35, %v6873_v31  ;;  %v2670_v28 = vsel %vm1006_vm0, %v6859_v15, %v2534_v3  ;;  %v2539_v63 = vadd.f32 1.0, %v2538_v24  ;;  %vm7720_vm6 = vcmask 720512   ;;  %v7074_v57 = vld [vmem:[#allocation3 + $0x20] sm:$0xff] (%p77_p0) }
 0x351   : > { %v3069_v41 = vsel %vm7720_vm6, %v3068_v40, %v3067_v23  ;;  %v3072_v32 = vperm.slane %v2668_v17, %v4899_v45  ;;  %v2541_v20 = vand.u32 2147483647, %v4121_v48  ;;  %vm7721_vm9 = vcmask 786112  }
 0x352   : > { %v3071_v51 = vsel %vm7721_vm9, %v3070_v1, %v3069_v41  ;;  %v3074_v52 = vperm.slane %v2669_v5, %v4882_v42  ;;  %v3076_v38 = vperm.slane %v2670_v28, %v4870_v50  ;;  %v2540_v55 = vmul.f32 %v4121_v48, %v2539_v63  ;;  %v7099_v63 = vld [vmem:[#allocation3 + $0x8] sm:$0xff] (%p77_p0)  ;;  %v7101_v41 = vld [vmem:[#allocation3 + $0x18] sm:$0xff] (%p77_p0) }
 0x353   : > { %vm7722_vm12 = vcmask 851712   ;;  %vm2542_vm10 = vcmp.lt.f32.partialorder %v2541_v20, 0.0004427343  ;;  %vm1007_vm8 = vcmp.gt.f32.partialorder %v6883_v6, 20.0  ;;  %vm3092_vm1 = vcmask 1047559  }
 0x354   : > { %v4125_v7 = vpop.eup %4124  ;;  %v3073_v49 = vsel %vm7722_vm12, %v3072_v32, %v3071_v51  ;;  %vm3102_vm7 = vcmp.lt.s32.totalorder (%p77_p0), %v7725_v22, 8  ;;  %v4237_v14 = vmov (%p77_p0), 0   ;;  %v7103_v32 = vld [vmem:[#allocation3 + $0x28] sm:$0xff] (%p77_p0) }
 0x355   : > { %v2537_v16 = vmul.f32 0.6931472, %v4125_v7  ;;  %v3075_v15 = vsel %vm7723_vm13, %v3074_v52, %v3073_v49  ;;  %4130 = vset.pattern.permute.xlu0 (%p77_p0), %v4237_v14  ;;  %4128 = vset.pattern.permute.xlu1 (%p77_p0), %v4237_v14 }
 0x356   : > { %v3077_v45 = vsel %vm7724_vm14, %v3076_v38, %v3075_v15  ;;  %4129 = vset.pattern.permute.xlu2 (%p77_p0), %v4237_v14 }
 0x357   : > { %v2543_v31 = vsel %vm2542_vm10, %v2540_v55, %v2537_v16 }
 0x358   : > { %v2671_v35 = vsel %vm1007_vm8, %v6883_v6, %v2543_v31  ;;  %v7128_v31 = vld [vmem:[#allocation3 + $0x30] sm:$0xff] (%p77_p0) }
 0x359   : > { %v3078_v42 = vperm.slane %v2671_v35, %v4938_v47  ;;  %79 = sbr.rel (!%p77_p0) target bundleno = 99 (0x63), region = 53  ;;  %v7132_v35 = vld [vmem:[#allocation3 + $0x40] sm:$0xff] (%p77_p0) }
 0x35b   : > { %v3079_v25 = vsel %vm2861_vm15, %v3078_v42, %v3077_v45  ;;  %vm7726_vm15 = vcmask (%p77_p0), 7168   ;;  %v7130_v45 = vld [vmem:[#allocation3 + $0x38] sm:$0xff] (%p77_p0) }
 0x35c   : > { %v3093_v50 = vsel %vm3092_vm1, %v3079_v25, %v3091_v33  ;;  %vm7727_vm5 = vmmov (%p77_p0), %vm7726_vm15 }
 0x35d   : > { %3096 = vst [vmem:[%s3095_s27] sm:$0xff] %v3093_v50  ;;  %vm7728_vm11 = vmmov (%p77_p0), %vm7727_vm5 }
 0x35e   :  { %vm7729_vm4 = vmmov %vm7727_vm5 }
 0x35f   :  { %vm7730_vm2 = vmmov %vm7729_vm4 }
 0x360   :  { %vm7731_vm0 = vmmov %vm7730_vm2 }
 0x361   :  { %vm7732_vm3 = vmmov %vm7731_vm0 }
 0x362   :  { %vm7733_vm6 = vmmov %vm7731_vm0 }
 0x363   :  { %vm7734_vm9 = vmmov %vm7731_vm0 }
 0x364   :  { %v3105_v56 = vld [vmem:[#allocation2 + $0x10] sm:$0xff]  ;;  %v3103_v4 = vld [vmem:[#allocation2] sm:$0xff]  ;;  %v3104_v10 = vld [vmem:[#allocation2 + $0x8] sm:$0xff] }
 0x365   :  { %v3107_v6 = vld [vmem:[#allocation2 + $0x20] sm:$0xff]  ;;  %v6992_v47 = vsel %vm3102_vm7, %v3105_v56, -1e+30  ;;  %v6996_v12 = vsel %vm3102_vm7, %v3103_v4, -1e+30  ;;  %v3106_v11 = vld [vmem:[#allocation2 + $0x18] sm:$0xff]  ;;  %vm7735_vm12 = vmmov %vm7731_vm0 }
 0x366   :  { %v7000_v39 = vsel %vm3102_vm7, %v3107_v6, -1e+30  ;;  %3155 = vmax.xlane.f32.xlu1 %v6992_v47  ;;  %3151 = vmax.xlane.f32.xlu0 %v6996_v12  ;;  %v3108_v46 = vld [vmem:[#allocation2 + $0x28] sm:$0xff]  ;;  %v7007_v37 = vsel %vm3102_vm7, %v3104_v10, -1e+30  ;;  %v3109_v18 = vld [vmem:[#allocation2 + $0x30] sm:$0xff]  ;;  %vm7736_vm10 = vmmov %vm7731_vm0 }
 0x367   :  { %3159 = vmax.xlane.f32.xlu2 %v7000_v39  ;;  %v7011_v2 = vsel %vm3102_vm7, %v3106_v11, -1e+30  ;;  %v7015_v13 = vsel %vm3102_vm7, %v3108_v46, -1e+30  ;;  %v3110_v26 = vld [vmem:[#allocation2 + $0x38] sm:$0xff]  ;;  %v3111_v27 = vld [vmem:[#allocation2 + $0x40] sm:$0xff]  ;;  %vm7737_vm13 = vmmov %vm7731_vm0 }
 0x368   :  { %v7022_v61 = vsel %vm3102_vm7, %v3109_v18, -1e+30  ;;  %v7026_v36 = vsel %vm3102_vm7, %v3110_v26, -1e+30  ;;  %v7030_v43 = vsel %vm3102_vm7, %v3111_v27, -1e+30  ;;  %vm7738_vm8 = vmmov %vm7731_vm0 }
 0x369   :  { %v3112_v9 = vld [vmem:[#allocation2 + $0x48] sm:$0xff]  ;;  %v3113_v44 = vld [vmem:[#allocation2 + $0x50] sm:$0xff]  ;;  %v3114_v0 = vld [vmem:[#allocation2 + $0x58] sm:$0xff] }
 0x36a   :  { %v7037_v8 = vsel %vm3102_vm7, %v3112_v9, -1e+30  ;;  %v7041_v60 = vsel %vm3102_vm7, %v3113_v44, -1e+30  ;;  %v7045_v48 = vsel %vm3102_vm7, %v3114_v0, -1e+30  ;;  %vm7739_vm14 = vmmov %vm7731_vm0 }
 0x36b   :  { %v3115_v34 = vld [vmem:[#allocation2 + $0x60] sm:$0xff]  ;;  %v3116_v53 = vld [vmem:[#allocation2 + $0x68] sm:$0xff]  ;;  %v3117_v30 = vld [vmem:[#allocation2 + $0x70] sm:$0xff] }
 0x36c   :  { %v7052_v58 = vsel %vm3102_vm7, %v3115_v34, -1e+30  ;;  %v7056_v62 = vsel %vm3102_vm7, %v3116_v53, -1e+30  ;;  %v7060_v19 = vsel %vm3102_vm7, %v3117_v30, -1e+30  ;;  %vm7740_vm1 = vmmov %vm7731_vm0 }
 0x36d   :  { %v3118_v54 = vld [vmem:[#allocation2 + $0x78] sm:$0xff]  ;;  %v7157_v46 = vld [vmem:[#allocation3 + $0x48] sm:$0xff]  ;;  %v7159_v18 = vld [vmem:[#allocation3 + $0x50] sm:$0xff] }
 0x36e   :  { %3153 = vmax.xlane.f32.xlu0 %v7007_v37  ;;  %3157 = vmax.xlane.f32.xlu1 %v7011_v2  ;;  %v7067_v29 = vsel %vm3102_vm7, %v3118_v54, -1e+30  ;;  %v7161_v26 = vld [vmem:[#allocation3 + $0x58] sm:$0xff]  ;;  %vm7741_vm7 = vmmov %vm7731_vm0 }
 0x36f   :  { %3161 = vmax.xlane.f32.xlu2 %v7015_v13 }
 0x376   :  { %3163 = vmax.xlane.f32.xlu0 %v7022_v61  ;;  %3165 = vmax.xlane.f32.xlu1 %v7026_v36 }
 0x377   :  { %3167 = vmax.xlane.f32.xlu2 %v7030_v43 }
 0x37e   :  { %3169 = vmax.xlane.f32.xlu0 %v7037_v8  ;;  %3171 = vmax.xlane.f32.xlu1 %v7041_v60 }
 0x37f   :  { %3173 = vmax.xlane.f32.xlu2 %v7045_v48 }
 0x386   :  { %3175 = vmax.xlane.f32.xlu0 %v7052_v58  ;;  %3177 = vmax.xlane.f32.xlu1 %v7056_v62 }
 0x387   :  { %3179 = vmax.xlane.f32.xlu2 %v7060_v19 }
 0x38e   :  { %3181 = vmax.xlane.f32.xlu0 %v7067_v29 }
 0x3d9   :  { %v3156_v24 = vpop.xlane.xlu1 %3155  ;;  %v3152_v40 = vpop.xlane.xlu0 %3151 }
 0x3da   :  { %v7077_v33 = vmax.f32 %v7070_v59, %v3156_v24  ;;  %v7080_v1 = vmax.f32 %v7072_v21, %v3152_v40  ;;  %v3160_v17 = vpop.xlane.xlu2 %3159  ;;  %v7187_v24 = vld [vmem:[#allocation3 + $0x60] sm:$0xff]  ;;  %v7189_v40 = vld [vmem:[#allocation3 + $0x68] sm:$0xff] }
 0x3db   :  { %v7083_v3 = vmax.f32 %v7074_v57, %v3160_v17  ;;  %v7191_v17 = vld [vmem:[#allocation3 + $0x70] sm:$0xff] }
 0x3dc   :  { %3474 = vst.msk [vmem:[#allocation3 + $0x10] sm:$0xff] %vm7726_vm15, %v7077_v33  ;;  %3291 = vperm.xlu0 %4130, %v7077_v33   ;;  %3281 = vperm.xlu1 %4128, %v7080_v1   ;;  %vm7743_vm15 = vmmov %vm7731_vm0 }
 0x3dd   :  { %3472 = vst.msk [vmem:[#allocation3] sm:$0xff] %vm7727_vm5, %v7080_v1  ;;  %vm7750_vm5 = vmmov %vm7731_vm0 }
 0x3de   :  { %3476 = vst.msk [vmem:[#allocation3 + $0x20] sm:$0xff] %vm7728_vm11, %v7083_v3  ;;  %vm7751_vm11 = vmmov %vm7731_vm0 }
 0x3e1   :  { %v3154_v20 = vpop.xlane.xlu0 %3153  ;;  %v3158_v51 = vpop.xlane.xlu1 %3157 }
 0x3e2   :  { %v7106_v52 = vmax.f32 %v7099_v63, %v3154_v20  ;;  %v3162_v7 = vpop.xlane.xlu2 %3161  ;;  %v7109_v38 = vmax.f32 %v7101_v41, %v3158_v51 }
 0x3e3   :  { %v7112_v16 = vmax.f32 %v7103_v32, %v3162_v7 }
 0x3e4   :  { %v3200_v55 = vsub.f32 %v7099_v63, %v7106_v52  ;;  %3473 = vst.msk [vmem:[#allocation3 + $0x8] sm:$0xff] %vm7729_vm4, %v7106_v52  ;;  %3301 = vperm.xlu1 %4128, %v7083_v3   ;;  %3286 = vperm.xlu2 %4129, %v7106_v52   ;;  %v7745_v63 = vsub.f32 %v7074_v57, %v7083_v3  ;;  %vm7752_vm4 = vmmov %vm7731_vm0 }
 0x3e5   :  { %3477 = vst.msk [vmem:[#allocation3 + $0x28] sm:$0xff] %vm7730_vm2, %v7112_v16  ;;  %vm7755_vm2 = vmmov %vm7731_vm0 }
 0x3e6   :  { %3475 = vst.msk [vmem:[#allocation3 + $0x18] sm:$0xff] %vm7731_vm0, %v7109_v38  ;;  %v3223_v52 = vmul.f32 1.442695, %v7745_v63 }
 0x3e9   :  { %v3164_v42 = vpop.xlane.xlu0 %3163  ;;  %v3166_v25 = vpop.xlane.xlu1 %3165 }
 0x3ea   :  { %v7135_v50 = vmax.f32 %v7128_v31, %v3164_v42  ;;  %v3168_v22 = vpop.xlane.xlu2 %3167  ;;  %v7138_v56 = vmax.f32 %v7130_v45, %v3166_v25 }
 0x3eb   :  { %v7141_v4 = vmax.f32 %v7132_v35, %v3168_v22 }
 0x3ec   :  { %3478 = vst.msk [vmem:[#allocation3 + $0x30] sm:$0xff] %vm7732_vm3, %v7135_v50  ;;  %3296 = vperm.xlu2 %4129, %v7109_v38   ;;  %3311 = vperm.xlu1 %4128, %v7135_v50   ;;  %vm7759_vm3 = vmmov %vm7731_vm0 }
 0x3ed   :  { %3480 = vst.msk [vmem:[#allocation3 + $0x40] sm:$0xff] %vm7733_vm6, %v7141_v4  ;;  %vm7761_vm6 = vmmov %vm7731_vm0 }
 0x3ee   :  { %3479 = vst.msk [vmem:[#allocation3 + $0x38] sm:$0xff] %vm7734_vm9, %v7138_v56  ;;  %vm7762_vm9 = vmmov %vm7731_vm0 }
 0x3f1   :  { %v3170_v27 = vpop.xlane.xlu0 %3169  ;;  %v3172_v9 = vpop.xlane.xlu1 %3171 }
 0x3f2   :  { %v7164_v44 = vmax.f32 %v7157_v46, %v3170_v27  ;;  %v3174_v0 = vpop.xlane.xlu2 %3173  ;;  %v7167_v34 = vmax.f32 %v7159_v18, %v3172_v9 }
 0x3f3   :  { %v7170_v53 = vmax.f32 %v7161_v26, %v3174_v0 }
 0x3f4   :  { %3481 = vst.msk [vmem:[#allocation3 + $0x48] sm:$0xff] %vm7735_vm12, %v7164_v44  ;;  %3306 = vperm.xlu2 %4129, %v7112_v16   ;;  %3321 = vperm.xlu1 %4128, %v7141_v4   ;;  %vm7763_vm12 = vmmov %vm7731_vm0 }
 0x3f5   :  { %3326 = vperm.xlu0 %4130, %v7164_v44   ;;  %3483 = vst.msk [vmem:[#allocation3 + $0x58] sm:$0xff] %vm7736_vm10, %v7170_v53  ;;  %vm7764_vm10 = vmmov %vm7731_vm0 }
 0x3f6   :  { %3482 = vst.msk [vmem:[#allocation3 + $0x50] sm:$0xff] %vm7737_vm13, %v7167_v34  ;;  %vm7766_vm13 = vmmov %vm7731_vm0 }
 0x3f9   :  { %v3176_v20 = vpop.xlane.xlu0 %3175  ;;  %v3178_v51 = vpop.xlane.xlu1 %3177 }
 0x3fa   :  { %v7194_v7 = vmax.f32 %v7187_v24, %v3176_v20  ;;  %v3180_v42 = vpop.xlane.xlu2 %3179  ;;  %v7197_v25 = vmax.f32 %v7189_v40, %v3178_v51  ;;  %v7217_v20 = vld [vmem:[#allocation3 + $0x78] sm:$0xff] }
 0x3fb   :  { %v7200_v22 = vmax.f32 %v7191_v17, %v3180_v42 }
 0x3fc   :  { %3484 = vst.msk [vmem:[#allocation3 + $0x60] sm:$0xff] %vm7738_vm8, %v7194_v7  ;;  %3316 = vperm.xlu2 %4129, %v7138_v56   ;;  %3336 = vperm.xlu1 %4128, %v7170_v53   ;;  %vm7768_vm8 = vmmov %vm7731_vm0 }
 0x3fd   :  { %3341 = vperm.xlu0 %4130, %v7194_v7   ;;  %3486 = vst.msk [vmem:[#allocation3 + $0x70] sm:$0xff] %vm7739_vm14, %v7200_v22  ;;  %vm7769_vm14 = vmmov %vm7731_vm0 }
 0x3fe   :  { %3485 = vst.msk [vmem:[#allocation3 + $0x68] sm:$0xff] %vm7740_vm1, %v7197_v25  ;;  %vm7770_vm1 = vmmov %vm7731_vm0 }
 0x401   :  { %v3182_v51 = vpop.xlane.xlu0 %3181 }
 0x402   :  { %v7220_v42 = vmax.f32 %v7217_v20, %v3182_v51 }
 0x404   :  { %3487 = vst.msk [vmem:[#allocation3 + $0x78] sm:$0xff] %vm7741_vm7, %v7220_v42  ;;  %3331 = vperm.xlu2 %4129, %v7167_v34   ;;  %3351 = vperm.xlu1 %4128, %v7200_v22   ;;  %vm7771_vm7 = vmmov %vm7731_vm0 }
 0x405   :  { %3356 = vperm.xlu0 %4130, %v7220_v42  }
 0x40c   :  { %3346 = vperm.xlu2 %4129, %v7197_v25  }
 0x43e   :  { %v3287_v0 = vpop.permute.xlu2 %3286 }
 0x43f   :  { %v3360_v14 = vsub.f32 %v7007_v37, %v3287_v0 }
 0x441   :  { %v3377_v9 = vmul.f32 1.442695, %v3360_v14 }
 0x443   :  { %4131 = vpow2.f32 %v3377_v9 }
 0x446   :  { %v3297_v51 = vpop.permute.xlu2 %3296 }
 0x447   :  { %v3362_v49 = vsub.f32 %v7011_v2, %v3297_v51 }
 0x449   :  { %v4132_v30 = vpop.eup %4131  ;;  %v3381_v5 = vmul.f32 1.442695, %v3362_v49 }
 0x44a   :  { %3409 = vadd.xlane.f32.xlu1 %v4132_v30 }
 0x44e   :  { %v3282_v27 = vpop.permute.xlu1 %3281  ;;  %v3307_v11 = vpop.permute.xlu2 %3306 }
 0x44f   :  { %v3359_v54 = vsub.f32 %v6996_v12, %v3282_v27  ;;  %v3292_v6 = vpop.permute.xlu0 %3291  ;;  %v3364_v23 = vsub.f32 %v7015_v13, %v3307_v11 }
 0x450   :  { %v3361_v10 = vsub.f32 %v6992_v47, %v3292_v6 }
 0x451   :  { %v3375_v15 = vmul.f32 1.442695, %v3359_v54  ;;  %v3385_v2 = vmul.f32 1.442695, %v3364_v23 }
 0x452   :  { %v3379_v28 = vmul.f32 1.442695, %v3361_v10 }
 0x453   :  { %4133 = vpow2.f32 %v3375_v15 }
 0x454   :  { %4135 = vpow2.f32 %v3379_v28 }
 0x455   :  { %4137 = vpow2.f32 %v3381_v5 }
 0x456   :  { %v3302_v37 = vpop.permute.xlu1 %3301  ;;  %v3317_v14 = vpop.permute.xlu2 %3316 }
 0x457   :  { %v3363_v9 = vsub.f32 %v7000_v39, %v3302_v37  ;;  %v3366_v47 = vsub.f32 %v7026_v36, %v3317_v14 }
 0x459   :  { %v4134_v0 = vpop.eup %4133  ;;  %v3383_v30 = vmul.f32 1.442695, %v3363_v9  ;;  %v3389_v28 = vmul.f32 1.442695, %v3366_v47 }
 0x45a   :  { %3407 = vadd.xlane.f32.xlu2 %v4134_v0  ;;  %v4136_v12 = vpop.eup %4135 }
 0x45b   :  { %4139 = vpow2.f32 %v3383_v30  ;;  %3411 = vadd.xlane.f32.xlu0 %v4136_v12  ;;  %v4138_v10 = vpop.eup %4137 }
 0x45c   :  { %4141 = vpow2.f32 %v3385_v2 }
 0x45d   :  { %4143 = vpow2.f32 %v3389_v28 }
 0x45e   :  { %v3332_v6 = vpop.permute.xlu2 %3331  ;;  %v3312_v15 = vpop.permute.xlu1 %3311 }
 0x45f   :  { %v3365_v49 = vsub.f32 %v7022_v61, %v3312_v15  ;;  %v3369_v13 = vsub.f32 %v7041_v60, %v3332_v6 }
 0x461   :  { %v4140_v54 = vpop.eup %4139  ;;  %v3387_v39 = vmul.f32 1.442695, %v3365_v49  ;;  %v3395_v11 = vmul.f32 1.442695, %v3369_v13 }
 0x462   :  { %3413 = vadd.xlane.f32.xlu2 %v4138_v10  ;;  %3415 = vadd.xlane.f32.xlu1 %v4140_v54  ;;  %v4142_v51 = vpop.eup %4141 }
 0x463   :  { %4145 = vpow2.f32 %v3387_v39  ;;  %v4144_v61 = vpop.eup %4143 }
 0x464   :  { %4147 = vpow2.f32 %v3395_v11 }
 0x466   :  { %v3322_v5 = vpop.permute.xlu1 %3321  ;;  %v3347_v36 = vpop.permute.xlu2 %3346 }
 0x467   :  { %v3367_v23 = vsub.f32 %v7030_v43, %v3322_v5  ;;  %v3327_v27 = vpop.permute.xlu0 %3326  ;;  %v3372_v0 = vsub.f32 %v7056_v62, %v3347_v36 }
 0x468   :  { %v3368_v37 = vsub.f32 %v7037_v8, %v3327_v27 }
 0x469   :  { %v3391_v14 = vmul.f32 1.442695, %v3367_v23  ;;  %v4146_v9 = vpop.eup %4145  ;;  %v3401_v60 = vmul.f32 1.442695, %v3372_v0  ;;  %v7744_v0 = vsub.f32 %v7070_v59, %v7077_v33 }
 0x46a   :  { %v3393_v30 = vmul.f32 1.442695, %v3368_v37  ;;  %3417 = vadd.xlane.f32.xlu2 %v4142_v51  ;;  %3421 = vadd.xlane.f32.xlu1 %v4144_v61  ;;  %v4148_v8 = vpop.eup %4147 }
 0x46b   :  { %3419 = vadd.xlane.f32.xlu0 %v4146_v9  ;;  %4149 = vpow2.f32 %v3391_v14  ;;  %v7742_v14 = vsub.f32 %v7072_v21, %v7080_v1  ;;  %v3247_v1 = vld [vmem:[#allocation4] sm:$0xff] }
 0x46c   :  { %4151 = vpow2.f32 %v3393_v30  ;;  %v3219_v30 = vmul.f32 1.442695, %v7744_v0  ;;  %v3253_v0 = vld [vmem:[#allocation4 + $0x30] sm:$0xff] }
 0x46d   :  { %4153 = vpow2.f32 %v3401_v60  ;;  %v3215_v9 = vmul.f32 1.442695, %v7742_v14 }
 0x46e   :  { %v3337_v12 = vpop.permute.xlu1 %3336 }
 0x46f   :  { %v3370_v43 = vsub.f32 %v7045_v48, %v3337_v12  ;;  %v3342_v47 = vpop.permute.xlu0 %3341 }
 0x470   :  { %v3371_v2 = vsub.f32 %v7052_v58, %v3342_v47  ;;  %v3249_v47 = vld [vmem:[#allocation4 + $0x10] sm:$0xff] }
 0x471   :  { %v3397_v6 = vmul.f32 1.442695, %v3370_v43  ;;  %v4150_v15 = vpop.eup %4149 }
 0x472   :  { %v3399_v28 = vmul.f32 1.442695, %v3371_v2  ;;  %3427 = vadd.xlane.f32.xlu1 %v4148_v8  ;;  %v4152_v62 = vpop.eup %4151  ;;  %3423 = vadd.xlane.f32.xlu2 %v4150_v15  ;;  %v7747_v8 = vsub.f32 %v7103_v32, %v7112_v16  ;;  %v3250_v16 = vld [vmem:[#allocation4 + $0x18] sm:$0xff] }
 0x473   :  { %4155 = vpow2.f32 %v3397_v6  ;;  %3425 = vadd.xlane.f32.xlu0 %v4152_v62  ;;  %v4154_v39 = vpop.eup %4153 }
 0x474   :  { %4157 = vpow2.f32 %v3399_v28  ;;  %v3225_v57 = vmul.f32 1.442695, %v7747_v8 }
 0x476   :  { %v3352_v49 = vpop.permute.xlu1 %3351 }
 0x477   :  { %v3373_v10 = vsub.f32 %v7060_v19, %v3352_v49  ;;  %v3357_v54 = vpop.permute.xlu0 %3356  ;;  %v3217_v19 = vmul.f32 1.442695, %v3200_v55  ;;  %v7746_v55 = vsub.f32 %v7101_v41, %v7109_v38  ;;  %v7748_v41 = vsub.f32 %v7130_v45, %v7138_v56  ;;  %v3492_v49 = vld [vmem:[#allocation3 + $0x8] sm:$0xff] }
 0x478   :  { %v3374_v48 = vsub.f32 %v7067_v29, %v3357_v54  ;;  %v3248_v29 = vld [vmem:[#allocation4 + $0x8] sm:$0xff] }
 0x479   :  { %v4156_v13 = vpop.eup %4155  ;;  %v3403_v58 = vmul.f32 1.442695, %v3373_v10  ;;  %v3221_v60 = vmul.f32 1.442695, %v7746_v55  ;;  %v3229_v38 = vmul.f32 1.442695, %v7748_v41  ;;  %v7749_v10 = vsub.f32 %v7128_v31, %v7135_v50 }
 0x47a   :  { %v4158_v5 = vpop.eup %4157  ;;  %v3405_v11 = vmul.f32 1.442695, %v3374_v48  ;;  %3433 = vadd.xlane.f32.xlu1 %v4154_v39  ;;  %3429 = vadd.xlane.f32.xlu2 %v4156_v13  ;;  %v3251_v13 = vld [vmem:[#allocation4 + $0x20] sm:$0xff] }
 0x47b   :  { %4159 = vpow2.f32 %v3403_v58  ;;  %3431 = vadd.xlane.f32.xlu0 %v4158_v5  ;;  %v3227_v54 = vmul.f32 1.442695, %v7749_v10 }
 0x47c   :  { %4161 = vpow2.f32 %v3405_v11  ;;  %v7753_v11 = vsub.f32 %v7159_v18, %v7167_v34  ;;  %v3254_v18 = vld [vmem:[#allocation4 + $0x38] sm:$0xff] }
 0x47d   :  { %4163 = vpow2.f32 %v3217_v19 }
 0x47e   :  { %4165 = vpow2.f32 %v3215_v9  ;;  %v3252_v9 = vld [vmem:[#allocation4 + $0x28] sm:$0xff] }
 0x47f   :  { %4167 = vpow2.f32 %v3219_v30 }
 0x481   :  { %v4160_v36 = vpop.eup %4159 }
 0x482   :  { %v4162_v23 = vpop.eup %4161  ;;  %3435 = vadd.xlane.f32.xlu2 %v4160_v36  ;;  %v3235_v36 = vmul.f32 1.442695, %v7753_v11 }
 0x483   :  { %3437 = vadd.xlane.f32.xlu0 %v4162_v23  ;;  %v4164_v27 = vpop.eup %4163 }
 0x484   :  { %v3264_v51 = vmul.f32 %v4164_v27, %v3248_v29  ;;  %v4166_v21 = vpop.eup %4165  ;;  %v7754_v27 = vsub.f32 %v7132_v35, %v7141_v4 }
 0x485   :  { %v4168_v43 = vpop.eup %4167  ;;  %v3263_v59 = vmul.f32 %v4166_v21, %v3247_v1 }
 0x486   :  { %v3265_v6 = vmul.f32 %v4168_v43, %v3249_v47  ;;  %v3231_v29 = vmul.f32 1.442695, %v7754_v27  ;;  %v3495_v27 = vld [vmem:[#allocation3 + $0x20] sm:$0xff] }
 0x4bd   :  { %v3410_v37 = vpop.xlane.xlu1 %3409 }
 0x4be   :  { %v3440_v61 = vadd.f32 %v3410_v37, %v3264_v51  ;;  %v7756_v37 = vsub.f32 %v7157_v46, %v7164_v44 }
 0x4c0   :  { %3457 = vst.msk [vmem:[#allocation4 + $0x8] sm:$0xff] %vm7743_vm15, %v3440_v61  ;;  %v3233_v61 = vmul.f32 1.442695, %v7756_v37  ;;  %vm7772_vm15 = vmmov %vm7731_vm0 }
 0x4c7   :  { %v3508_v12 = vld [vmem:[#allocation4 + $0x8] sm:$0xff] }
 0x4c8   :  { %4169 = vlog2.f32 %v3508_v12  ;;  %v7757_v12 = vsub.f32 %v7189_v40, %v7197_v25 }
 0x4c9   :  { %4171 = vpow2.f32 %v3223_v52 }
 0x4ca   :  { %4173 = vpow2.f32 %v3221_v60  ;;  %v3241_v21 = vmul.f32 1.442695, %v7757_v12 }
 0x4cb   :  { %4175 = vpow2.f32 %v3225_v57 }
 0x4cc   :  { %4177 = vpow2.f32 %v3229_v38  ;;  %v3257_v38 = vld [vmem:[#allocation4 + $0x50] sm:$0xff] }
 0x4cd   :  { %v3408_v33 = vpop.xlane.xlu2 %3407  ;;  %4179 = vpow2.f32 %v3227_v54 }
 0x4ce   :  { %v4170_v2 = vpop.eup %4169  ;;  %v3439_v3 = vadd.f32 %v3408_v33, %v3263_v59  ;;  %v3412_v28 = vpop.xlane.xlu0 %3411  ;;  %v3491_v33 = vld [vmem:[#allocation3] sm:$0xff] }
 0x4cf   :  { %v3526_v15 = vmul.f32 0.6931472, %v4170_v2  ;;  %v4172_v62 = vpop.eup %4171  ;;  %v3441_v39 = vadd.f32 %v3412_v28, %v3265_v6  ;;  %v7758_v2 = vsub.f32 %v7161_v26, %v7170_v53  ;;  %v7760_v6 = vsub.f32 %v7187_v24, %v7194_v7  ;;  %v3493_v28 = vld [vmem:[#allocation3 + $0x10] sm:$0xff]  ;;  %v3255_v26 = vld [vmem:[#allocation4 + $0x40] sm:$0xff]  ;;  %v3256_v7 = vld [vmem:[#allocation4 + $0x48] sm:$0xff] }
 0x4d0   :  { %3456 = vst.msk [vmem:[#allocation4] sm:$0xff] %vm7750_vm5, %v3439_v3  ;;  %v4174_v48 = vpop.eup %4173  ;;  %v3267_v31 = vmul.f32 %v4172_v62, %v3251_v13  ;;  %v3494_v13 = vld [vmem:[#allocation3 + $0x18] sm:$0xff]  ;;  %vm7773_vm5 = vmmov %vm7731_vm0 }
 0x4d1   :  { %v3556_v32 = vadd.f32 %v3526_v15, %v3492_v49  ;;  %3458 = vst.msk [vmem:[#allocation4 + $0x10] sm:$0xff] %vm7751_vm11, %v3441_v39  ;;  %v3266_v45 = vmul.f32 %v4174_v48, %v3250_v16  ;;  %v4176_v19 = vpop.eup %4175  ;;  %v3237_v8 = vmul.f32 1.442695, %v7758_v2  ;;  %v3239_v41 = vmul.f32 1.442695, %v7760_v6  ;;  %vm7774_vm11 = vmmov %vm7731_vm0 }
 0x4d2   :  { %v4178_v51 = vpop.eup %4177  ;;  %v3268_v35 = vmul.f32 %v4176_v19, %v3252_v9  ;;  %v3258_v9 = vld [vmem:[#allocation4 + $0x58] sm:$0xff] }
 0x4d3   :  { %3572 = vst.msk [vmem:[%s7377_s4 + $0x8] sm:$0xff] %vm7752_vm4, %v3556_v32  ;;  %v4180_v34 = vpop.eup %4179  ;;  %v3270_v4 = vmul.f32 %v4178_v51, %v3254_v18  ;;  %vm7775_vm4 = vmmov %vm7731_vm0 }
 0x4d4   :  { %v3269_v52 = vmul.f32 %v4180_v34, %v3253_v0 }
 0x4d5   :  { %v3414_v50 = vpop.xlane.xlu2 %3413  ;;  %v3416_v56 = vpop.xlane.xlu1 %3415 }
 0x4d6   :  { %v3442_v58 = vadd.f32 %v3414_v50, %v3266_v45  ;;  %v3443_v5 = vadd.f32 %v3416_v56, %v3267_v31 }
 0x4d7   :  { %v3507_v23 = vld [vmem:[#allocation4] sm:$0xff] }
 0x4d8   :  { %4181 = vlog2.f32 %v3507_v23  ;;  %3459 = vst.msk [vmem:[#allocation4 + $0x18] sm:$0xff] %vm7755_vm2, %v3442_v58  ;;  %v3509_v14 = vld [vmem:[#allocation4 + $0x10] sm:$0xff]  ;;  %v7765_v58 = vsub.f32 %v7191_v17, %v7200_v22  ;;  %vm7776_vm2 = vmmov %vm7731_vm0 }
 0x4d9   :  { %3460 = vst.msk [vmem:[#allocation4 + $0x20] sm:$0xff] %vm7731_vm0, %v3443_v5  ;;  %4183 = vlog2.f32 %v3509_v14  ;;  %v3260_v14 = vld [vmem:[#allocation4 + $0x68] sm:$0xff] }
 0x4da   :  { %4185 = vpow2.f32 %v3235_v36  ;;  %v3243_v5 = vmul.f32 1.442695, %v7765_v58 }
 0x4db   :  { %4187 = vpow2.f32 %v3231_v29  ;;  %v7767_v29 = vsub.f32 %v7217_v20, %v7220_v42  ;;  %v3259_v20 = vld [vmem:[#allocation4 + $0x60] sm:$0xff] }
 0x4dc   :  { %4189 = vpow2.f32 %v3233_v61 }
 0x4dd   :  { %v3418_v30 = vpop.xlane.xlu2 %3417  ;;  %v3422_v63 = vpop.xlane.xlu1 %3421  ;;  %v3245_v51 = vmul.f32 1.442695, %v7767_v29 }
 0x4de   :  { %v4182_v55 = vpop.eup %4181  ;;  %v3444_v60 = vadd.f32 %v3418_v30, %v3268_v35  ;;  %v3446_v46 = vadd.f32 %v3422_v63, %v3270_v4  ;;  %v3420_v44 = vpop.xlane.xlu0 %3419 }
 0x4df   :  { %v3524_v1 = vmul.f32 0.6931472, %v4182_v55  ;;  %v3510_v43 = vld [vmem:[#allocation4 + $0x18] sm:$0xff]  ;;  %v3445_v47 = vadd.f32 %v3420_v44, %v3269_v52  ;;  %v4184_v59 = vpop.eup %4183 }
 0x4e0   :  { %4191 = vlog2.f32 %v3510_v43  ;;  %v3511_v57 = vld [vmem:[#allocation4 + $0x20] sm:$0xff]  ;;  %3461 = vst.msk [vmem:[#allocation4 + $0x28] sm:$0xff] %vm7759_vm3, %v3444_v60  ;;  %v4186_v3 = vpop.eup %4185  ;;  %v3528_v25 = vmul.f32 0.6931472, %v4184_v59  ;;  %v3498_v59 = vld [vmem:[#allocation3 + $0x38] sm:$0xff]  ;;  %vm7777_vm3 = vmmov %vm7731_vm0 }
 0x4e1   :  { %v3555_v40 = vadd.f32 %v3524_v1, %v3491_v33  ;;  %4193 = vlog2.f32 %v3511_v57  ;;  %3463 = vst.msk [vmem:[#allocation4 + $0x38] sm:$0xff] %vm7761_vm6, %v3446_v46  ;;  %v4188_v15 = vpop.eup %4187  ;;  %v3273_v62 = vmul.f32 %v4186_v3, %v3257_v38  ;;  %v3497_v3 = vld [vmem:[#allocation3 + $0x30] sm:$0xff]  ;;  %v3262_v38 = vld [vmem:[#allocation4 + $0x78] sm:$0xff]  ;;  %vm7778_vm6 = vmmov %vm7731_vm0 }
 0x4e2   :  { %3462 = vst.msk [vmem:[#allocation4 + $0x30] sm:$0xff] %vm7762_vm9, %v3445_v47  ;;  %v4190_v53 = vpop.eup %4189  ;;  %4195 = vpow2.f32 %v3241_v21  ;;  %v3557_v24 = vadd.f32 %v3528_v25, %v3493_v28  ;;  %v3271_v49 = vmul.f32 %v4188_v15, %v3255_v26  ;;  %v3496_v21 = vld [vmem:[#allocation3 + $0x28] sm:$0xff]  ;;  %vm7779_vm9 = vmmov %vm7731_vm0 }
 0x4e3   :  { %3571 = vst.msk [vmem:[%s7377_s4] sm:$0xff] %vm7763_vm12, %v3555_v40  ;;  %4197 = vpow2.f32 %v3237_v8  ;;  %v3272_v32 = vmul.f32 %v4190_v53, %v3256_v7  ;;  %vm7780_vm12 = vmmov %vm7731_vm0 }
 0x4e4   :  { %4199 = vpow2.f32 %v3239_v41  ;;  %3573 = vst.msk [vmem:[%s7377_s4 + $0x10] sm:$0xff] %vm7764_vm10, %v3557_v24  ;;  %v3261_v41 = vld [vmem:[#allocation4 + $0x70] sm:$0xff]  ;;  %vm7781_vm10 = vmmov %vm7731_vm0 }
 0x4e5   :  { %v3428_v10 = vpop.xlane.xlu1 %3427  ;;  %v3424_v39 = vpop.xlane.xlu2 %3423 }
 0x4e6   :  { %v4192_v54 = vpop.eup %4191  ;;  %v3449_v48 = vadd.f32 %v3428_v10, %v3273_v62  ;;  %v3447_v50 = vadd.f32 %v3424_v39, %v3271_v49  ;;  %v3426_v56 = vpop.xlane.xlu0 %3425  ;;  %v3501_v39 = vld [vmem:[#allocation3 + $0x50] sm:$0xff] }
 0x4e7   :  { %v4194_v16 = vpop.eup %4193  ;;  %v3530_v45 = vmul.f32 0.6931472, %v4192_v54  ;;  %v3512_v31 = vld [vmem:[#allocation4 + $0x28] sm:$0xff]  ;;  %v3448_v23 = vadd.f32 %v3426_v56, %v3272_v32 }
 0x4e8   :  { %v3532_v11 = vmul.f32 0.6931472, %v4194_v16  ;;  %4201 = vlog2.f32 %v3512_v31  ;;  %v3514_v36 = vld [vmem:[#allocation4 + $0x38] sm:$0xff]  ;;  %3466 = vst.msk [vmem:[#allocation4 + $0x50] sm:$0xff] %vm7766_vm13, %v3449_v48  ;;  %v4196_v19 = vpop.eup %4195  ;;  %v3500_v56 = vld [vmem:[#allocation3 + $0x48] sm:$0xff]  ;;  %vm7782_vm13 = vmmov %vm7731_vm0 }
 0x4e9   :  { %v3558_v37 = vadd.f32 %v3530_v45, %v3494_v13  ;;  %4203 = vlog2.f32 %v3514_v36  ;;  %v3513_v61 = vld [vmem:[#allocation4 + $0x30] sm:$0xff]  ;;  %3464 = vst.msk [vmem:[#allocation4 + $0x40] sm:$0xff] %vm7768_vm8, %v3447_v50  ;;  %v4198_v17 = vpop.eup %4197  ;;  %v3276_v42 = vmul.f32 %v4196_v19, %v3260_v14  ;;  %v3499_v13 = vld [vmem:[#allocation3 + $0x40] sm:$0xff]  ;;  %vm7783_vm8 = vmmov %vm7731_vm0 }
 0x4ea   :  { %v3559_v22 = vadd.f32 %v3532_v11, %v3495_v27  ;;  %4205 = vlog2.f32 %v3513_v61  ;;  %3465 = vst.msk [vmem:[#allocation4 + $0x48] sm:$0xff] %vm7769_vm14, %v3448_v23  ;;  %v4200_v18 = vpop.eup %4199  ;;  %v3274_v34 = vmul.f32 %v4198_v17, %v3258_v9  ;;  %v3504_v27 = vld [vmem:[#allocation3 + $0x68] sm:$0xff]  ;;  %vm7784_vm14 = vmmov %vm7731_vm0 }
 0x4eb   :  { %3574 = vst.msk [vmem:[%s7377_s4 + $0x18] sm:$0xff] %vm7770_vm1, %v3558_v37  ;;  %4207 = vpow2.f32 %v3243_v5  ;;  %v3275_v63 = vmul.f32 %v4200_v18, %v3259_v20  ;;  %v3502_v37 = vld [vmem:[#allocation3 + $0x58] sm:$0xff]  ;;  %vm7785_vm1 = vmmov %vm7731_vm0 }
 0x4ec   :  { %3575 = vst.msk [vmem:[%s7377_s4 + $0x20] sm:$0xff] %vm7771_vm7, %v3559_v22  ;;  %4209 = vpow2.f32 %v3245_v51  ;;  %v3503_v22 = vld [vmem:[#allocation3 + $0x60] sm:$0xff]  ;;  %vm7786_vm7 = vmmov %vm7731_vm0 }
 0x4ed   :  { %v3434_v0 = vpop.xlane.xlu1 %3433  ;;  %v3430_v4 = vpop.xlane.xlu2 %3429 }
 0x4ee   :  { %v4202_v35 = vpop.eup %4201  ;;  %v3452_v30 = vadd.f32 %v3434_v0, %v3276_v42  ;;  %v3450_v46 = vadd.f32 %v3430_v4, %v3274_v34  ;;  %v3432_v44 = vpop.xlane.xlu0 %3431  ;;  %v3505_v0 = vld [vmem:[#allocation3 + $0x70] sm:$0xff]  ;;  %v3506_v4 = vld [vmem:[#allocation3 + $0x78] sm:$0xff] }
 0x4ef   :  { %v4204_v52 = vpop.eup %4203  ;;  %v3534_v55 = vmul.f32 0.6931472, %v4202_v35  ;;  %v3517_v60 = vld [vmem:[#allocation4 + $0x50] sm:$0xff]  ;;  %v3451_v47 = vadd.f32 %v3432_v44, %v3275_v63 }
 0x4f0   :  { %v4206_v12 = vpop.eup %4205  ;;  %v3538_v1 = vmul.f32 0.6931472, %v4204_v52  ;;  %v3515_v43 = vld [vmem:[#allocation4 + $0x40] sm:$0xff]  ;;  %4211 = vlog2.f32 %v3517_v60  ;;  %3469 = vst.msk [vmem:[#allocation4 + $0x68] sm:$0xff] %vm7772_vm15, %v3452_v30 }
 0x4f1   :  { %v3560_v33 = vadd.f32 %v3534_v55, %v3496_v21  ;;  %v3536_v2 = vmul.f32 0.6931472, %v4206_v12  ;;  %4213 = vlog2.f32 %v3515_v43  ;;  %v3516_v8 = vld [vmem:[#allocation4 + $0x48] sm:$0xff]  ;;  %3467 = vst.msk [vmem:[#allocation4 + $0x58] sm:$0xff] %vm7773_vm5, %v3450_v46  ;;  %v4208_v57 = vpop.eup %4207 }
 0x4f2   :  { %v3562_v6 = vadd.f32 %v3538_v1, %v3498_v59  ;;  %4215 = vlog2.f32 %v3516_v8  ;;  %3468 = vst.msk [vmem:[#allocation4 + $0x60] sm:$0xff] %vm7774_vm11, %v3451_v47  ;;  %v4210_v40 = vpop.eup %4209  ;;  %v3277_v15 = vmul.f32 %v4208_v57, %v3261_v41 }
 0x4f3   :  { %3576 = vst.msk [vmem:[%s7377_s4 + $0x28] sm:$0xff] %vm7775_vm4, %v3560_v33  ;;  %v3561_v25 = vadd.f32 %v3536_v2, %v3497_v3  ;;  %v3278_v53 = vmul.f32 %v4210_v40, %v3262_v38 }
 0x4f4   :  { %3578 = vst.msk [vmem:[%s7377_s4 + $0x38] sm:$0xff] %vm7776_vm2, %v3562_v6 }
 0x4f5   :  { %3577 = vst.msk [vmem:[%s7377_s4 + $0x30] sm:$0xff] %vm7731_vm0, %v3561_v25  ;;  %v3436_v26 = vpop.xlane.xlu2 %3435 }
 0x4f6   :  { %v4212_v28 = vpop.eup %4211  ;;  %v3453_v49 = vadd.f32 %v3436_v26, %v3277_v15  ;;  %v3438_v10 = vpop.xlane.xlu0 %3437 }
 0x4f7   :  { %v4214_v24 = vpop.eup %4213  ;;  %v3544_v7 = vmul.f32 0.6931472, %v4212_v28  ;;  %v3520_v62 = vld [vmem:[#allocation4 + $0x68] sm:$0xff]  ;;  %v3454_v16 = vadd.f32 %v3438_v10, %v3278_v53 }
 0x4f8   :  { %v4216_v54 = vpop.eup %4215  ;;  %v3540_v48 = vmul.f32 0.6931472, %v4214_v24  ;;  %v3518_v32 = vld [vmem:[#allocation4 + $0x58] sm:$0xff]  ;;  %4217 = vlog2.f32 %v3520_v62  ;;  %3470 = vst.msk [vmem:[#allocation4 + $0x70] sm:$0xff] %vm7777_vm3, %v3453_v49 }
 0x4f9   :  { %v3565_v45 = vadd.f32 %v3544_v7, %v3501_v39  ;;  %v3542_v31 = vmul.f32 0.6931472, %v4216_v54  ;;  %4219 = vlog2.f32 %v3518_v32  ;;  %v3519_v50 = vld [vmem:[#allocation4 + $0x60] sm:$0xff]  ;;  %3471 = vst.msk [vmem:[#allocation4 + $0x78] sm:$0xff] %vm7778_vm6, %v3454_v16 }
 0x4fa   :  { %v3563_v58 = vadd.f32 %v3540_v48, %v3499_v13  ;;  %4221 = vlog2.f32 %v3519_v50 }
 0x4fb   :  { %3581 = vst.msk [vmem:[%s7377_s4 + $0x50] sm:$0xff] %vm7779_vm9, %v3565_v45  ;;  %v3564_v5 = vadd.f32 %v3542_v31, %v3500_v56 }
 0x4fc   :  { %3579 = vst.msk [vmem:[%s7377_s4 + $0x40] sm:$0xff] %vm7780_vm12, %v3563_v58 }
 0x4fd   :  { %3580 = vst.msk [vmem:[%s7377_s4 + $0x48] sm:$0xff] %vm7781_vm10, %v3564_v5 }
 0x4fe   :  { %v4218_v11 = vpop.eup %4217 }
 0x4ff   :  { %v4220_v36 = vpop.eup %4219  ;;  %v3550_v23 = vmul.f32 0.6931472, %v4218_v11  ;;  %v3521_v51 = vld [vmem:[#allocation4 + $0x70] sm:$0xff] }
 0x500   :  { %v4222_v19 = vpop.eup %4221  ;;  %v3546_v29 = vmul.f32 0.6931472, %v4220_v36  ;;  %4223 = vlog2.f32 %v3521_v51  ;;  %v3522_v17 = vld [vmem:[#allocation4 + $0x78] sm:$0xff] }
 0x501   :  { %v3568_v61 = vadd.f32 %v3550_v23, %v3504_v27  ;;  %v3548_v14 = vmul.f32 0.6931472, %v4222_v19  ;;  %4225 = vlog2.f32 %v3522_v17 }
 0x502   :  { %v3566_v9 = vadd.f32 %v3546_v29, %v3502_v37 }
 0x503   :  { %3584 = vst.msk [vmem:[%s7377_s4 + $0x68] sm:$0xff] %vm7782_vm13, %v3568_v61  ;;  %v3567_v18 = vadd.f32 %v3548_v14, %v3503_v22 }
 0x504   :  { %3582 = vst.msk [vmem:[%s7377_s4 + $0x58] sm:$0xff] %vm7783_vm8, %v3566_v9 }
 0x505   :  { %3583 = vst.msk [vmem:[%s7377_s4 + $0x60] sm:$0xff] %vm7784_vm14, %v3567_v18 }
 0x506   :  { %v4224_v20 = vpop.eup %4223 }
 0x507   :  { %v4226_v42 = vpop.eup %4225  ;;  %v3552_v34 = vmul.f32 0.6931472, %v4224_v20 }
 0x508   :  { %v3554_v35 = vmul.f32 0.6931472, %v4226_v42 }
 0x509   :  { %v3569_v30 = vadd.f32 %v3552_v34, %v3505_v0 }
 0x50a   :  { %v3570_v63 = vadd.f32 %v3554_v35, %v3506_v4 }
 0x50b   :  { %3585 = vst.msk [vmem:[%s7377_s4 + $0x70] sm:$0xff] %vm7785_vm1, %v3569_v30 }
 0x50c   :  { %3586 = vst.msk [vmem:[%s7377_s4 + $0x78] sm:$0xff] %vm7786_vm7, %v3570_v63 }

</bundles_post_ra>
